<compile_context>
chip_gen: v7x
topology: tpu7x:2x2x1
jax: 0.10.0
libtpu: 0.0.40
codegen_flags: <defaults>
</compile_context>

<pallas_src>
import jax
import jax.numpy as jnp
from jax import lax
from jax.experimental import pallas as pl
from jax.experimental.pallas import tpu as pltpu


# ----------------------------------------------------------------------------
# Fully fused ResNet1D forward kernel
# ----------------------------------------------------------------------------
def _make_resnet_kernel(L, K, has_down):
    """L: segment length, K: conv kernel size (9), has_down: per-block bool."""
    pad = (K - 1) // 2

    def kernel(*refs):
        x_ref = refs[0]
        o_ref, cols_ref = refs[-2], refs[-1]
        prefs = refs[1:-2]                       # flat [w0, b0, w1, b1, ...]

        nl = x_ref.shape[1]

        # Hoisted boundary masks: one iota + <=2 compares per tap, computed
        # once and reused by all K-tap convs (masks[k] is None for the center
        # tap).  Shape (1, nl) broadcasts across channels in the select.
        pos = lax.broadcasted_iota(jnp.int32, (1, nl), 1) % L
        masks = []
        for k in range(K):
            lo, hi = pad - k, L - (k - pad)
            cond = None
            if lo > 0:
                cond = pos >= lo
            if hi < L:
                c2 = pos < hi
                cond = c2 if cond is None else jnp.logical_and(cond, c2)
            masks.append(cond)

        def conv(x, idx, relu, residual=None):
            w_ref = prefs[2 * idx]               # (Cout, K*Cin) bf16, BN-scale folded
            b_ref = prefs[2 * idx + 1]           # (Cout, 1) f32 shift / bias
            cin = x.shape[0]
            kk = w_ref.shape[1] // cin           # static tap count (1 or K)

            if kk == 1:                          # 1x1 conv: plain matmul
                cols = x.astype(jnp.bfloat16)
            else:
                # Build the im2col slab tap-by-tap directly into VMEM scratch:
                # bounded live range (one tap), bf16 slab, reused buffer.
                for k in range(kk):
                    shift = (pad - k) % nl       # static, non-negative
                    xs = pltpu.roll(x, shift, axis=1) if shift else x
                    if masks[k] is not None:
                        xs = jnp.where(masks[k], xs, 0.0)
                    cols_ref[k * cin:(k + 1) * cin, :] = xs.astype(jnp.bfloat16)
                cols = cols_ref[:kk * cin, :]

            # Single MXU contraction, f32 accumulation inside the MXU.
            y = jnp.dot(w_ref[...], cols, preferred_element_type=jnp.float32)
            y = y + b_ref[...]                   # folded BN shift / bias only
            if residual is not None:
                y = y + residual
            return jnp.maximum(y, 0.0) if relu else y

        idx = 0
        # stem: conv(4->64, k=9) + BN + ReLU
        x = conv(x_ref[...], idx, relu=True)
        idx += 1
        # BasicBlock1D chain (dropout p=0.0 -> identity)
        for hd in has_down:
            y = conv(x, idx, relu=True)                      # conv1 + bn1 + relu
            idx += 1
            if hd:
                # TODO(synk): fuse this 1x1 downsample into conv1's matmul.
                identity = conv(x, idx, relu=False)          # 1x1 downsample + bn
                idx += 1
            else:
                identity = x
            x = conv(y, idx, relu=True, residual=identity)   # conv2 + bn2 + add + relu
            idx += 1
        # conv_out: 1x1 conv with bias (rows padded to 8 for an unmasked store)
        o_ref[...] = conv(x, idx, relu=False).astype(o_ref.dtype)

    return kernel


# ----------------------------------------------------------------------------
# Parameter flattening: each conv becomes (bf16 W2D with BN scale folded, shift)
# ----------------------------------------------------------------------------
def _w2d(w):
    """PyTorch layout (Cout, Cin, K) -> (Cout, K*Cin), column index k*Cin + c."""
    co, ci, k = w.shape
    return jnp.transpose(w, (0, 2, 1)).reshape(co, k * ci)


def _fold(w, scale, shift):
    wf = jnp.asarray(w, jnp.float32) * jnp.asarray(scale, jnp.float32)[:, None, None]
    return (_w2d(wf).astype(jnp.bfloat16),
            jnp.asarray(shift, jnp.float32).reshape(-1, 1))


def _flatten_convs(p, stem_cin_pad, out_rows_pad=8):
    convs = []
    # stem: zero-pad input channels 4 -> 16 (bf16 sublane-pack aligned slab rows)
    wstem = p["stem_w"]
    wstem = jnp.pad(wstem, ((0, 0), (0, stem_cin_pad - wstem.shape[1]), (0, 0)))
    convs.append(_fold(wstem, p["stem_bn"][0], p["stem_bn"][1]))
    for bp in p["layer1"] + p["layer2"]:
        convs.append(_fold(bp["w1"], bp["bn1"][0], bp["bn1"][1]))
        if "wd" in bp:
            convs.append(_fold(bp["wd"], bp["bnd"][0], bp["bnd"][1]))
        convs.append(_fold(bp["w2"], bp["bn2"][0], bp["bn2"][1]))
    # conv_out: 1x1 conv with bias, no BN; pad Cout 3 -> 8 for unmasked stores
    n_cls = p["out_w"].shape[0]
    wout = jnp.pad(p["out_w"], ((0, out_rows_pad - n_cls), (0, 0), (0, 0)))
    bout = jnp.pad(jnp.asarray(p["out_b"], jnp.float32), ((0, out_rows_pad - n_cls),))
    convs.append(_fold(wout, jnp.ones((out_rows_pad,), jnp.float32), bout))
    return convs


# ----------------------------------------------------------------------------
# Forward pass wrapper (single pallas_call, grid tiles N*L)
# ----------------------------------------------------------------------------
def resnet1d_forward(x, p, *, kernel_size=9, segs_per_tile=1):
    N, cin, L = x.shape
    assert L % 128 == 0, "sequence length must be lane-aligned (multiple of 128)"
    NL = N * L
    CIN_PAD = 16
    TILE = segs_per_tile * L                    # tile = whole batch segments
    assert NL % TILE == 0

    # pack batch into lanes: (N, C, L) -> (C, N*L); zero-pad stem channels
    xp = jnp.pad(x.astype(jnp.float32), ((0, 0), (0, CIN_PAD - cin), (0, 0)))
    x2 = jnp.transpose(xp, (1, 0, 2)).reshape(CIN_PAD, NL)

    convs = _flatten_convs(p, CIN_PAD)
    has_down = tuple("wd" in bp for bp in (p["layer1"] + p["layer2"]))
    kernel = _make_resnet_kernel(L, kernel_size, has_down)

    flat_args = [x2]
    in_specs = [pl.BlockSpec((CIN_PAD, TILE), lambda i: (0, i))]
    flops = 0
    for (w2d, b2) in convs:
        flat_args += [w2d, b2]
        # constant index_map -> weights stay VMEM-resident across grid steps
        in_specs += [pl.BlockSpec(w2d.shape, lambda i: (0, 0)),
                     pl.BlockSpec(b2.shape, lambda i: (0, 0))]
        flops += 2 * w2d.shape[0] * w2d.shape[1] * NL

    max_kcin = max(w.shape[1] for (w, _) in convs)          # 9 * 128 = 1152
    out_rows = convs[-1][0].shape[0]                         # 8 (padded)
    n_cls = p["out_w"].shape[0]                              # 3

    bytes_accessed = (x2.size * 4 + out_rows * NL * 4
                      + sum(w.size * 2 + b.size * 4 for (w, b) in convs))

    out2 = pl.pallas_call(
        kernel,
        out_shape=jax.ShapeDtypeStruct((out_rows, NL), jnp.float32),
        grid_spec=pltpu.PrefetchScalarGridSpec(
            num_scalar_prefetch=0,
            grid=(NL // TILE,),                              # tiles N*L
            in_specs=in_specs,
            out_specs=pl.BlockSpec((out_rows, TILE), lambda i: (0, i)),
            scratch_shapes=[pltpu.VMEM((max_kcin, TILE), jnp.bfloat16)],
        ),
        compiler_params=pltpu.CompilerParams(
            dimension_semantics=("parallel",),
            vmem_limit_bytes=32 * 1024 * 1024,
        ),
        cost_estimate=pl.CostEstimate(
            flops=flops, transcendentals=0, bytes_accessed=bytes_accessed),
    )(*flat_args)

    # unpack lanes back to (N, num_classes, L), dropping the padded rows
    return jnp.transpose(out2[:n_cls].reshape(n_cls, N, L), (1, 0, 2)).astype(x.dtype)


# ----------------------------------------------------------------------------
# Deterministic parameter construction (synthetic init, eval-mode BN folded)
# ----------------------------------------------------------------------------
def _conv_w(key, cout, cin, k):
    # PyTorch layout (Cout, Cin, K)
    return jax.random.normal(key, (cout, cin, k), jnp.float32) * (cin * k) ** -0.5


def _bn_fold(key, c, eps=1e-5):
    kg, kb, km, kv = jax.random.split(key, 4)
    gamma = 1.0 + 0.1 * jax.random.normal(kg, (c,), jnp.float32)
    beta = 0.1 * jax.random.normal(kb, (c,), jnp.float32)
    mean = 0.1 * jax.random.normal(km, (c,), jnp.float32)
    var = jnp.abs(jax.random.normal(kv, (c,), jnp.float32)) + 0.5
    scale = gamma / jnp.sqrt(var + eps)
    shift = beta - mean * scale
    return scale, shift


def init_params(key):
    keys = iter(jax.random.split(key, 64))
    p = {}
    # stem: Conv1d(4, 64, k=9, pad=4, bias=False) + BN(64)
    p["stem_w"] = _conv_w(next(keys), 64, 4, 9)
    p["stem_bn"] = _bn_fold(next(keys), 64)

    def block(cin, cout, with_down):
        b = {
            "w1": _conv_w(next(keys), cout, cin, 9),
            "bn1": _bn_fold(next(keys), cout),
            "w2": _conv_w(next(keys), cout, cout, 9),
            "bn2": _bn_fold(next(keys), cout),
        }
        if with_down:
            b["wd"] = _conv_w(next(keys), cout, cin, 1)
            b["bnd"] = _bn_fold(next(keys), cout)
        return b

    # layer1: 2 blocks 64->64; layer2: 2 blocks, first 64->128 with 1x1 downsample
    p["layer1"] = [block(64, 64, False), block(64, 64, False)]
    p["layer2"] = [block(64, 128, True), block(128, 128, False)]

    # conv_out: Conv1d(128, 3, k=1, bias=True)
    p["out_w"] = _conv_w(next(keys), 3, 128, 1)
    p["out_b"] = 0.1 * jax.random.normal(next(keys), (3,), jnp.float32)
    return p


# ----------------------------------------------------------------------------
# Pure-JAX reference (correctness check).  BN scale folded into the weights
# (exact algebra, same as the kernel) and conv operands cast to bf16 with f32
# accumulation to mirror the kernel's MXU precision.
# ----------------------------------------------------------------------------
def _conv_ref(x, w, pad, mm_dtype):
    return lax.conv_general_dilated(
        x.astype(mm_dtype), w.astype(mm_dtype),
        window_strides=(1,), padding=[(pad, pad)],
        dimension_numbers=("NCH", "OIH", "NCH"),
        preferred_element_type=jnp.float32)


def _cbr_ref(x, w, scale, shift, pad, relu, residual=None, mm_dtype=jnp.bfloat16):
    wf = w * scale[:, None, None]
    y = _conv_ref(x, wf, pad, mm_dtype) + shift[None, :, None]
    if residual is not None:
        y = y + residual
    return jnp.maximum(y, 0.0) if relu else y


def resnet1d_ref(x, p, mm_dtype=jnp.bfloat16):
    x = x.astype(jnp.float32)
    x = _cbr_ref(x, p["stem_w"], p["stem_bn"][0], p["stem_bn"][1], 4, True,
                 mm_dtype=mm_dtype)
    for bp in p["layer1"] + p["layer2"]:
        y = _cbr_ref(x, bp["w1"], bp["bn1"][0], bp["bn1"][1], 4, True,
                     mm_dtype=mm_dtype)
        if "wd" in bp:
            identity = _cbr_ref(x, bp["wd"], bp["bnd"][0], bp["bnd"][1], 0, False,
                                mm_dtype=mm_dtype)
        else:
            identity = x
        x = _cbr_ref(y, bp["w2"], bp["bn2"][0], bp["bn2"][1], 4, True,
                     residual=identity, mm_dtype=mm_dtype)
    ones = jnp.ones((p["out_w"].shape[0],), jnp.float32)
    return _cbr_ref(x, p["out_w"], ones, p["out_b"], 0, False, mm_dtype=mm_dtype)


# ----------------------------------------------------------------------------
if __name__ == "__main__":
    key = jax.random.PRNGKey(0)
    kx, kp = jax.random.split(key)

    N, C_IN, L = 2, 4, 128   # Conv1d(4, ...) input channels, lane-aligned length
    x = jax.random.normal(kx, (N, C_IN, L), jnp.float32)
    params = init_params(kp)

    out = jax.block_until_ready(resnet1d_forward(x, params))
    assert out.shape == (N, 3, L), out.shape

    ref = resnet1d_ref(x, params)
    max_err = float(jnp.max(jnp.abs(out - ref)))
    assert jnp.allclose(out, ref, rtol=2e-2, atol=2e-2), max_err

    print("KERNEL_OK")
</pallas_src>

<mosaic_0001>
module attributes {stable_mosaic.version = 11 : i64} {
  func.func @kernel(%arg0: i32, %arg1: memref<16x128xf32, #tpu.memory_space<vmem>>, %arg2: memref<64x144xbf16, #tpu.memory_space<vmem>>, %arg3: memref<64x1xf32, #tpu.memory_space<vmem>>, %arg4: memref<64x576xbf16, #tpu.memory_space<vmem>>, %arg5: memref<64x1xf32, #tpu.memory_space<vmem>>, %arg6: memref<64x576xbf16, #tpu.memory_space<vmem>>, %arg7: memref<64x1xf32, #tpu.memory_space<vmem>>, %arg8: memref<64x576xbf16, #tpu.memory_space<vmem>>, %arg9: memref<64x1xf32, #tpu.memory_space<vmem>>, %arg10: memref<64x576xbf16, #tpu.memory_space<vmem>>, %arg11: memref<64x1xf32, #tpu.memory_space<vmem>>, %arg12: memref<128x576xbf16, #tpu.memory_space<vmem>>, %arg13: memref<128x1xf32, #tpu.memory_space<vmem>>, %arg14: memref<128x64xbf16, #tpu.memory_space<vmem>>, %arg15: memref<128x1xf32, #tpu.memory_space<vmem>>, %arg16: memref<128x1152xbf16, #tpu.memory_space<vmem>>, %arg17: memref<128x1xf32, #tpu.memory_space<vmem>>, %arg18: memref<128x1152xbf16, #tpu.memory_space<vmem>>, %arg19: memref<128x1xf32, #tpu.memory_space<vmem>>, %arg20: memref<128x1152xbf16, #tpu.memory_space<vmem>>, %arg21: memref<128x1xf32, #tpu.memory_space<vmem>>, %arg22: memref<8x128xbf16, #tpu.memory_space<vmem>>, %arg23: memref<8x1xf32, #tpu.memory_space<vmem>>, %arg24: memref<8x128xf32, #tpu.memory_space<vmem>>, %arg25: memref<1152x128xbf16, #tpu.memory_space<vmem>>) attributes {dimension_semantics = [#tpu.dimension_semantics<parallel>], iteration_bounds = array<i64: 2>, scalar_prefetch = 0 : i64, scratch_operands = 1 : i64, tpu.core_type = #tpu.core_type<tc>, window_params = [{transform_indices = @transform_0, window_bounds = array<i64: 16, 128>}, {pipeline_mode = #tpu.pipeline_mode<synchronous>, transform_indices = @transform_1, window_bounds = array<i64: 64, 144>}, {pipeline_mode = #tpu.pipeline_mode<synchronous>, transform_indices = @transform_2, window_bounds = array<i64: 64, 1>}, {pipeline_mode = #tpu.pipeline_mode<synchronous>, transform_indices = @transform_3, window_bounds = array<i64: 64, 576>}, {pipeline_mode = #tpu.pipeline_mode<synchronous>, transform_indices = @transform_4, window_bounds = array<i64: 64, 1>}, {pipeline_mode = #tpu.pipeline_mode<synchronous>, transform_indices = @transform_5, window_bounds = array<i64: 64, 576>}, {pipeline_mode = #tpu.pipeline_mode<synchronous>, transform_indices = @transform_6, window_bounds = array<i64: 64, 1>}, {pipeline_mode = #tpu.pipeline_mode<synchronous>, transform_indices = @transform_7, window_bounds = array<i64: 64, 576>}, {pipeline_mode = #tpu.pipeline_mode<synchronous>, transform_indices = @transform_8, window_bounds = array<i64: 64, 1>}, {pipeline_mode = #tpu.pipeline_mode<synchronous>, transform_indices = @transform_9, window_bounds = array<i64: 64, 576>}, {pipeline_mode = #tpu.pipeline_mode<synchronous>, transform_indices = @transform_10, window_bounds = array<i64: 64, 1>}, {pipeline_mode = #tpu.pipeline_mode<synchronous>, transform_indices = @transform_11, window_bounds = array<i64: 128, 576>}, {pipeline_mode = #tpu.pipeline_mode<synchronous>, transform_indices = @transform_12, window_bounds = array<i64: 128, 1>}, {pipeline_mode = #tpu.pipeline_mode<synchronous>, transform_indices = @transform_13, window_bounds = array<i64: 128, 64>}, {pipeline_mode = #tpu.pipeline_mode<synchronous>, transform_indices = @transform_14, window_bounds = array<i64: 128, 1>}, {pipeline_mode = #tpu.pipeline_mode<synchronous>, transform_indices = @transform_15, window_bounds = array<i64: 128, 1152>}, {pipeline_mode = #tpu.pipeline_mode<synchronous>, transform_indices = @transform_16, window_bounds = array<i64: 128, 1>}, {pipeline_mode = #tpu.pipeline_mode<synchronous>, transform_indices = @transform_17, window_bounds = array<i64: 128, 1152>}, {pipeline_mode = #tpu.pipeline_mode<synchronous>, transform_indices = @transform_18, window_bounds = array<i64: 128, 1>}, {pipeline_mode = #tpu.pipeline_mode<synchronous>, transform_indices = @transform_19, window_bounds = array<i64: 128, 1152>}, {pipeline_mode = #tpu.pipeline_mode<synchronous>, transform_indices = @transform_20, window_bounds = array<i64: 128, 1>}, {pipeline_mode = #tpu.pipeline_mode<synchronous>, transform_indices = @transform_21, window_bounds = array<i64: 8, 128>}, {pipeline_mode = #tpu.pipeline_mode<synchronous>, transform_indices = @transform_22, window_bounds = array<i64: 8, 1>}, {transform_indices = @transform_23, window_bounds = array<i64: 8, 128>}]} {
    %0 = tpu.iota {dimensions = array<i32: 1>} : vector<1x128xi32>
    %c128_i32 = arith.constant 128 : i32
    %c0_i32 = arith.constant 0 : i32
    %1 = arith.cmpi eq, %c128_i32, %c0_i32 : i32
    %c1_i32 = arith.constant 1 : i32
    %2 = arith.select %1, %c1_i32, %c128_i32 : i32
    %3 = vector.broadcast %2 : i32 to vector<1x128xi32>
    %4 = arith.remsi %0, %3 : vector<1x128xi32>
    %c0_i32_0 = arith.constant 0 : i32
    %5 = vector.broadcast %c0_i32_0 : i32 to vector<1x128xi32>
    %6 = arith.cmpi ne, %4, %5 : vector<1x128xi32>
    %c0_i32_1 = arith.constant 0 : i32
    %7 = vector.broadcast %c0_i32_1 : i32 to vector<1x128xi32>
    %8 = arith.cmpi slt, %4, %7 : vector<1x128xi32>
    %c0_i32_2 = arith.constant 0 : i32
    %9 = arith.cmpi slt, %2, %c0_i32_2 : i32
    %10 = vector.broadcast %9 : i1 to vector<1x128xi1>
    %11 = vector.broadcast %10 : vector<1x128xi1> to vector<1x128xi1>
    %12 = arith.xori %8, %11 : vector<1x128xi1>
    %13 = arith.andi %12, %6 : vector<1x128xi1>
    %14 = vector.broadcast %2 : i32 to vector<1x128xi32>
    %15 = arith.addi %4, %14 : vector<1x128xi32>
    %16 = arith.select %13, %15, %4 : vector<1x128xi1>, vector<1x128xi32>
    %c4_i32 = arith.constant 4 : i32
    %17 = vector.broadcast %c4_i32 : i32 to vector<1x128xi32>
    %18 = arith.cmpi sge, %16, %17 : vector<1x128xi32>
    %c3_i32 = arith.constant 3 : i32
    %19 = vector.broadcast %c3_i32 : i32 to vector<1x128xi32>
    %20 = arith.cmpi sge, %16, %19 : vector<1x128xi32>
    %c2_i32 = arith.constant 2 : i32
    %21 = vector.broadcast %c2_i32 : i32 to vector<1x128xi32>
    %22 = arith.cmpi sge, %16, %21 : vector<1x128xi32>
    %c1_i32_3 = arith.constant 1 : i32
    %23 = vector.broadcast %c1_i32_3 : i32 to vector<1x128xi32>
    %24 = arith.cmpi sge, %16, %23 : vector<1x128xi32>
    %c127_i32 = arith.constant 127 : i32
    %25 = vector.broadcast %c127_i32 : i32 to vector<1x128xi32>
    %26 = arith.cmpi slt, %16, %25 : vector<1x128xi32>
    %c126_i32 = arith.constant 126 : i32
    %27 = vector.broadcast %c126_i32 : i32 to vector<1x128xi32>
    %28 = arith.cmpi slt, %16, %27 : vector<1x128xi32>
    %c125_i32 = arith.constant 125 : i32
    %29 = vector.broadcast %c125_i32 : i32 to vector<1x128xi32>
    %30 = arith.cmpi slt, %16, %29 : vector<1x128xi32>
    %c124_i32 = arith.constant 124 : i32
    %31 = vector.broadcast %c124_i32 : i32 to vector<1x128xi32>
    %32 = arith.cmpi slt, %16, %31 : vector<1x128xi32>
    %c0 = arith.constant 0 : index
    %c0_4 = arith.constant 0 : index
    %33 = vector.load %arg1[%c0, %c0_4] : memref<16x128xf32, #tpu.memory_space<vmem>>, vector<16x128xf32>
    %c4_i32_5 = arith.constant 4 : i32
    %34 = tpu.dynamic_rotate %33 by %c4_i32_5 dim 1 : vector<16x128xf32>, i32 -> vector<16x128xf32>
    %cst = arith.constant 0.000000e+00 : f32
    %35 = vector.shape_cast %18 : vector<1x128xi1> to vector<1x128xi1>
    %36 = vector.broadcast %35 : vector<1x128xi1> to vector<16x128xi1>
    %37 = vector.broadcast %cst : f32 to vector<16x128xf32>
    %38 = arith.select %36, %34, %37 : vector<16x128xi1>, vector<16x128xf32>
    %39 = arith.truncf %38 : vector<16x128xf32> to vector<16x128xbf16>
    %c0_6 = arith.constant 0 : index
    %c0_7 = arith.constant 0 : index
    %40 = vector.load %arg25[%c0_6, %c0_7] : memref<1152x128xbf16, #tpu.memory_space<vmem>>, vector<16x128xbf16>
    tpu.vector_store %arg25[%c0_6, %c0_7], %39 {strides = array<i32>} : memref<1152x128xbf16, #tpu.memory_space<vmem>>, vector<16x128xbf16>,
    %c3_i32_8 = arith.constant 3 : i32
    %41 = tpu.dynamic_rotate %33 by %c3_i32_8 dim 1 : vector<16x128xf32>, i32 -> vector<16x128xf32>
    %cst_9 = arith.constant 0.000000e+00 : f32
    %42 = vector.shape_cast %20 : vector<1x128xi1> to vector<1x128xi1>
    %43 = vector.broadcast %42 : vector<1x128xi1> to vector<16x128xi1>
    %44 = vector.broadcast %cst_9 : f32 to vector<16x128xf32>
    %45 = arith.select %43, %41, %44 : vector<16x128xi1>, vector<16x128xf32>
    %46 = arith.truncf %45 : vector<16x128xf32> to vector<16x128xbf16>
    %c16 = arith.constant 16 : index
    %c0_10 = arith.constant 0 : index
    %47 = vector.load %arg25[%c16, %c0_10] : memref<1152x128xbf16, #tpu.memory_space<vmem>>, vector<16x128xbf16>
    tpu.vector_store %arg25[%c16, %c0_10], %46 {strides = array<i32>} : memref<1152x128xbf16, #tpu.memory_space<vmem>>, vector<16x128xbf16>,
    %c2_i32_11 = arith.constant 2 : i32
    %48 = tpu.dynamic_rotate %33 by %c2_i32_11 dim 1 : vector<16x128xf32>, i32 -> vector<16x128xf32>
    %cst_12 = arith.constant 0.000000e+00 : f32
    %49 = vector.shape_cast %22 : vector<1x128xi1> to vector<1x128xi1>
    %50 = vector.broadcast %49 : vector<1x128xi1> to vector<16x128xi1>
    %51 = vector.broadcast %cst_12 : f32 to vector<16x128xf32>
    %52 = arith.select %50, %48, %51 : vector<16x128xi1>, vector<16x128xf32>
    %53 = arith.truncf %52 : vector<16x128xf32> to vector<16x128xbf16>
    %c32 = arith.constant 32 : index
    %c0_13 = arith.constant 0 : index
    %54 = vector.load %arg25[%c32, %c0_13] : memref<1152x128xbf16, #tpu.memory_space<vmem>>, vector<16x128xbf16>
    tpu.vector_store %arg25[%c32, %c0_13], %53 {strides = array<i32>} : memref<1152x128xbf16, #tpu.memory_space<vmem>>, vector<16x128xbf16>,
    %c1_i32_14 = arith.constant 1 : i32
    %55 = tpu.dynamic_rotate %33 by %c1_i32_14 dim 1 : vector<16x128xf32>, i32 -> vector<16x128xf32>
    %cst_15 = arith.constant 0.000000e+00 : f32
    %56 = vector.shape_cast %24 : vector<1x128xi1> to vector<1x128xi1>
    %57 = vector.broadcast %56 : vector<1x128xi1> to vector<16x128xi1>
    %58 = vector.broadcast %cst_15 : f32 to vector<16x128xf32>
    %59 = arith.select %57, %55, %58 : vector<16x128xi1>, vector<16x128xf32>
    %60 = arith.truncf %59 : vector<16x128xf32> to vector<16x128xbf16>
    %c48 = arith.constant 48 : index
    %c0_16 = arith.constant 0 : index
    %61 = vector.load %arg25[%c48, %c0_16] : memref<1152x128xbf16, #tpu.memory_space<vmem>>, vector<16x128xbf16>
    tpu.vector_store %arg25[%c48, %c0_16], %60 {strides = array<i32>} : memref<1152x128xbf16, #tpu.memory_space<vmem>>, vector<16x128xbf16>,
    %62 = arith.truncf %33 : vector<16x128xf32> to vector<16x128xbf16>
    %c64 = arith.constant 64 : index
    %c0_17 = arith.constant 0 : index
    %63 = vector.load %arg25[%c64, %c0_17] : memref<1152x128xbf16, #tpu.memory_space<vmem>>, vector<16x128xbf16>
    tpu.vector_store %arg25[%c64, %c0_17], %62 {strides = array<i32>} : memref<1152x128xbf16, #tpu.memory_space<vmem>>, vector<16x128xbf16>,
    %c127_i32_18 = arith.constant 127 : i32
    %64 = tpu.dynamic_rotate %33 by %c127_i32_18 dim 1 : vector<16x128xf32>, i32 -> vector<16x128xf32>
    %cst_19 = arith.constant 0.000000e+00 : f32
    %65 = vector.shape_cast %26 : vector<1x128xi1> to vector<1x128xi1>
    %66 = vector.broadcast %65 : vector<1x128xi1> to vector<16x128xi1>
    %67 = vector.broadcast %cst_19 : f32 to vector<16x128xf32>
    %68 = arith.select %66, %64, %67 : vector<16x128xi1>, vector<16x128xf32>
    %69 = arith.truncf %68 : vector<16x128xf32> to vector<16x128xbf16>
    %c80 = arith.constant 80 : index
    %c0_20 = arith.constant 0 : index
    %70 = vector.load %arg25[%c80, %c0_20] : memref<1152x128xbf16, #tpu.memory_space<vmem>>, vector<16x128xbf16>
    tpu.vector_store %arg25[%c80, %c0_20], %69 {strides = array<i32>} : memref<1152x128xbf16, #tpu.memory_space<vmem>>, vector<16x128xbf16>,
    %c126_i32_21 = arith.constant 126 : i32
    %71 = tpu.dynamic_rotate %33 by %c126_i32_21 dim 1 : vector<16x128xf32>, i32 -> vector<16x128xf32>
    %cst_22 = arith.constant 0.000000e+00 : f32
    %72 = vector.shape_cast %28 : vector<1x128xi1> to vector<1x128xi1>
    %73 = vector.broadcast %72 : vector<1x128xi1> to vector<16x128xi1>
    %74 = vector.broadcast %cst_22 : f32 to vector<16x128xf32>
    %75 = arith.select %73, %71, %74 : vector<16x128xi1>, vector<16x128xf32>
    %76 = arith.truncf %75 : vector<16x128xf32> to vector<16x128xbf16>
    %c96 = arith.constant 96 : index
    %c0_23 = arith.constant 0 : index
    %77 = vector.load %arg25[%c96, %c0_23] : memref<1152x128xbf16, #tpu.memory_space<vmem>>, vector<16x128xbf16>
    tpu.vector_store %arg25[%c96, %c0_23], %76 {strides = array<i32>} : memref<1152x128xbf16, #tpu.memory_space<vmem>>, vector<16x128xbf16>,
    %c125_i32_24 = arith.constant 125 : i32
    %78 = tpu.dynamic_rotate %33 by %c125_i32_24 dim 1 : vector<16x128xf32>, i32 -> vector<16x128xf32>
    %cst_25 = arith.constant 0.000000e+00 : f32
    %79 = vector.shape_cast %30 : vector<1x128xi1> to vector<1x128xi1>
    %80 = vector.broadcast %79 : vector<1x128xi1> to vector<16x128xi1>
    %81 = vector.broadcast %cst_25 : f32 to vector<16x128xf32>
    %82 = arith.select %80, %78, %81 : vector<16x128xi1>, vector<16x128xf32>
    %83 = arith.truncf %82 : vector<16x128xf32> to vector<16x128xbf16>
    %c112 = arith.constant 112 : index
    %c0_26 = arith.constant 0 : index
    %84 = vector.load %arg25[%c112, %c0_26] : memref<1152x128xbf16, #tpu.memory_space<vmem>>, vector<16x128xbf16>
    tpu.vector_store %arg25[%c112, %c0_26], %83 {strides = array<i32>} : memref<1152x128xbf16, #tpu.memory_space<vmem>>, vector<16x128xbf16>,
    %c124_i32_27 = arith.constant 124 : i32
    %85 = tpu.dynamic_rotate %33 by %c124_i32_27 dim 1 : vector<16x128xf32>, i32 -> vector<16x128xf32>
    %cst_28 = arith.constant 0.000000e+00 : f32
    %86 = vector.shape_cast %32 : vector<1x128xi1> to vector<1x128xi1>
    %87 = vector.broadcast %86 : vector<1x128xi1> to vector<16x128xi1>
    %88 = vector.broadcast %cst_28 : f32 to vector<16x128xf32>
    %89 = arith.select %87, %85, %88 : vector<16x128xi1>, vector<16x128xf32>
    %90 = arith.truncf %89 : vector<16x128xf32> to vector<16x128xbf16>
    %c128 = arith.constant 128 : index
    %c0_29 = arith.constant 0 : index
    %91 = vector.load %arg25[%c128, %c0_29] : memref<1152x128xbf16, #tpu.memory_space<vmem>>, vector<16x128xbf16>
    tpu.vector_store %arg25[%c128, %c0_29], %90 {strides = array<i32>} : memref<1152x128xbf16, #tpu.memory_space<vmem>>, vector<16x128xbf16>,
    %c0_30 = arith.constant 0 : index
    %c0_31 = arith.constant 0 : index
    %92 = vector.load %arg25[%c0_30, %c0_31] : memref<1152x128xbf16, #tpu.memory_space<vmem>>, vector<144x128xbf16>
    %c0_32 = arith.constant 0 : index
    %c0_33 = arith.constant 0 : index
    %93 = vector.load %arg2[%c0_32, %c0_33] : memref<64x144xbf16, #tpu.memory_space<vmem>>, vector<64x144xbf16>
    %cst_34 = arith.constant dense<0.000000e+00> : vector<64x128xf32>
    %94 = tpu.matmul %93, %92, %cst_34 {dimension_numbers = #tpu.dot_dimension_numbers<[1], [0], [0], [1], [0, 0, 1, 1], [], []>} : vector<64x144xbf16>, vector<144x128xbf16>, vector<64x128xf32> -> vector<64x128xf32>
    %c0_35 = arith.constant 0 : index
    %c0_36 = arith.constant 0 : index
    %95 = vector.load %arg3[%c0_35, %c0_36] : memref<64x1xf32, #tpu.memory_space<vmem>>, vector<64x1xf32>
    %96 = vector.broadcast %95 : vector<64x1xf32> to vector<64x128xf32>
    %97 = arith.addf %94, %96 : vector<64x128xf32>
    %cst_37 = arith.constant 0.000000e+00 : f32
    %98 = vector.broadcast %cst_37 : f32 to vector<64x128xf32>
    %99 = arith.maximumf %97, %98 : vector<64x128xf32>
    %c4_i32_38 = arith.constant 4 : i32
    %100 = tpu.dynamic_rotate %99 by %c4_i32_38 dim 1 : vector<64x128xf32>, i32 -> vector<64x128xf32>
    %cst_39 = arith.constant 0.000000e+00 : f32
    %101 = vector.shape_cast %18 : vector<1x128xi1> to vector<1x128xi1>
    %102 = vector.broadcast %101 : vector<1x128xi1> to vector<64x128xi1>
    %103 = vector.broadcast %cst_39 : f32 to vector<64x128xf32>
    %104 = arith.select %102, %100, %103 : vector<64x128xi1>, vector<64x128xf32>
    %105 = arith.truncf %104 : vector<64x128xf32> to vector<64x128xbf16>
    %c0_40 = arith.constant 0 : index
    %c0_41 = arith.constant 0 : index
    %106 = vector.load %arg25[%c0_40, %c0_41] : memref<1152x128xbf16, #tpu.memory_space<vmem>>, vector<64x128xbf16>
    tpu.vector_store %arg25[%c0_40, %c0_41], %105 {strides = array<i32>} : memref<1152x128xbf16, #tpu.memory_space<vmem>>, vector<64x128xbf16>,
    %c3_i32_42 = arith.constant 3 : i32
    %107 = tpu.dynamic_rotate %99 by %c3_i32_42 dim 1 : vector<64x128xf32>, i32 -> vector<64x128xf32>
    %cst_43 = arith.constant 0.000000e+00 : f32
    %108 = vector.shape_cast %20 : vector<1x128xi1> to vector<1x128xi1>
    %109 = vector.broadcast %108 : vector<1x128xi1> to vector<64x128xi1>
    %110 = vector.broadcast %cst_43 : f32 to vector<64x128xf32>
    %111 = arith.select %109, %107, %110 : vector<64x128xi1>, vector<64x128xf32>
    %112 = arith.truncf %111 : vector<64x128xf32> to vector<64x128xbf16>
    %c64_44 = arith.constant 64 : index
    %c0_45 = arith.constant 0 : index
    %113 = vector.load %arg25[%c64_44, %c0_45] : memref<1152x128xbf16, #tpu.memory_space<vmem>>, vector<64x128xbf16>
    tpu.vector_store %arg25[%c64_44, %c0_45], %112 {strides = array<i32>} : memref<1152x128xbf16, #tpu.memory_space<vmem>>, vector<64x128xbf16>,
    %c2_i32_46 = arith.constant 2 : i32
    %114 = tpu.dynamic_rotate %99 by %c2_i32_46 dim 1 : vector<64x128xf32>, i32 -> vector<64x128xf32>
    %cst_47 = arith.constant 0.000000e+00 : f32
    %115 = vector.shape_cast %22 : vector<1x128xi1> to vector<1x128xi1>
    %116 = vector.broadcast %115 : vector<1x128xi1> to vector<64x128xi1>
    %117 = vector.broadcast %cst_47 : f32 to vector<64x128xf32>
    %118 = arith.select %116, %114, %117 : vector<64x128xi1>, vector<64x128xf32>
    %119 = arith.truncf %118 : vector<64x128xf32> to vector<64x128xbf16>
    %c128_48 = arith.constant 128 : index
    %c0_49 = arith.constant 0 : index
    %120 = vector.load %arg25[%c128_48, %c0_49] : memref<1152x128xbf16, #tpu.memory_space<vmem>>, vector<64x128xbf16>
    tpu.vector_store %arg25[%c128_48, %c0_49], %119 {strides = array<i32>} : memref<1152x128xbf16, #tpu.memory_space<vmem>>, vector<64x128xbf16>,
    %c1_i32_50 = arith.constant 1 : i32
    %121 = tpu.dynamic_rotate %99 by %c1_i32_50 dim 1 : vector<64x128xf32>, i32 -> vector<64x128xf32>
    %cst_51 = arith.constant 0.000000e+00 : f32
    %122 = vector.shape_cast %24 : vector<1x128xi1> to vector<1x128xi1>
    %123 = vector.broadcast %122 : vector<1x128xi1> to vector<64x128xi1>
    %124 = vector.broadcast %cst_51 : f32 to vector<64x128xf32>
    %125 = arith.select %123, %121, %124 : vector<64x128xi1>, vector<64x128xf32>
    %126 = arith.truncf %125 : vector<64x128xf32> to vector<64x128xbf16>
    %c192 = arith.constant 192 : index
    %c0_52 = arith.constant 0 : index
    %127 = vector.load %arg25[%c192, %c0_52] : memref<1152x128xbf16, #tpu.memory_space<vmem>>, vector<64x128xbf16>
    tpu.vector_store %arg25[%c192, %c0_52], %126 {strides = array<i32>} : memref<1152x128xbf16, #tpu.memory_space<vmem>>, vector<64x128xbf16>,
    %128 = arith.truncf %99 : vector<64x128xf32> to vector<64x128xbf16>
    %c256 = arith.constant 256 : index
    %c0_53 = arith.constant 0 : index
    %129 = vector.load %arg25[%c256, %c0_53] : memref<1152x128xbf16, #tpu.memory_space<vmem>>, vector<64x128xbf16>
    tpu.vector_store %arg25[%c256, %c0_53], %128 {strides = array<i32>} : memref<1152x128xbf16, #tpu.memory_space<vmem>>, vector<64x128xbf16>,
    %c127_i32_54 = arith.constant 127 : i32
    %130 = tpu.dynamic_rotate %99 by %c127_i32_54 dim 1 : vector<64x128xf32>, i32 -> vector<64x128xf32>
    %cst_55 = arith.constant 0.000000e+00 : f32
    %131 = vector.shape_cast %26 : vector<1x128xi1> to vector<1x128xi1>
    %132 = vector.broadcast %131 : vector<1x128xi1> to vector<64x128xi1>
    %133 = vector.broadcast %cst_55 : f32 to vector<64x128xf32>
    %134 = arith.select %132, %130, %133 : vector<64x128xi1>, vector<64x128xf32>
    %135 = arith.truncf %134 : vector<64x128xf32> to vector<64x128xbf16>
    %c320 = arith.constant 320 : index
    %c0_56 = arith.constant 0 : index
    %136 = vector.load %arg25[%c320, %c0_56] : memref<1152x128xbf16, #tpu.memory_space<vmem>>, vector<64x128xbf16>
    tpu.vector_store %arg25[%c320, %c0_56], %135 {strides = array<i32>} : memref<1152x128xbf16, #tpu.memory_space<vmem>>, vector<64x128xbf16>,
    %c126_i32_57 = arith.constant 126 : i32
    %137 = tpu.dynamic_rotate %99 by %c126_i32_57 dim 1 : vector<64x128xf32>, i32 -> vector<64x128xf32>
    %cst_58 = arith.constant 0.000000e+00 : f32
    %138 = vector.shape_cast %28 : vector<1x128xi1> to vector<1x128xi1>
    %139 = vector.broadcast %138 : vector<1x128xi1> to vector<64x128xi1>
    %140 = vector.broadcast %cst_58 : f32 to vector<64x128xf32>
    %141 = arith.select %139, %137, %140 : vector<64x128xi1>, vector<64x128xf32>
    %142 = arith.truncf %141 : vector<64x128xf32> to vector<64x128xbf16>
    %c384 = arith.constant 384 : index
    %c0_59 = arith.constant 0 : index
    %143 = vector.load %arg25[%c384, %c0_59] : memref<1152x128xbf16, #tpu.memory_space<vmem>>, vector<64x128xbf16>
    tpu.vector_store %arg25[%c384, %c0_59], %142 {strides = array<i32>} : memref<1152x128xbf16, #tpu.memory_space<vmem>>, vector<64x128xbf16>,
    %c125_i32_60 = arith.constant 125 : i32
    %144 = tpu.dynamic_rotate %99 by %c125_i32_60 dim 1 : vector<64x128xf32>, i32 -> vector<64x128xf32>
    %cst_61 = arith.constant 0.000000e+00 : f32
    %145 = vector.shape_cast %30 : vector<1x128xi1> to vector<1x128xi1>
    %146 = vector.broadcast %145 : vector<1x128xi1> to vector<64x128xi1>
    %147 = vector.broadcast %cst_61 : f32 to vector<64x128xf32>
    %148 = arith.select %146, %144, %147 : vector<64x128xi1>, vector<64x128xf32>
    %149 = arith.truncf %148 : vector<64x128xf32> to vector<64x128xbf16>
    %c448 = arith.constant 448 : index
    %c0_62 = arith.constant 0 : index
    %150 = vector.load %arg25[%c448, %c0_62] : memref<1152x128xbf16, #tpu.memory_space<vmem>>, vector<64x128xbf16>
    tpu.vector_store %arg25[%c448, %c0_62], %149 {strides = array<i32>} : memref<1152x128xbf16, #tpu.memory_space<vmem>>, vector<64x128xbf16>,
    %c124_i32_63 = arith.constant 124 : i32
    %151 = tpu.dynamic_rotate %99 by %c124_i32_63 dim 1 : vector<64x128xf32>, i32 -> vector<64x128xf32>
    %cst_64 = arith.constant 0.000000e+00 : f32
    %152 = vector.shape_cast %32 : vector<1x128xi1> to vector<1x128xi1>
    %153 = vector.broadcast %152 : vector<1x128xi1> to vector<64x128xi1>
    %154 = vector.broadcast %cst_64 : f32 to vector<64x128xf32>
    %155 = arith.select %153, %151, %154 : vector<64x128xi1>, vector<64x128xf32>
    %156 = arith.truncf %155 : vector<64x128xf32> to vector<64x128xbf16>
    %c512 = arith.constant 512 : index
    %c0_65 = arith.constant 0 : index
    %157 = vector.load %arg25[%c512, %c0_65] : memref<1152x128xbf16, #tpu.memory_space<vmem>>, vector<64x128xbf16>
    tpu.vector_store %arg25[%c512, %c0_65], %156 {strides = array<i32>} : memref<1152x128xbf16, #tpu.memory_space<vmem>>, vector<64x128xbf16>,
    %c0_66 = arith.constant 0 : index
    %c0_67 = arith.constant 0 : index
    %158 = vector.load %arg25[%c0_66, %c0_67] : memref<1152x128xbf16, #tpu.memory_space<vmem>>, vector<576x128xbf16>
    %c0_68 = arith.constant 0 : index
    %c0_69 = arith.constant 0 : index
    %159 = vector.load %arg4[%c0_68, %c0_69] : memref<64x576xbf16, #tpu.memory_space<vmem>>, vector<64x576xbf16>
    %cst_70 = arith.constant dense<0.000000e+00> : vector<64x128xf32>
    %160 = tpu.matmul %159, %158, %cst_70 {dimension_numbers = #tpu.dot_dimension_numbers<[1], [0], [0], [1], [0, 0, 1, 1], [], []>} : vector<64x576xbf16>, vector<576x128xbf16>, vector<64x128xf32> -> vector<64x128xf32>
    %c0_71 = arith.constant 0 : index
    %c0_72 = arith.constant 0 : index
    %161 = vector.load %arg5[%c0_71, %c0_72] : memref<64x1xf32, #tpu.memory_space<vmem>>, vector<64x1xf32>
    %162 = vector.broadcast %161 : vector<64x1xf32> to vector<64x128xf32>
    %163 = arith.addf %160, %162 : vector<64x128xf32>
    %cst_73 = arith.constant 0.000000e+00 : f32
    %164 = vector.broadcast %cst_73 : f32 to vector<64x128xf32>
    %165 = arith.maximumf %163, %164 : vector<64x128xf32>
    %c4_i32_74 = arith.constant 4 : i32
    %166 = tpu.dynamic_rotate %165 by %c4_i32_74 dim 1 : vector<64x128xf32>, i32 -> vector<64x128xf32>
    %cst_75 = arith.constant 0.000000e+00 : f32
    %167 = vector.shape_cast %18 : vector<1x128xi1> to vector<1x128xi1>
    %168 = vector.broadcast %167 : vector<1x128xi1> to vector<64x128xi1>
    %169 = vector.broadcast %cst_75 : f32 to vector<64x128xf32>
    %170 = arith.select %168, %166, %169 : vector<64x128xi1>, vector<64x128xf32>
    %171 = arith.truncf %170 : vector<64x128xf32> to vector<64x128xbf16>
    %c0_76 = arith.constant 0 : index
    %c0_77 = arith.constant 0 : index
    %172 = vector.load %arg25[%c0_76, %c0_77] : memref<1152x128xbf16, #tpu.memory_space<vmem>>, vector<64x128xbf16>
    tpu.vector_store %arg25[%c0_76, %c0_77], %171 {strides = array<i32>} : memref<1152x128xbf16, #tpu.memory_space<vmem>>, vector<64x128xbf16>,
    %c3_i32_78 = arith.constant 3 : i32
    %173 = tpu.dynamic_rotate %165 by %c3_i32_78 dim 1 : vector<64x128xf32>, i32 -> vector<64x128xf32>
    %cst_79 = arith.constant 0.000000e+00 : f32
    %174 = vector.shape_cast %20 : vector<1x128xi1> to vector<1x128xi1>
    %175 = vector.broadcast %174 : vector<1x128xi1> to vector<64x128xi1>
    %176 = vector.broadcast %cst_79 : f32 to vector<64x128xf32>
    %177 = arith.select %175, %173, %176 : vector<64x128xi1>, vector<64x128xf32>
    %178 = arith.truncf %177 : vector<64x128xf32> to vector<64x128xbf16>
    %c64_80 = arith.constant 64 : index
    %c0_81 = arith.constant 0 : index
    %179 = vector.load %arg25[%c64_80, %c0_81] : memref<1152x128xbf16, #tpu.memory_space<vmem>>, vector<64x128xbf16>
    tpu.vector_store %arg25[%c64_80, %c0_81], %178 {strides = array<i32>} : memref<1152x128xbf16, #tpu.memory_space<vmem>>, vector<64x128xbf16>,
    %c2_i32_82 = arith.constant 2 : i32
    %180 = tpu.dynamic_rotate %165 by %c2_i32_82 dim 1 : vector<64x128xf32>, i32 -> vector<64x128xf32>
    %cst_83 = arith.constant 0.000000e+00 : f32
    %181 = vector.shape_cast %22 : vector<1x128xi1> to vector<1x128xi1>
    %182 = vector.broadcast %181 : vector<1x128xi1> to vector<64x128xi1>
    %183 = vector.broadcast %cst_83 : f32 to vector<64x128xf32>
    %184 = arith.select %182, %180, %183 : vector<64x128xi1>, vector<64x128xf32>
    %185 = arith.truncf %184 : vector<64x128xf32> to vector<64x128xbf16>
    %c128_84 = arith.constant 128 : index
    %c0_85 = arith.constant 0 : index
    %186 = vector.load %arg25[%c128_84, %c0_85] : memref<1152x128xbf16, #tpu.memory_space<vmem>>, vector<64x128xbf16>
    tpu.vector_store %arg25[%c128_84, %c0_85], %185 {strides = array<i32>} : memref<1152x128xbf16, #tpu.memory_space<vmem>>, vector<64x128xbf16>,
    %c1_i32_86 = arith.constant 1 : i32
    %187 = tpu.dynamic_rotate %165 by %c1_i32_86 dim 1 : vector<64x128xf32>, i32 -> vector<64x128xf32>
    %cst_87 = arith.constant 0.000000e+00 : f32
    %188 = vector.shape_cast %24 : vector<1x128xi1> to vector<1x128xi1>
    %189 = vector.broadcast %188 : vector<1x128xi1> to vector<64x128xi1>
    %190 = vector.broadcast %cst_87 : f32 to vector<64x128xf32>
    %191 = arith.select %189, %187, %190 : vector<64x128xi1>, vector<64x128xf32>
    %192 = arith.truncf %191 : vector<64x128xf32> to vector<64x128xbf16>
    %c192_88 = arith.constant 192 : index
    %c0_89 = arith.constant 0 : index
    %193 = vector.load %arg25[%c192_88, %c0_89] : memref<1152x128xbf16, #tpu.memory_space<vmem>>, vector<64x128xbf16>
    tpu.vector_store %arg25[%c192_88, %c0_89], %192 {strides = array<i32>} : memref<1152x128xbf16, #tpu.memory_space<vmem>>, vector<64x128xbf16>,
    %194 = arith.truncf %165 : vector<64x128xf32> to vector<64x128xbf16>
    %c256_90 = arith.constant 256 : index
    %c0_91 = arith.constant 0 : index
    %195 = vector.load %arg25[%c256_90, %c0_91] : memref<1152x128xbf16, #tpu.memory_space<vmem>>, vector<64x128xbf16>
    tpu.vector_store %arg25[%c256_90, %c0_91], %194 {strides = array<i32>} : memref<1152x128xbf16, #tpu.memory_space<vmem>>, vector<64x128xbf16>,
    %c127_i32_92 = arith.constant 127 : i32
    %196 = tpu.dynamic_rotate %165 by %c127_i32_92 dim 1 : vector<64x128xf32>, i32 -> vector<64x128xf32>
    %cst_93 = arith.constant 0.000000e+00 : f32
    %197 = vector.shape_cast %26 : vector<1x128xi1> to vector<1x128xi1>
    %198 = vector.broadcast %197 : vector<1x128xi1> to vector<64x128xi1>
    %199 = vector.broadcast %cst_93 : f32 to vector<64x128xf32>
    %200 = arith.select %198, %196, %199 : vector<64x128xi1>, vector<64x128xf32>
    %201 = arith.truncf %200 : vector<64x128xf32> to vector<64x128xbf16>
    %c320_94 = arith.constant 320 : index
    %c0_95 = arith.constant 0 : index
    %202 = vector.load %arg25[%c320_94, %c0_95] : memref<1152x128xbf16, #tpu.memory_space<vmem>>, vector<64x128xbf16>
    tpu.vector_store %arg25[%c320_94, %c0_95], %201 {strides = array<i32>} : memref<1152x128xbf16, #tpu.memory_space<vmem>>, vector<64x128xbf16>,
    %c126_i32_96 = arith.constant 126 : i32
    %203 = tpu.dynamic_rotate %165 by %c126_i32_96 dim 1 : vector<64x128xf32>, i32 -> vector<64x128xf32>
    %cst_97 = arith.constant 0.000000e+00 : f32
    %204 = vector.shape_cast %28 : vector<1x128xi1> to vector<1x128xi1>
    %205 = vector.broadcast %204 : vector<1x128xi1> to vector<64x128xi1>
    %206 = vector.broadcast %cst_97 : f32 to vector<64x128xf32>
    %207 = arith.select %205, %203, %206 : vector<64x128xi1>, vector<64x128xf32>
    %208 = arith.truncf %207 : vector<64x128xf32> to vector<64x128xbf16>
    %c384_98 = arith.constant 384 : index
    %c0_99 = arith.constant 0 : index
    %209 = vector.load %arg25[%c384_98, %c0_99] : memref<1152x128xbf16, #tpu.memory_space<vmem>>, vector<64x128xbf16>
    tpu.vector_store %arg25[%c384_98, %c0_99], %208 {strides = array<i32>} : memref<1152x128xbf16, #tpu.memory_space<vmem>>, vector<64x128xbf16>,
    %c125_i32_100 = arith.constant 125 : i32
    %210 = tpu.dynamic_rotate %165 by %c125_i32_100 dim 1 : vector<64x128xf32>, i32 -> vector<64x128xf32>
    %cst_101 = arith.constant 0.000000e+00 : f32
    %211 = vector.shape_cast %30 : vector<1x128xi1> to vector<1x128xi1>
    %212 = vector.broadcast %211 : vector<1x128xi1> to vector<64x128xi1>
    %213 = vector.broadcast %cst_101 : f32 to vector<64x128xf32>
    %214 = arith.select %212, %210, %213 : vector<64x128xi1>, vector<64x128xf32>
    %215 = arith.truncf %214 : vector<64x128xf32> to vector<64x128xbf16>
    %c448_102 = arith.constant 448 : index
    %c0_103 = arith.constant 0 : index
    %216 = vector.load %arg25[%c448_102, %c0_103] : memref<1152x128xbf16, #tpu.memory_space<vmem>>, vector<64x128xbf16>
    tpu.vector_store %arg25[%c448_102, %c0_103], %215 {strides = array<i32>} : memref<1152x128xbf16, #tpu.memory_space<vmem>>, vector<64x128xbf16>,
    %c124_i32_104 = arith.constant 124 : i32
    %217 = tpu.dynamic_rotate %165 by %c124_i32_104 dim 1 : vector<64x128xf32>, i32 -> vector<64x128xf32>
    %cst_105 = arith.constant 0.000000e+00 : f32
    %218 = vector.shape_cast %32 : vector<1x128xi1> to vector<1x128xi1>
    %219 = vector.broadcast %218 : vector<1x128xi1> to vector<64x128xi1>
    %220 = vector.broadcast %cst_105 : f32 to vector<64x128xf32>
    %221 = arith.select %219, %217, %220 : vector<64x128xi1>, vector<64x128xf32>
    %222 = arith.truncf %221 : vector<64x128xf32> to vector<64x128xbf16>
    %c512_106 = arith.constant 512 : index
    %c0_107 = arith.constant 0 : index
    %223 = vector.load %arg25[%c512_106, %c0_107] : memref<1152x128xbf16, #tpu.memory_space<vmem>>, vector<64x128xbf16>
    tpu.vector_store %arg25[%c512_106, %c0_107], %222 {strides = array<i32>} : memref<1152x128xbf16, #tpu.memory_space<vmem>>, vector<64x128xbf16>,
    %c0_108 = arith.constant 0 : index
    %c0_109 = arith.constant 0 : index
    %224 = vector.load %arg25[%c0_108, %c0_109] : memref<1152x128xbf16, #tpu.memory_space<vmem>>, vector<576x128xbf16>
    %c0_110 = arith.constant 0 : index
    %c0_111 = arith.constant 0 : index
    %225 = vector.load %arg6[%c0_110, %c0_111] : memref<64x576xbf16, #tpu.memory_space<vmem>>, vector<64x576xbf16>
    %cst_112 = arith.constant dense<0.000000e+00> : vector<64x128xf32>
    %226 = tpu.matmul %225, %224, %cst_112 {dimension_numbers = #tpu.dot_dimension_numbers<[1], [0], [0], [1], [0, 0, 1, 1], [], []>} : vector<64x576xbf16>, vector<576x128xbf16>, vector<64x128xf32> -> vector<64x128xf32>
    %c0_113 = arith.constant 0 : index
    %c0_114 = arith.constant 0 : index
    %227 = vector.load %arg7[%c0_113, %c0_114] : memref<64x1xf32, #tpu.memory_space<vmem>>, vector<64x1xf32>
    %228 = vector.broadcast %227 : vector<64x1xf32> to vector<64x128xf32>
    %229 = arith.addf %226, %228 : vector<64x128xf32>
    %230 = arith.addf %229, %99 : vector<64x128xf32>
    %cst_115 = arith.constant 0.000000e+00 : f32
    %231 = vector.broadcast %cst_115 : f32 to vector<64x128xf32>
    %232 = arith.maximumf %230, %231 : vector<64x128xf32>
    %c4_i32_116 = arith.constant 4 : i32
    %233 = tpu.dynamic_rotate %232 by %c4_i32_116 dim 1 : vector<64x128xf32>, i32 -> vector<64x128xf32>
    %cst_117 = arith.constant 0.000000e+00 : f32
    %234 = vector.shape_cast %18 : vector<1x128xi1> to vector<1x128xi1>
    %235 = vector.broadcast %234 : vector<1x128xi1> to vector<64x128xi1>
    %236 = vector.broadcast %cst_117 : f32 to vector<64x128xf32>
    %237 = arith.select %235, %233, %236 : vector<64x128xi1>, vector<64x128xf32>
    %238 = arith.truncf %237 : vector<64x128xf32> to vector<64x128xbf16>
    %c0_118 = arith.constant 0 : index
    %c0_119 = arith.constant 0 : index
    %239 = vector.load %arg25[%c0_118, %c0_119] : memref<1152x128xbf16, #tpu.memory_space<vmem>>, vector<64x128xbf16>
    tpu.vector_store %arg25[%c0_118, %c0_119], %238 {strides = array<i32>} : memref<1152x128xbf16, #tpu.memory_space<vmem>>, vector<64x128xbf16>,
    %c3_i32_120 = arith.constant 3 : i32
    %240 = tpu.dynamic_rotate %232 by %c3_i32_120 dim 1 : vector<64x128xf32>, i32 -> vector<64x128xf32>
    %cst_121 = arith.constant 0.000000e+00 : f32
    %241 = vector.shape_cast %20 : vector<1x128xi1> to vector<1x128xi1>
    %242 = vector.broadcast %241 : vector<1x128xi1> to vector<64x128xi1>
    %243 = vector.broadcast %cst_121 : f32 to vector<64x128xf32>
    %244 = arith.select %242, %240, %243 : vector<64x128xi1>, vector<64x128xf32>
    %245 = arith.truncf %244 : vector<64x128xf32> to vector<64x128xbf16>
    %c64_122 = arith.constant 64 : index
    %c0_123 = arith.constant 0 : index
    %246 = vector.load %arg25[%c64_122, %c0_123] : memref<1152x128xbf16, #tpu.memory_space<vmem>>, vector<64x128xbf16>
    tpu.vector_store %arg25[%c64_122, %c0_123], %245 {strides = array<i32>} : memref<1152x128xbf16, #tpu.memory_space<vmem>>, vector<64x128xbf16>,
    %c2_i32_124 = arith.constant 2 : i32
    %247 = tpu.dynamic_rotate %232 by %c2_i32_124 dim 1 : vector<64x128xf32>, i32 -> vector<64x128xf32>
    %cst_125 = arith.constant 0.000000e+00 : f32
    %248 = vector.shape_cast %22 : vector<1x128xi1> to vector<1x128xi1>
    %249 = vector.broadcast %248 : vector<1x128xi1> to vector<64x128xi1>
    %250 = vector.broadcast %cst_125 : f32 to vector<64x128xf32>
    %251 = arith.select %249, %247, %250 : vector<64x128xi1>, vector<64x128xf32>
    %252 = arith.truncf %251 : vector<64x128xf32> to vector<64x128xbf16>
    %c128_126 = arith.constant 128 : index
    %c0_127 = arith.constant 0 : index
    %253 = vector.load %arg25[%c128_126, %c0_127] : memref<1152x128xbf16, #tpu.memory_space<vmem>>, vector<64x128xbf16>
    tpu.vector_store %arg25[%c128_126, %c0_127], %252 {strides = array<i32>} : memref<1152x128xbf16, #tpu.memory_space<vmem>>, vector<64x128xbf16>,
    %c1_i32_128 = arith.constant 1 : i32
    %254 = tpu.dynamic_rotate %232 by %c1_i32_128 dim 1 : vector<64x128xf32>, i32 -> vector<64x128xf32>
    %cst_129 = arith.constant 0.000000e+00 : f32
    %255 = vector.shape_cast %24 : vector<1x128xi1> to vector<1x128xi1>
    %256 = vector.broadcast %255 : vector<1x128xi1> to vector<64x128xi1>
    %257 = vector.broadcast %cst_129 : f32 to vector<64x128xf32>
    %258 = arith.select %256, %254, %257 : vector<64x128xi1>, vector<64x128xf32>
    %259 = arith.truncf %258 : vector<64x128xf32> to vector<64x128xbf16>
    %c192_130 = arith.constant 192 : index
    %c0_131 = arith.constant 0 : index
    %260 = vector.load %arg25[%c192_130, %c0_131] : memref<1152x128xbf16, #tpu.memory_space<vmem>>, vector<64x128xbf16>
    tpu.vector_store %arg25[%c192_130, %c0_131], %259 {strides = array<i32>} : memref<1152x128xbf16, #tpu.memory_space<vmem>>, vector<64x128xbf16>,
    %261 = arith.truncf %232 : vector<64x128xf32> to vector<64x128xbf16>
    %c256_132 = arith.constant 256 : index
    %c0_133 = arith.constant 0 : index
    %262 = vector.load %arg25[%c256_132, %c0_133] : memref<1152x128xbf16, #tpu.memory_space<vmem>>, vector<64x128xbf16>
    tpu.vector_store %arg25[%c256_132, %c0_133], %261 {strides = array<i32>} : memref<1152x128xbf16, #tpu.memory_space<vmem>>, vector<64x128xbf16>,
    %c127_i32_134 = arith.constant 127 : i32
    %263 = tpu.dynamic_rotate %232 by %c127_i32_134 dim 1 : vector<64x128xf32>, i32 -> vector<64x128xf32>
    %cst_135 = arith.constant 0.000000e+00 : f32
    %264 = vector.shape_cast %26 : vector<1x128xi1> to vector<1x128xi1>
    %265 = vector.broadcast %264 : vector<1x128xi1> to vector<64x128xi1>
    %266 = vector.broadcast %cst_135 : f32 to vector<64x128xf32>
    %267 = arith.select %265, %263, %266 : vector<64x128xi1>, vector<64x128xf32>
    %268 = arith.truncf %267 : vector<64x128xf32> to vector<64x128xbf16>
    %c320_136 = arith.constant 320 : index
    %c0_137 = arith.constant 0 : index
    %269 = vector.load %arg25[%c320_136, %c0_137] : memref<1152x128xbf16, #tpu.memory_space<vmem>>, vector<64x128xbf16>
    tpu.vector_store %arg25[%c320_136, %c0_137], %268 {strides = array<i32>} : memref<1152x128xbf16, #tpu.memory_space<vmem>>, vector<64x128xbf16>,
    %c126_i32_138 = arith.constant 126 : i32
    %270 = tpu.dynamic_rotate %232 by %c126_i32_138 dim 1 : vector<64x128xf32>, i32 -> vector<64x128xf32>
    %cst_139 = arith.constant 0.000000e+00 : f32
    %271 = vector.shape_cast %28 : vector<1x128xi1> to vector<1x128xi1>
    %272 = vector.broadcast %271 : vector<1x128xi1> to vector<64x128xi1>
    %273 = vector.broadcast %cst_139 : f32 to vector<64x128xf32>
    %274 = arith.select %272, %270, %273 : vector<64x128xi1>, vector<64x128xf32>
    %275 = arith.truncf %274 : vector<64x128xf32> to vector<64x128xbf16>
    %c384_140 = arith.constant 384 : index
    %c0_141 = arith.constant 0 : index
    %276 = vector.load %arg25[%c384_140, %c0_141] : memref<1152x128xbf16, #tpu.memory_space<vmem>>, vector<64x128xbf16>
    tpu.vector_store %arg25[%c384_140, %c0_141], %275 {strides = array<i32>} : memref<1152x128xbf16, #tpu.memory_space<vmem>>, vector<64x128xbf16>,
    %c125_i32_142 = arith.constant 125 : i32
    %277 = tpu.dynamic_rotate %232 by %c125_i32_142 dim 1 : vector<64x128xf32>, i32 -> vector<64x128xf32>
    %cst_143 = arith.constant 0.000000e+00 : f32
    %278 = vector.shape_cast %30 : vector<1x128xi1> to vector<1x128xi1>
    %279 = vector.broadcast %278 : vector<1x128xi1> to vector<64x128xi1>
    %280 = vector.broadcast %cst_143 : f32 to vector<64x128xf32>
    %281 = arith.select %279, %277, %280 : vector<64x128xi1>, vector<64x128xf32>
    %282 = arith.truncf %281 : vector<64x128xf32> to vector<64x128xbf16>
    %c448_144 = arith.constant 448 : index
    %c0_145 = arith.constant 0 : index
    %283 = vector.load %arg25[%c448_144, %c0_145] : memref<1152x128xbf16, #tpu.memory_space<vmem>>, vector<64x128xbf16>
    tpu.vector_store %arg25[%c448_144, %c0_145], %282 {strides = array<i32>} : memref<1152x128xbf16, #tpu.memory_space<vmem>>, vector<64x128xbf16>,
    %c124_i32_146 = arith.constant 124 : i32
    %284 = tpu.dynamic_rotate %232 by %c124_i32_146 dim 1 : vector<64x128xf32>, i32 -> vector<64x128xf32>
    %cst_147 = arith.constant 0.000000e+00 : f32
    %285 = vector.shape_cast %32 : vector<1x128xi1> to vector<1x128xi1>
    %286 = vector.broadcast %285 : vector<1x128xi1> to vector<64x128xi1>
    %287 = vector.broadcast %cst_147 : f32 to vector<64x128xf32>
    %288 = arith.select %286, %284, %287 : vector<64x128xi1>, vector<64x128xf32>
    %289 = arith.truncf %288 : vector<64x128xf32> to vector<64x128xbf16>
    %c512_148 = arith.constant 512 : index
    %c0_149 = arith.constant 0 : index
    %290 = vector.load %arg25[%c512_148, %c0_149] : memref<1152x128xbf16, #tpu.memory_space<vmem>>, vector<64x128xbf16>
    tpu.vector_store %arg25[%c512_148, %c0_149], %289 {strides = array<i32>} : memref<1152x128xbf16, #tpu.memory_space<vmem>>, vector<64x128xbf16>,
    %c0_150 = arith.constant 0 : index
    %c0_151 = arith.constant 0 : index
    %291 = vector.load %arg25[%c0_150, %c0_151] : memref<1152x128xbf16, #tpu.memory_space<vmem>>, vector<576x128xbf16>
    %c0_152 = arith.constant 0 : index
    %c0_153 = arith.constant 0 : index
    %292 = vector.load %arg8[%c0_152, %c0_153] : memref<64x576xbf16, #tpu.memory_space<vmem>>, vector<64x576xbf16>
    %cst_154 = arith.constant dense<0.000000e+00> : vector<64x128xf32>
    %293 = tpu.matmul %292, %291, %cst_154 {dimension_numbers = #tpu.dot_dimension_numbers<[1], [0], [0], [1], [0, 0, 1, 1], [], []>} : vector<64x576xbf16>, vector<576x128xbf16>, vector<64x128xf32> -> vector<64x128xf32>
    %c0_155 = arith.constant 0 : index
    %c0_156 = arith.constant 0 : index
    %294 = vector.load %arg9[%c0_155, %c0_156] : memref<64x1xf32, #tpu.memory_space<vmem>>, vector<64x1xf32>
    %295 = vector.broadcast %294 : vector<64x1xf32> to vector<64x128xf32>
    %296 = arith.addf %293, %295 : vector<64x128xf32>
    %cst_157 = arith.constant 0.000000e+00 : f32
    %297 = vector.broadcast %cst_157 : f32 to vector<64x128xf32>
    %298 = arith.maximumf %296, %297 : vector<64x128xf32>
    %c4_i32_158 = arith.constant 4 : i32
    %299 = tpu.dynamic_rotate %298 by %c4_i32_158 dim 1 : vector<64x128xf32>, i32 -> vector<64x128xf32>
    %cst_159 = arith.constant 0.000000e+00 : f32
    %300 = vector.shape_cast %18 : vector<1x128xi1> to vector<1x128xi1>
    %301 = vector.broadcast %300 : vector<1x128xi1> to vector<64x128xi1>
    %302 = vector.broadcast %cst_159 : f32 to vector<64x128xf32>
    %303 = arith.select %301, %299, %302 : vector<64x128xi1>, vector<64x128xf32>
    %304 = arith.truncf %303 : vector<64x128xf32> to vector<64x128xbf16>
    %c0_160 = arith.constant 0 : index
    %c0_161 = arith.constant 0 : index
    %305 = vector.load %arg25[%c0_160, %c0_161] : memref<1152x128xbf16, #tpu.memory_space<vmem>>, vector<64x128xbf16>
    tpu.vector_store %arg25[%c0_160, %c0_161], %304 {strides = array<i32>} : memref<1152x128xbf16, #tpu.memory_space<vmem>>, vector<64x128xbf16>,
    %c3_i32_162 = arith.constant 3 : i32
    %306 = tpu.dynamic_rotate %298 by %c3_i32_162 dim 1 : vector<64x128xf32>, i32 -> vector<64x128xf32>
    %cst_163 = arith.constant 0.000000e+00 : f32
    %307 = vector.shape_cast %20 : vector<1x128xi1> to vector<1x128xi1>
    %308 = vector.broadcast %307 : vector<1x128xi1> to vector<64x128xi1>
    %309 = vector.broadcast %cst_163 : f32 to vector<64x128xf32>
    %310 = arith.select %308, %306, %309 : vector<64x128xi1>, vector<64x128xf32>
    %311 = arith.truncf %310 : vector<64x128xf32> to vector<64x128xbf16>
    %c64_164 = arith.constant 64 : index
    %c0_165 = arith.constant 0 : index
    %312 = vector.load %arg25[%c64_164, %c0_165] : memref<1152x128xbf16, #tpu.memory_space<vmem>>, vector<64x128xbf16>
    tpu.vector_store %arg25[%c64_164, %c0_165], %311 {strides = array<i32>} : memref<1152x128xbf16, #tpu.memory_space<vmem>>, vector<64x128xbf16>,
    %c2_i32_166 = arith.constant 2 : i32
    %313 = tpu.dynamic_rotate %298 by %c2_i32_166 dim 1 : vector<64x128xf32>, i32 -> vector<64x128xf32>
    %cst_167 = arith.constant 0.000000e+00 : f32
    %314 = vector.shape_cast %22 : vector<1x128xi1> to vector<1x128xi1>
    %315 = vector.broadcast %314 : vector<1x128xi1> to vector<64x128xi1>
    %316 = vector.broadcast %cst_167 : f32 to vector<64x128xf32>
    %317 = arith.select %315, %313, %316 : vector<64x128xi1>, vector<64x128xf32>
    %318 = arith.truncf %317 : vector<64x128xf32> to vector<64x128xbf16>
    %c128_168 = arith.constant 128 : index
    %c0_169 = arith.constant 0 : index
    %319 = vector.load %arg25[%c128_168, %c0_169] : memref<1152x128xbf16, #tpu.memory_space<vmem>>, vector<64x128xbf16>
    tpu.vector_store %arg25[%c128_168, %c0_169], %318 {strides = array<i32>} : memref<1152x128xbf16, #tpu.memory_space<vmem>>, vector<64x128xbf16>,
    %c1_i32_170 = arith.constant 1 : i32
    %320 = tpu.dynamic_rotate %298 by %c1_i32_170 dim 1 : vector<64x128xf32>, i32 -> vector<64x128xf32>
    %cst_171 = arith.constant 0.000000e+00 : f32
    %321 = vector.shape_cast %24 : vector<1x128xi1> to vector<1x128xi1>
    %322 = vector.broadcast %321 : vector<1x128xi1> to vector<64x128xi1>
    %323 = vector.broadcast %cst_171 : f32 to vector<64x128xf32>
    %324 = arith.select %322, %320, %323 : vector<64x128xi1>, vector<64x128xf32>
    %325 = arith.truncf %324 : vector<64x128xf32> to vector<64x128xbf16>
    %c192_172 = arith.constant 192 : index
    %c0_173 = arith.constant 0 : index
    %326 = vector.load %arg25[%c192_172, %c0_173] : memref<1152x128xbf16, #tpu.memory_space<vmem>>, vector<64x128xbf16>
    tpu.vector_store %arg25[%c192_172, %c0_173], %325 {strides = array<i32>} : memref<1152x128xbf16, #tpu.memory_space<vmem>>, vector<64x128xbf16>,
    %327 = arith.truncf %298 : vector<64x128xf32> to vector<64x128xbf16>
    %c256_174 = arith.constant 256 : index
    %c0_175 = arith.constant 0 : index
    %328 = vector.load %arg25[%c256_174, %c0_175] : memref<1152x128xbf16, #tpu.memory_space<vmem>>, vector<64x128xbf16>
    tpu.vector_store %arg25[%c256_174, %c0_175], %327 {strides = array<i32>} : memref<1152x128xbf16, #tpu.memory_space<vmem>>, vector<64x128xbf16>,
    %c127_i32_176 = arith.constant 127 : i32
    %329 = tpu.dynamic_rotate %298 by %c127_i32_176 dim 1 : vector<64x128xf32>, i32 -> vector<64x128xf32>
    %cst_177 = arith.constant 0.000000e+00 : f32
    %330 = vector.shape_cast %26 : vector<1x128xi1> to vector<1x128xi1>
    %331 = vector.broadcast %330 : vector<1x128xi1> to vector<64x128xi1>
    %332 = vector.broadcast %cst_177 : f32 to vector<64x128xf32>
    %333 = arith.select %331, %329, %332 : vector<64x128xi1>, vector<64x128xf32>
    %334 = arith.truncf %333 : vector<64x128xf32> to vector<64x128xbf16>
    %c320_178 = arith.constant 320 : index
    %c0_179 = arith.constant 0 : index
    %335 = vector.load %arg25[%c320_178, %c0_179] : memref<1152x128xbf16, #tpu.memory_space<vmem>>, vector<64x128xbf16>
    tpu.vector_store %arg25[%c320_178, %c0_179], %334 {strides = array<i32>} : memref<1152x128xbf16, #tpu.memory_space<vmem>>, vector<64x128xbf16>,
    %c126_i32_180 = arith.constant 126 : i32
    %336 = tpu.dynamic_rotate %298 by %c126_i32_180 dim 1 : vector<64x128xf32>, i32 -> vector<64x128xf32>
    %cst_181 = arith.constant 0.000000e+00 : f32
    %337 = vector.shape_cast %28 : vector<1x128xi1> to vector<1x128xi1>
    %338 = vector.broadcast %337 : vector<1x128xi1> to vector<64x128xi1>
    %339 = vector.broadcast %cst_181 : f32 to vector<64x128xf32>
    %340 = arith.select %338, %336, %339 : vector<64x128xi1>, vector<64x128xf32>
    %341 = arith.truncf %340 : vector<64x128xf32> to vector<64x128xbf16>
    %c384_182 = arith.constant 384 : index
    %c0_183 = arith.constant 0 : index
    %342 = vector.load %arg25[%c384_182, %c0_183] : memref<1152x128xbf16, #tpu.memory_space<vmem>>, vector<64x128xbf16>
    tpu.vector_store %arg25[%c384_182, %c0_183], %341 {strides = array<i32>} : memref<1152x128xbf16, #tpu.memory_space<vmem>>, vector<64x128xbf16>,
    %c125_i32_184 = arith.constant 125 : i32
    %343 = tpu.dynamic_rotate %298 by %c125_i32_184 dim 1 : vector<64x128xf32>, i32 -> vector<64x128xf32>
    %cst_185 = arith.constant 0.000000e+00 : f32
    %344 = vector.shape_cast %30 : vector<1x128xi1> to vector<1x128xi1>
    %345 = vector.broadcast %344 : vector<1x128xi1> to vector<64x128xi1>
    %346 = vector.broadcast %cst_185 : f32 to vector<64x128xf32>
    %347 = arith.select %345, %343, %346 : vector<64x128xi1>, vector<64x128xf32>
    %348 = arith.truncf %347 : vector<64x128xf32> to vector<64x128xbf16>
    %c448_186 = arith.constant 448 : index
    %c0_187 = arith.constant 0 : index
    %349 = vector.load %arg25[%c448_186, %c0_187] : memref<1152x128xbf16, #tpu.memory_space<vmem>>, vector<64x128xbf16>
    tpu.vector_store %arg25[%c448_186, %c0_187], %348 {strides = array<i32>} : memref<1152x128xbf16, #tpu.memory_space<vmem>>, vector<64x128xbf16>,
    %c124_i32_188 = arith.constant 124 : i32
    %350 = tpu.dynamic_rotate %298 by %c124_i32_188 dim 1 : vector<64x128xf32>, i32 -> vector<64x128xf32>
    %cst_189 = arith.constant 0.000000e+00 : f32
    %351 = vector.shape_cast %32 : vector<1x128xi1> to vector<1x128xi1>
    %352 = vector.broadcast %351 : vector<1x128xi1> to vector<64x128xi1>
    %353 = vector.broadcast %cst_189 : f32 to vector<64x128xf32>
    %354 = arith.select %352, %350, %353 : vector<64x128xi1>, vector<64x128xf32>
    %355 = arith.truncf %354 : vector<64x128xf32> to vector<64x128xbf16>
    %c512_190 = arith.constant 512 : index
    %c0_191 = arith.constant 0 : index
    %356 = vector.load %arg25[%c512_190, %c0_191] : memref<1152x128xbf16, #tpu.memory_space<vmem>>, vector<64x128xbf16>
    tpu.vector_store %arg25[%c512_190, %c0_191], %355 {strides = array<i32>} : memref<1152x128xbf16, #tpu.memory_space<vmem>>, vector<64x128xbf16>,
    %c0_192 = arith.constant 0 : index
    %c0_193 = arith.constant 0 : index
    %357 = vector.load %arg25[%c0_192, %c0_193] : memref<1152x128xbf16, #tpu.memory_space<vmem>>, vector<576x128xbf16>
    %c0_194 = arith.constant 0 : index
    %c0_195 = arith.constant 0 : index
    %358 = vector.load %arg10[%c0_194, %c0_195] : memref<64x576xbf16, #tpu.memory_space<vmem>>, vector<64x576xbf16>
    %cst_196 = arith.constant dense<0.000000e+00> : vector<64x128xf32>
    %359 = tpu.matmul %358, %357, %cst_196 {dimension_numbers = #tpu.dot_dimension_numbers<[1], [0], [0], [1], [0, 0, 1, 1], [], []>} : vector<64x576xbf16>, vector<576x128xbf16>, vector<64x128xf32> -> vector<64x128xf32>
    %c0_197 = arith.constant 0 : index
    %c0_198 = arith.constant 0 : index
    %360 = vector.load %arg11[%c0_197, %c0_198] : memref<64x1xf32, #tpu.memory_space<vmem>>, vector<64x1xf32>
    %361 = vector.broadcast %360 : vector<64x1xf32> to vector<64x128xf32>
    %362 = arith.addf %359, %361 : vector<64x128xf32>
    %363 = arith.addf %362, %232 : vector<64x128xf32>
    %cst_199 = arith.constant 0.000000e+00 : f32
    %364 = vector.broadcast %cst_199 : f32 to vector<64x128xf32>
    %365 = arith.maximumf %363, %364 : vector<64x128xf32>
    %c4_i32_200 = arith.constant 4 : i32
    %366 = tpu.dynamic_rotate %365 by %c4_i32_200 dim 1 : vector<64x128xf32>, i32 -> vector<64x128xf32>
    %cst_201 = arith.constant 0.000000e+00 : f32
    %367 = vector.shape_cast %18 : vector<1x128xi1> to vector<1x128xi1>
    %368 = vector.broadcast %367 : vector<1x128xi1> to vector<64x128xi1>
    %369 = vector.broadcast %cst_201 : f32 to vector<64x128xf32>
    %370 = arith.select %368, %366, %369 : vector<64x128xi1>, vector<64x128xf32>
    %371 = arith.truncf %370 : vector<64x128xf32> to vector<64x128xbf16>
    %c0_202 = arith.constant 0 : index
    %c0_203 = arith.constant 0 : index
    %372 = vector.load %arg25[%c0_202, %c0_203] : memref<1152x128xbf16, #tpu.memory_space<vmem>>, vector<64x128xbf16>
    tpu.vector_store %arg25[%c0_202, %c0_203], %371 {strides = array<i32>} : memref<1152x128xbf16, #tpu.memory_space<vmem>>, vector<64x128xbf16>,
    %c3_i32_204 = arith.constant 3 : i32
    %373 = tpu.dynamic_rotate %365 by %c3_i32_204 dim 1 : vector<64x128xf32>, i32 -> vector<64x128xf32>
    %cst_205 = arith.constant 0.000000e+00 : f32
    %374 = vector.shape_cast %20 : vector<1x128xi1> to vector<1x128xi1>
    %375 = vector.broadcast %374 : vector<1x128xi1> to vector<64x128xi1>
    %376 = vector.broadcast %cst_205 : f32 to vector<64x128xf32>
    %377 = arith.select %375, %373, %376 : vector<64x128xi1>, vector<64x128xf32>
    %378 = arith.truncf %377 : vector<64x128xf32> to vector<64x128xbf16>
    %c64_206 = arith.constant 64 : index
    %c0_207 = arith.constant 0 : index
    %379 = vector.load %arg25[%c64_206, %c0_207] : memref<1152x128xbf16, #tpu.memory_space<vmem>>, vector<64x128xbf16>
    tpu.vector_store %arg25[%c64_206, %c0_207], %378 {strides = array<i32>} : memref<1152x128xbf16, #tpu.memory_space<vmem>>, vector<64x128xbf16>,
    %c2_i32_208 = arith.constant 2 : i32
    %380 = tpu.dynamic_rotate %365 by %c2_i32_208 dim 1 : vector<64x128xf32>, i32 -> vector<64x128xf32>
    %cst_209 = arith.constant 0.000000e+00 : f32
    %381 = vector.shape_cast %22 : vector<1x128xi1> to vector<1x128xi1>
    %382 = vector.broadcast %381 : vector<1x128xi1> to vector<64x128xi1>
    %383 = vector.broadcast %cst_209 : f32 to vector<64x128xf32>
    %384 = arith.select %382, %380, %383 : vector<64x128xi1>, vector<64x128xf32>
    %385 = arith.truncf %384 : vector<64x128xf32> to vector<64x128xbf16>
    %c128_210 = arith.constant 128 : index
    %c0_211 = arith.constant 0 : index
    %386 = vector.load %arg25[%c128_210, %c0_211] : memref<1152x128xbf16, #tpu.memory_space<vmem>>, vector<64x128xbf16>
    tpu.vector_store %arg25[%c128_210, %c0_211], %385 {strides = array<i32>} : memref<1152x128xbf16, #tpu.memory_space<vmem>>, vector<64x128xbf16>,
    %c1_i32_212 = arith.constant 1 : i32
    %387 = tpu.dynamic_rotate %365 by %c1_i32_212 dim 1 : vector<64x128xf32>, i32 -> vector<64x128xf32>
    %cst_213 = arith.constant 0.000000e+00 : f32
    %388 = vector.shape_cast %24 : vector<1x128xi1> to vector<1x128xi1>
    %389 = vector.broadcast %388 : vector<1x128xi1> to vector<64x128xi1>
    %390 = vector.broadcast %cst_213 : f32 to vector<64x128xf32>
    %391 = arith.select %389, %387, %390 : vector<64x128xi1>, vector<64x128xf32>
    %392 = arith.truncf %391 : vector<64x128xf32> to vector<64x128xbf16>
    %c192_214 = arith.constant 192 : index
    %c0_215 = arith.constant 0 : index
    %393 = vector.load %arg25[%c192_214, %c0_215] : memref<1152x128xbf16, #tpu.memory_space<vmem>>, vector<64x128xbf16>
    tpu.vector_store %arg25[%c192_214, %c0_215], %392 {strides = array<i32>} : memref<1152x128xbf16, #tpu.memory_space<vmem>>, vector<64x128xbf16>,
    %394 = arith.truncf %365 : vector<64x128xf32> to vector<64x128xbf16>
    %c256_216 = arith.constant 256 : index
    %c0_217 = arith.constant 0 : index
    %395 = vector.load %arg25[%c256_216, %c0_217] : memref<1152x128xbf16, #tpu.memory_space<vmem>>, vector<64x128xbf16>
    tpu.vector_store %arg25[%c256_216, %c0_217], %394 {strides = array<i32>} : memref<1152x128xbf16, #tpu.memory_space<vmem>>, vector<64x128xbf16>,
    %c127_i32_218 = arith.constant 127 : i32
    %396 = tpu.dynamic_rotate %365 by %c127_i32_218 dim 1 : vector<64x128xf32>, i32 -> vector<64x128xf32>
    %cst_219 = arith.constant 0.000000e+00 : f32
    %397 = vector.shape_cast %26 : vector<1x128xi1> to vector<1x128xi1>
    %398 = vector.broadcast %397 : vector<1x128xi1> to vector<64x128xi1>
    %399 = vector.broadcast %cst_219 : f32 to vector<64x128xf32>
    %400 = arith.select %398, %396, %399 : vector<64x128xi1>, vector<64x128xf32>
    %401 = arith.truncf %400 : vector<64x128xf32> to vector<64x128xbf16>
    %c320_220 = arith.constant 320 : index
    %c0_221 = arith.constant 0 : index
    %402 = vector.load %arg25[%c320_220, %c0_221] : memref<1152x128xbf16, #tpu.memory_space<vmem>>, vector<64x128xbf16>
    tpu.vector_store %arg25[%c320_220, %c0_221], %401 {strides = array<i32>} : memref<1152x128xbf16, #tpu.memory_space<vmem>>, vector<64x128xbf16>,
    %c126_i32_222 = arith.constant 126 : i32
    %403 = tpu.dynamic_rotate %365 by %c126_i32_222 dim 1 : vector<64x128xf32>, i32 -> vector<64x128xf32>
    %cst_223 = arith.constant 0.000000e+00 : f32
    %404 = vector.shape_cast %28 : vector<1x128xi1> to vector<1x128xi1>
    %405 = vector.broadcast %404 : vector<1x128xi1> to vector<64x128xi1>
    %406 = vector.broadcast %cst_223 : f32 to vector<64x128xf32>
    %407 = arith.select %405, %403, %406 : vector<64x128xi1>, vector<64x128xf32>
    %408 = arith.truncf %407 : vector<64x128xf32> to vector<64x128xbf16>
    %c384_224 = arith.constant 384 : index
    %c0_225 = arith.constant 0 : index
    %409 = vector.load %arg25[%c384_224, %c0_225] : memref<1152x128xbf16, #tpu.memory_space<vmem>>, vector<64x128xbf16>
    tpu.vector_store %arg25[%c384_224, %c0_225], %408 {strides = array<i32>} : memref<1152x128xbf16, #tpu.memory_space<vmem>>, vector<64x128xbf16>,
    %c125_i32_226 = arith.constant 125 : i32
    %410 = tpu.dynamic_rotate %365 by %c125_i32_226 dim 1 : vector<64x128xf32>, i32 -> vector<64x128xf32>
    %cst_227 = arith.constant 0.000000e+00 : f32
    %411 = vector.shape_cast %30 : vector<1x128xi1> to vector<1x128xi1>
    %412 = vector.broadcast %411 : vector<1x128xi1> to vector<64x128xi1>
    %413 = vector.broadcast %cst_227 : f32 to vector<64x128xf32>
    %414 = arith.select %412, %410, %413 : vector<64x128xi1>, vector<64x128xf32>
    %415 = arith.truncf %414 : vector<64x128xf32> to vector<64x128xbf16>
    %c448_228 = arith.constant 448 : index
    %c0_229 = arith.constant 0 : index
    %416 = vector.load %arg25[%c448_228, %c0_229] : memref<1152x128xbf16, #tpu.memory_space<vmem>>, vector<64x128xbf16>
    tpu.vector_store %arg25[%c448_228, %c0_229], %415 {strides = array<i32>} : memref<1152x128xbf16, #tpu.memory_space<vmem>>, vector<64x128xbf16>,
    %c124_i32_230 = arith.constant 124 : i32
    %417 = tpu.dynamic_rotate %365 by %c124_i32_230 dim 1 : vector<64x128xf32>, i32 -> vector<64x128xf32>
    %cst_231 = arith.constant 0.000000e+00 : f32
    %418 = vector.shape_cast %32 : vector<1x128xi1> to vector<1x128xi1>
    %419 = vector.broadcast %418 : vector<1x128xi1> to vector<64x128xi1>
    %420 = vector.broadcast %cst_231 : f32 to vector<64x128xf32>
    %421 = arith.select %419, %417, %420 : vector<64x128xi1>, vector<64x128xf32>
    %422 = arith.truncf %421 : vector<64x128xf32> to vector<64x128xbf16>
    %c512_232 = arith.constant 512 : index
    %c0_233 = arith.constant 0 : index
    %423 = vector.load %arg25[%c512_232, %c0_233] : memref<1152x128xbf16, #tpu.memory_space<vmem>>, vector<64x128xbf16>
    tpu.vector_store %arg25[%c512_232, %c0_233], %422 {strides = array<i32>} : memref<1152x128xbf16, #tpu.memory_space<vmem>>, vector<64x128xbf16>,
    %c0_234 = arith.constant 0 : index
    %c0_235 = arith.constant 0 : index
    %424 = vector.load %arg25[%c0_234, %c0_235] : memref<1152x128xbf16, #tpu.memory_space<vmem>>, vector<576x128xbf16>
    %c0_236 = arith.constant 0 : index
    %c0_237 = arith.constant 0 : index
    %425 = vector.load %arg12[%c0_236, %c0_237] : memref<128x576xbf16, #tpu.memory_space<vmem>>, vector<128x576xbf16>
    %cst_238 = arith.constant dense<0.000000e+00> : vector<128x128xf32>
    %426 = tpu.matmul %425, %424, %cst_238 {dimension_numbers = #tpu.dot_dimension_numbers<[1], [0], [0], [1], [0, 0, 1, 1], [], []>} : vector<128x576xbf16>, vector<576x128xbf16>, vector<128x128xf32> -> vector<128x128xf32>
    %c0_239 = arith.constant 0 : index
    %c0_240 = arith.constant 0 : index
    %427 = vector.load %arg13[%c0_239, %c0_240] : memref<128x1xf32, #tpu.memory_space<vmem>>, vector<128x1xf32>
    %428 = vector.broadcast %427 : vector<128x1xf32> to vector<128x128xf32>
    %429 = arith.addf %426, %428 : vector<128x128xf32>
    %cst_241 = arith.constant 0.000000e+00 : f32
    %430 = vector.broadcast %cst_241 : f32 to vector<128x128xf32>
    %431 = arith.maximumf %429, %430 : vector<128x128xf32>
    %432 = arith.truncf %365 : vector<64x128xf32> to vector<64x128xbf16>
    %c0_242 = arith.constant 0 : index
    %c0_243 = arith.constant 0 : index
    %433 = vector.load %arg14[%c0_242, %c0_243] : memref<128x64xbf16, #tpu.memory_space<vmem>>, vector<128x64xbf16>
    %cst_244 = arith.constant dense<0.000000e+00> : vector<128x128xf32>
    %434 = tpu.matmul %433, %432, %cst_244 {dimension_numbers = #tpu.dot_dimension_numbers<[1], [0], [0], [1], [0, 0, 1, 1], [], []>} : vector<128x64xbf16>, vector<64x128xbf16>, vector<128x128xf32> -> vector<128x128xf32>
    %c0_245 = arith.constant 0 : index
    %c0_246 = arith.constant 0 : index
    %435 = vector.load %arg15[%c0_245, %c0_246] : memref<128x1xf32, #tpu.memory_space<vmem>>, vector<128x1xf32>
    %436 = vector.broadcast %435 : vector<128x1xf32> to vector<128x128xf32>
    %437 = arith.addf %434, %436 : vector<128x128xf32>
    %c4_i32_247 = arith.constant 4 : i32
    %438 = tpu.dynamic_rotate %431 by %c4_i32_247 dim 1 : vector<128x128xf32>, i32 -> vector<128x128xf32>
    %cst_248 = arith.constant 0.000000e+00 : f32
    %439 = vector.shape_cast %18 : vector<1x128xi1> to vector<1x128xi1>
    %440 = vector.broadcast %439 : vector<1x128xi1> to vector<128x128xi1>
    %441 = vector.broadcast %cst_248 : f32 to vector<128x128xf32>
    %442 = arith.select %440, %438, %441 : vector<128x128xi1>, vector<128x128xf32>
    %443 = arith.truncf %442 : vector<128x128xf32> to vector<128x128xbf16>
    %c0_249 = arith.constant 0 : index
    %c0_250 = arith.constant 0 : index
    %444 = vector.load %arg25[%c0_249, %c0_250] : memref<1152x128xbf16, #tpu.memory_space<vmem>>, vector<128x128xbf16>
    tpu.vector_store %arg25[%c0_249, %c0_250], %443 {strides = array<i32>} : memref<1152x128xbf16, #tpu.memory_space<vmem>>, vector<128x128xbf16>,
    %c3_i32_251 = arith.constant 3 : i32
    %445 = tpu.dynamic_rotate %431 by %c3_i32_251 dim 1 : vector<128x128xf32>, i32 -> vector<128x128xf32>
    %cst_252 = arith.constant 0.000000e+00 : f32
    %446 = vector.shape_cast %20 : vector<1x128xi1> to vector<1x128xi1>
    %447 = vector.broadcast %446 : vector<1x128xi1> to vector<128x128xi1>
    %448 = vector.broadcast %cst_252 : f32 to vector<128x128xf32>
    %449 = arith.select %447, %445, %448 : vector<128x128xi1>, vector<128x128xf32>
    %450 = arith.truncf %449 : vector<128x128xf32> to vector<128x128xbf16>
    %c128_253 = arith.constant 128 : index
    %c0_254 = arith.constant 0 : index
    %451 = vector.load %arg25[%c128_253, %c0_254] : memref<1152x128xbf16, #tpu.memory_space<vmem>>, vector<128x128xbf16>
    tpu.vector_store %arg25[%c128_253, %c0_254], %450 {strides = array<i32>} : memref<1152x128xbf16, #tpu.memory_space<vmem>>, vector<128x128xbf16>,
    %c2_i32_255 = arith.constant 2 : i32
    %452 = tpu.dynamic_rotate %431 by %c2_i32_255 dim 1 : vector<128x128xf32>, i32 -> vector<128x128xf32>
    %cst_256 = arith.constant 0.000000e+00 : f32
    %453 = vector.shape_cast %22 : vector<1x128xi1> to vector<1x128xi1>
    %454 = vector.broadcast %453 : vector<1x128xi1> to vector<128x128xi1>
    %455 = vector.broadcast %cst_256 : f32 to vector<128x128xf32>
    %456 = arith.select %454, %452, %455 : vector<128x128xi1>, vector<128x128xf32>
    %457 = arith.truncf %456 : vector<128x128xf32> to vector<128x128xbf16>
    %c256_257 = arith.constant 256 : index
    %c0_258 = arith.constant 0 : index
    %458 = vector.load %arg25[%c256_257, %c0_258] : memref<1152x128xbf16, #tpu.memory_space<vmem>>, vector<128x128xbf16>
    tpu.vector_store %arg25[%c256_257, %c0_258], %457 {strides = array<i32>} : memref<1152x128xbf16, #tpu.memory_space<vmem>>, vector<128x128xbf16>,
    %c1_i32_259 = arith.constant 1 : i32
    %459 = tpu.dynamic_rotate %431 by %c1_i32_259 dim 1 : vector<128x128xf32>, i32 -> vector<128x128xf32>
    %cst_260 = arith.constant 0.000000e+00 : f32
    %460 = vector.shape_cast %24 : vector<1x128xi1> to vector<1x128xi1>
    %461 = vector.broadcast %460 : vector<1x128xi1> to vector<128x128xi1>
    %462 = vector.broadcast %cst_260 : f32 to vector<128x128xf32>
    %463 = arith.select %461, %459, %462 : vector<128x128xi1>, vector<128x128xf32>
    %464 = arith.truncf %463 : vector<128x128xf32> to vector<128x128xbf16>
    %c384_261 = arith.constant 384 : index
    %c0_262 = arith.constant 0 : index
    %465 = vector.load %arg25[%c384_261, %c0_262] : memref<1152x128xbf16, #tpu.memory_space<vmem>>, vector<128x128xbf16>
    tpu.vector_store %arg25[%c384_261, %c0_262], %464 {strides = array<i32>} : memref<1152x128xbf16, #tpu.memory_space<vmem>>, vector<128x128xbf16>,
    %466 = arith.truncf %431 : vector<128x128xf32> to vector<128x128xbf16>
    %c512_263 = arith.constant 512 : index
    %c0_264 = arith.constant 0 : index
    %467 = vector.load %arg25[%c512_263, %c0_264] : memref<1152x128xbf16, #tpu.memory_space<vmem>>, vector<128x128xbf16>
    tpu.vector_store %arg25[%c512_263, %c0_264], %466 {strides = array<i32>} : memref<1152x128xbf16, #tpu.memory_space<vmem>>, vector<128x128xbf16>,
    %c127_i32_265 = arith.constant 127 : i32
    %468 = tpu.dynamic_rotate %431 by %c127_i32_265 dim 1 : vector<128x128xf32>, i32 -> vector<128x128xf32>
    %cst_266 = arith.constant 0.000000e+00 : f32
    %469 = vector.shape_cast %26 : vector<1x128xi1> to vector<1x128xi1>
    %470 = vector.broadcast %469 : vector<1x128xi1> to vector<128x128xi1>
    %471 = vector.broadcast %cst_266 : f32 to vector<128x128xf32>
    %472 = arith.select %470, %468, %471 : vector<128x128xi1>, vector<128x128xf32>
    %473 = arith.truncf %472 : vector<128x128xf32> to vector<128x128xbf16>
    %c640 = arith.constant 640 : index
    %c0_267 = arith.constant 0 : index
    %474 = vector.load %arg25[%c640, %c0_267] : memref<1152x128xbf16, #tpu.memory_space<vmem>>, vector<128x128xbf16>
    tpu.vector_store %arg25[%c640, %c0_267], %473 {strides = array<i32>} : memref<1152x128xbf16, #tpu.memory_space<vmem>>, vector<128x128xbf16>,
    %c126_i32_268 = arith.constant 126 : i32
    %475 = tpu.dynamic_rotate %431 by %c126_i32_268 dim 1 : vector<128x128xf32>, i32 -> vector<128x128xf32>
    %cst_269 = arith.constant 0.000000e+00 : f32
    %476 = vector.shape_cast %28 : vector<1x128xi1> to vector<1x128xi1>
    %477 = vector.broadcast %476 : vector<1x128xi1> to vector<128x128xi1>
    %478 = vector.broadcast %cst_269 : f32 to vector<128x128xf32>
    %479 = arith.select %477, %475, %478 : vector<128x128xi1>, vector<128x128xf32>
    %480 = arith.truncf %479 : vector<128x128xf32> to vector<128x128xbf16>
    %c768 = arith.constant 768 : index
    %c0_270 = arith.constant 0 : index
    %481 = vector.load %arg25[%c768, %c0_270] : memref<1152x128xbf16, #tpu.memory_space<vmem>>, vector<128x128xbf16>
    tpu.vector_store %arg25[%c768, %c0_270], %480 {strides = array<i32>} : memref<1152x128xbf16, #tpu.memory_space<vmem>>, vector<128x128xbf16>,
    %c125_i32_271 = arith.constant 125 : i32
    %482 = tpu.dynamic_rotate %431 by %c125_i32_271 dim 1 : vector<128x128xf32>, i32 -> vector<128x128xf32>
    %cst_272 = arith.constant 0.000000e+00 : f32
    %483 = vector.shape_cast %30 : vector<1x128xi1> to vector<1x128xi1>
    %484 = vector.broadcast %483 : vector<1x128xi1> to vector<128x128xi1>
    %485 = vector.broadcast %cst_272 : f32 to vector<128x128xf32>
    %486 = arith.select %484, %482, %485 : vector<128x128xi1>, vector<128x128xf32>
    %487 = arith.truncf %486 : vector<128x128xf32> to vector<128x128xbf16>
    %c896 = arith.constant 896 : index
    %c0_273 = arith.constant 0 : index
    %488 = vector.load %arg25[%c896, %c0_273] : memref<1152x128xbf16, #tpu.memory_space<vmem>>, vector<128x128xbf16>
    tpu.vector_store %arg25[%c896, %c0_273], %487 {strides = array<i32>} : memref<1152x128xbf16, #tpu.memory_space<vmem>>, vector<128x128xbf16>,
    %c124_i32_274 = arith.constant 124 : i32
    %489 = tpu.dynamic_rotate %431 by %c124_i32_274 dim 1 : vector<128x128xf32>, i32 -> vector<128x128xf32>
    %cst_275 = arith.constant 0.000000e+00 : f32
    %490 = vector.shape_cast %32 : vector<1x128xi1> to vector<1x128xi1>
    %491 = vector.broadcast %490 : vector<1x128xi1> to vector<128x128xi1>
    %492 = vector.broadcast %cst_275 : f32 to vector<128x128xf32>
    %493 = arith.select %491, %489, %492 : vector<128x128xi1>, vector<128x128xf32>
    %494 = arith.truncf %493 : vector<128x128xf32> to vector<128x128xbf16>
    %c1024 = arith.constant 1024 : index
    %c0_276 = arith.constant 0 : index
    %495 = vector.load %arg25[%c1024, %c0_276] : memref<1152x128xbf16, #tpu.memory_space<vmem>>, vector<128x128xbf16>
    tpu.vector_store %arg25[%c1024, %c0_276], %494 {strides = array<i32>} : memref<1152x128xbf16, #tpu.memory_space<vmem>>, vector<128x128xbf16>,
    %c0_277 = arith.constant 0 : index
    %c0_278 = arith.constant 0 : index
    %496 = vector.load %arg25[%c0_277, %c0_278] : memref<1152x128xbf16, #tpu.memory_space<vmem>>, vector<1152x128xbf16>
    %c0_279 = arith.constant 0 : index
    %c0_280 = arith.constant 0 : index
    %497 = vector.load %arg16[%c0_279, %c0_280] : memref<128x1152xbf16, #tpu.memory_space<vmem>>, vector<128x1152xbf16>
    %cst_281 = arith.constant dense<0.000000e+00> : vector<128x128xf32>
    %498 = tpu.matmul %497, %496, %cst_281 {dimension_numbers = #tpu.dot_dimension_numbers<[1], [0], [0], [1], [0, 0, 1, 1], [], []>} : vector<128x1152xbf16>, vector<1152x128xbf16>, vector<128x128xf32> -> vector<128x128xf32>
    %c0_282 = arith.constant 0 : index
    %c0_283 = arith.constant 0 : index
    %499 = vector.load %arg17[%c0_282, %c0_283] : memref<128x1xf32, #tpu.memory_space<vmem>>, vector<128x1xf32>
    %500 = vector.broadcast %499 : vector<128x1xf32> to vector<128x128xf32>
    %501 = arith.addf %498, %500 : vector<128x128xf32>
    %502 = arith.addf %501, %437 : vector<128x128xf32>
    %cst_284 = arith.constant 0.000000e+00 : f32
    %503 = vector.broadcast %cst_284 : f32 to vector<128x128xf32>
    %504 = arith.maximumf %502, %503 : vector<128x128xf32>
    %c4_i32_285 = arith.constant 4 : i32
    %505 = tpu.dynamic_rotate %504 by %c4_i32_285 dim 1 : vector<128x128xf32>, i32 -> vector<128x128xf32>
    %cst_286 = arith.constant 0.000000e+00 : f32
    %506 = vector.shape_cast %18 : vector<1x128xi1> to vector<1x128xi1>
    %507 = vector.broadcast %506 : vector<1x128xi1> to vector<128x128xi1>
    %508 = vector.broadcast %cst_286 : f32 to vector<128x128xf32>
    %509 = arith.select %507, %505, %508 : vector<128x128xi1>, vector<128x128xf32>
    %510 = arith.truncf %509 : vector<128x128xf32> to vector<128x128xbf16>
    %c0_287 = arith.constant 0 : index
    %c0_288 = arith.constant 0 : index
    %511 = vector.load %arg25[%c0_287, %c0_288] : memref<1152x128xbf16, #tpu.memory_space<vmem>>, vector<128x128xbf16>
    tpu.vector_store %arg25[%c0_287, %c0_288], %510 {strides = array<i32>} : memref<1152x128xbf16, #tpu.memory_space<vmem>>, vector<128x128xbf16>,
    %c3_i32_289 = arith.constant 3 : i32
    %512 = tpu.dynamic_rotate %504 by %c3_i32_289 dim 1 : vector<128x128xf32>, i32 -> vector<128x128xf32>
    %cst_290 = arith.constant 0.000000e+00 : f32
    %513 = vector.shape_cast %20 : vector<1x128xi1> to vector<1x128xi1>
    %514 = vector.broadcast %513 : vector<1x128xi1> to vector<128x128xi1>
    %515 = vector.broadcast %cst_290 : f32 to vector<128x128xf32>
    %516 = arith.select %514, %512, %515 : vector<128x128xi1>, vector<128x128xf32>
    %517 = arith.truncf %516 : vector<128x128xf32> to vector<128x128xbf16>
    %c128_291 = arith.constant 128 : index
    %c0_292 = arith.constant 0 : index
    %518 = vector.load %arg25[%c128_291, %c0_292] : memref<1152x128xbf16, #tpu.memory_space<vmem>>, vector<128x128xbf16>
    tpu.vector_store %arg25[%c128_291, %c0_292], %517 {strides = array<i32>} : memref<1152x128xbf16, #tpu.memory_space<vmem>>, vector<128x128xbf16>,
    %c2_i32_293 = arith.constant 2 : i32
    %519 = tpu.dynamic_rotate %504 by %c2_i32_293 dim 1 : vector<128x128xf32>, i32 -> vector<128x128xf32>
    %cst_294 = arith.constant 0.000000e+00 : f32
    %520 = vector.shape_cast %22 : vector<1x128xi1> to vector<1x128xi1>
    %521 = vector.broadcast %520 : vector<1x128xi1> to vector<128x128xi1>
    %522 = vector.broadcast %cst_294 : f32 to vector<128x128xf32>
    %523 = arith.select %521, %519, %522 : vector<128x128xi1>, vector<128x128xf32>
    %524 = arith.truncf %523 : vector<128x128xf32> to vector<128x128xbf16>
    %c256_295 = arith.constant 256 : index
    %c0_296 = arith.constant 0 : index
    %525 = vector.load %arg25[%c256_295, %c0_296] : memref<1152x128xbf16, #tpu.memory_space<vmem>>, vector<128x128xbf16>
    tpu.vector_store %arg25[%c256_295, %c0_296], %524 {strides = array<i32>} : memref<1152x128xbf16, #tpu.memory_space<vmem>>, vector<128x128xbf16>,
    %c1_i32_297 = arith.constant 1 : i32
    %526 = tpu.dynamic_rotate %504 by %c1_i32_297 dim 1 : vector<128x128xf32>, i32 -> vector<128x128xf32>
    %cst_298 = arith.constant 0.000000e+00 : f32
    %527 = vector.shape_cast %24 : vector<1x128xi1> to vector<1x128xi1>
    %528 = vector.broadcast %527 : vector<1x128xi1> to vector<128x128xi1>
    %529 = vector.broadcast %cst_298 : f32 to vector<128x128xf32>
    %530 = arith.select %528, %526, %529 : vector<128x128xi1>, vector<128x128xf32>
    %531 = arith.truncf %530 : vector<128x128xf32> to vector<128x128xbf16>
    %c384_299 = arith.constant 384 : index
    %c0_300 = arith.constant 0 : index
    %532 = vector.load %arg25[%c384_299, %c0_300] : memref<1152x128xbf16, #tpu.memory_space<vmem>>, vector<128x128xbf16>
    tpu.vector_store %arg25[%c384_299, %c0_300], %531 {strides = array<i32>} : memref<1152x128xbf16, #tpu.memory_space<vmem>>, vector<128x128xbf16>,
    %533 = arith.truncf %504 : vector<128x128xf32> to vector<128x128xbf16>
    %c512_301 = arith.constant 512 : index
    %c0_302 = arith.constant 0 : index
    %534 = vector.load %arg25[%c512_301, %c0_302] : memref<1152x128xbf16, #tpu.memory_space<vmem>>, vector<128x128xbf16>
    tpu.vector_store %arg25[%c512_301, %c0_302], %533 {strides = array<i32>} : memref<1152x128xbf16, #tpu.memory_space<vmem>>, vector<128x128xbf16>,
    %c127_i32_303 = arith.constant 127 : i32
    %535 = tpu.dynamic_rotate %504 by %c127_i32_303 dim 1 : vector<128x128xf32>, i32 -> vector<128x128xf32>
    %cst_304 = arith.constant 0.000000e+00 : f32
    %536 = vector.shape_cast %26 : vector<1x128xi1> to vector<1x128xi1>
    %537 = vector.broadcast %536 : vector<1x128xi1> to vector<128x128xi1>
    %538 = vector.broadcast %cst_304 : f32 to vector<128x128xf32>
    %539 = arith.select %537, %535, %538 : vector<128x128xi1>, vector<128x128xf32>
    %540 = arith.truncf %539 : vector<128x128xf32> to vector<128x128xbf16>
    %c640_305 = arith.constant 640 : index
    %c0_306 = arith.constant 0 : index
    %541 = vector.load %arg25[%c640_305, %c0_306] : memref<1152x128xbf16, #tpu.memory_space<vmem>>, vector<128x128xbf16>
    tpu.vector_store %arg25[%c640_305, %c0_306], %540 {strides = array<i32>} : memref<1152x128xbf16, #tpu.memory_space<vmem>>, vector<128x128xbf16>,
    %c126_i32_307 = arith.constant 126 : i32
    %542 = tpu.dynamic_rotate %504 by %c126_i32_307 dim 1 : vector<128x128xf32>, i32 -> vector<128x128xf32>
    %cst_308 = arith.constant 0.000000e+00 : f32
    %543 = vector.shape_cast %28 : vector<1x128xi1> to vector<1x128xi1>
    %544 = vector.broadcast %543 : vector<1x128xi1> to vector<128x128xi1>
    %545 = vector.broadcast %cst_308 : f32 to vector<128x128xf32>
    %546 = arith.select %544, %542, %545 : vector<128x128xi1>, vector<128x128xf32>
    %547 = arith.truncf %546 : vector<128x128xf32> to vector<128x128xbf16>
    %c768_309 = arith.constant 768 : index
    %c0_310 = arith.constant 0 : index
    %548 = vector.load %arg25[%c768_309, %c0_310] : memref<1152x128xbf16, #tpu.memory_space<vmem>>, vector<128x128xbf16>
    tpu.vector_store %arg25[%c768_309, %c0_310], %547 {strides = array<i32>} : memref<1152x128xbf16, #tpu.memory_space<vmem>>, vector<128x128xbf16>,
    %c125_i32_311 = arith.constant 125 : i32
    %549 = tpu.dynamic_rotate %504 by %c125_i32_311 dim 1 : vector<128x128xf32>, i32 -> vector<128x128xf32>
    %cst_312 = arith.constant 0.000000e+00 : f32
    %550 = vector.shape_cast %30 : vector<1x128xi1> to vector<1x128xi1>
    %551 = vector.broadcast %550 : vector<1x128xi1> to vector<128x128xi1>
    %552 = vector.broadcast %cst_312 : f32 to vector<128x128xf32>
    %553 = arith.select %551, %549, %552 : vector<128x128xi1>, vector<128x128xf32>
    %554 = arith.truncf %553 : vector<128x128xf32> to vector<128x128xbf16>
    %c896_313 = arith.constant 896 : index
    %c0_314 = arith.constant 0 : index
    %555 = vector.load %arg25[%c896_313, %c0_314] : memref<1152x128xbf16, #tpu.memory_space<vmem>>, vector<128x128xbf16>
    tpu.vector_store %arg25[%c896_313, %c0_314], %554 {strides = array<i32>} : memref<1152x128xbf16, #tpu.memory_space<vmem>>, vector<128x128xbf16>,
    %c124_i32_315 = arith.constant 124 : i32
    %556 = tpu.dynamic_rotate %504 by %c124_i32_315 dim 1 : vector<128x128xf32>, i32 -> vector<128x128xf32>
    %cst_316 = arith.constant 0.000000e+00 : f32
    %557 = vector.shape_cast %32 : vector<1x128xi1> to vector<1x128xi1>
    %558 = vector.broadcast %557 : vector<1x128xi1> to vector<128x128xi1>
    %559 = vector.broadcast %cst_316 : f32 to vector<128x128xf32>
    %560 = arith.select %558, %556, %559 : vector<128x128xi1>, vector<128x128xf32>
    %561 = arith.truncf %560 : vector<128x128xf32> to vector<128x128xbf16>
    %c1024_317 = arith.constant 1024 : index
    %c0_318 = arith.constant 0 : index
    %562 = vector.load %arg25[%c1024_317, %c0_318] : memref<1152x128xbf16, #tpu.memory_space<vmem>>, vector<128x128xbf16>
    tpu.vector_store %arg25[%c1024_317, %c0_318], %561 {strides = array<i32>} : memref<1152x128xbf16, #tpu.memory_space<vmem>>, vector<128x128xbf16>,
    %c0_319 = arith.constant 0 : index
    %c0_320 = arith.constant 0 : index
    %563 = vector.load %arg25[%c0_319, %c0_320] : memref<1152x128xbf16, #tpu.memory_space<vmem>>, vector<1152x128xbf16>
    %c0_321 = arith.constant 0 : index
    %c0_322 = arith.constant 0 : index
    %564 = vector.load %arg18[%c0_321, %c0_322] : memref<128x1152xbf16, #tpu.memory_space<vmem>>, vector<128x1152xbf16>
    %cst_323 = arith.constant dense<0.000000e+00> : vector<128x128xf32>
    %565 = tpu.matmul %564, %563, %cst_323 {dimension_numbers = #tpu.dot_dimension_numbers<[1], [0], [0], [1], [0, 0, 1, 1], [], []>} : vector<128x1152xbf16>, vector<1152x128xbf16>, vector<128x128xf32> -> vector<128x128xf32>
    %c0_324 = arith.constant 0 : index
    %c0_325 = arith.constant 0 : index
    %566 = vector.load %arg19[%c0_324, %c0_325] : memref<128x1xf32, #tpu.memory_space<vmem>>, vector<128x1xf32>
    %567 = vector.broadcast %566 : vector<128x1xf32> to vector<128x128xf32>
    %568 = arith.addf %565, %567 : vector<128x128xf32>
    %cst_326 = arith.constant 0.000000e+00 : f32
    %569 = vector.broadcast %cst_326 : f32 to vector<128x128xf32>
    %570 = arith.maximumf %568, %569 : vector<128x128xf32>
    %c4_i32_327 = arith.constant 4 : i32
    %571 = tpu.dynamic_rotate %570 by %c4_i32_327 dim 1 : vector<128x128xf32>, i32 -> vector<128x128xf32>
    %cst_328 = arith.constant 0.000000e+00 : f32
    %572 = vector.shape_cast %18 : vector<1x128xi1> to vector<1x128xi1>
    %573 = vector.broadcast %572 : vector<1x128xi1> to vector<128x128xi1>
    %574 = vector.broadcast %cst_328 : f32 to vector<128x128xf32>
    %575 = arith.select %573, %571, %574 : vector<128x128xi1>, vector<128x128xf32>
    %576 = arith.truncf %575 : vector<128x128xf32> to vector<128x128xbf16>
    %c0_329 = arith.constant 0 : index
    %c0_330 = arith.constant 0 : index
    %577 = vector.load %arg25[%c0_329, %c0_330] : memref<1152x128xbf16, #tpu.memory_space<vmem>>, vector<128x128xbf16>
    tpu.vector_store %arg25[%c0_329, %c0_330], %576 {strides = array<i32>} : memref<1152x128xbf16, #tpu.memory_space<vmem>>, vector<128x128xbf16>,
    %c3_i32_331 = arith.constant 3 : i32
    %578 = tpu.dynamic_rotate %570 by %c3_i32_331 dim 1 : vector<128x128xf32>, i32 -> vector<128x128xf32>
    %cst_332 = arith.constant 0.000000e+00 : f32
    %579 = vector.shape_cast %20 : vector<1x128xi1> to vector<1x128xi1>
    %580 = vector.broadcast %579 : vector<1x128xi1> to vector<128x128xi1>
    %581 = vector.broadcast %cst_332 : f32 to vector<128x128xf32>
    %582 = arith.select %580, %578, %581 : vector<128x128xi1>, vector<128x128xf32>
    %583 = arith.truncf %582 : vector<128x128xf32> to vector<128x128xbf16>
    %c128_333 = arith.constant 128 : index
    %c0_334 = arith.constant 0 : index
    %584 = vector.load %arg25[%c128_333, %c0_334] : memref<1152x128xbf16, #tpu.memory_space<vmem>>, vector<128x128xbf16>
    tpu.vector_store %arg25[%c128_333, %c0_334], %583 {strides = array<i32>} : memref<1152x128xbf16, #tpu.memory_space<vmem>>, vector<128x128xbf16>,
    %c2_i32_335 = arith.constant 2 : i32
    %585 = tpu.dynamic_rotate %570 by %c2_i32_335 dim 1 : vector<128x128xf32>, i32 -> vector<128x128xf32>
    %cst_336 = arith.constant 0.000000e+00 : f32
    %586 = vector.shape_cast %22 : vector<1x128xi1> to vector<1x128xi1>
    %587 = vector.broadcast %586 : vector<1x128xi1> to vector<128x128xi1>
    %588 = vector.broadcast %cst_336 : f32 to vector<128x128xf32>
    %589 = arith.select %587, %585, %588 : vector<128x128xi1>, vector<128x128xf32>
    %590 = arith.truncf %589 : vector<128x128xf32> to vector<128x128xbf16>
    %c256_337 = arith.constant 256 : index
    %c0_338 = arith.constant 0 : index
    %591 = vector.load %arg25[%c256_337, %c0_338] : memref<1152x128xbf16, #tpu.memory_space<vmem>>, vector<128x128xbf16>
    tpu.vector_store %arg25[%c256_337, %c0_338], %590 {strides = array<i32>} : memref<1152x128xbf16, #tpu.memory_space<vmem>>, vector<128x128xbf16>,
    %c1_i32_339 = arith.constant 1 : i32
    %592 = tpu.dynamic_rotate %570 by %c1_i32_339 dim 1 : vector<128x128xf32>, i32 -> vector<128x128xf32>
    %cst_340 = arith.constant 0.000000e+00 : f32
    %593 = vector.shape_cast %24 : vector<1x128xi1> to vector<1x128xi1>
    %594 = vector.broadcast %593 : vector<1x128xi1> to vector<128x128xi1>
    %595 = vector.broadcast %cst_340 : f32 to vector<128x128xf32>
    %596 = arith.select %594, %592, %595 : vector<128x128xi1>, vector<128x128xf32>
    %597 = arith.truncf %596 : vector<128x128xf32> to vector<128x128xbf16>
    %c384_341 = arith.constant 384 : index
    %c0_342 = arith.constant 0 : index
    %598 = vector.load %arg25[%c384_341, %c0_342] : memref<1152x128xbf16, #tpu.memory_space<vmem>>, vector<128x128xbf16>
    tpu.vector_store %arg25[%c384_341, %c0_342], %597 {strides = array<i32>} : memref<1152x128xbf16, #tpu.memory_space<vmem>>, vector<128x128xbf16>,
    %599 = arith.truncf %570 : vector<128x128xf32> to vector<128x128xbf16>
    %c512_343 = arith.constant 512 : index
    %c0_344 = arith.constant 0 : index
    %600 = vector.load %arg25[%c512_343, %c0_344] : memref<1152x128xbf16, #tpu.memory_space<vmem>>, vector<128x128xbf16>
    tpu.vector_store %arg25[%c512_343, %c0_344], %599 {strides = array<i32>} : memref<1152x128xbf16, #tpu.memory_space<vmem>>, vector<128x128xbf16>,
    %c127_i32_345 = arith.constant 127 : i32
    %601 = tpu.dynamic_rotate %570 by %c127_i32_345 dim 1 : vector<128x128xf32>, i32 -> vector<128x128xf32>
    %cst_346 = arith.constant 0.000000e+00 : f32
    %602 = vector.shape_cast %26 : vector<1x128xi1> to vector<1x128xi1>
    %603 = vector.broadcast %602 : vector<1x128xi1> to vector<128x128xi1>
    %604 = vector.broadcast %cst_346 : f32 to vector<128x128xf32>
    %605 = arith.select %603, %601, %604 : vector<128x128xi1>, vector<128x128xf32>
    %606 = arith.truncf %605 : vector<128x128xf32> to vector<128x128xbf16>
    %c640_347 = arith.constant 640 : index
    %c0_348 = arith.constant 0 : index
    %607 = vector.load %arg25[%c640_347, %c0_348] : memref<1152x128xbf16, #tpu.memory_space<vmem>>, vector<128x128xbf16>
    tpu.vector_store %arg25[%c640_347, %c0_348], %606 {strides = array<i32>} : memref<1152x128xbf16, #tpu.memory_space<vmem>>, vector<128x128xbf16>,
    %c126_i32_349 = arith.constant 126 : i32
    %608 = tpu.dynamic_rotate %570 by %c126_i32_349 dim 1 : vector<128x128xf32>, i32 -> vector<128x128xf32>
    %cst_350 = arith.constant 0.000000e+00 : f32
    %609 = vector.shape_cast %28 : vector<1x128xi1> to vector<1x128xi1>
    %610 = vector.broadcast %609 : vector<1x128xi1> to vector<128x128xi1>
    %611 = vector.broadcast %cst_350 : f32 to vector<128x128xf32>
    %612 = arith.select %610, %608, %611 : vector<128x128xi1>, vector<128x128xf32>
    %613 = arith.truncf %612 : vector<128x128xf32> to vector<128x128xbf16>
    %c768_351 = arith.constant 768 : index
    %c0_352 = arith.constant 0 : index
    %614 = vector.load %arg25[%c768_351, %c0_352] : memref<1152x128xbf16, #tpu.memory_space<vmem>>, vector<128x128xbf16>
    tpu.vector_store %arg25[%c768_351, %c0_352], %613 {strides = array<i32>} : memref<1152x128xbf16, #tpu.memory_space<vmem>>, vector<128x128xbf16>,
    %c125_i32_353 = arith.constant 125 : i32
    %615 = tpu.dynamic_rotate %570 by %c125_i32_353 dim 1 : vector<128x128xf32>, i32 -> vector<128x128xf32>
    %cst_354 = arith.constant 0.000000e+00 : f32
    %616 = vector.shape_cast %30 : vector<1x128xi1> to vector<1x128xi1>
    %617 = vector.broadcast %616 : vector<1x128xi1> to vector<128x128xi1>
    %618 = vector.broadcast %cst_354 : f32 to vector<128x128xf32>
    %619 = arith.select %617, %615, %618 : vector<128x128xi1>, vector<128x128xf32>
    %620 = arith.truncf %619 : vector<128x128xf32> to vector<128x128xbf16>
    %c896_355 = arith.constant 896 : index
    %c0_356 = arith.constant 0 : index
    %621 = vector.load %arg25[%c896_355, %c0_356] : memref<1152x128xbf16, #tpu.memory_space<vmem>>, vector<128x128xbf16>
    tpu.vector_store %arg25[%c896_355, %c0_356], %620 {strides = array<i32>} : memref<1152x128xbf16, #tpu.memory_space<vmem>>, vector<128x128xbf16>,
    %c124_i32_357 = arith.constant 124 : i32
    %622 = tpu.dynamic_rotate %570 by %c124_i32_357 dim 1 : vector<128x128xf32>, i32 -> vector<128x128xf32>
    %cst_358 = arith.constant 0.000000e+00 : f32
    %623 = vector.shape_cast %32 : vector<1x128xi1> to vector<1x128xi1>
    %624 = vector.broadcast %623 : vector<1x128xi1> to vector<128x128xi1>
    %625 = vector.broadcast %cst_358 : f32 to vector<128x128xf32>
    %626 = arith.select %624, %622, %625 : vector<128x128xi1>, vector<128x128xf32>
    %627 = arith.truncf %626 : vector<128x128xf32> to vector<128x128xbf16>
    %c1024_359 = arith.constant 1024 : index
    %c0_360 = arith.constant 0 : index
    %628 = vector.load %arg25[%c1024_359, %c0_360] : memref<1152x128xbf16, #tpu.memory_space<vmem>>, vector<128x128xbf16>
    tpu.vector_store %arg25[%c1024_359, %c0_360], %627 {strides = array<i32>} : memref<1152x128xbf16, #tpu.memory_space<vmem>>, vector<128x128xbf16>,
    %c0_361 = arith.constant 0 : index
    %c0_362 = arith.constant 0 : index
    %629 = vector.load %arg25[%c0_361, %c0_362] : memref<1152x128xbf16, #tpu.memory_space<vmem>>, vector<1152x128xbf16>
    %c0_363 = arith.constant 0 : index
    %c0_364 = arith.constant 0 : index
    %630 = vector.load %arg20[%c0_363, %c0_364] : memref<128x1152xbf16, #tpu.memory_space<vmem>>, vector<128x1152xbf16>
    %cst_365 = arith.constant dense<0.000000e+00> : vector<128x128xf32>
    %631 = tpu.matmul %630, %629, %cst_365 {dimension_numbers = #tpu.dot_dimension_numbers<[1], [0], [0], [1], [0, 0, 1, 1], [], []>} : vector<128x1152xbf16>, vector<1152x128xbf16>, vector<128x128xf32> -> vector<128x128xf32>
    %c0_366 = arith.constant 0 : index
    %c0_367 = arith.constant 0 : index
    %632 = vector.load %arg21[%c0_366, %c0_367] : memref<128x1xf32, #tpu.memory_space<vmem>>, vector<128x1xf32>
    %633 = vector.broadcast %632 : vector<128x1xf32> to vector<128x128xf32>
    %634 = arith.addf %631, %633 : vector<128x128xf32>
    %635 = arith.addf %634, %504 : vector<128x128xf32>
    %cst_368 = arith.constant 0.000000e+00 : f32
    %636 = vector.broadcast %cst_368 : f32 to vector<128x128xf32>
    %637 = arith.maximumf %635, %636 : vector<128x128xf32>
    %638 = arith.truncf %637 : vector<128x128xf32> to vector<128x128xbf16>
    %c0_369 = arith.constant 0 : index
    %c0_370 = arith.constant 0 : index
    %639 = vector.load %arg22[%c0_369, %c0_370] : memref<8x128xbf16, #tpu.memory_space<vmem>>, vector<8x128xbf16>
    %cst_371 = arith.constant dense<0.000000e+00> : vector<8x128xf32>
    %640 = tpu.matmul %639, %638, %cst_371 {dimension_numbers = #tpu.dot_dimension_numbers<[1], [0], [0], [1], [0, 0, 1, 1], [], []>} : vector<8x128xbf16>, vector<128x128xbf16>, vector<8x128xf32> -> vector<8x128xf32>
    %c0_372 = arith.constant 0 : index
    %c0_373 = arith.constant 0 : index
    %641 = vector.load %arg23[%c0_372, %c0_373] : memref<8x1xf32, #tpu.memory_space<vmem>>, vector<8x1xf32>
    %642 = vector.broadcast %641 : vector<8x1xf32> to vector<8x128xf32>
    %643 = arith.addf %640, %642 : vector<8x128xf32>
    %c0_374 = arith.constant 0 : index
    %c0_375 = arith.constant 0 : index
    %644 = vector.load %arg24[%c0_374, %c0_375] : memref<8x128xf32, #tpu.memory_space<vmem>>, vector<8x128xf32>
    tpu.vector_store %arg24[%c0_374, %c0_375], %643 {strides = array<i32>} : memref<8x128xf32, #tpu.memory_space<vmem>>, vector<8x128xf32>,
    return
  }
  func.func @transform_0(%arg0: i32) -> (i32, i32) {
    %c0_i32 = arith.constant 0 : i32
    %c0_i32_0 = arith.constant 0 : i32
    return %c0_i32, %arg0 : i32, i32
  }
  func.func @transform_1(%arg0: i32) -> (i32, i32) {
    %c0_i32 = arith.constant 0 : i32
    %c0_i32_0 = arith.constant 0 : i32
    %c0_i32_1 = arith.constant 0 : i32
    return %c0_i32, %c0_i32_0 : i32, i32
  }
  func.func @transform_2(%arg0: i32) -> (i32, i32) {
    %c0_i32 = arith.constant 0 : i32
    %c0_i32_0 = arith.constant 0 : i32
    %c0_i32_1 = arith.constant 0 : i32
    return %c0_i32, %c0_i32_0 : i32, i32
  }
  func.func @transform_3(%arg0: i32) -> (i32, i32) {
    %c0_i32 = arith.constant 0 : i32
    %c0_i32_0 = arith.constant 0 : i32
    %c0_i32_1 = arith.constant 0 : i32
    return %c0_i32, %c0_i32_0 : i32, i32
  }
  func.func @transform_4(%arg0: i32) -> (i32, i32) {
    %c0_i32 = arith.constant 0 : i32
    %c0_i32_0 = arith.constant 0 : i32
    %c0_i32_1 = arith.constant 0 : i32
    return %c0_i32, %c0_i32_0 : i32, i32
  }
  func.func @transform_5(%arg0: i32) -> (i32, i32) {
    %c0_i32 = arith.constant 0 : i32
    %c0_i32_0 = arith.constant 0 : i32
    %c0_i32_1 = arith.constant 0 : i32
    return %c0_i32, %c0_i32_0 : i32, i32
  }
  func.func @transform_6(%arg0: i32) -> (i32, i32) {
    %c0_i32 = arith.constant 0 : i32
    %c0_i32_0 = arith.constant 0 : i32
    %c0_i32_1 = arith.constant 0 : i32
    return %c0_i32, %c0_i32_0 : i32, i32
  }
  func.func @transform_7(%arg0: i32) -> (i32, i32) {
    %c0_i32 = arith.constant 0 : i32
    %c0_i32_0 = arith.constant 0 : i32
    %c0_i32_1 = arith.constant 0 : i32
    return %c0_i32, %c0_i32_0 : i32, i32
  }
  func.func @transform_8(%arg0: i32) -> (i32, i32) {
    %c0_i32 = arith.constant 0 : i32
    %c0_i32_0 = arith.constant 0 : i32
    %c0_i32_1 = arith.constant 0 : i32
    return %c0_i32, %c0_i32_0 : i32, i32
  }
  func.func @transform_9(%arg0: i32) -> (i32, i32) {
    %c0_i32 = arith.constant 0 : i32
    %c0_i32_0 = arith.constant 0 : i32
    %c0_i32_1 = arith.constant 0 : i32
    return %c0_i32, %c0_i32_0 : i32, i32
  }
  func.func @transform_10(%arg0: i32) -> (i32, i32) {
    %c0_i32 = arith.constant 0 : i32
    %c0_i32_0 = arith.constant 0 : i32
    %c0_i32_1 = arith.constant 0 : i32
    return %c0_i32, %c0_i32_0 : i32, i32
  }
  func.func @transform_11(%arg0: i32) -> (i32, i32) {
    %c0_i32 = arith.constant 0 : i32
    %c0_i32_0 = arith.constant 0 : i32
    %c0_i32_1 = arith.constant 0 : i32
    return %c0_i32, %c0_i32_0 : i32, i32
  }
  func.func @transform_12(%arg0: i32) -> (i32, i32) {
    %c0_i32 = arith.constant 0 : i32
    %c0_i32_0 = arith.constant 0 : i32
    %c0_i32_1 = arith.constant 0 : i32
    return %c0_i32, %c0_i32_0 : i32, i32
  }
  func.func @transform_13(%arg0: i32) -> (i32, i32) {
    %c0_i32 = arith.constant 0 : i32
    %c0_i32_0 = arith.constant 0 : i32
    %c0_i32_1 = arith.constant 0 : i32
    return %c0_i32, %c0_i32_0 : i32, i32
  }
  func.func @transform_14(%arg0: i32) -> (i32, i32) {
    %c0_i32 = arith.constant 0 : i32
    %c0_i32_0 = arith.constant 0 : i32
    %c0_i32_1 = arith.constant 0 : i32
    return %c0_i32, %c0_i32_0 : i32, i32
  }
  func.func @transform_15(%arg0: i32) -> (i32, i32) {
    %c0_i32 = arith.constant 0 : i32
    %c0_i32_0 = arith.constant 0 : i32
    %c0_i32_1 = arith.constant 0 : i32
    return %c0_i32, %c0_i32_0 : i32, i32
  }
  func.func @transform_16(%arg0: i32) -> (i32, i32) {
    %c0_i32 = arith.constant 0 : i32
    %c0_i32_0 = arith.constant 0 : i32
    %c0_i32_1 = arith.constant 0 : i32
    return %c0_i32, %c0_i32_0 : i32, i32
  }
  func.func @transform_17(%arg0: i32) -> (i32, i32) {
    %c0_i32 = arith.constant 0 : i32
    %c0_i32_0 = arith.constant 0 : i32
    %c0_i32_1 = arith.constant 0 : i32
    return %c0_i32, %c0_i32_0 : i32, i32
  }
  func.func @transform_18(%arg0: i32) -> (i32, i32) {
    %c0_i32 = arith.constant 0 : i32
    %c0_i32_0 = arith.constant 0 : i32
    %c0_i32_1 = arith.constant 0 : i32
    return %c0_i32, %c0_i32_0 : i32, i32
  }
  func.func @transform_19(%arg0: i32) -> (i32, i32) {
    %c0_i32 = arith.constant 0 : i32
    %c0_i32_0 = arith.constant 0 : i32
    %c0_i32_1 = arith.constant 0 : i32
    return %c0_i32, %c0_i32_0 : i32, i32
  }
  func.func @transform_20(%arg0: i32) -> (i32, i32) {
    %c0_i32 = arith.constant 0 : i32
    %c0_i32_0 = arith.constant 0 : i32
    %c0_i32_1 = arith.constant 0 : i32
    return %c0_i32, %c0_i32_0 : i32, i32
  }
  func.func @transform_21(%arg0: i32) -> (i32, i32) {
    %c0_i32 = arith.constant 0 : i32
    %c0_i32_0 = arith.constant 0 : i32
    %c0_i32_1 = arith.constant 0 : i32
    return %c0_i32, %c0_i32_0 : i32, i32
  }
  func.func @transform_22(%arg0: i32) -> (i32, i32) {
    %c0_i32 = arith.constant 0 : i32
    %c0_i32_0 = arith.constant 0 : i32
    %c0_i32_1 = arith.constant 0 : i32
    return %c0_i32, %c0_i32_0 : i32, i32
  }
  func.func @transform_23(%arg0: i32) -> (i32, i32) {
    %c0_i32 = arith.constant 0 : i32
    %c0_i32_0 = arith.constant 0 : i32
    return %c0_i32, %arg0 : i32, i32
  }
}

</mosaic_0001>

<bundles_post_ra>
// kernel: tpu_custom_call.1
= control target key start
LH: loop header
LB: loop body
LE: loop exit
PB: predicated region body
PF: predicated region fallthrough
CT: control target
= control target key end

     0   :  { %s19887_s0 = inlined_call_operand.hbm [shape: f32[16,256], index: 0, kind: input, shape index: {}]   ;;  %s19888_s1 = inlined_call_operand.hbm [shape: bf16[64,144], index: 1, kind: input, shape index: {}]   ;;  %s19889_s2 = inlined_call_operand.vmem [shape: f32[64,1], index: 2, kind: input, shape index: {}]   ;;  %s19890_s3 = inlined_call_operand.hbm [shape: bf16[64,576], index: 3, kind: input, shape index: {}]   ;;  %s19891_s4 = inlined_call_operand.vmem [shape: f32[64,1], index: 4, kind: input, shape index: {}]   ;;  %s19892_s5 = inlined_call_operand.hbm [shape: bf16[64,576], index: 5, kind: input, shape index: {}]   ;;  %s19893_s6 = inlined_call_operand.vmem [shape: f32[64,1], index: 6, kind: input, shape index: {}]   ;;  %s19894_s7 = inlined_call_operand.hbm [shape: bf16[64,576], index: 7, kind: input, shape index: {}]   ;;  %s19895_s8 = inlined_call_operand.vmem [shape: f32[64,1], index: 8, kind: input, shape index: {}]   ;;  %s19896_s9 = inlined_call_operand.hbm [shape: bf16[64,576], index: 9, kind: input, shape index: {}]   ;;  %s19897_s10 = inlined_call_operand.vmem [shape: f32[64,1], index: 10, kind: input, shape index: {}]   ;;  %s19898_s11 = inlined_call_operand.vmem [shape: bf16[128,576], index: 11, kind: input, shape index: {}]   ;;  %s19899_s12 = inlined_call_operand.vmem [shape: f32[128,1], index: 12, kind: input, shape index: {}]   ;;  %s19900_s13 = inlined_call_operand.vmem [shape: bf16[128,64], index: 13, kind: input, shape index: {}]   ;;  %s19901_s14 = inlined_call_operand.vmem [shape: f32[128,1], index: 14, kind: input, shape index: {}]   ;;  %s19902_s15 = inlined_call_operand.vmem [shape: bf16[128,1152], index: 15, kind: input, shape index: {}]   ;;  %s19903_s16 = inlined_call_operand.vmem [shape: f32[128,1], index: 16, kind: input, shape index: {}]   ;;  %s19904_s17 = inlined_call_operand.vmem [shape: bf16[128,1152], index: 17, kind: input, shape index: {}]   ;;  %s19905_s18 = inlined_call_operand.vmem [shape: f32[128,1], index: 18, kind: input, shape index: {}]   ;;  %s19906_s19 = inlined_call_operand.vmem [shape: bf16[128,1152], index: 19, kind: input, shape index: {}]   ;;  %s19907_s20 = inlined_call_operand.vmem [shape: f32[128,1], index: 20, kind: input, shape index: {}]   ;;  %s19908_s21 = inlined_call_operand.vmem [shape: bf16[8,128], index: 21, kind: input, shape index: {}]   ;;  %s19909_s22 = inlined_call_operand.vmem [shape: f32[8,1], index: 22, kind: input, shape index: {}]   ;;  %s19910_s23 = inlined_call_operand.hbm [shape: f32[8,256], index: 23, kind: output, shape index: {}]  }
   0x1   :  { %19960 = sst [smem:[#allocation23_spill]] %s19887_s0 }
   0x2   :  { %19961 = sst [smem:[#allocation24_spill]] %s19888_s1 }
   0x3   :  { %19962 = sst [smem:[#allocation25_spill]] %s19889_s2 }
   0x4   :  { %19963 = sst [smem:[#allocation26_spill]] %s19890_s3 }
   0x5   :  { %19964 = sst [smem:[#allocation27_spill]] %s19891_s4 }
   0x6   :  { %19965 = sst [smem:[#allocation28_spill]] %s19892_s5 }
   0x7   :  { %19966 = sst [smem:[#allocation29_spill]] %s19893_s6 }
   0x8   :  { %19967 = sst [smem:[#allocation30_spill]] %s19894_s7 }
   0x9   :  { %19968 = sst [smem:[#allocation31_spill]] %s19895_s8 }
   0xa   :  { %19969 = sst [smem:[#allocation32_spill]] %s19896_s9 }
   0xb   :  { %19970 = sst [smem:[#allocation33_spill]] %s19897_s10 }
   0xc   :  { %19971 = sst [smem:[#allocation34_spill]] %s19901_s14 }
   0xd   :  { %19972 = sst [smem:[#allocation35_spill]] %s19902_s15 }
   0xe   :  { %19973 = sst [smem:[#allocation36_spill]] %s19903_s16 }
   0xf   :  { %19974 = sst [smem:[#allocation37_spill]] %s19904_s17 }
  0x10   :  { %19975 = sst [smem:[#allocation38_spill]] %s19905_s18 }
  0x11   :  { %19976 = sst [smem:[#allocation39_spill]] %s19906_s19 }
  0x12   :  { %19977 = sst [smem:[#allocation40_spill]] %s19907_s20 }
  0x13   :  { %19978 = sst [smem:[#allocation41_spill]] %s19908_s21 }
  0x14   :  { %19979 = sst [smem:[#allocation42_spill]] %s19909_s22 }
  0x15   :  { %19980 = sst [smem:[#allocation43_spill]] %s19910_s23 }
  0x16   :  { %28 = vsyncpa [#allocation4], 0 }
  0x17   :  { %30 = vsyncpa [#allocation4 + $0x1], 0 }
  0x18   :  { %31 = vsyncpa [#allocation7], 0 }
  0x19   :  { %32 = vsyncpa [#allocation10], 0 }
  0x1a   :  { %33 = vsyncpa [#allocation13], 0 }
  0x1b   :  { %34 = vsyncpa [#allocation5], 0 }
  0x1c   :  { %36 = vsyncpa [#allocation5 + $0x1], 0  ;;  %s16166_s4 = smov 0   ;;  %s16168_s30 = smov 0  }
  0x1d   :  { %s16170_s24 = smov 0   ;;  %s16172_s25 = smov 0  }
  0x1e LB: > { %19981 = sst [smem:[#allocation20_spill]] %s16009_s4  ;;  %s16187_s5 = sadd.s32 4294967295, %s16021_s25   ;;  %s16021_s25 = sphi %s16172_s25, %s20057_s25   ;;  %s16017_s24 = sphi %s16170_s24, %s20056_s24   ;;  %s16013_s30 = sphi %s16168_s30, %s20055_s30   ;;  %s16009_s4 = sphi %s16166_s4, %s20054_s4  }
  0x1f   : > { %s10263_s1 = sadd.s32 4294967294, %s16021_s25   ;;  %p62_p0 = scmp.ne.s32.totalorder %s16013_s30, %s16009_s4 }
  0x20   : > { %p19923_p1 = scmp.eq.s32.totalorder %s16187_s5, 0  ;;  %p554_p3 = scmp.eq.s32.totalorder %s10263_s1, 1 }
  0x21   : > { %p10264_p5 = scmp.ge.s32.totalorder %s16021_s25, 1  ;;  %p561_p7 = scmp.lt.s32.totalorder %s16021_s25, 3 }
  0x22   : > { %p16196_p4 = por %p19923_p1, %p62_p0  ;;  %p16201_p6 = por %p554_p3, %p62_p0 }
  0x23   : > { %p16206_p8 = pnand %p10264_p5, %p561_p7  ;;  %s16023_s27 = smov [#allocation6]  }
  0x24   : > { %s19982_s26 = scalar_select %p16196_p4, 1, 0 }
  0x25   : > { %s19983_s2 = scalar_select %p16201_p6, 1, 0 }
  0x26   : > { %s19985_s6 = scalar_select %p16206_p8, 1, 0 }
  0x27   : > { %19984 = sst [smem:[#allocation21_spill]] %s19983_s2  ;;  %s573_s7 = sshll.u32 %s16023_s27, 4  ;;  %s574_s7 = int_to_ptr.vmem [resolvable:$true] %s573_s7 }
  0x28   : > { %p13382_p9 = pneg %p16206_p8  ;;  %s16024_s29 = smov [#allocation9]  }
  0x29   : > { %s605_s3 = sshll.u32 %s16024_s29, 4  ;;  %s19987_s2 = sld [smem:[#allocation24_spill]]  ;;  %s606_s3 = int_to_ptr.vmem [resolvable:$true] %s605_s3 }
  0x2a   : > { %p16215_p11 = pnand %p13382_p9, %p19923_p1 }
  0x2c   : > { %p16227_p13 = pneg %p16215_p11 }
  0x2f   : > { %s15773_s4 = scalar_lea.hbm %s19987_s2, 1024 }
  0x30   : > { %p15774_p12 = scmp.ne.s32.totalorder %s19987_s2, %s15773_s4  ;;  %p15780_p5 = scmp.lt.u32.totalorder %s15773_s4, %s19987_s2 }
  0x32   : > { %p15776_p0 = pnand %p16227_p13, %p15774_p12 }
  0x34   : > { %p15777_p3 = pneg %p15776_p0 }
  0x36   : > { %p15782_p7 = pnand %p15780_p5, %p15777_p3 }
  0x38   : > { %15785 = shalt.err (!%p15782_p7)
}
  0x39   : > { %s15786_s29 = scalar_lea.vmem %s574_s7, 1024  ;;  %p15794_p2 = scmp.lt.s32.totalorder %s574_s7, %s574_s7 }
  0x3a   : > { %p15787_p9 = scmp.ne.s32.totalorder %s574_s7, %s15786_s29  ;;  %p15795_p6 = scmp.lt.s32.totalorder %s15786_s29, %s15786_s29 }
  0x3c   : > { %p15789_p10 = pnand %p15787_p9, %p16227_p13  ;;  %p15796_p4 = por %p15795_p6, %p15794_p2 }
  0x3e   : > { %p15790_p1 = pneg %p15789_p10 }
  0x40   : > { %p15797_p8 = pnand %p15796_p4, %p15790_p1 }
  0x42   : > { %15800 = shalt.err (!%p15797_p8)
}
  0x43   : > { %s19932_s21 = smov 128   ;;  %s19933_s23 = smov 8  }
  0x44   : > { %13385 = dma.hbm_to_vmem [thread:$0]  (!%p16215_p11), %s19987_s2, 1024, %s574_s7, [#allocation7], %s19932_s21, %s19932_s21, %s19933_s23  }
  0x45   : > { %s16027_s4 = smov [#allocation8]   ;;  %s19989_s19 = sld [smem:[#allocation28_spill]] }
  0x46   : > { %s589_s0 = sshll.u32 %s16027_s4, 4  ;;  %s590_s0 = int_to_ptr.vmem [resolvable:$true] %s589_s0 }
  0x4b   : > { %s15801_s18 = scalar_lea.hbm %s19989_s19, 2560 }
  0x4c   : > { %p15802_p1 = scmp.ne.s32.totalorder %s19989_s19, %s15801_s18  ;;  %p15808_p6 = scmp.lt.u32.totalorder %s15801_s18, %s19989_s19 }
  0x4e   : > { %p15804_p2 = pnand %p15802_p1, %p16227_p13 }
  0x50   : > { %p15805_p4 = pneg %p15804_p2 }
  0x52   : > { %p15810_p8 = pnand %p15808_p6, %p15805_p4 }
  0x54   : > { %15813 = shalt.err (!%p15810_p8)
}
  0x55   : > { %s15814_s7 = scalar_lea.vmem %s606_s3, 2560  ;;  %p15822_p3 = scmp.lt.s32.totalorder %s606_s3, %s606_s3 }
  0x56   : > { %p15815_p10 = scmp.ne.s32.totalorder %s606_s3, %s15814_s7  ;;  %p15823_p5 = scmp.lt.s32.totalorder %s15814_s7, %s15814_s7 }
  0x58   : > { %p15817_p12 = pnand %p15815_p10, %p16227_p13  ;;  %p15824_p7 = por %p15823_p5, %p15822_p3 }
  0x5a   : > { %p15818_p0 = pneg %p15817_p12 }
  0x5c   : > { %p15825_p9 = pnand %p15824_p7, %p15818_p0 }
  0x5e   : > { %15828 = shalt.err (!%p15825_p9)
}
  0x5f   : > { %s16028_s14 = smov 320   ;;  %s16029_s17 = smov 20  }
  0x60   : > { %13391 = dma.hbm_to_vmem [thread:$0]  (!%p16215_p11), %s19989_s19, 2560, %s606_s3, [#allocation10], %s16028_s14, %s16028_s14, %s16029_s17  }
  0x61   : > { %s19990_s22 = sld [smem:[#allocation26_spill]] }
  0x67   : > { %s15829_s4 = scalar_lea.hbm %s19990_s22, 2560 }
  0x68   : > { %p15830_p1 = scmp.ne.s32.totalorder %s19990_s22, %s15829_s4  ;;  %p15836_p6 = scmp.lt.u32.totalorder %s15829_s4, %s19990_s22 }
  0x6a   : > { %p15832_p2 = pnand %p15830_p1, %p16227_p13 }
  0x6c   : > { %p15833_p4 = pneg %p15832_p2 }
  0x6e   : > { %p15838_p8 = pnand %p15836_p6, %p15833_p4 }
  0x70   : > { %15841 = shalt.err (!%p15838_p8)
}
  0x71   : > { %s15842_s15 = scalar_lea.vmem %s590_s0, 2560  ;;  %p15850_p3 = scmp.lt.s32.totalorder %s590_s0, %s590_s0 }
  0x72   : > { %p15843_p10 = scmp.ne.s32.totalorder %s590_s0, %s15842_s15  ;;  %p15851_p5 = scmp.lt.s32.totalorder %s15842_s15, %s15842_s15 }
  0x74   : > { %p15845_p12 = pnand %p15843_p10, %p16227_p13  ;;  %p15852_p7 = por %p15851_p5, %p15850_p3 }
  0x76   : > { %p15846_p0 = pneg %p15845_p12 }
  0x78   : > { %p15853_p9 = pnand %p15852_p7, %p15846_p0 }
  0x7a   : > { %15856 = shalt.err (!%p15853_p9)
}
  0x7b   : > { %13388 = dma.hbm_to_vmem [thread:$0]  (!%p16215_p11), %s19990_s22, 2560, %s590_s0, [#allocation7], %s16028_s14, %s16028_s14, %s16029_s17  }
  0x7c   : > { %s16030_s16 = smov [#allocation11]   ;;  %s16031_s20 = smov [#allocation12]  }
  0x7d   : > { %s621_s18 = sshll.u32 %s16030_s16, 4  ;;  %s637_s4 = sshll.u32 %s16031_s20, 4  ;;  %s622_s18 = int_to_ptr.vmem [resolvable:$true] %s621_s18  ;;  %s638_s4 = int_to_ptr.vmem [resolvable:$true] %s637_s4 }
  0x7e   : > { %s19991_s7 = sld [smem:[#allocation30_spill]] }
  0x84   : > { %s15857_s15 = scalar_lea.hbm %s19991_s7, 2560 }
  0x85   : > { %p15858_p1 = scmp.ne.s32.totalorder %s19991_s7, %s15857_s15  ;;  %p15864_p6 = scmp.lt.u32.totalorder %s15857_s15, %s19991_s7 }
  0x87   : > { %p15860_p2 = pnand %p15858_p1, %p16227_p13 }
  0x89   : > { %p15861_p4 = pneg %p15860_p2 }
  0x8b   : > { %p15866_p8 = pnand %p15864_p6, %p15861_p4 }
  0x8d   : > { %15869 = shalt.err (!%p15866_p8)
}
  0x8e   : > { %s15870_s0 = scalar_lea.vmem %s622_s18, 2560  ;;  %p15878_p3 = scmp.lt.s32.totalorder %s622_s18, %s622_s18 }
  0x8f   : > { %p15871_p10 = scmp.ne.s32.totalorder %s622_s18, %s15870_s0  ;;  %p15879_p5 = scmp.lt.s32.totalorder %s15870_s0, %s15870_s0 }
  0x91   : > { %p15873_p12 = pnand %p15871_p10, %p16227_p13  ;;  %p15880_p7 = por %p15879_p5, %p15878_p3 }
  0x93   : > { %p15874_p0 = pneg %p15873_p12 }
  0x95   : > { %p15881_p9 = pnand %p15880_p7, %p15874_p0 }
  0x97   : > { %15884 = shalt.err (!%p15881_p9)
}
  0x98   : > { %13394 = dma.hbm_to_vmem [thread:$0]  (!%p16215_p11), %s19991_s7, 2560, %s622_s18, [#allocation10], %s16028_s14, %s16028_s14, %s16029_s17  }
  0x99   : > { %s19992_s9 = sld [smem:[#allocation32_spill]] }
  0x9f   : > { %s15885_s16 = scalar_lea.hbm %s19992_s9, 2560 }
  0xa0   : > { %p15886_p1 = scmp.ne.s32.totalorder %s19992_s9, %s15885_s16  ;;  %p15892_p6 = scmp.lt.u32.totalorder %s15885_s16, %s19992_s9 }
  0xa2   : > { %p15888_p2 = pnand %p15886_p1, %p16227_p13 }
  0xa4   : > { %p15889_p4 = pneg %p15888_p2 }
  0xa6   : > { %p15894_p8 = pnand %p15892_p6, %p15889_p4 }
  0xa8   : > { %15897 = shalt.err (!%p15894_p8)
}
  0xa9   : > { %s15898_s3 = scalar_lea.vmem %s638_s4, 2560  ;;  %p15906_p3 = scmp.lt.s32.totalorder %s638_s4, %s638_s4 }
  0xaa   : > { %p15899_p10 = scmp.ne.s32.totalorder %s638_s4, %s15898_s3  ;;  %p15907_p5 = scmp.lt.s32.totalorder %s15898_s3, %s15898_s3 }
  0xac   : > { %p15901_p12 = pnand %p15899_p10, %p16227_p13  ;;  %p15908_p7 = por %p15907_p5, %p15906_p3 }
  0xae   : > { %p15902_p0 = pneg %p15901_p12 }
  0xb0   : > { %p15909_p9 = pnand %p15908_p7, %p15902_p0 }
  0xb2   : > { %15912 = shalt.err (!%p15909_p9)
}
  0xb3   : > { %13397 = dma.hbm_to_vmem [thread:$0]  (!%p16215_p11), %s19992_s9, 2560, %s638_s4, [#allocation13], %s16028_s14, %s16028_s14, %s16029_s17  }
  0xb4   : > { %s16331_s27 = sadd.s32 1, %s16021_s25   ;;  %s49_s19 = sadd.s32 1, %s16017_s24 }
  0xb5   : > { %s46_s28 = ssub.s32 %s16021_s25, %s16331_s27  ;;  %p56_p1 = scmp.ne.s32.totalorder %s16017_s24, %s16013_s30 }
  0xb6   : > { %p47_p13 = scmp.eq.s32.totalorder %s46_s28, 0  ;;  %p57_p2 = scmp.eq.s32.totalorder %s16021_s25, 0 }
  0xb7   : > { %p13411_p4 = scmp.lt.s32.totalorder %s16021_s25, 2  ;;  %p19994_p8 = scmp.eq.s32.totalorder %s16187_s5, 1 }
  0xb8   : > { %s16341_s2 = scalar_select %p47_p13, %s16017_s24, %s49_s19  }
  0xb9   : > { %p58_p6 = por %p57_p2, %p56_p1  ;;  %p16345_p10 = por %p19994_p8, %p56_p1 }
  0xba   : > { %19993 = sst [smem:[#allocation22_spill]] %s16341_s2  ;;  %s690_s21 = sand.u32 1, %s16017_s24  }
  0xbb   : > { %s10272_s16 = sshll.u32 %s16021_s25, 7  ;;  %s10271_s14 = sshll.u32 %s690_s21, 4 }
  0xbc   : > { %s19996_s20 = sld [smem:[#allocation23_spill]]  ;;  %s694_s29 = scalar_lea.vmem [#allocation3], %s10271_s14 }
  0xbd   : > { %s700_s15 = sshll.u32 %s694_s29, 4  ;;  %p16356_p11 = pnand %p13411_p4, %p58_p6  ;;  %s16360_s15 = int_to_ptr.vmem [resolvable:$true] %s700_s15 }
  0xbe   : > { %s16362_s18 = scalar_lea.sflag [#allocation4], %s690_s21 }
  0xbf   : > { %p15915_p0 = pneg %p16356_p11 }
  0xc2   : > { %s16354_s1 = scalar_lea.hbm %s19996_s20, %s10272_s16  ;;  %s15918_s16 = scalar_lea.hbm %s19996_s20, 512 }
  0xc3   : > { %s15913_s0 = scalar_lea.hbm %s16354_s1, 256  ;;  %p15919_p7 = scmp.lt.u32.totalorder %s16354_s1, %s19996_s20 }
  0xc4   : > { %p15914_p12 = scmp.ne.s32.totalorder %s16354_s1, %s15913_s0  ;;  %p15920_p9 = scmp.lt.u32.totalorder %s15918_s16, %s15913_s0 }
  0xc5   : > { %p15922_p1 = scmp.lt.u32.totalorder %s15913_s0, %s16354_s1 }
  0xc6   : > { %p15916_p3 = pnand %p15915_p0, %p15914_p12  ;;  %p15921_p13 = por %p15920_p9, %p15919_p7 }
  0xc8   : > { %p15917_p5 = pneg %p15916_p3  ;;  %p15923_p2 = por %p15922_p1, %p15921_p13 }
  0xca   : > { %p15924_p4 = pnand %p15923_p2, %p15917_p5 }
  0xcc   : > { %15927 = shalt.err (!%p15924_p4)
}
  0xcd   : > { %s15928_s21 = scalar_lea.vmem %s16360_s15, 256  ;;  %s16032_s4 = smov [#allocation3]  }
  0xce   : > { %p15929_p6 = scmp.ne.s32.totalorder %s16360_s15, %s15928_s21  ;;  %s15933_s29 = sshll.u32 %s16032_s4, 4  ;;  %s15934_s29 = int_to_ptr.vmem [resolvable:$false] %s15933_s29 }
  0xcf   : > { %s15935_s28 = scalar_lea.vmem %s15934_s29, 512  ;;  %p15936_p3 = scmp.lt.s32.totalorder %s16360_s15, %s15934_s29 }
  0xd0   : > { %p15931_p8 = pnand %p15929_p6, %p15915_p0  ;;  %p15937_p7 = scmp.lt.s32.totalorder %s15935_s28, %s15928_s21 }
  0xd2   : > { %p15932_p12 = pneg %p15931_p8  ;;  %p15938_p9 = por %p15937_p7, %p15936_p3 }
  0xd4   : > { %p15939_p13 = pnand %p15938_p9, %p15932_p12 }
  0xd6   : > { %15942 = shalt.err (!%p15939_p13)
}
  0xd7   : > { %s16033_s0 = smov 256   ;;  %s19998_s19 = smov 8  }
  0xd8   : > { %s19999_s16 = smov 128   ;;  %p20000_p0 = scmp.ne.s32.totalorder %s19985_s6, 0 }
  0xd9   : > { %13401 = dma.hbm_to_vmem [thread:$0]  (!%p16356_p11), %s16354_s1, 256, %s16360_s15, %s16362_s18, %s16033_s0, %s19999_s16, %s19998_s19  }
  0xda   : > { %712 = sbr.rel (%p20000_p0) target bundleno = 4483 (0x1183), region = 112  ;;  %s16395_s14 = sand.u32 (!%p20000_p0), 1, %s16013_s30  }
  0xdb   : > { %s10274_s17 = sshll.u32 (!%p20000_p0), %s16395_s14, 4  ;;  %s715_s21 = scalar_lea.sflag (!%p20000_p0), [#allocation4], %s16395_s14 }
  0xdc   : > { %s718_s4 = scalar_lea.vmem (!%p20000_p0), [#allocation3], %s10274_s17  ;;  %p20001_p5 = scmp.ne.s32.totalorder (!%p20000_p0), %s19982_s26, 0 }
  0xe1   : > { %15988 = dma.done.wait (%p20001_p5), %s715_s21, 256  }
  0xe2   : > { %15990 = vsyncadd (%p20001_p5), %s715_s21, 4294967040  ;;  %p20002_p1 = scmp.eq.s32.totalorder %s16187_s5, 0 }
  0xe4   : > { %15992 = dma.done.wait (%p20002_p1), [#allocation7], 3584   ;;  %p20003_p11 = pmov %p20002_p1 }
  0xe5   : > { %p20004_p2 = pmov %p20002_p1 }
  0xe6   : > { %15994 = vsyncadd (%p20003_p11), [#allocation7], 4294963712 }
  0xe7   : > { %15996 = dma.done.wait (%p20004_p2), [#allocation10], 5120   ;;  %p20005_p4 = pmov %p20002_p1 }
  0xe8   : > { %p20006_p6 = pmov %p20002_p1 }
  0xe9   : > { %15998 = vsyncadd (%p20005_p4), [#allocation10], 4294962176 }
  0xea   : > { %16000 = dma.done.wait (%p20006_p6), [#allocation13], 2560   ;;  %p20007_p8 = pmov %p20002_p1 }
  0xeb   : > { %v16034_v0 = vmov 0   ;;  %v16418_v1 = vld [vmem:[%s718_s4] sm:$0xff]  ;;  %v16420_v2 = vld [vmem:[%s718_s4 + $0x8] sm:$0xff]  ;;  %s19950_s26 = smov 4   ;;  %s19948_s6 = smov 2   ;;  %vm1009_vm0 = vcmask 130048   ;;  %v802_v14 = vlaneseq }
  0xec   : > { %16002 = vsyncadd (%p20007_p8), [#allocation13], 4294964736  ;;  %1022 = vmatprep.subr.bf16.mxu0 %v16034_v0  ;;  %13511 = vset.pattern.permute.xlu0 %v16034_v0  ;;  %v13471_v3 = vpack.i.bf16 %v16420_v2, %v16418_v1  ;;  %s19946_s1 = smov 3   ;;  %s19944_s15 = smov 1   ;;  %v866_v4 = vpack.c.bf16 %v16420_v2, %v16418_v1  ;;  %v15275_v5 = vld [vmem:[#allocation6 + $0x4] ss:$8 sps:$4 sm:$0xff]  }
  0xed   : > { %13512 = vset.pattern.permute.xlu1 %v16034_v0  ;;  %s19936_s3 = smov 127   ;;  %s19942_s18 = smov 126   ;;  %10289 = vmatprep.mubr.msk.bf16.mxu0 %vm1009_vm0, %v15275_v5  ;;  %v16459_v15 = vand.u32 127, %v802_v14  ;;  %v15273_v56 = vld [vmem:[#allocation6] ss:$8 sps:$4 sm:$0xff]  }
  0xee   : > { %13472 = vrot.lane.b32.xlu0 %v13471_v3, %s19950_s26  ;;  %13482 = vrot.lane.b32.xlu1 %v13471_v3, %s19948_s6  ;;  %s19938_s29 = smov 125   ;;  %s19940_s28 = smov 124   ;;  %v15276_v57 = vld [vmem:[#allocation6 + $0x14] ss:$8 sps:$4 sm:$0xff]   ;;  %v15278_v58 = vld [vmem:[#allocation6 + $0x10] ss:$8 sps:$4 sm:$0xff]  }
  0xef   : > { %s20008_s16 = sld [smem:[#allocation25_spill]]  ;;  %vm816_vm1 = vcmp.ge.s32.totalorder %v16459_v15, 4  ;;  %vm817_vm3 = vcmp.ge.s32.totalorder %v16459_v15, 3  ;;  %vm818_vm5 = vcmp.ge.s32.totalorder %v16459_v15, 2  ;;  %vm819_vm7 = vcmp.ge.s32.totalorder %v16459_v15, 1  ;;  %s20029_s0 = smov 124  }
  0xf0   : > { %vm16462_vm2 = vmpackc.low %vm816_vm1, %vm816_vm1  ;;  %vm820_vm9 = vcmp.lt.s32.totalorder %v16459_v15, 127  ;;  %vm821_vm11 = vcmp.lt.s32.totalorder %v16459_v15, 126  ;;  %vm822_vm13 = vcmp.lt.s32.totalorder %v16459_v15, 125  ;;  %vm823_vm15 = vcmp.lt.s32.totalorder %v16459_v15, 124  ;;  %v15279_v59 = vld [vmem:[#allocation6 + $0x24] ss:$8 sps:$4 sm:$0xff]  }
  0xf1   : > { %vm16467_vm4 = vmpackc.low %vm817_vm3, %vm817_vm3  ;;  %v15281_v60 = vld [vmem:[#allocation6 + $0x20] ss:$8 sps:$4 sm:$0xff]   ;;  %v15282_v61 = vld [vmem:[#allocation6 + $0x34] ss:$8 sps:$4 sm:$0xff]   ;;  %s20030_s21 = sld [smem:[#allocation27_spill]]  ;;  %s20031_s9 = smov 4  }
  0xf2   : > { %13477 = vrot.lane.b32.xlu0 %v13471_v3, %s19946_s1  ;;  %13487 = vrot.lane.b32.xlu1 %v13471_v3, %s19944_s15  ;;  %vm16472_vm6 = vmpackc.low %vm818_vm5, %vm818_vm5  ;;  %v15284_v62 = vld [vmem:[#allocation6 + $0x30] ss:$8 sps:$4 sm:$0xff]   ;;  %s20025_s15 = smov 1   ;;  %s20032_s7 = smov 2  }
  0xf3   : > { %vm16480_vm8 = vmpackc.low %vm819_vm7, %vm819_vm7  ;;  %s20034_s17 = sld [smem:[#allocation29_spill]]  ;;  %s20035_s8 = sld [smem:[#allocation31_spill]] }
  0xf4   : > { %vm16491_vm10 = vmpackc.low %vm820_vm9, %vm820_vm9  ;;  %s20036_s10 = sld [smem:[#allocation33_spill]]  ;;  %s20037_s20 = sld [smem:[#allocation35_spill]] }
  0xf5   : > { %v925_v6 = vld [vmem:[%s20008_s16] sm:$0xff]  ;;  %v926_v7 = vld [vmem:[%s20008_s16 + $0x8] sm:$0xff]  ;;  %v927_v8 = vld [vmem:[%s20008_s16 + $0x10] sm:$0xff]  ;;  %s20038_s4 = sld [smem:[#allocation36_spill]]  ;;  %s20043_s2 = sld [smem:[#allocation38_spill]] }
  0xf6   : > { %13492 = vrot.lane.b32.xlu0 %v13471_v3, %s19936_s3  ;;  %13497 = vrot.lane.b32.xlu1 %v13471_v3, %s19942_s18  ;;  %v928_v9 = vld [vmem:[%s20008_s16 + $0x18] sm:$0xff]  ;;  %v929_v10 = vld [vmem:[%s20008_s16 + $0x20] sm:$0xff]  ;;  %vm16499_vm12 = vmpackc.low %vm821_vm11, %vm821_vm11  ;;  %s20026_s18 = smov 126   ;;  %s20040_s3 = sld [smem:[#allocation34_spill]] }
  0xf7   : > { %v930_v11 = vld [vmem:[%s20008_s16 + $0x28] sm:$0xff]  ;;  %v931_v12 = vld [vmem:[%s20008_s16 + $0x30] sm:$0xff]  ;;  %v932_v13 = vld [vmem:[%s20008_s16 + $0x38] sm:$0xff] }
  0xf8   : > { %vm16514_vm14 = vmpackc.low %vm822_vm13, %vm822_vm13 }
  0xf9   : > { %vm16521_vm1 = vmpackc.low %vm823_vm15, %vm823_vm15 }
  0xfa   : > { %13502 = vrot.lane.b32.xlu0 %v13471_v3, %s19938_s29  ;;  %13507 = vrot.lane.b32.xlu1 %v13471_v3, %s19940_s28  ;;  %s20027_s29 = smov 127   ;;  %s20028_s28 = smov 125  }
  0xfe   : > { %935 = vperm.xlu0 %13511, %v925_v6   ;;  %940 = vperm.xlu1 %13512, %v926_v7  }
 0x102   : > { %945 = vperm.xlu1 %13512, %v927_v8   ;;  %950 = vperm.xlu0 %13511, %v928_v9  }
 0x106   : > { %955 = vperm.xlu1 %13512, %v929_v10   ;;  %960 = vperm.xlu0 %13511, %v930_v11  }
 0x10a   : > { %965 = vperm.xlu1 %13512, %v931_v12   ;;  %970 = vperm.xlu0 %13511, %v932_v13  }
 0x160   : > { %v13473_v18 = vpop.permute.xlu0 %13472  ;;  %v13483_v19 = vpop.permute.xlu1 %13482 }
 0x161   : > { %v13475_v20 = vunpack.i.h.bf16 %v13473_v18  ;;  %v13474_v21 = vunpack.i.l.bf16 %v13473_v18  ;;  %v13485_v27 = vunpack.i.h.bf16 %v13483_v19  ;;  %v13484_v28 = vunpack.i.l.bf16 %v13483_v19 }
 0x163   : > { %v10674_v23 = vpack.c.bf16 %v13475_v20, %v13474_v21  ;;  %v10680_v32 = vpack.c.bf16 %v13485_v27, %v13484_v28 }
 0x164   : > { %v13478_v24 = vpop.permute.xlu0 %13477  ;;  %v13488_v29 = vpop.permute.xlu1 %13487 }
 0x165   : > { %v13480_v25 = vunpack.i.h.bf16 %v13478_v24  ;;  %v13479_v26 = vunpack.i.l.bf16 %v13478_v24  ;;  %10675 = vmatpush1.bf16.msk.msra.mxu0 %vm16462_vm2, %v10674_v23  ;;  %v13490_v33 = vunpack.i.h.bf16 %v13488_v29  ;;  %v13489_v34 = vunpack.i.l.bf16 %v13488_v29 }
 0x166   : > { %1024 = vmatprep.subr.bf16.mxu0 %v16034_v0 }
 0x167   : > { %v10677_v31 = vpack.c.bf16 %v13480_v25, %v13479_v26  ;;  %v10683_v35 = vpack.c.bf16 %v13490_v33, %v13489_v34 }
 0x168   : > { %v13493_v36 = vpop.permute.xlu0 %13492  ;;  %v13498_v40 = vpop.permute.xlu1 %13497 }
 0x169   : > { %10678 = vmatpush1.bf16.msk.msra.mxu0 %vm16467_vm4, %v10677_v31  ;;  %v13495_v38 = vunpack.i.h.bf16 %v13493_v36  ;;  %v13494_v39 = vunpack.i.l.bf16 %v13493_v36  ;;  %v13500_v43 = vunpack.i.h.bf16 %v13498_v40  ;;  %v13499_v44 = vunpack.i.l.bf16 %v13498_v40 }
 0x16a   : > { %1026 = vmatprep.subr.bf16.mxu0 %v16034_v0 }
 0x16b   : > { %v10686_v42 = vpack.c.bf16 %v13495_v38, %v13494_v39  ;;  %v10689_v46 = vpack.c.bf16 %v13500_v43, %v13499_v44 }
 0x16c   : > { %v13503_v45 = vpop.permute.xlu0 %13502  ;;  %v13508_v49 = vpop.permute.xlu1 %13507 }
 0x16d   : > { %10681 = vmatpush1.bf16.msk.msra.mxu0 %vm16472_vm6, %v10680_v32  ;;  %v13505_v47 = vunpack.i.h.bf16 %v13503_v45  ;;  %v13504_v48 = vunpack.i.l.bf16 %v13503_v45  ;;  %v13510_v51 = vunpack.i.h.bf16 %v13508_v49  ;;  %v13509_v52 = vunpack.i.l.bf16 %v13508_v49  ;;  %v15287_v49 = vld [vmem:[#allocation8 + $0x4] ss:$20 sps:$4 sm:$0xff]  }
 0x16e   : > { %1028 = vmatprep.subr.bf16.mxu0 %v16034_v0  ;;  %1612 = vmatprep.mubr.bf16.mxu1 %v15287_v49 }
 0x16f   : > { %v10692_v50 = vpack.c.bf16 %v13505_v47, %v13504_v48  ;;  %v10695_v54 = vpack.c.bf16 %v13510_v51, %v13509_v52  ;;  %v1420_v51 = vld [vmem:[%s20030_s21 + $0x8] sm:$0xff]  ;;  %v1419_v52 = vld [vmem:[%s20030_s21] sm:$0xff] }
 0x171   : > { %10684 = vmatpush1.bf16.msk.msra.mxu0 %vm16480_vm8, %v10683_v35 }
 0x172   : > { %1030 = vmatprep.subr.bf16.mxu0 %v16034_v0 }
 0x175   : > { %1031 = vmatpush1.bf16.msra.mxu0 %v866_v4 }
 0x176   : > { %1032 = vmatprep.subr.bf16.mxu0 %v16034_v0 }
 0x179   : > { %10687 = vmatpush1.bf16.msk.msra.mxu0 %vm16491_vm10, %v10686_v42 }
 0x17a   : > { %1034 = vmatprep.subr.bf16.mxu0 %v16034_v0 }
 0x17d   : > { %10690 = vmatpush1.bf16.msk.msra.mxu0 %vm16499_vm12, %v10689_v46  ;;  %v936_v63 = vpop.permute.xlu0 %935  ;;  %v941_v1 = vpop.permute.xlu1 %940 }
 0x17e   : > { %1036 = vmatprep.subr.bf16.mxu0 %v16034_v0 }
 0x181   : > { %10693 = vmatpush1.bf16.msk.msra.mxu0 %vm16514_vm14, %v10692_v50  ;;  %v946_v10 = vpop.permute.xlu1 %945  ;;  %v951_v14 = vpop.permute.xlu0 %950  ;;  %v15302_v50 = vld [vmem:[#allocation8 + $0x10] ss:$20 sps:$4 sm:$0xff]  }
 0x182   : > { %1038 = vmatprep.subr.bf16.mxu0 %v16034_v0 }
 0x185   : > { %10696 = vmatpush1.bf16.msk.msra.mxu0 %vm16521_vm1, %v10695_v54  ;;  %v956_v24 = vpop.permute.xlu1 %955  ;;  %v961_v28 = vpop.permute.xlu0 %960  ;;  %v1422_v54 = vld [vmem:[%s20030_s21 + $0x18] sm:$0xff] }
 0x188   : > { %1055 = vmatmul.mubr.bf16.vlgmr.msra.gmra.mrb[0].mxu0 %v15273_v56  ;;  %v1421_v56 = vld [vmem:[%s20030_s21 + $0x10] sm:$0xff] }
 0x189   : > { %10290 = vmatprep.mubr.msk.bf16.mxu0 %vm1009_vm0, %v15276_v57  ;;  %v966_v36 = vpop.permute.xlu1 %965  ;;  %v971_v42 = vpop.permute.xlu0 %970  ;;  %v1424_v57 = vld [vmem:[%s20030_s21 + $0x28] sm:$0xff] }
 0x190   : > { %1063 = vmatmul.mubr.bf16.gmra.mrb[4].mxu0 %v15278_v58  ;;  %v1423_v58 = vld [vmem:[%s20030_s21 + $0x20] sm:$0xff] }
 0x191   : > { %10291 = vmatprep.mubr.msk.bf16.mxu0 %vm1009_vm0, %v15279_v59  ;;  %v1426_v59 = vld [vmem:[%s20030_s21 + $0x38] sm:$0xff] }
 0x198   : > { %1071 = vmatmul.mubr.bf16.gmra.mrb[8].mxu0 %v15281_v60  ;;  %v1425_v60 = vld [vmem:[%s20030_s21 + $0x30] sm:$0xff]  ;;  %s20046_s21 = sld [smem:[#allocation42_spill]] }
 0x199   : > { %10292 = vmatprep.mubr.msk.bf16.mxu0 %vm1009_vm0, %v15282_v61  ;;  %vm1567_vm0 = vcmask 523264  }
 0x1a0   : > { %1079 = vmatmul.mubr.bf16.gmra.mrb[12].mxu0 %v15284_v62 }
 0x1a1   : > { %13090 = vmatprep.mubr.msk.bf16.mxu0 %vm1567_vm0, %v15302_v50 }
 0x25b   : > { %v1056_v0 = vpop.f32.mrb[0].mxu0 }
 0x25c   : > { %v1057_v2 = vadd.f32 %v1056_v0, %v936_v63  ;;  %v1058_v3 = vpop.f32.mrb[1].mxu0 }
 0x25d   : > { %v1059_v4 = vpop.f32.mrb[2].mxu0 }
 0x25e   : > { %v1060_v5 = vadd.f32 %v1059_v4, %v941_v1  ;;  %v1061_v6 = vpop.f32.mrb[3].mxu0  ;;  %v16531_v7 = vmax.f32 %v1057_v2, 0.0 }
 0x260   : > { %v16533_v8 = vmax.f32 %v1060_v5, 0.0 }
 0x262   : > { %v16537_v9 = vpack.i.bf16 %v16533_v8, %v16531_v7 }
 0x263   : > { %v1064_v11 = vpop.f32.mrb[4].mxu0 }
 0x264   : > { %v1065_v12 = vadd.f32 %v1064_v11, %v946_v10  ;;  %v1066_v13 = vpop.f32.mrb[5].mxu0  ;;  %13519 = vrot.lane.b32.xlu0 %v16537_v9, %s19950_s26  ;;  %13514 = vrot.lane.b32.xlu1 %v16537_v9, %s19948_s6 }
 0x265   : > { %v1067_v15 = vpop.f32.mrb[6].mxu0 }
 0x266   : > { %v1068_v18 = vadd.f32 %v1067_v15, %v951_v14  ;;  %v1069_v19 = vpop.f32.mrb[7].mxu0  ;;  %v16543_v20 = vmax.f32 %v1065_v12, 0.0 }
 0x268   : > { %v16545_v21 = vmax.f32 %v1068_v18, 0.0 }
 0x26a   : > { %v13528_v23 = vpack.i.bf16 %v16545_v21, %v16543_v20 }
 0x26b   : > { %v1072_v25 = vpop.f32.mrb[8].mxu0 }
 0x26c   : > { %v1073_v26 = vadd.f32 %v1072_v25, %v956_v24  ;;  %v1074_v27 = vpop.f32.mrb[9].mxu0  ;;  %13529 = vrot.lane.b32.xlu0 %v13528_v23, %s19950_s26  ;;  %13524 = vrot.lane.b32.xlu1 %v13528_v23, %s19948_s6 }
 0x26d   : > { %v1075_v29 = vpop.f32.mrb[10].mxu0 }
 0x26e   : > { %v1076_v31 = vadd.f32 %v1075_v29, %v961_v28  ;;  %v1077_v32 = vpop.f32.mrb[11].mxu0  ;;  %v16551_v33 = vmax.f32 %v1073_v26, 0.0 }
 0x270   : > { %v16553_v34 = vmax.f32 %v1076_v31, 0.0 }
 0x272   : > { %v13538_v35 = vpack.i.bf16 %v16553_v34, %v16551_v33 }
 0x273   : > { %v1080_v38 = vpop.f32.mrb[12].mxu0 }
 0x274   : > { %v1081_v39 = vadd.f32 %v1080_v38, %v966_v36  ;;  %v1082_v40 = vpop.f32.mrb[13].mxu0  ;;  %13539 = vrot.lane.b32.xlu0 %v13538_v35, %s19950_s26  ;;  %13534 = vrot.lane.b32.xlu1 %v13538_v35, %s19948_s6 }
 0x275   : > { %v1083_v43 = vpop.f32.mrb[14].mxu0 }
 0x276   : > { %v1084_v44 = vadd.f32 %v1083_v43, %v971_v42  ;;  %v1085_v45 = vpop.f32.mrb[15].mxu0  ;;  %v16559_v46 = vmax.f32 %v1081_v39, 0.0 }
 0x278   : > { %v16561_v47 = vmax.f32 %v1084_v44, 0.0 }
 0x27a   : > { %v13553_v48 = vpack.i.bf16 %v16561_v47, %v16559_v46 }
 0x27c   : > { %13554 = vrot.lane.b32.xlu0 %v13553_v48, %s19950_s26  ;;  %13544 = vrot.lane.b32.xlu1 %v13553_v48, %s19948_s6  ;;  %s20033_s26 = smov 3   ;;  %s20039_s6 = smov %s20038_s4 }
 0x280   : > { %13559 = vrot.lane.b32.xlu0 %v16537_v9, %s19946_s1  ;;  %13549 = vrot.lane.b32.xlu1 %v16537_v9, %s20025_s15 }
 0x284   : > { %13569 = vrot.lane.b32.xlu0 %v13528_v23, %s19946_s1  ;;  %13564 = vrot.lane.b32.xlu1 %v13528_v23, %s20025_s15 }
 0x288   : > { %13579 = vrot.lane.b32.xlu0 %v13538_v35, %s19946_s1  ;;  %13574 = vrot.lane.b32.xlu1 %v13538_v35, %s20025_s15 }
 0x28c   : > { %13589 = vrot.lane.b32.xlu0 %v13553_v48, %s19946_s1  ;;  %13584 = vrot.lane.b32.xlu1 %v13553_v48, %s20025_s15 }
 0x290   : > { %13599 = vrot.lane.b32.xlu0 %v13528_v23, %s20026_s18  ;;  %13594 = vrot.lane.b32.xlu1 %v16537_v9, %s20026_s18 }
 0x294   : > { %13609 = vrot.lane.b32.xlu0 %v13553_v48, %s20026_s18  ;;  %13604 = vrot.lane.b32.xlu1 %v13538_v35, %s20026_s18 }
 0x298   : > { %13619 = vrot.lane.b32.xlu0 %v16537_v9, %s20027_s29  ;;  %13614 = vrot.lane.b32.xlu1 %v16537_v9, %s20028_s28 }
 0x29c   : > { %13629 = vrot.lane.b32.xlu0 %v13528_v23, %s20027_s29  ;;  %13624 = vrot.lane.b32.xlu1 %v13528_v23, %s20028_s28 }
 0x2a0   : > { %13639 = vrot.lane.b32.xlu0 %v13538_v35, %s20027_s29  ;;  %13634 = vrot.lane.b32.xlu1 %v13538_v35, %s20028_s28 }
 0x2a4   : > { %13649 = vrot.lane.b32.xlu0 %v13553_v48, %s20027_s29  ;;  %13644 = vrot.lane.b32.xlu1 %v13553_v48, %s20028_s28 }
 0x2a8   : > { %13659 = vrot.lane.b32.xlu0 %v13528_v23, %s20029_s0  ;;  %13654 = vrot.lane.b32.xlu1 %v16537_v9, %s20029_s0 }
 0x2ac   : > { %13669 = vrot.lane.b32.xlu0 %v13553_v48, %s20029_s0  ;;  %13664 = vrot.lane.b32.xlu1 %v13538_v35, %s20029_s0 }
 0x2b0   : > { %1434 = vperm.xlu0 %13511, %v1420_v51   ;;  %1429 = vperm.xlu1 %13512, %v1419_v52  }
 0x2b4   : > { %1444 = vperm.xlu0 %13511, %v1422_v54   ;;  %1439 = vperm.xlu1 %13512, %v1421_v56  }
 0x2b8   : > { %1454 = vperm.xlu0 %13511, %v1424_v57   ;;  %1449 = vperm.xlu1 %13512, %v1423_v58  }
 0x2bc   : > { %1464 = vperm.xlu0 %13511, %v1426_v59   ;;  %1459 = vperm.xlu1 %13512, %v1425_v60  }
 0x2d6   : > { %v13520_v61 = vpop.permute.xlu0 %13519  ;;  %v13515_v62 = vpop.permute.xlu1 %13514 }
 0x2d7   : > { %v13522_v63 = vunpack.i.h.bf16 %v13520_v61  ;;  %v13521_v0 = vunpack.i.l.bf16 %v13520_v61  ;;  %v13517_v1 = vunpack.i.h.bf16 %v13515_v62  ;;  %v13516_v2 = vunpack.i.l.bf16 %v13515_v62 }
 0x2d9   : > { %v10722_v3 = vpack.c.bf16 %v13517_v1, %v13516_v2  ;;  %v10698_v4 = vpack.c.bf16 %v13522_v63, %v13521_v0 }
 0x2db   : > { %11753 = vmatprep.subr.msk.bf16.mxu1 %vm16472_vm6, %v10722_v3 }
 0x2dc   : > { %11754 = vmatpush3.bf16.msk.msra.mxu1 %vm16462_vm2, %v10698_v4 }
 0x2de   : > { %v13530_v5 = vpop.permute.xlu0 %13529  ;;  %v13525_v6 = vpop.permute.xlu1 %13524 }
 0x2df   : > { %v13532_v9 = vunpack.i.h.bf16 %v13530_v5  ;;  %v13531_v10 = vunpack.i.l.bf16 %v13530_v5  ;;  %v13527_v11 = vunpack.i.h.bf16 %v13525_v6  ;;  %v13526_v12 = vunpack.i.l.bf16 %v13525_v6 }
 0x2e1   : > { %v10701_v13 = vpack.c.bf16 %v13532_v9, %v13531_v10  ;;  %v10725_v14 = vpack.c.bf16 %v13527_v11, %v13526_v12 }
 0x2e3   : > { %11755 = vmatprep.subr.msk.bf16.mxu1 %vm16472_vm6, %v10725_v14 }
 0x2e4   : > { %11756 = vmatpush3.bf16.msk.msra.mxu1 %vm16462_vm2, %v10701_v13 }
 0x2e6   : > { %v13540_v15 = vpop.permute.xlu0 %13539  ;;  %v13535_v18 = vpop.permute.xlu1 %13534 }
 0x2e7   : > { %v13542_v19 = vunpack.i.h.bf16 %v13540_v15  ;;  %v13541_v23 = vunpack.i.l.bf16 %v13540_v15  ;;  %v13537_v24 = vunpack.i.h.bf16 %v13535_v18  ;;  %v13536_v25 = vunpack.i.l.bf16 %v13535_v18 }
 0x2e9   : > { %v10704_v26 = vpack.c.bf16 %v13542_v19, %v13541_v23  ;;  %v10728_v27 = vpack.c.bf16 %v13537_v24, %v13536_v25 }
 0x2eb   : > { %11757 = vmatprep.subr.msk.bf16.mxu1 %vm16472_vm6, %v10728_v27  ;;  %v15288_v27 = vld [vmem:[#allocation8 + $0x2c] ss:$20 sps:$4 sm:$0xff]  }
 0x2ec   : > { %11758 = vmatpush3.bf16.msk.msra.mxu1 %vm16462_vm2, %v10704_v26  ;;  %v15285_v26 = vld [vmem:[#allocation8] ss:$20 sps:$4 sm:$0xff]  }
 0x2ee   : > { %v13555_v28 = vpop.permute.xlu0 %13554  ;;  %v13545_v29 = vpop.permute.xlu1 %13544 }
 0x2ef   : > { %v13557_v31 = vunpack.i.h.bf16 %v13555_v28  ;;  %v13556_v32 = vunpack.i.l.bf16 %v13555_v28  ;;  %v13547_v35 = vunpack.i.h.bf16 %v13545_v29  ;;  %v13546_v36 = vunpack.i.l.bf16 %v13545_v29 }
 0x2f1   : > { %v10707_v38 = vpack.c.bf16 %v13557_v31, %v13556_v32  ;;  %v10731_v39 = vpack.c.bf16 %v13547_v35, %v13546_v36  ;;  %v1223_v32 = vpack.c.bf16 %v16533_v8, %v16531_v7 }
 0x2f2   : > { %v13560_v40 = vpop.permute.xlu0 %13559  ;;  %v13550_v42 = vpop.permute.xlu1 %13549 }
 0x2f3   : > { %v13562_v43 = vunpack.i.h.bf16 %v13560_v40  ;;  %v13561_v44 = vunpack.i.l.bf16 %v13560_v40  ;;  %v13552_v45 = vunpack.i.h.bf16 %v13550_v42  ;;  %v13551_v48 = vunpack.i.l.bf16 %v13550_v42  ;;  %11759 = vmatprep.subr.msk.bf16.mxu1 %vm16472_vm6, %v10731_v39 }
 0x2f4   : > { %11760 = vmatpush3.bf16.msk.msra.mxu1 %vm16462_vm2, %v10707_v38  ;;  %v1224_v42 = vpack.c.bf16 %v16545_v21, %v16543_v20 }
 0x2f5   : > { %v10710_v49 = vpack.c.bf16 %v13562_v43, %v13561_v44  ;;  %v10734_v50 = vpack.c.bf16 %v13552_v45, %v13551_v48  ;;  %v15290_v48 = vld [vmem:[#allocation8 + $0x28] ss:$20 sps:$4 sm:$0xff]  }
 0x2f6   : > { %v13570_v51 = vpop.permute.xlu0 %13569  ;;  %v13565_v52 = vpop.permute.xlu1 %13564 }
 0x2f7   : > { %v13572_v54 = vunpack.i.h.bf16 %v13570_v51  ;;  %v13571_v56 = vunpack.i.l.bf16 %v13570_v51  ;;  %v13567_v57 = vunpack.i.h.bf16 %v13565_v52  ;;  %v13566_v58 = vunpack.i.l.bf16 %v13565_v52  ;;  %11761 = vmatprep.subr.msk.bf16.mxu1 %vm16480_vm8, %v10734_v50 }
 0x2f8   : > { %11762 = vmatpush3.bf16.msk.msra.mxu1 %vm16467_vm4, %v10710_v49  ;;  %v15291_v49 = vld [vmem:[#allocation8 + $0x54] ss:$20 sps:$4 sm:$0xff]   ;;  %v1225_v52 = vpack.c.bf16 %v16553_v34, %v16551_v33 }
 0x2f9   : > { %v10713_v59 = vpack.c.bf16 %v13572_v54, %v13571_v56  ;;  %v10737_v60 = vpack.c.bf16 %v13567_v57, %v13566_v58 }
 0x2fa   : > { %v13580_v61 = vpop.permute.xlu0 %13579  ;;  %v13575_v62 = vpop.permute.xlu1 %13574 }
 0x2fb   : > { %v13582_v63 = vunpack.i.h.bf16 %v13580_v61  ;;  %v13581_v0 = vunpack.i.l.bf16 %v13580_v61  ;;  %v13577_v1 = vunpack.i.h.bf16 %v13575_v62  ;;  %v13576_v2 = vunpack.i.l.bf16 %v13575_v62  ;;  %11763 = vmatprep.subr.msk.bf16.mxu1 %vm16480_vm8, %v10737_v60 }
 0x2fc   : > { %11764 = vmatpush3.bf16.msk.msra.mxu1 %vm16467_vm4, %v10713_v59  ;;  %v1226_v62 = vpack.c.bf16 %v16561_v47, %v16559_v46 }
 0x2fd   : > { %v10716_v3 = vpack.c.bf16 %v13582_v63, %v13581_v0  ;;  %v10740_v4 = vpack.c.bf16 %v13577_v1, %v13576_v2  ;;  %v15293_v2 = vld [vmem:[#allocation8 + $0x50] ss:$20 sps:$4 sm:$0xff]  }
 0x2fe   : > { %v13590_v5 = vpop.permute.xlu0 %13589  ;;  %v13585_v6 = vpop.permute.xlu1 %13584 }
 0x2ff   : > { %v13592_v9 = vunpack.i.h.bf16 %v13590_v5  ;;  %v13591_v10 = vunpack.i.l.bf16 %v13590_v5  ;;  %v13587_v11 = vunpack.i.h.bf16 %v13585_v6  ;;  %v13586_v12 = vunpack.i.l.bf16 %v13585_v6  ;;  %11765 = vmatprep.subr.msk.bf16.mxu1 %vm16480_vm8, %v10740_v4 }
 0x300   : > { %11766 = vmatpush3.bf16.msk.msra.mxu1 %vm16467_vm4, %v10716_v3  ;;  %v15294_v3 = vld [vmem:[#allocation8 + $0x7c] ss:$20 sps:$4 sm:$0xff]  }
 0x301   : > { %v10719_v13 = vpack.c.bf16 %v13592_v9, %v13591_v10  ;;  %v10743_v14 = vpack.c.bf16 %v13587_v11, %v13586_v12 }
 0x302   : > { %v13600_v15 = vpop.permute.xlu0 %13599  ;;  %v13595_v18 = vpop.permute.xlu1 %13594 }
 0x303   : > { %v13602_v19 = vunpack.i.h.bf16 %v13600_v15  ;;  %v13601_v23 = vunpack.i.l.bf16 %v13600_v15  ;;  %v13597_v24 = vunpack.i.h.bf16 %v13595_v18  ;;  %v13596_v25 = vunpack.i.l.bf16 %v13595_v18  ;;  %11767 = vmatprep.subr.msk.bf16.mxu1 %vm16480_vm8, %v10743_v14 }
 0x304   : > { %11768 = vmatpush3.bf16.msk.msra.mxu1 %vm16467_vm4, %v10719_v13 }
 0x305   : > { %v10758_v28 = vpack.c.bf16 %v13597_v24, %v13596_v25  ;;  %v10761_v35 = vpack.c.bf16 %v13602_v19, %v13601_v23 }
 0x306   : > { %v13610_v29 = vpop.permute.xlu0 %13609  ;;  %v13605_v31 = vpop.permute.xlu1 %13604 }
 0x307   : > { %v13607_v36 = vunpack.i.h.bf16 %v13605_v31  ;;  %v13606_v38 = vunpack.i.l.bf16 %v13605_v31  ;;  %1613 = vmatmul.mubr.bf16.vlgmr.msra.gmra.mrb[0].mxu1 %v15285_v26  ;;  %11793 = vmatprep.subr.msk.bf16.mxu1 %vm16499_vm12, %v10758_v28  ;;  %v13612_v43 = vunpack.i.h.bf16 %v13610_v29  ;;  %v13611_v44 = vunpack.i.l.bf16 %v13610_v29 }
 0x308   : > { %11794 = vmatpush3.bf16.msra.mxu1 %v1223_v32  ;;  %1620 = vmatprep.mubr.bf16.mxu1 %v15288_v27  ;;  %v15296_v32 = vld [vmem:[#allocation8 + $0x78] ss:$20 sps:$4 sm:$0xff]  }
 0x309   : > { %11795 = vmatprep.subr.msk.bf16.mxu1 %vm16499_vm12, %v10761_v35  ;;  %v10764_v45 = vpack.c.bf16 %v13607_v36, %v13606_v38  ;;  %v10767_v54 = vpack.c.bf16 %v13612_v43, %v13611_v44 }
 0x30a   : > { %v13620_v39 = vpop.permute.xlu0 %13619  ;;  %v13615_v40 = vpop.permute.xlu1 %13614 }
 0x30b   : > { %v13617_v56 = vunpack.i.h.bf16 %v13615_v40  ;;  %v13616_v57 = vunpack.i.l.bf16 %v13615_v40  ;;  %v13622_v58 = vunpack.i.h.bf16 %v13620_v39  ;;  %v13621_v59 = vunpack.i.l.bf16 %v13620_v39 }
 0x30c   : > { %11796 = vmatpush3.bf16.msra.mxu1 %v1224_v42  ;;  %v15299_v42 = vld [vmem:[#allocation8 + $0xc] ss:$20 sps:$4 sm:$0xff]  }
 0x30d   : > { %11797 = vmatprep.subr.msk.bf16.mxu1 %vm16499_vm12, %v10764_v45  ;;  %v10770_v63 = vpack.c.bf16 %v13617_v56, %v13616_v57  ;;  %v10746_v6 = vpack.c.bf16 %v13622_v58, %v13621_v59  ;;  %v15297_v56 = vld [vmem:[#allocation8 + $0x8] ss:$20 sps:$4 sm:$0xff]   ;;  %v15303_v59 = vld [vmem:[#allocation8 + $0x30] ss:$20 sps:$4 sm:$0xff]  }
 0x30e   : > { %v13630_v50 = vpop.permute.xlu0 %13629  ;;  %v13625_v51 = vpop.permute.xlu1 %13624  ;;  %v15300_v57 = vld [vmem:[#allocation8 + $0x34] ss:$20 sps:$4 sm:$0xff]  }
 0x30f   : > { %1621 = vmatmul.mubr.bf16.gmra.mrb[4].mxu1 %v15290_v48  ;;  %v13627_v0 = vunpack.i.h.bf16 %v13625_v51  ;;  %v13626_v1 = vunpack.i.l.bf16 %v13625_v51  ;;  %v13632_v4 = vunpack.i.h.bf16 %v13630_v50  ;;  %v13631_v5 = vunpack.i.l.bf16 %v13630_v50 }
 0x310   : > { %11798 = vmatpush3.bf16.msra.mxu1 %v1225_v52  ;;  %1628 = vmatprep.mubr.bf16.mxu1 %v15291_v49 }
 0x311   : > { %11799 = vmatprep.subr.msk.bf16.mxu1 %vm16499_vm12, %v10767_v54  ;;  %v10773_v13 = vpack.c.bf16 %v13627_v0, %v13626_v1  ;;  %v10749_v14 = vpack.c.bf16 %v13632_v4, %v13631_v5  ;;  %v15309_v0 = vld [vmem:[#allocation8 + $0x88] ss:$20 sps:$4 sm:$0xff]   ;;  %v15310_v1 = vld [vmem:[#allocation8 + $0x84] ss:$20 sps:$4 sm:$0xff]  }
 0x312   : > { %v13640_v60 = vpop.permute.xlu0 %13639  ;;  %v13635_v61 = vpop.permute.xlu1 %13634 }
 0x313   : > { %v13637_v9 = vunpack.i.h.bf16 %v13635_v61  ;;  %v13636_v10 = vunpack.i.l.bf16 %v13635_v61  ;;  %v13642_v15 = vunpack.i.h.bf16 %v13640_v60  ;;  %v13641_v18 = vunpack.i.l.bf16 %v13640_v60  ;;  %v15304_v60 = vld [vmem:[#allocation8 + $0x38] ss:$20 sps:$4 sm:$0xff]   ;;  %v15305_v61 = vld [vmem:[#allocation8 + $0x5c] ss:$20 sps:$4 sm:$0xff]  }
 0x314   : > { %11800 = vmatpush3.bf16.msra.mxu1 %v1226_v62  ;;  %v15308_v62 = vld [vmem:[#allocation8 + $0x60] ss:$20 sps:$4 sm:$0xff]  }
 0x315   : > { %11801 = vmatprep.subr.msk.bf16.mxu1 %vm16514_vm14, %v10770_v63  ;;  %v10776_v19 = vpack.c.bf16 %v13637_v9, %v13636_v10  ;;  %v10752_v36 = vpack.c.bf16 %v13642_v15, %v13641_v18  ;;  %v15307_v63 = vld [vmem:[#allocation8 + $0x58] ss:$20 sps:$4 sm:$0xff]  }
 0x316   : > { %v13650_v11 = vpop.permute.xlu0 %13649  ;;  %v13645_v12 = vpop.permute.xlu1 %13644 }
 0x317   : > { %1629 = vmatmul.mubr.bf16.gmra.mrb[8].mxu1 %v15293_v2  ;;  %v13647_v23 = vunpack.i.h.bf16 %v13645_v12  ;;  %v13646_v24 = vunpack.i.l.bf16 %v13645_v12  ;;  %v13652_v38 = vunpack.i.h.bf16 %v13650_v11  ;;  %v13651_v39 = vunpack.i.l.bf16 %v13650_v11  ;;  %v15312_v2 = vld [vmem:[#allocation8 + $0x80] ss:$20 sps:$4 sm:$0xff]  }
 0x318   : > { %11802 = vmatpush3.bf16.msk.msra.mxu1 %vm16491_vm10, %v10746_v6  ;;  %1636 = vmatprep.mubr.bf16.mxu1 %v15294_v3 }
 0x319   : > { %11803 = vmatprep.subr.msk.bf16.mxu1 %vm16514_vm14, %v10773_v13  ;;  %v10779_v43 = vpack.c.bf16 %v13647_v23, %v13646_v24  ;;  %v10755_v50 = vpack.c.bf16 %v13652_v38, %v13651_v39 }
 0x31a   : > { %v13660_v25 = vpop.permute.xlu0 %13659  ;;  %v13655_v26 = vpop.permute.xlu1 %13654 }
 0x31b   : > { %v13662_v27 = vunpack.i.h.bf16 %v13660_v25  ;;  %v13661_v28 = vunpack.i.l.bf16 %v13660_v25  ;;  %v13657_v29 = vunpack.i.h.bf16 %v13655_v26  ;;  %v13656_v31 = vunpack.i.l.bf16 %v13655_v26 }
 0x31c   : > { %11804 = vmatpush3.bf16.msk.msra.mxu1 %vm16491_vm10, %v10749_v14 }
 0x31d   : > { %v10782_v35 = vpack.c.bf16 %v13657_v29, %v13656_v31  ;;  %11805 = vmatprep.subr.msk.bf16.mxu1 %vm16514_vm14, %v10776_v19  ;;  %v10785_v44 = vpack.c.bf16 %v13662_v27, %v13661_v28 }
 0x31e   : > { %v13665_v40 = vpop.permute.xlu1 %13664  ;;  %v13670_v49 = vpop.permute.xlu0 %13669 }
 0x31f   : > { %v13667_v45 = vunpack.i.h.bf16 %v13665_v40  ;;  %v13666_v48 = vunpack.i.l.bf16 %v13665_v40  ;;  %1637 = vmatmul.mubr.bf16.gmra.mrb[12].mxu1 %v15296_v32  ;;  %13082 = vmatprep.subr.msk.bf16.mxu0 %vm16521_vm1, %v10782_v35  ;;  %v13672_v51 = vunpack.i.h.bf16 %v13670_v49  ;;  %v13671_v52 = vunpack.i.l.bf16 %v13670_v49 }
 0x320   : > { %11806 = vmatpush3.bf16.msk.msra.mxu1 %vm16491_vm10, %v10752_v36  ;;  %13083 = vmatpush3.bf16.msk.msra.mxu0 %vm16521_vm1, %v10782_v35 }
 0x321   : > { %11807 = vmatprep.subr.msk.bf16.mxu1 %vm16514_vm14, %v10779_v43  ;;  %13084 = vmatprep.subr.msk.bf16.mxu0 %vm16521_vm1, %v10785_v44  ;;  %v10788_v54 = vpack.c.bf16 %v13667_v45, %v13666_v48  ;;  %v10791_v58 = vpack.c.bf16 %v13672_v51, %v13671_v52 }
 0x322   : > { %1677 = vmatprep.mubr.bf16.mxu1 %v15299_v42 }
 0x324   : > { %11808 = vmatpush3.bf16.msk.msra.mxu1 %vm16491_vm10, %v10755_v50  ;;  %13085 = vmatpush3.bf16.msk.msra.mxu0 %vm16521_vm1, %v10785_v44 }
 0x325   : > { %13086 = vmatprep.subr.msk.bf16.mxu0 %vm16521_vm1, %v10788_v54 }
 0x327   : > { %1678 = vmatmul.mubr.bf16.vlgmr.msra.gmra.mrb[16].mxu1 %v15297_v56 }
 0x328   : > { %13087 = vmatpush3.bf16.msk.msra.mxu0 %vm16521_vm1, %v10788_v54  ;;  %1685 = vmatprep.mubr.bf16.mxu1 %v15300_v57 }
 0x329   : > { %13088 = vmatprep.subr.msk.bf16.mxu0 %vm16521_vm1, %v10791_v58 }
 0x32c   : > { %13089 = vmatpush3.bf16.msk.msra.mxu0 %vm16521_vm1, %v10791_v58 }
 0x32f   : > { %1686 = vmatmul.mubr.bf16.gmra.mrb[20].mxu1 %v15303_v59  ;;  %13091 = vmatmul.mubr.msk.bf16.vlgmr.msra.gmra.mrb[16].mxu0 %vm1567_vm0, %v15304_v60  ;;  %v1435_v38 = vpop.permute.xlu0 %1434  ;;  %v1430_v40 = vpop.permute.xlu1 %1429 }
 0x330   : > { %1693 = vmatprep.mubr.bf16.mxu1 %v15305_v61  ;;  %13094 = vmatprep.mubr.msk.bf16.mxu0 %vm1567_vm0, %v15308_v62 }
 0x333   : > { %v1445_v54 = vpop.permute.xlu0 %1444  ;;  %v1440_v56 = vpop.permute.xlu1 %1439 }
 0x337   : > { %1694 = vmatmul.mubr.bf16.gmra.mrb[24].mxu1 %v15307_v63  ;;  %13095 = vmatmul.mubr.msk.bf16.gmra.mrb[20].mxu0 %vm1567_vm0, %v15309_v0 }
 0x338   : > { %1701 = vmatprep.mubr.bf16.mxu1 %v15310_v1 }
 0x33f   : > { %1702 = vmatmul.mubr.bf16.gmra.mrb[28].mxu1 %v15312_v2 }
 0x3da   : > { %v11769_v3 = vpop.f32.mrb[0].mxu1 }
 0x3db   : > { %v11770_v4 = vpop.f32.mrb[1].mxu1 }
 0x3dc   : > { %v11771_v5 = vadd.f32 %v11770_v4, %v11769_v3  ;;  %v11772_v6 = vpop.f32.mrb[2].mxu1 }
 0x3dd   : > { %v11773_v9 = vpop.f32.mrb[3].mxu1 }
 0x3de   : > { %v11774_v10 = vadd.f32 %v11773_v9, %v11772_v6  ;;  %v1615_v43 = vadd.f32 %v11771_v5, %v1430_v40 }
 0x3e0   : > { %v1618_v49 = vadd.f32 %v11774_v10, %v1435_v38  ;;  %v1450_v10 = vpop.permute.xlu1 %1449 }
 0x3e2   : > { %v11775_v11 = vpop.f32.mrb[4].mxu1 }
 0x3e3   : > { %v11776_v12 = vpop.f32.mrb[5].mxu1 }
 0x3e4   : > { %v11777_v13 = vadd.f32 %v11776_v12, %v11775_v11  ;;  %v11778_v14 = vpop.f32.mrb[6].mxu1 }
 0x3e5   : > { %v11779_v15 = vpop.f32.mrb[7].mxu1 }
 0x3e6   : > { %v11780_v18 = vadd.f32 %v11779_v15, %v11778_v14  ;;  %v1623_v61 = vadd.f32 %v11777_v13, %v1440_v56 }
 0x3e8   : > { %v1626_v4 = vadd.f32 %v11780_v18, %v1445_v54 }
 0x3ea   : > { %v11781_v19 = vpop.f32.mrb[8].mxu1 }
 0x3eb   : > { %v11782_v23 = vpop.f32.mrb[9].mxu1 }
 0x3ec   : > { %v11783_v24 = vadd.f32 %v11782_v23, %v11781_v19  ;;  %v11784_v25 = vpop.f32.mrb[10].mxu1  ;;  %v1455_v19 = vpop.permute.xlu0 %1454 }
 0x3ed   : > { %v11785_v26 = vpop.f32.mrb[11].mxu1 }
 0x3ee   : > { %v11786_v27 = vadd.f32 %v11785_v26, %v11784_v25  ;;  %v1631_v23 = vadd.f32 %v11783_v24, %v1450_v10 }
 0x3f2   : > { %v11787_v28 = vpop.f32.mrb[12].mxu1 }
 0x3f3   : > { %v11788_v29 = vpop.f32.mrb[13].mxu1 }
 0x3f4   : > { %v16705_v31 = vadd.f32 %v11788_v29, %v11787_v28  ;;  %v11790_v32 = vpop.f32.mrb[14].mxu1 }
 0x3f5   : > { %v11791_v35 = vpop.f32.mrb[15].mxu1 }
 0x3f6   : > { %v16707_v36 = vadd.f32 %v11791_v35, %v11790_v32 }
 0x3fa   : > { %v11809_v39 = vpop.f32.mrb[16].mxu1 }
 0x3fb   : > { %v11810_v42 = vpop.f32.mrb[17].mxu1 }
 0x3fc   : > { %v11811_v44 = vadd.f32 %v11810_v42, %v11809_v39  ;;  %v11812_v45 = vpop.f32.mrb[18].mxu1  ;;  %v1634_v42 = vadd.f32 %v11786_v27, %v1455_v19  ;;  %v1460_v27 = vpop.permute.xlu1 %1459  ;;  %v2108_v19 = vld [vmem:[%s20034_s17 + $0x8] sm:$0xff] }
 0x3fd   : > { %v11813_v48 = vpop.f32.mrb[19].mxu1 }
 0x3fe   : > { %v11814_v50 = vadd.f32 %v11813_v48, %v11812_v45  ;;  %v1680_v51 = vadd.f32 %v11811_v44, %v1615_v43 }
 0x400   : > { %v1683_v52 = vadd.f32 %v11814_v50, %v1618_v49 }
 0x402   : > { %v11815_v57 = vpop.f32.mrb[20].mxu1  ;;  %v13092_v58 = vpop.f32.mrb[16].mxu0 }
 0x403   : > { %v11816_v59 = vpop.f32.mrb[21].mxu1  ;;  %v1744_v60 = vpop.f32.mrb[17].mxu0 }
 0x404   : > { %v11817_v62 = vadd.f32 %v11816_v59, %v11815_v57  ;;  %v1745_v63 = vadd.f32 %v1744_v60, %v1680_v51  ;;  %v11818_v0 = vpop.f32.mrb[22].mxu1  ;;  %v13093_v1 = vpop.f32.mrb[18].mxu0  ;;  %v1639_v59 = vadd.f32 %v16705_v31, %v1460_v27 }
 0x405   : > { %v11819_v2 = vpop.f32.mrb[23].mxu1  ;;  %v1747_v3 = vpop.f32.mrb[19].mxu0 }
 0x406   : > { %v1688_v5 = vadd.f32 %v11817_v62, %v1623_v61  ;;  %v11820_v6 = vadd.f32 %v11819_v2, %v11818_v0  ;;  %v1748_v9 = vadd.f32 %v1747_v3, %v1683_v52  ;;  %v1775_v12 = vmax.f32 %v1745_v63, 0.0 }
 0x408   : > { %v1753_v11 = vadd.f32 %v13092_v58, %v1688_v5  ;;  %v1691_v14 = vadd.f32 %v11820_v6, %v1626_v4  ;;  %v1776_v15 = vmax.f32 %v1748_v9, 0.0  ;;  %v1465_v58 = vpop.permute.xlu0 %1464 }
 0x409   : > { %v1642_v0 = vadd.f32 %v16707_v36, %v1465_v58 }
 0x40a   : > { %v1777_v25 = vmax.f32 %v1753_v11, 0.0  ;;  %v1756_v26 = vadd.f32 %v13093_v1, %v1691_v14  ;;  %v11821_v13 = vpop.f32.mrb[24].mxu1  ;;  %v16709_v28 = vpack.i.bf16 %v1776_v15, %v1775_v12  ;;  %v13096_v29 = vpop.f32.mrb[20].mxu0  ;;  %v16715_v44 = vpack.c.bf16 %v1776_v15, %v1775_v12  ;;  %v15315_v14 = vld [vmem:[#allocation9 + $0x4] ss:$20 sps:$4 sm:$0xff]  }
 0x40b   : > { %v11822_v32 = vpop.f32.mrb[25].mxu1  ;;  %v1760_v35 = vpop.f32.mrb[21].mxu0  ;;  %2299 = vmatprep.mubr.bf16.mxu1 %v15315_v14  ;;  %v15321_v15 = vld [vmem:[#allocation9 + $0xc] ss:$20 sps:$4 sm:$0xff]  }
 0x40c   : > { %v1778_v38 = vmax.f32 %v1756_v26, 0.0  ;;  %v11823_v18 = vadd.f32 %v11822_v32, %v11821_v13  ;;  %v11824_v39 = vpop.f32.mrb[26].mxu1  ;;  %13679 = vrot.lane.b32.xlu0 %v16709_v28, %s20031_s9  ;;  %13674 = vrot.lane.b32.xlu1 %v16709_v28, %s20032_s7  ;;  %v13097_v40 = vpop.f32.mrb[22].mxu0  ;;  %v2109_v26 = vld [vmem:[%s20034_s17 + $0x10] sm:$0xff]  ;;  %v2112_v13 = vld [vmem:[%s20034_s17 + $0x28] sm:$0xff] }
 0x40d   : > { %v11825_v24 = vpop.f32.mrb[27].mxu1  ;;  %v1763_v43 = vpop.f32.mrb[23].mxu0  ;;  %2364 = vmatprep.mubr.bf16.mxu0 %v15321_v15  ;;  %v2113_v32 = vld [vmem:[%s20034_s17 + $0x30] sm:$0xff] }
 0x40e   : > { %v11826_v45 = vadd.f32 %v11825_v24, %v11824_v39  ;;  %v1696_v48 = vadd.f32 %v11823_v18, %v1631_v23  ;;  %v13703_v49 = vpack.i.bf16 %v1778_v38, %v1777_v25  ;;  %v16721_v52 = vpack.c.bf16 %v1778_v38, %v1777_v25  ;;  %v2107_v23 = vld [vmem:[%s20034_s17] sm:$0xff]  ;;  %v2110_v25 = vld [vmem:[%s20034_s17 + $0x18] sm:$0xff] }
 0x410   : > { %v1761_v50 = vadd.f32 %v1760_v35, %v1696_v48  ;;  %13689 = vrot.lane.b32.xlu0 %v16709_v28, %s20026_s18  ;;  %13684 = vrot.lane.b32.xlu1 %v16709_v28, %s20025_s15  ;;  %v1699_v51 = vadd.f32 %v11826_v45, %v1634_v42 }
 0x412   : > { %v1764_v54 = vadd.f32 %v1763_v43, %v1699_v51  ;;  %v11827_v56 = vpop.f32.mrb[28].mxu1  ;;  %v1779_v60 = vmax.f32 %v1761_v50, 0.0 }
 0x413   : > { %v11828_v57 = vpop.f32.mrb[29].mxu1 }
 0x414   : > { %v1780_v61 = vmax.f32 %v1764_v54, 0.0  ;;  %v11829_v62 = vadd.f32 %v11828_v57, %v11827_v56  ;;  %v11830_v63 = vpop.f32.mrb[30].mxu1  ;;  %13704 = vrot.lane.b32.xlu0 %v13703_v49, %s20031_s9  ;;  %13694 = vrot.lane.b32.xlu1 %v16709_v28, %s20033_s26 }
 0x415   : > { %v11831_v1 = vpop.f32.mrb[31].mxu1 }
 0x416   : > { %v1704_v2 = vadd.f32 %v11829_v62, %v1639_v59  ;;  %v11832_v3 = vadd.f32 %v11831_v1, %v11830_v63  ;;  %v13718_v4 = vpack.i.bf16 %v1780_v61, %v1779_v60  ;;  %v16730_v31 = vpack.c.bf16 %v1780_v61, %v1779_v60 }
 0x418   : > { %v1769_v5 = vadd.f32 %v13096_v29, %v1704_v2  ;;  %v1707_v6 = vadd.f32 %v11832_v3, %v1642_v0  ;;  %13709 = vrot.lane.b32.xlu0 %v13703_v49, %s20025_s15  ;;  %13699 = vrot.lane.b32.xlu1 %v13703_v49, %s20032_s7  ;;  %v2114_v29 = vld [vmem:[%s20034_s17 + $0x38] sm:$0xff] }
 0x41a   : > { %v1772_v9 = vadd.f32 %v13097_v40, %v1707_v6  ;;  %v1781_v10 = vmax.f32 %v1769_v5, 0.0 }
 0x41c   : > { %v1782_v11 = vmax.f32 %v1772_v9, 0.0  ;;  %13719 = vrot.lane.b32.xlu0 %v13718_v4, %s20031_s9  ;;  %13714 = vrot.lane.b32.xlu1 %v13718_v4, %s20032_s7 }
 0x41e   : > { %v13733_v36 = vpack.i.bf16 %v1782_v11, %v1781_v10  ;;  %v16736_v12 = vpack.c.bf16 %v1782_v11, %v1781_v10 }
 0x420   : > { %13734 = vrot.lane.b32.xlu0 %v13733_v36, %s20031_s9  ;;  %13724 = vrot.lane.b32.xlu1 %v13733_v36, %s20032_s7 }
 0x424   : > { %13739 = vrot.lane.b32.xlu0 %v13703_v49, %s20033_s26  ;;  %13729 = vrot.lane.b32.xlu1 %v13703_v49, %s20026_s18 }
 0x428   : > { %13749 = vrot.lane.b32.xlu0 %v13718_v4, %s20026_s18  ;;  %13744 = vrot.lane.b32.xlu1 %v13718_v4, %s20025_s15 }
 0x42c   : > { %13759 = vrot.lane.b32.xlu0 %v13733_v36, %s20025_s15  ;;  %13754 = vrot.lane.b32.xlu1 %v13718_v4, %s20033_s26 }
 0x430   : > { %13774 = vrot.lane.b32.xlu0 %v13733_v36, %s20033_s26  ;;  %13764 = vrot.lane.b32.xlu1 %v13733_v36, %s20026_s18 }
 0x434   : > { %13779 = vrot.lane.b32.xlu0 %v16709_v28, %s20027_s29  ;;  %13769 = vrot.lane.b32.xlu1 %v16709_v28, %s20028_s28 }
 0x438   : > { %13789 = vrot.lane.b32.xlu0 %v13703_v49, %s20027_s29  ;;  %13784 = vrot.lane.b32.xlu1 %v13703_v49, %s20028_s28 }
 0x43c   : > { %13799 = vrot.lane.b32.xlu0 %v13718_v4, %s20027_s29  ;;  %13794 = vrot.lane.b32.xlu1 %v13718_v4, %s20028_s28 }
 0x440   : > { %13809 = vrot.lane.b32.xlu0 %v13733_v36, %s20027_s29  ;;  %13804 = vrot.lane.b32.xlu1 %v13733_v36, %s20028_s28 }
 0x444   : > { %13819 = vrot.lane.b32.xlu0 %v13703_v49, %s20029_s0  ;;  %13814 = vrot.lane.b32.xlu1 %v16709_v28, %s20029_s0  ;;  %v2111_v28 = vld [vmem:[%s20034_s17 + $0x20] sm:$0xff] }
 0x448   : > { %13829 = vrot.lane.b32.xlu0 %v13733_v36, %s20029_s0  ;;  %13824 = vrot.lane.b32.xlu1 %v13718_v4, %s20029_s0 }
 0x44c   : > { %2122 = vperm.xlu0 %13511, %v2108_v19   ;;  %2117 = vperm.xlu1 %13512, %v2107_v23  }
 0x450   : > { %2132 = vperm.xlu0 %13511, %v2110_v25   ;;  %2127 = vperm.xlu1 %13512, %v2109_v26  }
 0x454   : > { %2142 = vperm.xlu0 %13511, %v2112_v13   ;;  %2137 = vperm.xlu1 %13512, %v2111_v28  }
 0x458   : > { %2152 = vperm.xlu0 %13511, %v2114_v29   ;;  %2147 = vperm.xlu1 %13512, %v2113_v32  }
 0x47e   : > { %v13680_v35 = vpop.permute.xlu0 %13679  ;;  %v13675_v38 = vpop.permute.xlu1 %13674 }
 0x47f   : > { %v13682_v18 = vunpack.i.h.bf16 %v13680_v35  ;;  %v13681_v39 = vunpack.i.l.bf16 %v13680_v35  ;;  %v13677_v40 = vunpack.i.h.bf16 %v13675_v38  ;;  %v13676_v42 = vunpack.i.l.bf16 %v13675_v38 }
 0x481   : > { %v10794_v24 = vpack.c.bf16 %v13682_v18, %v13681_v39  ;;  %v10818_v43 = vpack.c.bf16 %v13677_v40, %v13676_v42 }
 0x482   : > { %v13690_v45 = vpop.permute.xlu0 %13689  ;;  %v13685_v48 = vpop.permute.xlu1 %13684 }
 0x483   : > { %v13692_v49 = vunpack.i.h.bf16 %v13690_v45  ;;  %v13691_v50 = vunpack.i.l.bf16 %v13690_v45  ;;  %11841 = vmatprep.subr.msk.bf16.mxu1 %vm16472_vm6, %v10818_v43  ;;  %v13687_v9 = vunpack.i.h.bf16 %v13685_v48  ;;  %v13686_v10 = vunpack.i.l.bf16 %v13685_v48 }
 0x484   : > { %11842 = vmatpush3.bf16.msk.msra.mxu1 %vm16462_vm2, %v10794_v24 }
 0x485   : > { %v10854_v51 = vpack.c.bf16 %v13692_v49, %v13691_v50  ;;  %v10830_v18 = vpack.c.bf16 %v13687_v9, %v13686_v10 }
 0x486   : > { %v13705_v54 = vpop.permute.xlu0 %13704  ;;  %v13695_v56 = vpop.permute.xlu1 %13694 }
 0x487   : > { %11881 = vmatprep.subr.msk.bf16.mxu0 %vm16499_vm12, %v10854_v51  ;;  %v13707_v27 = vunpack.i.h.bf16 %v13705_v54  ;;  %v13706_v57 = vunpack.i.l.bf16 %v13705_v54  ;;  %v13697_v13 = vunpack.i.h.bf16 %v13695_v56  ;;  %v13696_v28 = vunpack.i.l.bf16 %v13695_v56 }
 0x488   : > { %11882 = vmatpush3.bf16.msra.mxu0 %v16715_v44 }
 0x489   : > { %v10797_v63 = vpack.c.bf16 %v13707_v27, %v13706_v57  ;;  %v10806_v24 = vpack.c.bf16 %v13697_v13, %v13696_v28 }
 0x48a   : > { %v13710_v58 = vpop.permute.xlu0 %13709  ;;  %v13700_v59 = vpop.permute.xlu1 %13699 }
 0x48b   : > { %v13702_v60 = vunpack.i.h.bf16 %v13700_v59  ;;  %v13701_v61 = vunpack.i.l.bf16 %v13700_v59  ;;  %v13712_v29 = vunpack.i.h.bf16 %v13710_v58  ;;  %v13711_v32 = vunpack.i.l.bf16 %v13710_v58 }
 0x48d   : > { %v10821_v62 = vpack.c.bf16 %v13702_v60, %v13701_v61  ;;  %v10833_v43 = vpack.c.bf16 %v13712_v29, %v13711_v32 }
 0x48e   : > { %v13720_v0 = vpop.permute.xlu0 %13719  ;;  %v13715_v1 = vpop.permute.xlu1 %13714 }
 0x48f   : > { %v13722_v2 = vunpack.i.h.bf16 %v13720_v0  ;;  %v13721_v3 = vunpack.i.l.bf16 %v13720_v0  ;;  %v13717_v4 = vunpack.i.h.bf16 %v13715_v1  ;;  %v13716_v5 = vunpack.i.l.bf16 %v13715_v1  ;;  %11843 = vmatprep.subr.msk.bf16.mxu1 %vm16472_vm6, %v10821_v62 }
 0x490   : > { %11844 = vmatpush3.bf16.msk.msra.mxu1 %vm16462_vm2, %v10797_v63 }
 0x491   : > { %v10800_v44 = vpack.c.bf16 %v13722_v2, %v13721_v3  ;;  %v10824_v6 = vpack.c.bf16 %v13717_v4, %v13716_v5 }
 0x492   : > { %v13735_v11 = vpop.permute.xlu0 %13734  ;;  %v13725_v36 = vpop.permute.xlu1 %13724 }
 0x493   : > { %v13737_v14 = vunpack.i.h.bf16 %v13735_v11  ;;  %v13736_v15 = vunpack.i.l.bf16 %v13735_v11  ;;  %v13727_v19 = vunpack.i.h.bf16 %v13725_v36  ;;  %v13726_v23 = vunpack.i.l.bf16 %v13725_v36  ;;  %11845 = vmatprep.subr.msk.bf16.mxu1 %vm16472_vm6, %v10824_v6 }
 0x494   : > { %11846 = vmatpush3.bf16.msk.msra.mxu1 %vm16462_vm2, %v10800_v44 }
 0x495   : > { %v10803_v25 = vpack.c.bf16 %v13737_v14, %v13736_v15  ;;  %v10827_v26 = vpack.c.bf16 %v13727_v19, %v13726_v23 }
 0x496   : > { %v13740_v35 = vpop.permute.xlu0 %13739  ;;  %v13730_v38 = vpop.permute.xlu1 %13729 }
 0x497   : > { %v13732_v39 = vunpack.i.h.bf16 %v13730_v38  ;;  %v13731_v40 = vunpack.i.l.bf16 %v13730_v38  ;;  %11847 = vmatprep.subr.msk.bf16.mxu1 %vm16472_vm6, %v10827_v26  ;;  %v13742_v45 = vunpack.i.h.bf16 %v13740_v35  ;;  %v13741_v48 = vunpack.i.l.bf16 %v13740_v35  ;;  %v15316_v26 = vld [vmem:[#allocation9 + $0x2c] ss:$20 sps:$4 sm:$0xff]  }
 0x498   : > { %11848 = vmatpush3.bf16.msk.msra.mxu1 %vm16462_vm2, %v10803_v25  ;;  %v15313_v25 = vld [vmem:[#allocation9] ss:$20 sps:$4 sm:$0xff]  }
 0x499   : > { %v10857_v42 = vpack.c.bf16 %v13732_v39, %v13731_v40  ;;  %11849 = vmatprep.subr.msk.bf16.mxu1 %vm16480_vm8, %v10830_v18  ;;  %v10809_v58 = vpack.c.bf16 %v13742_v45, %v13741_v48 }
 0x49a   : > { %v13750_v49 = vpop.permute.xlu0 %13749  ;;  %v13745_v50 = vpop.permute.xlu1 %13744 }
 0x49b   : > { %v13752_v51 = vunpack.i.h.bf16 %v13750_v49  ;;  %v13751_v54 = vunpack.i.l.bf16 %v13750_v49  ;;  %v13747_v56 = vunpack.i.h.bf16 %v13745_v50  ;;  %v13746_v27 = vunpack.i.l.bf16 %v13745_v50  ;;  %11883 = vmatprep.subr.msk.bf16.mxu0 %vm16499_vm12, %v10857_v42  ;;  %v15318_v50 = vld [vmem:[#allocation9 + $0x28] ss:$20 sps:$4 sm:$0xff]  }
 0x49c   : > { %11850 = vmatpush3.bf16.msk.msra.mxu1 %vm16467_vm4, %v10806_v24  ;;  %11884 = vmatpush3.bf16.msra.mxu0 %v16721_v52 }
 0x49d   : > { %v10860_v57 = vpack.c.bf16 %v13752_v51, %v13751_v54  ;;  %11851 = vmatprep.subr.msk.bf16.mxu1 %vm16480_vm8, %v10833_v43  ;;  %v10836_v59 = vpack.c.bf16 %v13747_v56, %v13746_v27  ;;  %v15322_v51 = vld [vmem:[#allocation9 + $0x54] ss:$20 sps:$4 sm:$0xff]  }
 0x49e   : > { %v13760_v60 = vpop.permute.xlu0 %13759  ;;  %v13755_v61 = vpop.permute.xlu1 %13754 }
 0x49f   : > { %v13762_v62 = vunpack.i.h.bf16 %v13760_v60  ;;  %v13761_v63 = vunpack.i.l.bf16 %v13760_v60  ;;  %v13757_v0 = vunpack.i.h.bf16 %v13755_v61  ;;  %v13756_v1 = vunpack.i.l.bf16 %v13755_v61  ;;  %11885 = vmatprep.subr.msk.bf16.mxu0 %vm16499_vm12, %v10860_v57 }
 0x4a0   : > { %11852 = vmatpush3.bf16.msk.msra.mxu1 %vm16467_vm4, %v10809_v58  ;;  %11886 = vmatpush3.bf16.msra.mxu0 %v16730_v31 }
 0x4a1   : > { %v10812_v52 = vpack.c.bf16 %v13757_v0, %v13756_v1  ;;  %11853 = vmatprep.subr.msk.bf16.mxu1 %vm16480_vm8, %v10836_v59  ;;  %v10839_v2 = vpack.c.bf16 %v13762_v62, %v13761_v63 }
 0x4a2   : > { %v13775_v3 = vpop.permute.xlu0 %13774  ;;  %v13765_v4 = vpop.permute.xlu1 %13764 }
 0x4a3   : > { %v13777_v5 = vunpack.i.h.bf16 %v13775_v3  ;;  %v13776_v44 = vunpack.i.l.bf16 %v13775_v3  ;;  %v13767_v6 = vunpack.i.h.bf16 %v13765_v4  ;;  %v13766_v9 = vunpack.i.l.bf16 %v13765_v4  ;;  %v15319_v3 = vld [vmem:[#allocation9 + $0x8] ss:$20 sps:$4 sm:$0xff]   ;;  %v15324_v4 = vld [vmem:[#allocation9 + $0x50] ss:$20 sps:$4 sm:$0xff]  }
 0x4a4   : > { %11854 = vmatpush3.bf16.msk.msra.mxu1 %vm16467_vm4, %v10812_v52 }
 0x4a5   : > { %v10815_v10 = vpack.c.bf16 %v13777_v5, %v13776_v44  ;;  %v10863_v11 = vpack.c.bf16 %v13767_v6, %v13766_v9  ;;  %11855 = vmatprep.subr.msk.bf16.mxu1 %vm16480_vm8, %v10839_v2  ;;  %v15325_v6 = vld [vmem:[#allocation9 + $0x7c] ss:$20 sps:$4 sm:$0xff]  }
 0x4a6   : > { %v13780_v31 = vpop.permute.xlu0 %13779  ;;  %v13770_v36 = vpop.permute.xlu1 %13769 }
 0x4a7   : > { %v13782_v14 = vunpack.i.h.bf16 %v13780_v31  ;;  %v13781_v15 = vunpack.i.l.bf16 %v13780_v31  ;;  %v13772_v19 = vunpack.i.h.bf16 %v13770_v36  ;;  %v13771_v23 = vunpack.i.l.bf16 %v13770_v36  ;;  %11887 = vmatprep.subr.msk.bf16.mxu0 %vm16499_vm12, %v10863_v11 }
 0x4a8   : > { %11856 = vmatpush3.bf16.msk.msra.mxu1 %vm16467_vm4, %v10815_v10  ;;  %11888 = vmatpush3.bf16.msra.mxu0 %v16736_v12  ;;  %v15327_v10 = vld [vmem:[#allocation9 + $0x34] ss:$20 sps:$4 sm:$0xff]  }
 0x4a9   : > { %v10842_v13 = vpack.c.bf16 %v13782_v14, %v13781_v15  ;;  %v10866_v28 = vpack.c.bf16 %v13772_v19, %v13771_v23  ;;  %v15329_v19 = vld [vmem:[#allocation9 + $0x78] ss:$20 sps:$4 sm:$0xff]   ;;  %v15330_v23 = vld [vmem:[#allocation9 + $0x30] ss:$20 sps:$4 sm:$0xff]  }
 0x4aa   : > { %v13790_v29 = vpop.permute.xlu0 %13789  ;;  %v13785_v32 = vpop.permute.xlu1 %13784 }
 0x4ab   : > { %v13792_v35 = vunpack.i.h.bf16 %v13790_v29  ;;  %v13791_v38 = vunpack.i.l.bf16 %v13790_v29  ;;  %v13787_v18 = vunpack.i.h.bf16 %v13785_v32  ;;  %v13786_v39 = vunpack.i.l.bf16 %v13785_v32  ;;  %2300 = vmatmul.mubr.bf16.vlgmr.msra.gmra.mrb[32].mxu1 %v15313_v25  ;;  %11889 = vmatprep.subr.msk.bf16.mxu0 %vm16514_vm14, %v10866_v28  ;;  %v15331_v28 = vld [vmem:[#allocation9 + $0x5c] ss:$20 sps:$4 sm:$0xff]  }
 0x4ac   : > { %11890 = vmatpush3.bf16.msk.msra.mxu0 %vm16491_vm10, %v10842_v13  ;;  %2307 = vmatprep.mubr.bf16.mxu1 %v15316_v26  ;;  %v15333_v29 = vld [vmem:[#allocation9 + $0x10] ss:$20 sps:$4 sm:$0xff]  }
 0x4ad   : > { %v10845_v40 = vpack.c.bf16 %v13792_v35, %v13791_v38  ;;  %v10869_v42 = vpack.c.bf16 %v13787_v18, %v13786_v39  ;;  %v15334_v35 = vld [vmem:[#allocation9 + $0x58] ss:$20 sps:$4 sm:$0xff]   ;;  %v15338_v39 = vld [vmem:[#allocation9 + $0x60] ss:$20 sps:$4 sm:$0xff]  }
 0x4ae   : > { %v13800_v12 = vpop.permute.xlu0 %13799  ;;  %v13795_v24 = vpop.permute.xlu1 %13794  ;;  %v15335_v38 = vld [vmem:[#allocation9 + $0x38] ss:$20 sps:$4 sm:$0xff]  }
 0x4af   : > { %v13802_v43 = vunpack.i.h.bf16 %v13800_v12  ;;  %v13801_v45 = vunpack.i.l.bf16 %v13800_v12  ;;  %v13797_v48 = vunpack.i.h.bf16 %v13795_v24  ;;  %v13796_v49 = vunpack.i.l.bf16 %v13795_v24  ;;  %11891 = vmatprep.subr.msk.bf16.mxu0 %vm16514_vm14, %v10869_v42  ;;  %v15336_v18 = vld [vmem:[#allocation9 + $0x84] ss:$20 sps:$4 sm:$0xff]   ;;  %v15340_v42 = vld [vmem:[#allocation9 + $0x88] ss:$20 sps:$4 sm:$0xff]  }
 0x4b0   : > { %11892 = vmatpush3.bf16.msk.msra.mxu0 %vm16491_vm10, %v10845_v40  ;;  %v15339_v40 = vld [vmem:[#allocation9 + $0x80] ss:$20 sps:$4 sm:$0xff]  }
 0x4b1   : > { %v10848_v54 = vpack.c.bf16 %v13802_v43, %v13801_v45  ;;  %v10872_v56 = vpack.c.bf16 %v13797_v48, %v13796_v49 }
 0x4b2   : > { %v13810_v27 = vpop.permute.xlu0 %13809  ;;  %v13805_v57 = vpop.permute.xlu1 %13804 }
 0x4b3   : > { %v13812_v58 = vunpack.i.h.bf16 %v13810_v27  ;;  %v13811_v59 = vunpack.i.l.bf16 %v13810_v27  ;;  %v13807_v60 = vunpack.i.h.bf16 %v13805_v57  ;;  %v13806_v61 = vunpack.i.l.bf16 %v13805_v57  ;;  %2308 = vmatmul.mubr.bf16.gmra.mrb[36].mxu1 %v15318_v50  ;;  %11893 = vmatprep.subr.msk.bf16.mxu0 %vm16514_vm14, %v10872_v56 }
 0x4b4   : > { %11894 = vmatpush3.bf16.msk.msra.mxu0 %vm16491_vm10, %v10848_v54  ;;  %2315 = vmatprep.mubr.bf16.mxu1 %v15322_v51 }
 0x4b5   : > { %v10851_v62 = vpack.c.bf16 %v13812_v58, %v13811_v59  ;;  %v10875_v63 = vpack.c.bf16 %v13807_v60, %v13806_v61 }
 0x4b6   : > { %v13820_v0 = vpop.permute.xlu0 %13819  ;;  %v13815_v1 = vpop.permute.xlu1 %13814 }
 0x4b7   : > { %v13817_v52 = vunpack.i.h.bf16 %v13815_v1  ;;  %v13816_v2 = vunpack.i.l.bf16 %v13815_v1  ;;  %11895 = vmatprep.subr.msk.bf16.mxu0 %vm16514_vm14, %v10875_v63  ;;  %v13822_v5 = vunpack.i.h.bf16 %v13820_v0  ;;  %v13821_v44 = vunpack.i.l.bf16 %v13820_v0 }
 0x4b8   : > { %11896 = vmatpush3.bf16.msk.msra.mxu0 %vm16491_vm10, %v10851_v62 }
 0x4b9   : > { %v10878_v9 = vpack.c.bf16 %v13817_v52, %v13816_v2  ;;  %v10881_v31 = vpack.c.bf16 %v13822_v5, %v13821_v44 }
 0x4ba   : > { %v13825_v11 = vpop.permute.xlu1 %13824  ;;  %v13830_v15 = vpop.permute.xlu0 %13829 }
 0x4bb   : > { %2316 = vmatmul.mubr.bf16.gmra.mrb[40].mxu1 %v15324_v4  ;;  %2365 = vmatmul.mubr.bf16.vlgmr.msra.gmra.mrb[24].mxu0 %v15319_v3  ;;  %v13827_v36 = vunpack.i.h.bf16 %v13825_v11  ;;  %v13826_v14 = vunpack.i.l.bf16 %v13825_v11  ;;  %v13832_v25 = vunpack.i.h.bf16 %v13830_v15  ;;  %v13831_v26 = vunpack.i.l.bf16 %v13830_v15 }
 0x4bc   : > { %13098 = vmatprep.subr.msk.bf16.mxu1 %vm16521_vm1, %v10878_v9  ;;  %2323 = vmatprep.mubr.bf16.mxu1 %v15325_v6 }
 0x4bd   : > { %13099 = vmatpush3.bf16.msk.msra.mxu1 %vm16521_vm1, %v10878_v9  ;;  %2372 = vmatprep.mubr.bf16.mxu0 %v15327_v10  ;;  %v10884_v13 = vpack.c.bf16 %v13827_v36, %v13826_v14  ;;  %v10887_v32 = vpack.c.bf16 %v13832_v25, %v13831_v26 }
 0x4be   : > { %13100 = vmatprep.subr.msk.bf16.mxu1 %vm16521_vm1, %v10881_v31 }
 0x4c1   : > { %13101 = vmatpush3.bf16.msk.msra.mxu1 %vm16521_vm1, %v10881_v31 }
 0x4c2   : > { %13102 = vmatprep.subr.msk.bf16.mxu1 %vm16521_vm1, %v10884_v13 }
 0x4c3   : > { %2324 = vmatmul.mubr.bf16.gmra.mrb[44].mxu1 %v15329_v19  ;;  %2373 = vmatmul.mubr.bf16.gmra.mrb[28].mxu0 %v15330_v23 }
 0x4c4   : > { %2380 = vmatprep.mubr.bf16.mxu0 %v15331_v28  ;;  %13106 = vmatprep.mubr.msk.bf16.mxu1 %vm1567_vm0, %v15333_v29 }
 0x4c5   : > { %13103 = vmatpush3.bf16.msk.msra.mxu1 %vm16521_vm1, %v10884_v13 }
 0x4c6   : > { %13104 = vmatprep.subr.msk.bf16.mxu1 %vm16521_vm1, %v10887_v32 }
 0x4c9   : > { %13105 = vmatpush3.bf16.msk.msra.mxu1 %vm16521_vm1, %v10887_v32 }
 0x4cb   : > { %2381 = vmatmul.mubr.bf16.gmra.mrb[32].mxu0 %v15334_v35  ;;  %v2123_v58 = vpop.permute.xlu0 %2122  ;;  %v2118_v59 = vpop.permute.xlu1 %2117 }
 0x4cc   : > { %13107 = vmatmul.mubr.msk.bf16.vlgmr.msra.gmra.mrb[48].mxu1 %vm1567_vm0, %v15335_v38  ;;  %2388 = vmatprep.mubr.bf16.mxu0 %v15336_v18 }
 0x4cd   : > { %13110 = vmatprep.mubr.msk.bf16.mxu1 %vm1567_vm0, %v15338_v39 }
 0x4cf   : > { %v2133_v31 = vpop.permute.xlu0 %2132  ;;  %v2128_v36 = vpop.permute.xlu1 %2127 }
 0x4d3   : > { %2389 = vmatmul.mubr.bf16.gmra.mrb[36].mxu0 %v15339_v40 }
 0x4d4   : > { %13111 = vmatmul.mubr.msk.bf16.gmra.mrb[52].mxu1 %vm1567_vm0, %v15340_v42 }
 0x57e   : > { %v11857_v12 = vpop.f32.mrb[32].mxu1 }
 0x57f   : > { %v11858_v24 = vpop.f32.mrb[33].mxu1 }
 0x580   : > { %v11859_v43 = vadd.f32 %v11858_v24, %v11857_v12  ;;  %v11860_v45 = vpop.f32.mrb[34].mxu1  ;;  %v2143_v12 = vpop.permute.xlu0 %2142 }
 0x581   : > { %v11861_v48 = vpop.f32.mrb[35].mxu1  ;;  %v2138_v24 = vpop.permute.xlu1 %2137 }
 0x582   : > { %v11862_v49 = vadd.f32 %v11861_v48, %v11860_v45  ;;  %v2302_v0 = vadd.f32 %v11859_v43, %v2118_v59 }
 0x584   : > { %v2305_v44 = vadd.f32 %v11862_v49, %v2123_v58 }
 0x586   : > { %v11863_v50 = vpop.f32.mrb[36].mxu1 }
 0x587   : > { %v11864_v51 = vpop.f32.mrb[37].mxu1 }
 0x588   : > { %v11865_v54 = vadd.f32 %v11864_v51, %v11863_v50  ;;  %v11866_v56 = vpop.f32.mrb[38].mxu1 }
 0x589   : > { %v11867_v27 = vpop.f32.mrb[39].mxu1 }
 0x58a   : > { %v11868_v57 = vadd.f32 %v11867_v27, %v11866_v56  ;;  %v2310_v25 = vadd.f32 %v11865_v54, %v2128_v36 }
 0x58c   : > { %v2313_v38 = vadd.f32 %v11868_v57, %v2133_v31 }
 0x58e   : > { %v11869_v60 = vpop.f32.mrb[40].mxu1  ;;  %v11897_v61 = vpop.f32.mrb[24].mxu0 }
 0x58f   : > { %v11870_v62 = vpop.f32.mrb[41].mxu1  ;;  %v11898_v63 = vpop.f32.mrb[25].mxu0 }
 0x590   : > { %v11871_v1 = vadd.f32 %v11870_v62, %v11869_v60  ;;  %v11899_v52 = vadd.f32 %v11898_v63, %v11897_v61  ;;  %v11872_v2 = vpop.f32.mrb[42].mxu1  ;;  %v11900_v3 = vpop.f32.mrb[26].mxu0 }
 0x591   : > { %v11873_v4 = vpop.f32.mrb[43].mxu1  ;;  %v11901_v5 = vpop.f32.mrb[27].mxu0 }
 0x592   : > { %v11874_v6 = vadd.f32 %v11873_v4, %v11872_v2  ;;  %v11902_v9 = vadd.f32 %v11901_v5, %v11900_v3  ;;  %v2367_v10 = vadd.f32 %v11899_v52, %v2302_v0  ;;  %v2318_v49 = vadd.f32 %v11871_v1, %v2138_v24  ;;  %v2153_v4 = vpop.permute.xlu0 %2152  ;;  %v2148_v5 = vpop.permute.xlu1 %2147 }
 0x594   : > { %v2370_v11 = vadd.f32 %v11902_v9, %v2305_v44  ;;  %v2321_v27 = vadd.f32 %v11874_v6, %v2143_v12 }
 0x596   : > { %v11875_v14 = vpop.f32.mrb[44].mxu1  ;;  %v11903_v15 = vpop.f32.mrb[28].mxu0 }
 0x597   : > { %v11876_v19 = vpop.f32.mrb[45].mxu1  ;;  %v11904_v23 = vpop.f32.mrb[29].mxu0 }
 0x598   : > { %v11877_v26 = vadd.f32 %v11876_v19, %v11875_v14  ;;  %v11905_v13 = vadd.f32 %v11904_v23, %v11903_v15  ;;  %v11878_v28 = vpop.f32.mrb[46].mxu1  ;;  %v11906_v29 = vpop.f32.mrb[30].mxu0 }
 0x599   : > { %v11879_v32 = vpop.f32.mrb[47].mxu1  ;;  %v11907_v35 = vpop.f32.mrb[31].mxu0 }
 0x59a   : > { %v11880_v18 = vadd.f32 %v11879_v32, %v11878_v28  ;;  %v11908_v39 = vadd.f32 %v11907_v35, %v11906_v29  ;;  %v2375_v40 = vadd.f32 %v11905_v13, %v2310_v25 }
 0x59c   : > { %v2378_v42 = vadd.f32 %v11908_v39, %v2313_v38  ;;  %v2329_v13 = vadd.f32 %v11880_v18, %v2153_v4 }
 0x59e   : > { %v11909_v43 = vpop.f32.mrb[32].mxu0 }
 0x59f   : > { %v13108_v45 = vpop.f32.mrb[48].mxu1  ;;  %v11910_v48 = vpop.f32.mrb[33].mxu0 }
 0x5a0   : > { %v2440_v50 = vadd.f32 %v13108_v45, %v2375_v40  ;;  %v11911_v51 = vadd.f32 %v11910_v48, %v11909_v43  ;;  %v2431_v54 = vpop.f32.mrb[49].mxu1  ;;  %v11912_v56 = vpop.f32.mrb[34].mxu0 }
 0x5a1   : > { %v2432_v58 = vadd.f32 %v2431_v54, %v2367_v10  ;;  %v13109_v59 = vpop.f32.mrb[50].mxu1  ;;  %v11913_v60 = vpop.f32.mrb[35].mxu0  ;;  %v2805_v54 = vld [vmem:[%s20035_s8 + $0x18] sm:$0xff] }
 0x5a2   : > { %v2464_v57 = vadd.f32 %v2440_v50, %v16543_v20  ;;  %v2443_v61 = vadd.f32 %v13109_v59, %v2378_v42  ;;  %v11914_v62 = vadd.f32 %v11913_v60, %v11912_v56  ;;  %v2434_v63 = vpop.f32.mrb[51].mxu1  ;;  %v2383_v0 = vadd.f32 %v11911_v51, %v2318_v49  ;;  %v2803_v50 = vld [vmem:[%s20035_s8 + $0x8] sm:$0xff]  ;;  %v2802_v51 = vld [vmem:[%s20035_s8] sm:$0xff]  ;;  %v2804_v56 = vld [vmem:[%s20035_s8 + $0x10] sm:$0xff] }
 0x5a3   : > { %v2435_v52 = vadd.f32 %v2434_v63, %v2370_v11  ;;  %v2462_v6 = vadd.f32 %v2432_v58, %v16531_v7  ;;  %v2326_v20 = vadd.f32 %v11877_v26, %v2148_v5  ;;  %v2806_v58 = vld [vmem:[%s20035_s8 + $0x20] sm:$0xff]  ;;  %v2809_v59 = vld [vmem:[%s20035_s8 + $0x38] sm:$0xff]  ;;  %v2808_v60 = vld [vmem:[%s20035_s8 + $0x30] sm:$0xff] }
 0x5a4   : > { %v2465_v2 = vadd.f32 %v2443_v61, %v16545_v21  ;;  %v2386_v3 = vadd.f32 %v11914_v62, %v2321_v27  ;;  %v16868_v44 = vmax.f32 %v2464_v57, 0.0  ;;  %v2807_v27 = vld [vmem:[%s20035_s8 + $0x28] sm:$0xff]  ;;  %s20044_s8 = sld [smem:[#allocation39_spill]] }
 0x5a5   : > { %v2463_v1 = vadd.f32 %v2435_v52, %v16533_v8  ;;  %v16877_v28 = vmax.f32 %v2462_v6, 0.0 }
 0x5a6   : > { %v16871_v9 = vmax.f32 %v2465_v2, 0.0  ;;  %v11915_v10 = vpop.f32.mrb[36].mxu0 }
 0x5a7   : > { %v13112_v31 = vpop.f32.mrb[52].mxu1  ;;  %v11916_v36 = vpop.f32.mrb[37].mxu0  ;;  %v16873_v14 = vmax.f32 %v2463_v1, 0.0 }
 0x5a8   : > { %v11917_v11 = vadd.f32 %v11916_v36, %v11915_v10  ;;  %v2447_v15 = vpop.f32.mrb[53].mxu1  ;;  %v11918_v21 = vpop.f32.mrb[38].mxu0  ;;  %v13838_v19 = vpack.i.bf16 %v16871_v9, %v16868_v44 }
 0x5a9   : > { %v2448_v8 = vadd.f32 %v2447_v15, %v2383_v0  ;;  %v13113_v23 = vpop.f32.mrb[54].mxu1  ;;  %v11919_v25 = vpop.f32.mrb[39].mxu0  ;;  %v13848_v39 = vpack.i.bf16 %v16873_v14, %v16877_v28 }
 0x5aa   : > { %v2391_v7 = vadd.f32 %v11917_v11, %v2326_v20  ;;  %v11920_v29 = vadd.f32 %v11919_v25, %v11918_v21  ;;  %v2450_v32 = vpop.f32.mrb[55].mxu1  ;;  %13839 = vrot.lane.b32.xlu0 %v13838_v19, %s20031_s9  ;;  %13834 = vrot.lane.b32.xlu1 %v13838_v19, %s20032_s7  ;;  %v15708_v37 = vld [vmem:[%s20044_s8 + $0x10] ss:$36 sps:$4 sm:$0xff]  }
 0x5ab   : > { %v2451_v26 = vadd.f32 %v2450_v32, %v2386_v3  ;;  %v2466_v43 = vadd.f32 %v2448_v8, %v16551_v33  ;;  %v15750_v55 = vld [vmem:[%s20044_s8 + $0xf0] ss:$36 sps:$4 sm:$0xff]  }
 0x5ac   : > { %v2456_v35 = vadd.f32 %v13112_v31, %v2391_v7  ;;  %v2394_v38 = vadd.f32 %v11920_v29, %v2329_v13  ;;  %v2606_v13 = vpack.c.bf16 %v16873_v14, %v16877_v28 }
 0x5ad   : > { %v2467_v12 = vadd.f32 %v2451_v26, %v16553_v34  ;;  %v16899_v49 = vmax.f32 %v2466_v43, 0.0  ;;  %v15343_v34 = vld [vmem:[#allocation11 + $0x4] ss:$20 sps:$4 sm:$0xff]  }
 0x5ae   : > { %v2468_v40 = vadd.f32 %v2456_v35, %v16559_v46  ;;  %v2459_v42 = vadd.f32 %v13113_v23, %v2394_v38  ;;  %13849 = vrot.lane.b32.xlu0 %v13848_v39, %s20031_s9  ;;  %13844 = vrot.lane.b32.xlu1 %v13848_v39, %s20032_s7 }
 0x5af   : > { %v16895_v46 = vmax.f32 %v2467_v12, 0.0  ;;  %2994 = vmatprep.mubr.bf16.mxu0 %v15343_v34 }
 0x5b0   : > { %v2469_v18 = vadd.f32 %v2459_v42, %v16561_v47  ;;  %v16888_v24 = vmax.f32 %v2468_v40, 0.0  ;;  %v15349_v47 = vld [vmem:[#allocation11 + $0xc] ss:$20 sps:$4 sm:$0xff]  }
 0x5b1   : > { %v13883_v33 = vpack.i.bf16 %v16895_v46, %v16899_v49  ;;  %3059 = vmatprep.mubr.bf16.mxu1 %v15349_v47 }
 0x5b2   : > { %v16891_v45 = vmax.f32 %v2469_v18, 0.0  ;;  %13859 = vrot.lane.b32.xlu0 %v13848_v39, %s20026_s18  ;;  %13854 = vrot.lane.b32.xlu1 %v13848_v39, %s20025_s15 }
 0x5b4   : > { %v13868_v48 = vpack.i.bf16 %v16891_v45, %v16888_v24 }
 0x5b6   : > { %13869 = vrot.lane.b32.xlu0 %v13868_v48, %s20031_s9  ;;  %13864 = vrot.lane.b32.xlu1 %v13868_v48, %s20032_s7 }
 0x5ba   : > { %13884 = vrot.lane.b32.xlu0 %v13883_v33, %s20031_s9  ;;  %13874 = vrot.lane.b32.xlu1 %v13883_v33, %s20032_s7 }
 0x5be   : > { %13889 = vrot.lane.b32.xlu0 %v13838_v19, %s20025_s15  ;;  %13879 = vrot.lane.b32.xlu1 %v13848_v39, %s20033_s26 }
 0x5c2   : > { %13899 = vrot.lane.b32.xlu0 %v13838_v19, %s20033_s26  ;;  %13894 = vrot.lane.b32.xlu1 %v13838_v19, %s20026_s18 }
 0x5c6   : > { %13909 = vrot.lane.b32.xlu0 %v13883_v33, %s20026_s18  ;;  %13904 = vrot.lane.b32.xlu1 %v13883_v33, %s20025_s15 }
 0x5ca   : > { %13914 = vrot.lane.b32.xlu0 %v13868_v48, %s20025_s15  ;;  %13919 = vrot.lane.b32.xlu1 %v13883_v33, %s20033_s26 }
 0x5ce   : > { %13929 = vrot.lane.b32.xlu0 %v13868_v48, %s20033_s26  ;;  %13924 = vrot.lane.b32.xlu1 %v13868_v48, %s20026_s18 }
 0x5d2   : > { %13939 = vrot.lane.b32.xlu0 %v13848_v39, %s20027_s29  ;;  %13934 = vrot.lane.b32.xlu1 %v13848_v39, %s20028_s28 }
 0x5d6   : > { %13949 = vrot.lane.b32.xlu0 %v13838_v19, %s20027_s29  ;;  %13944 = vrot.lane.b32.xlu1 %v13838_v19, %s20028_s28 }
 0x5da   : > { %13964 = vrot.lane.b32.xlu0 %v13883_v33, %s20027_s29  ;;  %13954 = vrot.lane.b32.xlu1 %v13883_v33, %s20028_s28 }
 0x5de   : > { %13969 = vrot.lane.b32.xlu0 %v13868_v48, %s20027_s29  ;;  %13959 = vrot.lane.b32.xlu1 %v13868_v48, %s20028_s28 }
 0x5e2   : > { %13979 = vrot.lane.b32.xlu0 %v13838_v19, %s20029_s0  ;;  %13974 = vrot.lane.b32.xlu1 %v13848_v39, %s20029_s0 }
 0x5e6   : > { %13989 = vrot.lane.b32.xlu0 %v13868_v48, %s20029_s0  ;;  %13984 = vrot.lane.b32.xlu1 %v13883_v33, %s20029_s0 }
 0x5ea   : > { %2817 = vperm.xlu0 %13511, %v2803_v50   ;;  %2812 = vperm.xlu1 %13512, %v2802_v51  }
 0x5ee   : > { %2827 = vperm.xlu0 %13511, %v2805_v54   ;;  %2822 = vperm.xlu1 %13512, %v2804_v56  }
 0x5f2   : > { %2837 = vperm.xlu0 %13511, %v2807_v27   ;;  %2832 = vperm.xlu1 %13512, %v2806_v58  }
 0x5f6   : > { %2847 = vperm.xlu0 %13511, %v2809_v59   ;;  %2842 = vperm.xlu1 %13512, %v2808_v60  }
 0x61c   : > { %v13840_v57 = vpop.permute.xlu0 %13839  ;;  %v13835_v61 = vpop.permute.xlu1 %13834 }
 0x61d   : > { %v13837_v62 = vunpack.i.h.bf16 %v13835_v61  ;;  %v13836_v63 = vunpack.i.l.bf16 %v13835_v61  ;;  %v13842_v10 = vunpack.i.h.bf16 %v13840_v57  ;;  %v13841_v20 = vunpack.i.l.bf16 %v13840_v57 }
 0x61f   : > { %v10917_v11 = vpack.c.bf16 %v13837_v62, %v13836_v63  ;;  %v10893_v8 = vpack.c.bf16 %v13842_v10, %v13841_v20 }
 0x620   : > { %v13850_v0 = vpop.permute.xlu0 %13849  ;;  %v13845_v52 = vpop.permute.xlu1 %13844 }
 0x621   : > { %v13852_v2 = vunpack.i.h.bf16 %v13850_v0  ;;  %v13851_v3 = vunpack.i.l.bf16 %v13850_v0  ;;  %v13847_v4 = vunpack.i.h.bf16 %v13845_v52  ;;  %v13846_v1 = vunpack.i.l.bf16 %v13845_v52 }
 0x622   : > { %v2607_v0 = vpack.c.bf16 %v16871_v9, %v16868_v44 }
 0x623   : > { %v10890_v5 = vpack.c.bf16 %v13852_v2, %v13851_v3  ;;  %v10914_v6 = vpack.c.bf16 %v13847_v4, %v13846_v1 }
 0x624   : > { %v13860_v31 = vpop.permute.xlu0 %13859  ;;  %v13855_v36 = vpop.permute.xlu1 %13854 }
 0x625   : > { %v13862_v15 = vunpack.i.h.bf16 %v13860_v31  ;;  %v13861_v21 = vunpack.i.l.bf16 %v13860_v31  ;;  %11929 = vmatprep.subr.msk.bf16.mxu0 %vm16472_vm6, %v10914_v6  ;;  %v13857_v34 = vunpack.i.h.bf16 %v13855_v36  ;;  %v13856_v47 = vunpack.i.l.bf16 %v13855_v36 }
 0x626   : > { %11930 = vmatpush3.bf16.msk.msra.mxu0 %vm16462_vm2, %v10890_v5 }
 0x627   : > { %v10950_v19 = vpack.c.bf16 %v13862_v15, %v13861_v21  ;;  %11931 = vmatprep.subr.msk.bf16.mxu0 %vm16472_vm6, %v10917_v11  ;;  %v10926_v57 = vpack.c.bf16 %v13857_v34, %v13856_v47 }
 0x628   : > { %v13870_v23 = vpop.permute.xlu0 %13869  ;;  %v13865_v25 = vpop.permute.xlu1 %13864 }
 0x629   : > { %11969 = vmatprep.subr.msk.bf16.mxu1 %vm16499_vm12, %v10950_v19  ;;  %v13867_v7 = vunpack.i.h.bf16 %v13865_v25  ;;  %v13866_v29 = vunpack.i.l.bf16 %v13865_v25  ;;  %v13872_v42 = vunpack.i.h.bf16 %v13870_v23  ;;  %v13871_v18 = vunpack.i.l.bf16 %v13870_v23 }
 0x62a   : > { %11932 = vmatpush3.bf16.msk.msra.mxu0 %vm16462_vm2, %v10893_v8  ;;  %11970 = vmatpush3.bf16.msra.mxu1 %v2606_v13  ;;  %v2608_v8 = vpack.c.bf16 %v16895_v46, %v16899_v49 }
 0x62b   : > { %v10923_v50 = vpack.c.bf16 %v13867_v7, %v13866_v29  ;;  %v10899_v51 = vpack.c.bf16 %v13872_v42, %v13871_v18 }
 0x62c   : > { %v13885_v32 = vpop.permute.xlu0 %13884  ;;  %v13875_v26 = vpop.permute.xlu1 %13874 }
 0x62d   : > { %v13887_v35 = vunpack.i.h.bf16 %v13885_v32  ;;  %v13886_v38 = vunpack.i.l.bf16 %v13885_v32  ;;  %v13877_v39 = vunpack.i.h.bf16 %v13875_v26  ;;  %v13876_v40 = vunpack.i.l.bf16 %v13875_v26 }
 0x62f   : > { %v10896_v12 = vpack.c.bf16 %v13887_v35, %v13886_v38  ;;  %v10920_v43 = vpack.c.bf16 %v13877_v39, %v13876_v40 }
 0x630   : > { %v13890_v48 = vpop.permute.xlu0 %13889  ;;  %v13880_v33 = vpop.permute.xlu1 %13879 }
 0x631   : > { %11933 = vmatprep.subr.msk.bf16.mxu0 %vm16472_vm6, %v10920_v43  ;;  %v13892_v54 = vunpack.i.h.bf16 %v13890_v48  ;;  %v13891_v56 = vunpack.i.l.bf16 %v13890_v48  ;;  %v13882_v27 = vunpack.i.h.bf16 %v13880_v33  ;;  %v13881_v58 = vunpack.i.l.bf16 %v13880_v33 }
 0x632   : > { %11934 = vmatpush3.bf16.msk.msra.mxu0 %vm16462_vm2, %v10896_v12  ;;  %v2609_v33 = vpack.c.bf16 %v16891_v45, %v16888_v24 }
 0x633   : > { %11935 = vmatprep.subr.msk.bf16.mxu0 %vm16472_vm6, %v10923_v50  ;;  %v10929_v52 = vpack.c.bf16 %v13892_v54, %v13891_v56  ;;  %v10902_v2 = vpack.c.bf16 %v13882_v27, %v13881_v58  ;;  %v15341_v54 = vld [vmem:[#allocation11] ss:$20 sps:$4 sm:$0xff]  }
 0x634   : > { %v13900_v59 = vpop.permute.xlu0 %13899  ;;  %v13895_v60 = vpop.permute.xlu1 %13894  ;;  %v15344_v56 = vld [vmem:[#allocation11 + $0x2c] ss:$20 sps:$4 sm:$0xff]  }
 0x635   : > { %v13897_v61 = vunpack.i.h.bf16 %v13895_v60  ;;  %v13896_v62 = vunpack.i.l.bf16 %v13895_v60  ;;  %v13902_v3 = vunpack.i.h.bf16 %v13900_v59  ;;  %v13901_v4 = vunpack.i.l.bf16 %v13900_v59 }
 0x636   : > { %11936 = vmatpush3.bf16.msk.msra.mxu0 %vm16462_vm2, %v10899_v51 }
 0x637   : > { %v10953_v63 = vpack.c.bf16 %v13897_v61, %v13896_v62  ;;  %11937 = vmatprep.subr.msk.bf16.mxu0 %vm16480_vm8, %v10926_v57  ;;  %v10905_v11 = vpack.c.bf16 %v13902_v3, %v13901_v4 }
 0x638   : > { %v13910_v1 = vpop.permute.xlu0 %13909  ;;  %v13905_v5 = vpop.permute.xlu1 %13904 }
 0x639   : > { %v13912_v6 = vunpack.i.h.bf16 %v13910_v1  ;;  %v13911_v10 = vunpack.i.l.bf16 %v13910_v1  ;;  %v13907_v20 = vunpack.i.h.bf16 %v13905_v5  ;;  %v13906_v31 = vunpack.i.l.bf16 %v13905_v5  ;;  %11971 = vmatprep.subr.msk.bf16.mxu1 %vm16499_vm12, %v10953_v63 }
 0x63a   : > { %11938 = vmatpush3.bf16.msk.msra.mxu0 %vm16467_vm4, %v10902_v2  ;;  %11972 = vmatpush3.bf16.msra.mxu1 %v2607_v0 }
 0x63b   : > { %v10956_v36 = vpack.c.bf16 %v13912_v6, %v13911_v10  ;;  %11939 = vmatprep.subr.msk.bf16.mxu0 %vm16480_vm8, %v10929_v52  ;;  %v10932_v15 = vpack.c.bf16 %v13907_v20, %v13906_v31  ;;  %v15346_v10 = vld [vmem:[#allocation11 + $0x28] ss:$20 sps:$4 sm:$0xff]  }
 0x63c   : > { %v13915_v21 = vpop.permute.xlu0 %13914  ;;  %v13920_v19 = vpop.permute.xlu1 %13919  ;;  %v15350_v20 = vld [vmem:[#allocation11 + $0x54] ss:$20 sps:$4 sm:$0xff]  }
 0x63d   : > { %v13917_v23 = vunpack.i.h.bf16 %v13915_v21  ;;  %v13916_v25 = vunpack.i.l.bf16 %v13915_v21  ;;  %v13922_v13 = vunpack.i.h.bf16 %v13920_v19  ;;  %v13921_v7 = vunpack.i.l.bf16 %v13920_v19  ;;  %11973 = vmatprep.subr.msk.bf16.mxu1 %vm16499_vm12, %v10956_v36 }
 0x63e   : > { %11940 = vmatpush3.bf16.msk.msra.mxu0 %vm16467_vm4, %v10905_v11  ;;  %11974 = vmatpush3.bf16.msra.mxu1 %v2608_v8 }
 0x63f   : > { %v10908_v29 = vpack.c.bf16 %v13922_v13, %v13921_v7  ;;  %11941 = vmatprep.subr.msk.bf16.mxu0 %vm16480_vm8, %v10932_v15  ;;  %v10935_v32 = vpack.c.bf16 %v13917_v23, %v13916_v25 }
 0x640   : > { %v13930_v26 = vpop.permute.xlu0 %13929  ;;  %v13925_v35 = vpop.permute.xlu1 %13924 }
 0x641   : > { %v13932_v38 = vunpack.i.h.bf16 %v13930_v26  ;;  %v13931_v39 = vunpack.i.l.bf16 %v13930_v26  ;;  %v13927_v40 = vunpack.i.h.bf16 %v13925_v35  ;;  %v13926_v42 = vunpack.i.l.bf16 %v13925_v35  ;;  %v15347_v35 = vld [vmem:[#allocation11 + $0x8] ss:$20 sps:$4 sm:$0xff]  }
 0x642   : > { %11942 = vmatpush3.bf16.msk.msra.mxu0 %vm16467_vm4, %v10908_v29 }
 0x643   : > { %v10911_v18 = vpack.c.bf16 %v13932_v38, %v13931_v39  ;;  %v10959_v12 = vpack.c.bf16 %v13927_v40, %v13926_v42  ;;  %11943 = vmatprep.subr.msk.bf16.mxu0 %vm16480_vm8, %v10935_v32  ;;  %v15352_v38 = vld [vmem:[#allocation11 + $0x50] ss:$20 sps:$4 sm:$0xff]  }
 0x644   : > { %v13940_v43 = vpop.permute.xlu0 %13939  ;;  %v13935_v48 = vpop.permute.xlu1 %13934  ;;  %v15353_v42 = vld [vmem:[#allocation11 + $0x7c] ss:$20 sps:$4 sm:$0xff]  }
 0x645   : > { %v13942_v34 = vunpack.i.h.bf16 %v13940_v43  ;;  %v13941_v47 = vunpack.i.l.bf16 %v13940_v43  ;;  %v13937_v50 = vunpack.i.h.bf16 %v13935_v48  ;;  %v13936_v51 = vunpack.i.l.bf16 %v13935_v48  ;;  %11975 = vmatprep.subr.msk.bf16.mxu1 %vm16499_vm12, %v10959_v12  ;;  %v15355_v12 = vld [vmem:[#allocation11 + $0x34] ss:$20 sps:$4 sm:$0xff]  }
 0x646   : > { %11944 = vmatpush3.bf16.msk.msra.mxu0 %vm16467_vm4, %v10911_v18  ;;  %11976 = vmatpush3.bf16.msra.mxu1 %v2609_v33 }
 0x647   : > { %v10938_v27 = vpack.c.bf16 %v13942_v34, %v13941_v47  ;;  %v10962_v58 = vpack.c.bf16 %v13937_v50, %v13936_v51  ;;  %v15357_v50 = vld [vmem:[#allocation11 + $0x78] ss:$20 sps:$4 sm:$0xff]   ;;  %v15358_v51 = vld [vmem:[#allocation11 + $0x30] ss:$20 sps:$4 sm:$0xff]  }
 0x648   : > { %v13950_v59 = vpop.permute.xlu0 %13949  ;;  %v13945_v60 = vpop.permute.xlu1 %13944 }
 0x649   : > { %v13952_v57 = vunpack.i.h.bf16 %v13950_v59  ;;  %v13951_v61 = vunpack.i.l.bf16 %v13950_v59  ;;  %v13947_v62 = vunpack.i.h.bf16 %v13945_v60  ;;  %v13946_v63 = vunpack.i.l.bf16 %v13945_v60  ;;  %2995 = vmatmul.mubr.bf16.vlgmr.msra.gmra.mrb[40].mxu0 %v15341_v54  ;;  %11977 = vmatprep.subr.msk.bf16.mxu1 %vm16514_vm14, %v10962_v58  ;;  %v15359_v58 = vld [vmem:[#allocation11 + $0x5c] ss:$20 sps:$4 sm:$0xff]  }
 0x64a   : > { %11978 = vmatpush3.bf16.msk.msra.mxu1 %vm16491_vm10, %v10938_v27  ;;  %3002 = vmatprep.mubr.bf16.mxu0 %v15344_v56  ;;  %v15361_v59 = vld [vmem:[#allocation11 + $0x10] ss:$20 sps:$4 sm:$0xff]  }
 0x64b   : > { %v10941_v0 = vpack.c.bf16 %v13952_v57, %v13951_v61  ;;  %v10965_v52 = vpack.c.bf16 %v13947_v62, %v13946_v63  ;;  %v15362_v57 = vld [vmem:[#allocation11 + $0x58] ss:$20 sps:$4 sm:$0xff]   ;;  %v15366_v63 = vld [vmem:[#allocation11 + $0x60] ss:$20 sps:$4 sm:$0xff]  }
 0x64c   : > { %v13965_v2 = vpop.permute.xlu0 %13964  ;;  %v13955_v3 = vpop.permute.xlu1 %13954  ;;  %v15363_v61 = vld [vmem:[#allocation11 + $0x38] ss:$20 sps:$4 sm:$0xff]  }
 0x64d   : > { %v13967_v4 = vunpack.i.h.bf16 %v13965_v2  ;;  %v13966_v1 = vunpack.i.l.bf16 %v13965_v2  ;;  %v13957_v5 = vunpack.i.h.bf16 %v13955_v3  ;;  %v13956_v6 = vunpack.i.l.bf16 %v13955_v3  ;;  %11979 = vmatprep.subr.msk.bf16.mxu1 %vm16514_vm14, %v10965_v52  ;;  %v15364_v62 = vld [vmem:[#allocation11 + $0x84] ss:$20 sps:$4 sm:$0xff]   ;;  %v15368_v52 = vld [vmem:[#allocation11 + $0x88] ss:$20 sps:$4 sm:$0xff]  }
 0x64e   : > { %11980 = vmatpush3.bf16.msk.msra.mxu1 %vm16491_vm10, %v10941_v0  ;;  %v15367_v0 = vld [vmem:[#allocation11 + $0x80] ss:$20 sps:$4 sm:$0xff]  }
 0x64f   : > { %v10944_v31 = vpack.c.bf16 %v13967_v4, %v13966_v1  ;;  %v10968_v36 = vpack.c.bf16 %v13957_v5, %v13956_v6 }
 0x650   : > { %v13970_v11 = vpop.permute.xlu0 %13969  ;;  %v13960_v15 = vpop.permute.xlu1 %13959 }
 0x651   : > { %v13972_v21 = vunpack.i.h.bf16 %v13970_v11  ;;  %v13971_v19 = vunpack.i.l.bf16 %v13970_v11  ;;  %v13962_v8 = vunpack.i.h.bf16 %v13960_v15  ;;  %v13961_v23 = vunpack.i.l.bf16 %v13960_v15  ;;  %3003 = vmatmul.mubr.bf16.gmra.mrb[44].mxu0 %v15346_v10  ;;  %11981 = vmatprep.subr.msk.bf16.mxu1 %vm16514_vm14, %v10968_v36 }
 0x652   : > { %11982 = vmatpush3.bf16.msk.msra.mxu1 %vm16491_vm10, %v10944_v31  ;;  %3010 = vmatprep.mubr.bf16.mxu0 %v15350_v20 }
 0x653   : > { %v10947_v25 = vpack.c.bf16 %v13972_v21, %v13971_v19  ;;  %v10971_v13 = vpack.c.bf16 %v13962_v8, %v13961_v23 }
 0x654   : > { %v13980_v7 = vpop.permute.xlu0 %13979  ;;  %v13975_v29 = vpop.permute.xlu1 %13974 }
 0x655   : > { %v13977_v32 = vunpack.i.h.bf16 %v13975_v29  ;;  %v13976_v26 = vunpack.i.l.bf16 %v13975_v29  ;;  %11983 = vmatprep.subr.msk.bf16.mxu1 %vm16514_vm14, %v10971_v13  ;;  %v13982_v39 = vunpack.i.h.bf16 %v13980_v7  ;;  %v13981_v40 = vunpack.i.l.bf16 %v13980_v7 }
 0x656   : > { %11984 = vmatpush3.bf16.msk.msra.mxu1 %vm16491_vm10, %v10947_v25 }
 0x657   : > { %v10974_v18 = vpack.c.bf16 %v13977_v32, %v13976_v26  ;;  %v10977_v48 = vpack.c.bf16 %v13982_v39, %v13981_v40 }
 0x658   : > { %v13985_v43 = vpop.permute.xlu1 %13984  ;;  %v13990_v47 = vpop.permute.xlu0 %13989 }
 0x659   : > { %3011 = vmatmul.mubr.bf16.gmra.mrb[48].mxu0 %v15352_v38  ;;  %3060 = vmatmul.mubr.bf16.vlgmr.msra.gmra.mrb[56].mxu1 %v15347_v35  ;;  %v13987_v33 = vunpack.i.h.bf16 %v13985_v43  ;;  %v13986_v34 = vunpack.i.l.bf16 %v13985_v43  ;;  %v13992_v54 = vunpack.i.h.bf16 %v13990_v47  ;;  %v13991_v56 = vunpack.i.l.bf16 %v13990_v47 }
 0x65a   : > { %13114 = vmatprep.subr.msk.bf16.mxu0 %vm16521_vm1, %v10974_v18  ;;  %3018 = vmatprep.mubr.bf16.mxu0 %v15353_v42 }
 0x65b   : > { %13115 = vmatpush3.bf16.msk.msra.mxu0 %vm16521_vm1, %v10974_v18  ;;  %3067 = vmatprep.mubr.bf16.mxu1 %v15355_v12  ;;  %v10980_v27 = vpack.c.bf16 %v13987_v33, %v13986_v34  ;;  %v10983_v60 = vpack.c.bf16 %v13992_v54, %v13991_v56 }
 0x65c   : > { %13116 = vmatprep.subr.msk.bf16.mxu0 %vm16521_vm1, %v10977_v48 }
 0x65f   : > { %13117 = vmatpush3.bf16.msk.msra.mxu0 %vm16521_vm1, %v10977_v48 }
 0x660   : > { %13118 = vmatprep.subr.msk.bf16.mxu0 %vm16521_vm1, %v10980_v27 }
 0x661   : > { %3019 = vmatmul.mubr.bf16.gmra.mrb[52].mxu0 %v15357_v50  ;;  %3068 = vmatmul.mubr.bf16.gmra.mrb[60].mxu1 %v15358_v51 }
 0x662   : > { %3075 = vmatprep.mubr.bf16.mxu1 %v15359_v58  ;;  %13122 = vmatprep.mubr.msk.bf16.mxu0 %vm1567_vm0, %v15361_v59 }
 0x663   : > { %13119 = vmatpush3.bf16.msk.msra.mxu0 %vm16521_vm1, %v10980_v27 }
 0x664   : > { %13120 = vmatprep.subr.msk.bf16.mxu0 %vm16521_vm1, %v10983_v60 }
 0x667   : > { %13121 = vmatpush3.bf16.msk.msra.mxu0 %vm16521_vm1, %v10983_v60 }
 0x669   : > { %3076 = vmatmul.mubr.bf16.gmra.mrb[64].mxu1 %v15362_v57  ;;  %v2818_v21 = vpop.permute.xlu0 %2817  ;;  %v2813_v19 = vpop.permute.xlu1 %2812 }
 0x66a   : > { %13123 = vmatmul.mubr.msk.bf16.vlgmr.msra.gmra.mrb[56].mxu0 %vm1567_vm0, %v15363_v61  ;;  %3083 = vmatprep.mubr.bf16.mxu1 %v15364_v62 }
 0x66b   : > { %13126 = vmatprep.mubr.msk.bf16.mxu0 %vm1567_vm0, %v15366_v63 }
 0x66d   : > { %v2828_v48 = vpop.permute.xlu0 %2827  ;;  %v2823_v33 = vpop.permute.xlu1 %2822 }
 0x671   : > { %3084 = vmatmul.mubr.bf16.gmra.mrb[68].mxu1 %v15367_v0 }
 0x672   : > { %13127 = vmatmul.mubr.msk.bf16.gmra.mrb[60].mxu0 %vm1567_vm0, %v15368_v52 }
 0x71c   : > { %v11945_v2 = vpop.f32.mrb[40].mxu0 }
 0x71d   : > { %v11946_v3 = vpop.f32.mrb[41].mxu0 }
 0x71e   : > { %v11947_v4 = vadd.f32 %v11946_v3, %v11945_v2  ;;  %v11948_v1 = vpop.f32.mrb[42].mxu0  ;;  %v2838_v2 = vpop.permute.xlu0 %2837 }
 0x71f   : > { %v11949_v5 = vpop.f32.mrb[43].mxu0  ;;  %v2833_v3 = vpop.permute.xlu1 %2832 }
 0x720   : > { %v11950_v6 = vadd.f32 %v11949_v5, %v11948_v1  ;;  %v2997_v7 = vadd.f32 %v11947_v4, %v2813_v19 }
 0x722   : > { %v3000_v40 = vadd.f32 %v11950_v6, %v2818_v21 }
 0x724   : > { %v11951_v10 = vpop.f32.mrb[44].mxu0 }
 0x725   : > { %v11952_v20 = vpop.f32.mrb[45].mxu0 }
 0x726   : > { %v11953_v31 = vadd.f32 %v11952_v20, %v11951_v10  ;;  %v11954_v36 = vpop.f32.mrb[46].mxu0 }
 0x727   : > { %v11955_v11 = vpop.f32.mrb[47].mxu0 }
 0x728   : > { %v11956_v15 = vadd.f32 %v11955_v11, %v11954_v36  ;;  %v3005_v54 = vadd.f32 %v11953_v31, %v2823_v33 }
 0x72a   : > { %v3008_v61 = vadd.f32 %v11956_v15, %v2828_v48 }
 0x72c   : > { %v11957_v8 = vpop.f32.mrb[48].mxu0  ;;  %v11985_v23 = vpop.f32.mrb[56].mxu1 }
 0x72d   : > { %v11958_v25 = vpop.f32.mrb[49].mxu0  ;;  %v11986_v13 = vpop.f32.mrb[57].mxu1 }
 0x72e   : > { %v11959_v29 = vadd.f32 %v11958_v25, %v11957_v8  ;;  %v11987_v32 = vadd.f32 %v11986_v13, %v11985_v23  ;;  %v11960_v26 = vpop.f32.mrb[50].mxu0  ;;  %v11988_v35 = vpop.f32.mrb[58].mxu1 }
 0x72f   : > { %v11961_v38 = vpop.f32.mrb[51].mxu0  ;;  %v11989_v39 = vpop.f32.mrb[59].mxu1 }
 0x730   : > { %v11962_v42 = vadd.f32 %v11961_v38, %v11960_v26  ;;  %v11990_v18 = vadd.f32 %v11989_v39, %v11988_v35  ;;  %v3062_v12 = vadd.f32 %v11987_v32, %v2997_v7  ;;  %v3013_v6 = vadd.f32 %v11959_v29, %v2833_v3  ;;  %v2848_v32 = vpop.permute.xlu0 %2847  ;;  %v2843_v26 = vpop.permute.xlu1 %2842 }
 0x732   : > { %v3065_v43 = vadd.f32 %v11990_v18, %v3000_v40  ;;  %v3016_v8 = vadd.f32 %v11962_v42, %v2838_v2 }
 0x734   : > { %v11963_v34 = vpop.f32.mrb[52].mxu0  ;;  %v11991_v47 = vpop.f32.mrb[60].mxu1 }
 0x735   : > { %v11964_v50 = vpop.f32.mrb[53].mxu0  ;;  %v11992_v51 = vpop.f32.mrb[61].mxu1 }
 0x736   : > { %v11965_v56 = vadd.f32 %v11964_v50, %v11963_v34  ;;  %v11993_v27 = vadd.f32 %v11992_v51, %v11991_v47  ;;  %v11966_v58 = vpop.f32.mrb[54].mxu0  ;;  %v11994_v59 = vpop.f32.mrb[62].mxu1 }
 0x737   : > { %v11967_v60 = vpop.f32.mrb[55].mxu0  ;;  %v11995_v57 = vpop.f32.mrb[63].mxu1 }
 0x738   : > { %v11968_v62 = vadd.f32 %v11967_v60, %v11966_v58  ;;  %v11996_v63 = vadd.f32 %v11995_v57, %v11994_v59  ;;  %v3070_v0 = vadd.f32 %v11993_v27, %v3005_v54  ;;  %v3021_v40 = vadd.f32 %v11965_v56, %v2843_v26 }
 0x73a   : > { %v3073_v52 = vadd.f32 %v11996_v63, %v3008_v61  ;;  %v3024_v29 = vadd.f32 %v11968_v62, %v2848_v32 }
 0x73c   : > { %v11997_v4 = vpop.f32.mrb[64].mxu1 }
 0x73d   : > { %v13124_v1 = vpop.f32.mrb[56].mxu0  ;;  %v11998_v5 = vpop.f32.mrb[65].mxu1 }
 0x73e   : > { %v3135_v10 = vadd.f32 %v13124_v1, %v3070_v0  ;;  %v11999_v20 = vadd.f32 %v11998_v5, %v11997_v4  ;;  %v3126_v31 = vpop.f32.mrb[57].mxu0  ;;  %v12000_v36 = vpop.f32.mrb[66].mxu1 }
 0x73f   : > { %v3127_v11 = vadd.f32 %v3126_v31, %v3062_v12  ;;  %v13125_v21 = vpop.f32.mrb[58].mxu0  ;;  %v12001_v19 = vpop.f32.mrb[67].mxu1  ;;  %v15371_v31 = vld [vmem:[#allocation12 + $0x4] ss:$20 sps:$4 sm:$0xff]  }
 0x740   : > { %v3138_v23 = vadd.f32 %v13125_v21, %v3073_v52  ;;  %v12002_v15 = vadd.f32 %v12001_v19, %v12000_v36  ;;  %v3129_v25 = vpop.f32.mrb[59].mxu0  ;;  %v3078_v13 = vadd.f32 %v11999_v20, %v3013_v6  ;;  %v3159_v35 = vmax.f32 %v3135_v10, 0.0  ;;  %3681 = vmatprep.mubr.bf16.mxu1 %v15371_v31  ;;  %v15377_v36 = vld [vmem:[#allocation12 + $0xc] ss:$20 sps:$4 sm:$0xff]   ;;  %v3492_v19 = vld [vmem:[%s20036_s10 + $0x18] sm:$0xff] }
 0x741   : > { %v3130_v7 = vadd.f32 %v3129_v25, %v3065_v43  ;;  %v3157_v18 = vmax.f32 %v3127_v11, 0.0  ;;  %3746 = vmatprep.mubr.bf16.mxu0 %v15377_v36  ;;  %v3490_v11 = vld [vmem:[%s20036_s10 + $0x8] sm:$0xff]  ;;  %v3489_v21 = vld [vmem:[%s20036_s10] sm:$0xff]  ;;  %v3496_v25 = vld [vmem:[%s20036_s10 + $0x38] sm:$0xff] }
 0x742   : > { %v3160_v38 = vmax.f32 %v3138_v23, 0.0  ;;  %v3081_v39 = vadd.f32 %v12002_v15, %v3016_v8  ;;  %v3491_v8 = vld [vmem:[%s20036_s10 + $0x10] sm:$0xff]  ;;  %v3494_v23 = vld [vmem:[%s20036_s10 + $0x28] sm:$0xff]  ;;  %v3493_v15 = vld [vmem:[%s20036_s10 + $0x20] sm:$0xff] }
 0x743   : > { %v3158_v48 = vmax.f32 %v3130_v7, 0.0 }
 0x744   : > { %v12003_v33 = vpop.f32.mrb[68].mxu1  ;;  %v13998_v34 = vpack.i.bf16 %v3160_v38, %v3159_v35  ;;  %v17043_v0 = vpack.c.bf16 %v3160_v38, %v3159_v35 }
 0x745   : > { %v13128_v12 = vpop.f32.mrb[60].mxu0  ;;  %v12004_v47 = vpop.f32.mrb[69].mxu1  ;;  %v14008_v50 = vpack.i.bf16 %v3158_v48, %v3157_v18  ;;  %v17039_v61 = vpack.c.bf16 %v3158_v48, %v3157_v18 }
 0x746   : > { %v12005_v42 = vadd.f32 %v12004_v47, %v12003_v33  ;;  %v3142_v51 = vpop.f32.mrb[61].mxu0  ;;  %13999 = vrot.lane.b32.xlu0 %v13998_v34, %s20031_s9  ;;  %13994 = vrot.lane.b32.xlu1 %v13998_v34, %s20032_s7  ;;  %v12006_v43 = vpop.f32.mrb[70].mxu1 }
 0x747   : > { %v3143_v54 = vadd.f32 %v3142_v51, %v3078_v13  ;;  %v13129_v27 = vpop.f32.mrb[62].mxu0  ;;  %v12007_v58 = vpop.f32.mrb[71].mxu1  ;;  %v3495_v13 = vld [vmem:[%s20036_s10 + $0x30] sm:$0xff] }
 0x748   : > { %v3086_v59 = vadd.f32 %v12005_v42, %v3021_v40  ;;  %v12008_v56 = vadd.f32 %v12007_v58, %v12006_v43  ;;  %v3145_v60 = vpop.f32.mrb[63].mxu0 }
 0x749   : > { %v3146_v57 = vadd.f32 %v3145_v60, %v3081_v39  ;;  %v3161_v52 = vmax.f32 %v3143_v54, 0.0 }
 0x74a   : > { %v3151_v62 = vadd.f32 %v13128_v12, %v3086_v59  ;;  %v3089_v63 = vadd.f32 %v12008_v56, %v3024_v29  ;;  %14009 = vrot.lane.b32.xlu0 %v14008_v50, %s20031_s9  ;;  %14004 = vrot.lane.b32.xlu1 %v14008_v50, %s20032_s7 }
 0x74b   : > { %v3162_v2 = vmax.f32 %v3146_v57, 0.0 }
 0x74c   : > { %v3163_v3 = vmax.f32 %v3151_v62, 0.0  ;;  %v3154_v4 = vadd.f32 %v13129_v27, %v3089_v63 }
 0x74d   : > { %v14043_v1 = vpack.i.bf16 %v3162_v2, %v3161_v52  ;;  %v17047_v6 = vpack.c.bf16 %v3162_v2, %v3161_v52 }
 0x74e   : > { %v3164_v5 = vmax.f32 %v3154_v4, 0.0  ;;  %14019 = vrot.lane.b32.xlu0 %v14008_v50, %s20026_s18  ;;  %14014 = vrot.lane.b32.xlu1 %v14008_v50, %s20025_s15 }
 0x750   : > { %v14028_v10 = vpack.i.bf16 %v3164_v5, %v3163_v3  ;;  %v17051_v20 = vpack.c.bf16 %v3164_v5, %v3163_v3 }
 0x752   : > { %14029 = vrot.lane.b32.xlu0 %v14028_v10, %s20031_s9  ;;  %14024 = vrot.lane.b32.xlu1 %v14028_v10, %s20032_s7 }
 0x756   : > { %14044 = vrot.lane.b32.xlu0 %v14043_v1, %s20031_s9  ;;  %14034 = vrot.lane.b32.xlu1 %v14043_v1, %s20032_s7 }
 0x75a   : > { %14049 = vrot.lane.b32.xlu0 %v13998_v34, %s20025_s15  ;;  %14039 = vrot.lane.b32.xlu1 %v14008_v50, %s20033_s26 }
 0x75e   : > { %14059 = vrot.lane.b32.xlu0 %v13998_v34, %s20033_s26  ;;  %14054 = vrot.lane.b32.xlu1 %v13998_v34, %s20026_s18 }
 0x762   : > { %14069 = vrot.lane.b32.xlu0 %v14043_v1, %s20026_s18  ;;  %14064 = vrot.lane.b32.xlu1 %v14043_v1, %s20025_s15 }
 0x766   : > { %14074 = vrot.lane.b32.xlu0 %v14028_v10, %s20025_s15  ;;  %14079 = vrot.lane.b32.xlu1 %v14043_v1, %s20033_s26 }
 0x76a   : > { %14089 = vrot.lane.b32.xlu0 %v14028_v10, %s20033_s26  ;;  %14084 = vrot.lane.b32.xlu1 %v14028_v10, %s20026_s18 }
 0x76e   : > { %14099 = vrot.lane.b32.xlu0 %v14008_v50, %s20027_s29  ;;  %14094 = vrot.lane.b32.xlu1 %v14008_v50, %s20028_s28 }
 0x772   : > { %14109 = vrot.lane.b32.xlu0 %v13998_v34, %s20027_s29  ;;  %14104 = vrot.lane.b32.xlu1 %v13998_v34, %s20028_s28 }
 0x776   : > { %14124 = vrot.lane.b32.xlu0 %v14043_v1, %s20027_s29  ;;  %14114 = vrot.lane.b32.xlu1 %v14043_v1, %s20028_s28 }
 0x77a   : > { %14129 = vrot.lane.b32.xlu0 %v14028_v10, %s20027_s29  ;;  %14119 = vrot.lane.b32.xlu1 %v14028_v10, %s20028_s28 }
 0x77e   : > { %14139 = vrot.lane.b32.xlu0 %v13998_v34, %s20029_s0  ;;  %14134 = vrot.lane.b32.xlu1 %v14008_v50, %s20029_s0 }
 0x782   : > { %14149 = vrot.lane.b32.xlu0 %v14028_v10, %s20029_s0  ;;  %14144 = vrot.lane.b32.xlu1 %v14043_v1, %s20029_s0 }
 0x786   : > { %3504 = vperm.xlu0 %13511, %v3490_v11   ;;  %3499 = vperm.xlu1 %13512, %v3489_v21  }
 0x78a   : > { %3514 = vperm.xlu0 %13511, %v3492_v19   ;;  %3509 = vperm.xlu1 %13512, %v3491_v8  }
 0x78e   : > { %3524 = vperm.xlu0 %13511, %v3494_v23   ;;  %3519 = vperm.xlu1 %13512, %v3493_v15  }
 0x792   : > { %3534 = vperm.xlu0 %13511, %v3496_v25   ;;  %3529 = vperm.xlu1 %13512, %v3495_v13  }
 0x7b8   : > { %v14000_v7 = vpop.permute.xlu0 %13999  ;;  %v13995_v32 = vpop.permute.xlu1 %13994 }
 0x7b9   : > { %v13997_v26 = vunpack.i.h.bf16 %v13995_v32  ;;  %v13996_v35 = vunpack.i.l.bf16 %v13995_v32  ;;  %v14002_v12 = vunpack.i.h.bf16 %v14000_v7  ;;  %v14001_v47 = vunpack.i.l.bf16 %v14000_v7 }
 0x7bb   : > { %v11013_v51 = vpack.c.bf16 %v13997_v26, %v13996_v35  ;;  %v10989_v58 = vpack.c.bf16 %v14002_v12, %v14001_v47 }
 0x7bc   : > { %v14010_v38 = vpop.permute.xlu0 %14009  ;;  %v14005_v39 = vpop.permute.xlu1 %14004 }
 0x7bd   : > { %v14012_v40 = vunpack.i.h.bf16 %v14010_v38  ;;  %v14011_v29 = vunpack.i.l.bf16 %v14010_v38  ;;  %v14007_v18 = vunpack.i.h.bf16 %v14005_v39  ;;  %v14006_v48 = vunpack.i.l.bf16 %v14005_v39 }
 0x7bf   : > { %v10986_v33 = vpack.c.bf16 %v14012_v40, %v14011_v29  ;;  %v11010_v34 = vpack.c.bf16 %v14007_v18, %v14006_v48 }
 0x7c0   : > { %v14020_v50 = vpop.permute.xlu0 %14019  ;;  %v14015_v42 = vpop.permute.xlu1 %14014 }
 0x7c1   : > { %v14022_v43 = vunpack.i.h.bf16 %v14020_v50  ;;  %v14021_v54 = vunpack.i.l.bf16 %v14020_v50  ;;  %12017 = vmatprep.subr.msk.bf16.mxu1 %vm16472_vm6, %v11010_v34  ;;  %v14017_v21 = vunpack.i.h.bf16 %v14015_v42  ;;  %v14016_v19 = vunpack.i.l.bf16 %v14015_v42 }
 0x7c2   : > { %12018 = vmatpush3.bf16.msk.msra.mxu1 %vm16462_vm2, %v10986_v33 }
 0x7c3   : > { %v11046_v27 = vpack.c.bf16 %v14022_v43, %v14021_v54  ;;  %12019 = vmatprep.subr.msk.bf16.mxu1 %vm16472_vm6, %v11013_v51  ;;  %v11022_v26 = vpack.c.bf16 %v14017_v21, %v14016_v19 }
 0x7c4   : > { %v14030_v59 = vpop.permute.xlu0 %14029  ;;  %v14025_v56 = vpop.permute.xlu1 %14024 }
 0x7c5   : > { %12057 = vmatprep.subr.msk.bf16.mxu0 %vm16499_vm12, %v11046_v27  ;;  %v14027_v60 = vunpack.i.h.bf16 %v14025_v56  ;;  %v14026_v57 = vunpack.i.l.bf16 %v14025_v56  ;;  %v14032_v1 = vunpack.i.h.bf16 %v14030_v59  ;;  %v14031_v5 = vunpack.i.l.bf16 %v14030_v59 }
 0x7c6   : > { %12020 = vmatpush3.bf16.msk.msra.mxu1 %vm16462_vm2, %v10989_v58  ;;  %12058 = vmatpush3.bf16.msra.mxu0 %v17039_v61 }
 0x7c7   : > { %v11019_v8 = vpack.c.bf16 %v14027_v60, %v14026_v57  ;;  %v10995_v61 = vpack.c.bf16 %v14032_v1, %v14031_v5 }
 0x7c8   : > { %v14045_v62 = vpop.permute.xlu0 %14044  ;;  %v14035_v63 = vpop.permute.xlu1 %14034 }
 0x7c9   : > { %v14047_v52 = vunpack.i.h.bf16 %v14045_v62  ;;  %v14046_v2 = vunpack.i.l.bf16 %v14045_v62  ;;  %v14037_v3 = vunpack.i.h.bf16 %v14035_v63  ;;  %v14036_v4 = vunpack.i.l.bf16 %v14035_v63 }
 0x7cb   : > { %v10992_v10 = vpack.c.bf16 %v14047_v52, %v14046_v2  ;;  %v11016_v31 = vpack.c.bf16 %v14037_v3, %v14036_v4 }
 0x7cc   : > { %v14050_v36 = vpop.permute.xlu0 %14049  ;;  %v14040_v11 = vpop.permute.xlu1 %14039 }
 0x7cd   : > { %12021 = vmatprep.subr.msk.bf16.mxu1 %vm16472_vm6, %v11016_v31  ;;  %v14052_v23 = vunpack.i.h.bf16 %v14050_v36  ;;  %v14051_v15 = vunpack.i.l.bf16 %v14050_v36  ;;  %v14042_v25 = vunpack.i.h.bf16 %v14040_v11  ;;  %v14041_v13 = vunpack.i.l.bf16 %v14040_v11 }
 0x7ce   : > { %12022 = vmatpush3.bf16.msk.msra.mxu1 %vm16462_vm2, %v10992_v10 }
 0x7cf   : > { %12023 = vmatprep.subr.msk.bf16.mxu1 %vm16472_vm6, %v11019_v8  ;;  %v11025_v40 = vpack.c.bf16 %v14052_v23, %v14051_v15  ;;  %v10998_v29 = vpack.c.bf16 %v14042_v25, %v14041_v13  ;;  %v15369_v8 = vld [vmem:[#allocation12] ss:$20 sps:$4 sm:$0xff]  }
 0x7d0   : > { %v14060_v7 = vpop.permute.xlu0 %14059  ;;  %v14055_v32 = vpop.permute.xlu1 %14054 }
 0x7d1   : > { %v14057_v35 = vunpack.i.h.bf16 %v14055_v32  ;;  %v14056_v38 = vunpack.i.l.bf16 %v14055_v32  ;;  %v14062_v18 = vunpack.i.h.bf16 %v14060_v7  ;;  %v14061_v48 = vunpack.i.l.bf16 %v14060_v7 }
 0x7d2   : > { %12024 = vmatpush3.bf16.msk.msra.mxu1 %vm16462_vm2, %v10995_v61  ;;  %v15372_v61 = vld [vmem:[#allocation12 + $0x2c] ss:$20 sps:$4 sm:$0xff]  }
 0x7d3   : > { %v11049_v39 = vpack.c.bf16 %v14057_v35, %v14056_v38  ;;  %12025 = vmatprep.subr.msk.bf16.mxu1 %vm16480_vm8, %v11022_v26  ;;  %v11001_v43 = vpack.c.bf16 %v14062_v18, %v14061_v48 }
 0x7d4   : > { %v14070_v33 = vpop.permute.xlu0 %14069  ;;  %v14065_v34 = vpop.permute.xlu1 %14064 }
 0x7d5   : > { %v14072_v12 = vunpack.i.h.bf16 %v14070_v33  ;;  %v14071_v47 = vunpack.i.l.bf16 %v14070_v33  ;;  %v14067_v50 = vunpack.i.h.bf16 %v14065_v34  ;;  %v14066_v42 = vunpack.i.l.bf16 %v14065_v34  ;;  %12059 = vmatprep.subr.msk.bf16.mxu0 %vm16499_vm12, %v11049_v39  ;;  %v15374_v34 = vld [vmem:[#allocation12 + $0x28] ss:$20 sps:$4 sm:$0xff]  }
 0x7d6   : > { %12026 = vmatpush3.bf16.msk.msra.mxu1 %vm16467_vm4, %v10998_v29  ;;  %12060 = vmatpush3.bf16.msra.mxu0 %v17043_v0 }
 0x7d7   : > { %v11052_v51 = vpack.c.bf16 %v14072_v12, %v14071_v47  ;;  %12027 = vmatprep.subr.msk.bf16.mxu1 %vm16480_vm8, %v11025_v40  ;;  %v11028_v54 = vpack.c.bf16 %v14067_v50, %v14066_v42  ;;  %v15378_v12 = vld [vmem:[#allocation12 + $0x54] ss:$20 sps:$4 sm:$0xff]  }
 0x7d8   : > { %v14075_v27 = vpop.permute.xlu0 %14074  ;;  %v14080_v58 = vpop.permute.xlu1 %14079 }
 0x7d9   : > { %v14077_v59 = vunpack.i.h.bf16 %v14075_v27  ;;  %v14076_v56 = vunpack.i.l.bf16 %v14075_v27  ;;  %v14082_v60 = vunpack.i.h.bf16 %v14080_v58  ;;  %v14081_v57 = vunpack.i.l.bf16 %v14080_v58  ;;  %12061 = vmatprep.subr.msk.bf16.mxu0 %vm16499_vm12, %v11052_v51 }
 0x7da   : > { %12028 = vmatpush3.bf16.msk.msra.mxu1 %vm16467_vm4, %v11001_v43  ;;  %12062 = vmatpush3.bf16.msra.mxu0 %v17047_v6 }
 0x7db   : > { %v11004_v0 = vpack.c.bf16 %v14082_v60, %v14081_v57  ;;  %12029 = vmatprep.subr.msk.bf16.mxu1 %vm16480_vm8, %v11028_v54  ;;  %v11031_v62 = vpack.c.bf16 %v14077_v59, %v14076_v56 }
 0x7dc   : > { %v14090_v63 = vpop.permute.xlu0 %14089  ;;  %v14085_v52 = vpop.permute.xlu1 %14084 }
 0x7dd   : > { %v14092_v2 = vunpack.i.h.bf16 %v14090_v63  ;;  %v14091_v3 = vunpack.i.l.bf16 %v14090_v63  ;;  %v14087_v4 = vunpack.i.h.bf16 %v14085_v52  ;;  %v14086_v1 = vunpack.i.l.bf16 %v14085_v52  ;;  %v15375_v63 = vld [vmem:[#allocation12 + $0x8] ss:$20 sps:$4 sm:$0xff]   ;;  %v15380_v52 = vld [vmem:[#allocation12 + $0x50] ss:$20 sps:$4 sm:$0xff]  }
 0x7de   : > { %12030 = vmatpush3.bf16.msk.msra.mxu1 %vm16467_vm4, %v11004_v0 }
 0x7df   : > { %v11007_v5 = vpack.c.bf16 %v14092_v2, %v14091_v3  ;;  %v11055_v10 = vpack.c.bf16 %v14087_v4, %v14086_v1  ;;  %12031 = vmatprep.subr.msk.bf16.mxu1 %vm16480_vm8, %v11031_v62  ;;  %v15381_v4 = vld [vmem:[#allocation12 + $0x7c] ss:$20 sps:$4 sm:$0xff]  }
 0x7e0   : > { %v14100_v6 = vpop.permute.xlu0 %14099  ;;  %v14095_v31 = vpop.permute.xlu1 %14094 }
 0x7e1   : > { %v14102_v36 = vunpack.i.h.bf16 %v14100_v6  ;;  %v14101_v11 = vunpack.i.l.bf16 %v14100_v6  ;;  %v14097_v21 = vunpack.i.h.bf16 %v14095_v31  ;;  %v14096_v19 = vunpack.i.l.bf16 %v14095_v31  ;;  %12063 = vmatprep.subr.msk.bf16.mxu0 %vm16499_vm12, %v11055_v10 }
 0x7e2   : > { %12032 = vmatpush3.bf16.msk.msra.mxu1 %vm16467_vm4, %v11007_v5  ;;  %12064 = vmatpush3.bf16.msra.mxu0 %v17051_v20  ;;  %v15383_v5 = vld [vmem:[#allocation12 + $0x34] ss:$20 sps:$4 sm:$0xff]  }
 0x7e3   : > { %v11034_v23 = vpack.c.bf16 %v14102_v36, %v14101_v11  ;;  %v11058_v15 = vpack.c.bf16 %v14097_v21, %v14096_v19  ;;  %v15385_v21 = vld [vmem:[#allocation12 + $0x78] ss:$20 sps:$4 sm:$0xff]   ;;  %v15386_v19 = vld [vmem:[#allocation12 + $0x30] ss:$20 sps:$4 sm:$0xff]  }
 0x7e4   : > { %v14110_v25 = vpop.permute.xlu0 %14109  ;;  %v14105_v13 = vpop.permute.xlu1 %14104 }
 0x7e5   : > { %v14112_v7 = vunpack.i.h.bf16 %v14110_v25  ;;  %v14111_v32 = vunpack.i.l.bf16 %v14110_v25  ;;  %v14107_v26 = vunpack.i.h.bf16 %v14105_v13  ;;  %v14106_v35 = vunpack.i.l.bf16 %v14105_v13  ;;  %3682 = vmatmul.mubr.bf16.vlgmr.msra.gmra.mrb[72].mxu1 %v15369_v8  ;;  %12065 = vmatprep.subr.msk.bf16.mxu0 %vm16514_vm14, %v11058_v15  ;;  %v15387_v15 = vld [vmem:[#allocation12 + $0x5c] ss:$20 sps:$4 sm:$0xff]  }
 0x7e6   : > { %12066 = vmatpush3.bf16.msk.msra.mxu0 %vm16491_vm10, %v11034_v23  ;;  %3689 = vmatprep.mubr.bf16.mxu1 %v15372_v61  ;;  %v15389_v25 = vld [vmem:[#allocation12 + $0x10] ss:$20 sps:$4 sm:$0xff]  }
 0x7e7   : > { %v11037_v38 = vpack.c.bf16 %v14112_v7, %v14111_v32  ;;  %v11061_v39 = vpack.c.bf16 %v14107_v26, %v14106_v35  ;;  %v15390_v7 = vld [vmem:[#allocation12 + $0x58] ss:$20 sps:$4 sm:$0xff]   ;;  %v15394_v35 = vld [vmem:[#allocation12 + $0x60] ss:$20 sps:$4 sm:$0xff]  }
 0x7e8   : > { %v14125_v20 = vpop.permute.xlu0 %14124  ;;  %v14115_v40 = vpop.permute.xlu1 %14114  ;;  %v15391_v32 = vld [vmem:[#allocation12 + $0x38] ss:$20 sps:$4 sm:$0xff]  }
 0x7e9   : > { %v14127_v29 = vunpack.i.h.bf16 %v14125_v20  ;;  %v14126_v18 = vunpack.i.l.bf16 %v14125_v20  ;;  %v14117_v48 = vunpack.i.h.bf16 %v14115_v40  ;;  %v14116_v33 = vunpack.i.l.bf16 %v14115_v40  ;;  %12067 = vmatprep.subr.msk.bf16.mxu0 %vm16514_vm14, %v11061_v39  ;;  %v15392_v26 = vld [vmem:[#allocation12 + $0x84] ss:$20 sps:$4 sm:$0xff]   ;;  %v15396_v39 = vld [vmem:[#allocation12 + $0x88] ss:$20 sps:$4 sm:$0xff]  }
 0x7ea   : > { %12068 = vmatpush3.bf16.msk.msra.mxu0 %vm16491_vm10, %v11037_v38  ;;  %v15395_v38 = vld [vmem:[#allocation12 + $0x80] ss:$20 sps:$4 sm:$0xff]  }
 0x7eb   : > { %v11040_v47 = vpack.c.bf16 %v14127_v29, %v14126_v18  ;;  %v11064_v50 = vpack.c.bf16 %v14117_v48, %v14116_v33 }
 0x7ec   : > { %v14130_v42 = vpop.permute.xlu0 %14129  ;;  %v14120_v51 = vpop.permute.xlu1 %14119 }
 0x7ed   : > { %v14132_v43 = vunpack.i.h.bf16 %v14130_v42  ;;  %v14131_v54 = vunpack.i.l.bf16 %v14130_v42  ;;  %v14122_v27 = vunpack.i.h.bf16 %v14120_v51  ;;  %v14121_v58 = vunpack.i.l.bf16 %v14120_v51  ;;  %3690 = vmatmul.mubr.bf16.gmra.mrb[76].mxu1 %v15374_v34  ;;  %12069 = vmatprep.subr.msk.bf16.mxu0 %vm16514_vm14, %v11064_v50 }
 0x7ee   : > { %12070 = vmatpush3.bf16.msk.msra.mxu0 %vm16491_vm10, %v11040_v47  ;;  %3697 = vmatprep.mubr.bf16.mxu1 %v15378_v12 }
 0x7ef   : > { %v11043_v59 = vpack.c.bf16 %v14132_v43, %v14131_v54  ;;  %v11067_v56 = vpack.c.bf16 %v14122_v27, %v14121_v58 }
 0x7f0   : > { %v14140_v60 = vpop.permute.xlu0 %14139  ;;  %v14135_v57 = vpop.permute.xlu1 %14134 }
 0x7f1   : > { %v14137_v0 = vunpack.i.h.bf16 %v14135_v57  ;;  %v14136_v62 = vunpack.i.l.bf16 %v14135_v57  ;;  %12071 = vmatprep.subr.msk.bf16.mxu0 %vm16514_vm14, %v11067_v56  ;;  %v14142_v2 = vunpack.i.h.bf16 %v14140_v60  ;;  %v14141_v3 = vunpack.i.l.bf16 %v14140_v60 }
 0x7f2   : > { %12072 = vmatpush3.bf16.msk.msra.mxu0 %vm16491_vm10, %v11043_v59 }
 0x7f3   : > { %v11070_v1 = vpack.c.bf16 %v14137_v0, %v14136_v62  ;;  %v11073_v6 = vpack.c.bf16 %v14142_v2, %v14141_v3 }
 0x7f4   : > { %v14145_v10 = vpop.permute.xlu1 %14144  ;;  %v14150_v11 = vpop.permute.xlu0 %14149 }
 0x7f5   : > { %3698 = vmatmul.mubr.bf16.gmra.mrb[80].mxu1 %v15380_v52  ;;  %3747 = vmatmul.mubr.bf16.vlgmr.msra.gmra.mrb[64].mxu0 %v15375_v63  ;;  %v14147_v31 = vunpack.i.h.bf16 %v14145_v10  ;;  %v14146_v36 = vunpack.i.l.bf16 %v14145_v10  ;;  %v14152_v8 = vunpack.i.h.bf16 %v14150_v11  ;;  %v14151_v61 = vunpack.i.l.bf16 %v14150_v11 }
 0x7f6   : > { %13130 = vmatprep.subr.msk.bf16.mxu1 %vm16521_vm1, %v11070_v1  ;;  %3705 = vmatprep.mubr.bf16.mxu1 %v15381_v4 }
 0x7f7   : > { %13131 = vmatpush3.bf16.msk.msra.mxu1 %vm16521_vm1, %v11070_v1  ;;  %3754 = vmatprep.mubr.bf16.mxu0 %v15383_v5  ;;  %v11076_v23 = vpack.c.bf16 %v14147_v31, %v14146_v36  ;;  %v11079_v13 = vpack.c.bf16 %v14152_v8, %v14151_v61 }
 0x7f8   : > { %13132 = vmatprep.subr.msk.bf16.mxu1 %vm16521_vm1, %v11073_v6 }
 0x7fb   : > { %13133 = vmatpush3.bf16.msk.msra.mxu1 %vm16521_vm1, %v11073_v6 }
 0x7fc   : > { %13134 = vmatprep.subr.msk.bf16.mxu1 %vm16521_vm1, %v11076_v23 }
 0x7fd   : > { %3706 = vmatmul.mubr.bf16.gmra.mrb[84].mxu1 %v15385_v21  ;;  %3755 = vmatmul.mubr.bf16.gmra.mrb[68].mxu0 %v15386_v19 }
 0x7fe   : > { %3762 = vmatprep.mubr.bf16.mxu0 %v15387_v15  ;;  %13138 = vmatprep.mubr.msk.bf16.mxu1 %vm1567_vm0, %v15389_v25 }
 0x7ff   : > { %13135 = vmatpush3.bf16.msk.msra.mxu1 %vm16521_vm1, %v11076_v23 }
 0x800   : > { %13136 = vmatprep.subr.msk.bf16.mxu1 %vm16521_vm1, %v11079_v13 }
 0x803   : > { %13137 = vmatpush3.bf16.msk.msra.mxu1 %vm16521_vm1, %v11079_v13 }
 0x805   : > { %3763 = vmatmul.mubr.bf16.gmra.mrb[72].mxu0 %v15390_v7  ;;  %v3505_v43 = vpop.permute.xlu0 %3504  ;;  %v3500_v54 = vpop.permute.xlu1 %3499 }
 0x806   : > { %13139 = vmatmul.mubr.msk.bf16.vlgmr.msra.gmra.mrb[88].mxu1 %vm1567_vm0, %v15391_v32  ;;  %3770 = vmatprep.mubr.bf16.mxu0 %v15392_v26 }
 0x807   : > { %13142 = vmatprep.mubr.msk.bf16.mxu1 %vm1567_vm0, %v15394_v35 }
 0x809   : > { %v3515_v6 = vpop.permute.xlu0 %3514  ;;  %v3510_v31 = vpop.permute.xlu1 %3509 }
 0x80d   : > { %3771 = vmatmul.mubr.bf16.gmra.mrb[76].mxu0 %v15395_v38 }
 0x80e   : > { %13143 = vmatmul.mubr.msk.bf16.gmra.mrb[92].mxu1 %vm1567_vm0, %v15396_v39 }
 0x8b8   : > { %v12033_v20 = vpop.f32.mrb[72].mxu1 }
 0x8b9   : > { %v12034_v40 = vpop.f32.mrb[73].mxu1 }
 0x8ba   : > { %v12035_v29 = vadd.f32 %v12034_v40, %v12033_v20  ;;  %v12036_v18 = vpop.f32.mrb[74].mxu1  ;;  %v3525_v20 = vpop.permute.xlu0 %3524 }
 0x8bb   : > { %v12037_v48 = vpop.f32.mrb[75].mxu1  ;;  %v3520_v40 = vpop.permute.xlu1 %3519 }
 0x8bc   : > { %v12038_v33 = vadd.f32 %v12037_v48, %v12036_v18  ;;  %v3684_v63 = vadd.f32 %v12035_v29, %v3500_v54 }
 0x8be   : > { %v3687_v5 = vadd.f32 %v12038_v33, %v3505_v43 }
 0x8c0   : > { %v12039_v34 = vpop.f32.mrb[76].mxu1 }
 0x8c1   : > { %v12040_v12 = vpop.f32.mrb[77].mxu1 }
 0x8c2   : > { %v12041_v47 = vadd.f32 %v12040_v12, %v12039_v34  ;;  %v12042_v50 = vpop.f32.mrb[78].mxu1 }
 0x8c3   : > { %v12043_v42 = vpop.f32.mrb[79].mxu1 }
 0x8c4   : > { %v12044_v51 = vadd.f32 %v12043_v42, %v12042_v50  ;;  %v3692_v25 = vadd.f32 %v12041_v47, %v3510_v31 }
 0x8c6   : > { %v3695_v38 = vadd.f32 %v12044_v51, %v3515_v6 }
 0x8c8   : > { %v12045_v27 = vpop.f32.mrb[80].mxu1  ;;  %v12073_v58 = vpop.f32.mrb[64].mxu0 }
 0x8c9   : > { %v12046_v59 = vpop.f32.mrb[81].mxu1  ;;  %v12074_v56 = vpop.f32.mrb[65].mxu0 }
 0x8ca   : > { %v12047_v60 = vadd.f32 %v12046_v59, %v12045_v27  ;;  %v12075_v57 = vadd.f32 %v12074_v56, %v12073_v58  ;;  %v12048_v0 = vpop.f32.mrb[82].mxu1  ;;  %v12076_v62 = vpop.f32.mrb[66].mxu0 }
 0x8cb   : > { %v12049_v52 = vpop.f32.mrb[83].mxu1  ;;  %v12077_v2 = vpop.f32.mrb[67].mxu0 }
 0x8cc   : > { %v12050_v3 = vadd.f32 %v12049_v52, %v12048_v0  ;;  %v12078_v4 = vadd.f32 %v12077_v2, %v12076_v62  ;;  %v3749_v1 = vadd.f32 %v12075_v57, %v3684_v63  ;;  %v3700_v42 = vadd.f32 %v12047_v60, %v3520_v40  ;;  %v3535_v2 = vpop.permute.xlu0 %3534  ;;  %v3530_v60 = vpop.permute.xlu1 %3529 }
 0x8ce   : > { %v3752_v10 = vadd.f32 %v12078_v4, %v3687_v5  ;;  %v3703_v27 = vadd.f32 %v12050_v3, %v3525_v20 }
 0x8d0   : > { %v12051_v36 = vpop.f32.mrb[84].mxu1  ;;  %v12079_v11 = vpop.f32.mrb[68].mxu0 }
 0x8d1   : > { %v12052_v21 = vpop.f32.mrb[85].mxu1  ;;  %v12080_v19 = vpop.f32.mrb[69].mxu0 }
 0x8d2   : > { %v12053_v8 = vadd.f32 %v12052_v21, %v12051_v36  ;;  %v12081_v61 = vadd.f32 %v12080_v19, %v12079_v11  ;;  %v12054_v23 = vpop.f32.mrb[86].mxu1  ;;  %v12082_v15 = vpop.f32.mrb[70].mxu0 }
 0x8d3   : > { %v12055_v13 = vpop.f32.mrb[87].mxu1  ;;  %v12083_v7 = vpop.f32.mrb[71].mxu0 }
 0x8d4   : > { %v12056_v32 = vadd.f32 %v12055_v13, %v12054_v23  ;;  %v12084_v26 = vadd.f32 %v12083_v7, %v12082_v15  ;;  %v3757_v35 = vadd.f32 %v12081_v61, %v3692_v25  ;;  %v3708_v3 = vadd.f32 %v12053_v8, %v3530_v60  ;;  %v4222_v60 = vld [vmem:[%s19899_s12 + $0x70] sm:$0xff] }
 0x8d6   : > { %v3760_v39 = vadd.f32 %v12084_v26, %v3695_v38  ;;  %v3711_v31 = vadd.f32 %v12056_v32, %v3535_v2  ;;  %v4220_v2 = vld [vmem:[%s19899_s12 + $0x60] sm:$0xff] }
 0x8d8   : > { %v12085_v29 = vpop.f32.mrb[72].mxu0 }
 0x8d9   : > { %v13140_v18 = vpop.f32.mrb[88].mxu1  ;;  %v12086_v48 = vpop.f32.mrb[73].mxu0 }
 0x8da   : > { %v3822_v33 = vadd.f32 %v13140_v18, %v3757_v35  ;;  %v12087_v34 = vadd.f32 %v12086_v48, %v12085_v29  ;;  %v3813_v12 = vpop.f32.mrb[89].mxu1  ;;  %v12088_v50 = vpop.f32.mrb[74].mxu0 }
 0x8db   : > { %v3814_v43 = vadd.f32 %v3813_v12, %v3749_v1  ;;  %v13141_v54 = vpop.f32.mrb[90].mxu1  ;;  %v12089_v47 = vpop.f32.mrb[75].mxu0 }
 0x8dc   : > { %v3846_v58 = vadd.f32 %v3822_v33, %v16868_v44  ;;  %v3825_v59 = vadd.f32 %v13141_v54, %v3760_v39  ;;  %v12090_v56 = vadd.f32 %v12089_v47, %v12088_v50  ;;  %v3816_v51 = vpop.f32.mrb[91].mxu1  ;;  %v3765_v57 = vadd.f32 %v12087_v34, %v3700_v42  ;;  %v15413_v42 = vld [vmem:[%s19898_s11 + $0xc] ss:$20 sps:$4 sm:$0xff]   ;;  %v4211_v47 = vld [vmem:[%s19899_s12 + $0x18] sm:$0xff] }
 0x8dd   : > { %v3844_v0 = vadd.f32 %v3814_v43, %v16877_v28  ;;  %v3817_v62 = vadd.f32 %v3816_v51, %v3752_v10  ;;  %4657 = vmatprep.mubr.bf16.mxu1 %v15413_v42  ;;  %v4209_v43 = vld [vmem:[%s19899_s12 + $0x8] sm:$0xff]  ;;  %v4208_v54 = vld [vmem:[%s19899_s12] sm:$0xff]  ;;  %v4214_v51 = vld [vmem:[%s19899_s12 + $0x30] sm:$0xff] }
 0x8de   : > { %v3847_v63 = vadd.f32 %v3825_v59, %v16871_v9  ;;  %v3768_v52 = vadd.f32 %v12090_v56, %v3703_v27  ;;  %v3854_v1 = vmax.f32 %v3846_v58, 0.0  ;;  %v4210_v27 = vld [vmem:[%s19899_s12 + $0x10] sm:$0xff]  ;;  %v4213_v58 = vld [vmem:[%s19899_s12 + $0x28] sm:$0xff]  ;;  %v4212_v59 = vld [vmem:[%s19899_s12 + $0x20] sm:$0xff] }
 0x8df   : > { %v3845_v4 = vadd.f32 %v3817_v62, %v16873_v14  ;;  %v3852_v44 = vmax.f32 %v3844_v0, 0.0  ;;  %v4215_v56 = vld [vmem:[%s19899_s12 + $0x38] sm:$0xff]  ;;  %v4216_v0 = vld [vmem:[%s19899_s12 + $0x40] sm:$0xff] }
 0x8e0   : > { %v3855_v5 = vmax.f32 %v3847_v63, 0.0  ;;  %v12091_v6 = vpop.f32.mrb[76].mxu0  ;;  %v4219_v62 = vld [vmem:[%s19899_s12 + $0x58] sm:$0xff]  ;;  %v4218_v63 = vld [vmem:[%s19899_s12 + $0x50] sm:$0xff] }
 0x8e1   : > { %v3853_v36 = vmax.f32 %v3845_v4, 0.0  ;;  %v13144_v11 = vpop.f32.mrb[92].mxu1  ;;  %v12092_v21 = vpop.f32.mrb[77].mxu0  ;;  %v4223_v4 = vld [vmem:[%s19899_s12 + $0x78] sm:$0xff] }
 0x8e2   : > { %v12093_v19 = vadd.f32 %v12092_v21, %v12091_v6  ;;  %v3829_v61 = vpop.f32.mrb[93].mxu1  ;;  %v12094_v28 = vpop.f32.mrb[78].mxu0  ;;  %v14168_v10 = vpack.i.bf16 %v3855_v5, %v3854_v1 }
 0x8e3   : > { %v3830_v23 = vadd.f32 %v3829_v61, %v3765_v57  ;;  %v13145_v9 = vpop.f32.mrb[94].mxu1  ;;  %v12095_v15 = vpop.f32.mrb[79].mxu0  ;;  %v14163_v25 = vpack.i.bf16 %v3853_v36, %v3852_v44  ;;  %v17192_v18 = vpack.c.bf16 %v3853_v36, %v3852_v44  ;;  %v4217_v57 = vld [vmem:[%s19899_s12 + $0x48] sm:$0xff] }
 0x8e4   : > { %v3773_v13 = vadd.f32 %v12093_v19, %v3708_v3  ;;  %v12096_v14 = vadd.f32 %v12095_v15, %v12094_v28  ;;  %v3832_v7 = vpop.f32.mrb[95].mxu1 }
 0x8e5   : > { %v3848_v26 = vadd.f32 %v3830_v23, %v16899_v49  ;;  %v3833_v35 = vadd.f32 %v3832_v7, %v3768_v52  ;;  %14164 = vrot.lane.b32.xlu0 %v14163_v25, %s20031_s9  ;;  %14154 = vrot.lane.b32.xlu1 %v14163_v25, %s20032_s7  ;;  %v17194_v49 = vpack.c.bf16 %v3855_v5, %v3854_v1  ;;  %v4221_v52 = vld [vmem:[%s19899_s12 + $0x68] sm:$0xff] }
 0x8e6   : > { %v3838_v8 = vadd.f32 %v13144_v11, %v3773_v13  ;;  %v3776_v32 = vadd.f32 %v12096_v14, %v3711_v31 }
 0x8e7   : > { %v3856_v38 = vmax.f32 %v3848_v26, 0.0  ;;  %v3849_v39 = vadd.f32 %v3833_v35, %v16895_v46 }
 0x8e8   : > { %v3850_v20 = vadd.f32 %v3838_v8, %v16888_v24  ;;  %v3841_v40 = vadd.f32 %v13145_v9, %v3776_v32 }
 0x8e9   : > { %v3857_v29 = vmax.f32 %v3849_v39, 0.0  ;;  %14169 = vrot.lane.b32.xlu0 %v14168_v10, %s20031_s9  ;;  %14159 = vrot.lane.b32.xlu1 %v14168_v10, %s20032_s7 }
 0x8ea   : > { %v3858_v48 = vmax.f32 %v3850_v20, 0.0  ;;  %v3851_v33 = vadd.f32 %v3841_v40, %v16891_v45  ;;  %v15399_v45 = vld [vmem:[%s19898_s11 + $0x4] ss:$20 sps:$4 sm:$0xff]  }
 0x8eb   : > { %v14183_v34 = vpack.i.bf16 %v3857_v29, %v3856_v38  ;;  %v17199_v24 = vpack.c.bf16 %v3857_v29, %v3856_v38  ;;  %4560 = vmatprep.mubr.bf16.mxu0 %v15399_v45 }
 0x8ec   : > { %v3859_v12 = vmax.f32 %v3851_v33, 0.0 }
 0x8ed   : > { %14184 = vrot.lane.b32.xlu0 %v14183_v34, %s20031_s9  ;;  %14174 = vrot.lane.b32.xlu1 %v14183_v34, %s20032_s7 }
 0x8ee   : > { %v14188_v46 = vpack.i.bf16 %v3859_v12, %v3858_v48  ;;  %v17201_v50 = vpack.c.bf16 %v3859_v12, %v3858_v48 }
 0x8f1   : > { %14189 = vrot.lane.b32.xlu0 %v14188_v46, %s20031_s9  ;;  %14179 = vrot.lane.b32.xlu1 %v14188_v46, %s20032_s7 }
 0x8f5   : > { %14199 = vrot.lane.b32.xlu0 %v14163_v25, %s20033_s26  ;;  %14194 = vrot.lane.b32.xlu1 %v14163_v25, %s20025_s15 }
 0x8f9   : > { %14209 = vrot.lane.b32.xlu0 %v14168_v10, %s20033_s26  ;;  %14204 = vrot.lane.b32.xlu1 %v14168_v10, %s20025_s15 }
 0x8fd   : > { %14224 = vrot.lane.b32.xlu0 %v14183_v34, %s20033_s26  ;;  %14214 = vrot.lane.b32.xlu1 %v14183_v34, %s20025_s15 }
 0x901   : > { %14229 = vrot.lane.b32.xlu0 %v14188_v46, %s20033_s26  ;;  %14219 = vrot.lane.b32.xlu1 %v14188_v46, %s20025_s15 }
 0x905   : > { %14239 = vrot.lane.b32.xlu0 %v14168_v10, %s20026_s18  ;;  %14234 = vrot.lane.b32.xlu1 %v14163_v25, %s20026_s18 }
 0x909   : > { %14249 = vrot.lane.b32.xlu0 %v14188_v46, %s20026_s18  ;;  %14244 = vrot.lane.b32.xlu1 %v14183_v34, %s20026_s18 }
 0x90d   : > { %14259 = vrot.lane.b32.xlu0 %v14163_v25, %s20027_s29  ;;  %14254 = vrot.lane.b32.xlu1 %v14163_v25, %s20028_s28 }
 0x911   : > { %14269 = vrot.lane.b32.xlu0 %v14168_v10, %s20027_s29  ;;  %14264 = vrot.lane.b32.xlu1 %v14168_v10, %s20028_s28 }
 0x915   : > { %14284 = vrot.lane.b32.xlu0 %v14183_v34, %s20027_s29  ;;  %14274 = vrot.lane.b32.xlu1 %v14183_v34, %s20028_s28 }
 0x919   : > { %14289 = vrot.lane.b32.xlu0 %v14188_v46, %s20027_s29  ;;  %14279 = vrot.lane.b32.xlu1 %v14188_v46, %s20028_s28 }
 0x91d   : > { %14299 = vrot.lane.b32.xlu0 %v14168_v10, %s20029_s0  ;;  %14294 = vrot.lane.b32.xlu1 %v14163_v25, %s20029_s0 }
 0x921   : > { %14309 = vrot.lane.b32.xlu0 %v14188_v46, %s20029_s0  ;;  %14304 = vrot.lane.b32.xlu1 %v14183_v34, %s20029_s0 }
 0x925   : > { %4231 = vperm.xlu0 %13511, %v4209_v43   ;;  %4226 = vperm.xlu1 %13512, %v4208_v54  }
 0x929   : > { %4241 = vperm.xlu0 %13511, %v4211_v47   ;;  %4236 = vperm.xlu1 %13512, %v4210_v27  }
 0x92d   : > { %4251 = vperm.xlu0 %13511, %v4213_v58   ;;  %4246 = vperm.xlu1 %13512, %v4212_v59  }
 0x931   : > { %4261 = vperm.xlu0 %13511, %v4215_v56   ;;  %4256 = vperm.xlu1 %13512, %v4214_v51  }
 0x935   : > { %4271 = vperm.xlu0 %13511, %v4217_v57   ;;  %4266 = vperm.xlu1 %13512, %v4216_v0  }
 0x939   : > { %4281 = vperm.xlu0 %13511, %v4219_v62   ;;  %4276 = vperm.xlu1 %13512, %v4218_v63  }
 0x93d   : > { %4291 = vperm.xlu0 %13511, %v4221_v52   ;;  %4286 = vperm.xlu1 %13512, %v4220_v2  }
 0x941   : > { %4301 = vperm.xlu0 %13511, %v4223_v4   ;;  %4296 = vperm.xlu1 %13512, %v4222_v60  }
 0x957   : > { %v14165_v1 = vpop.permute.xlu0 %14164  ;;  %v14155_v5 = vpop.permute.xlu1 %14154 }
 0x958   : > { %v14167_v6 = vunpack.i.h.bf16 %v14165_v1  ;;  %v14166_v3 = vunpack.i.l.bf16 %v14165_v1  ;;  %v14157_v31 = vunpack.i.h.bf16 %v14155_v5  ;;  %v14156_v44 = vunpack.i.l.bf16 %v14155_v5 }
 0x95a   : > { %v11082_v36 = vpack.c.bf16 %v14167_v6, %v14166_v3  ;;  %v11106_v11 = vpack.c.bf16 %v14157_v31, %v14156_v44 }
 0x95b   : > { %v14170_v21 = vpop.permute.xlu0 %14169  ;;  %v14160_v19 = vpop.permute.xlu1 %14159 }
 0x95c   : > { %v14172_v61 = vunpack.i.h.bf16 %v14170_v21  ;;  %v14171_v28 = vunpack.i.l.bf16 %v14170_v21  ;;  %v14162_v10 = vunpack.i.h.bf16 %v14160_v19  ;;  %v14161_v23 = vunpack.i.l.bf16 %v14160_v19  ;;  %12105 = vmatprep.subr.msk.bf16.mxu0 %vm16472_vm6, %v11106_v11 }
 0x95d   : > { %12106 = vmatpush3.bf16.msk.msra.mxu0 %vm16462_vm2, %v11082_v36 }
 0x95e   : > { %v11085_v9 = vpack.c.bf16 %v14172_v61, %v14171_v28  ;;  %v11109_v15 = vpack.c.bf16 %v14162_v10, %v14161_v23 }
 0x95f   : > { %v14185_v25 = vpop.permute.xlu0 %14184  ;;  %v14175_v13 = vpop.permute.xlu1 %14174 }
 0x960   : > { %v14187_v14 = vunpack.i.h.bf16 %v14185_v25  ;;  %v14186_v7 = vunpack.i.l.bf16 %v14185_v25  ;;  %v14177_v26 = vunpack.i.h.bf16 %v14175_v13  ;;  %v14176_v35 = vunpack.i.l.bf16 %v14175_v13  ;;  %12107 = vmatprep.subr.msk.bf16.mxu0 %vm16472_vm6, %v11109_v15 }
 0x961   : > { %12108 = vmatpush3.bf16.msk.msra.mxu0 %vm16462_vm2, %v11085_v9 }
 0x962   : > { %v11088_v8 = vpack.c.bf16 %v14187_v14, %v14186_v7  ;;  %v11112_v32 = vpack.c.bf16 %v14177_v26, %v14176_v35  ;;  %v15397_v14 = vld [vmem:[%s19898_s11] ss:$20 sps:$4 sm:$0xff]  }
 0x963   : > { %v14190_v38 = vpop.permute.xlu0 %14189  ;;  %v14180_v39 = vpop.permute.xlu1 %14179  ;;  %v15400_v7 = vld [vmem:[%s19898_s11 + $0x2c] ss:$20 sps:$4 sm:$0xff]  }
 0x964   : > { %v14192_v20 = vunpack.i.h.bf16 %v14190_v38  ;;  %v14191_v40 = vunpack.i.l.bf16 %v14190_v38  ;;  %v14182_v29 = vunpack.i.h.bf16 %v14180_v39  ;;  %v14181_v48 = vunpack.i.l.bf16 %v14180_v39  ;;  %12109 = vmatprep.subr.msk.bf16.mxu0 %vm16472_vm6, %v11112_v32 }
 0x965   : > { %12110 = vmatpush3.bf16.msk.msra.mxu0 %vm16462_vm2, %v11088_v8 }
 0x966   : > { %v11091_v33 = vpack.c.bf16 %v14192_v20, %v14191_v40  ;;  %v11115_v34 = vpack.c.bf16 %v14182_v29, %v14181_v48 }
 0x967   : > { %v14200_v12 = vpop.permute.xlu0 %14199  ;;  %v14195_v46 = vpop.permute.xlu1 %14194 }
 0x968   : > { %v14202_v45 = vunpack.i.h.bf16 %v14200_v12  ;;  %v14201_v42 = vunpack.i.l.bf16 %v14200_v12  ;;  %v14197_v43 = vunpack.i.h.bf16 %v14195_v46  ;;  %v14196_v54 = vunpack.i.l.bf16 %v14195_v46  ;;  %12111 = vmatprep.subr.msk.bf16.mxu0 %vm16472_vm6, %v11115_v34  ;;  %v15402_v34 = vld [vmem:[%s19898_s11 + $0x28] ss:$20 sps:$4 sm:$0xff]  }
 0x969   : > { %12112 = vmatpush3.bf16.msk.msra.mxu0 %vm16462_vm2, %v11091_v33  ;;  %v15403_v12 = vld [vmem:[%s19898_s11 + $0x54] ss:$20 sps:$4 sm:$0xff]  }
 0x96a   : > { %v11094_v47 = vpack.c.bf16 %v14202_v45, %v14201_v42  ;;  %v11118_v27 = vpack.c.bf16 %v14197_v43, %v14196_v54 }
 0x96b   : > { %v14210_v58 = vpop.permute.xlu0 %14209  ;;  %v14205_v59 = vpop.permute.xlu1 %14204 }
 0x96c   : > { %v14212_v56 = vunpack.i.h.bf16 %v14210_v58  ;;  %v14211_v51 = vunpack.i.l.bf16 %v14210_v58  ;;  %v14207_v57 = vunpack.i.h.bf16 %v14205_v59  ;;  %v14206_v0 = vunpack.i.l.bf16 %v14205_v59  ;;  %12113 = vmatprep.subr.msk.bf16.mxu0 %vm16480_vm8, %v11118_v27 }
 0x96d   : > { %12114 = vmatpush3.bf16.msk.msra.mxu0 %vm16467_vm4, %v11094_v47 }
 0x96e   : > { %v11097_v62 = vpack.c.bf16 %v14212_v56, %v14211_v51  ;;  %v11121_v63 = vpack.c.bf16 %v14207_v57, %v14206_v0  ;;  %v15405_v0 = vld [vmem:[%s19898_s11 + $0x50] ss:$20 sps:$4 sm:$0xff]  }
 0x96f   : > { %v14225_v52 = vpop.permute.xlu0 %14224  ;;  %v14215_v2 = vpop.permute.xlu1 %14214 }
 0x970   : > { %v14227_v4 = vunpack.i.h.bf16 %v14225_v52  ;;  %v14226_v60 = vunpack.i.l.bf16 %v14225_v52  ;;  %v14217_v1 = vunpack.i.h.bf16 %v14215_v2  ;;  %v14216_v5 = vunpack.i.l.bf16 %v14215_v2  ;;  %12115 = vmatprep.subr.msk.bf16.mxu0 %vm16480_vm8, %v11121_v63 }
 0x971   : > { %12116 = vmatpush3.bf16.msk.msra.mxu0 %vm16467_vm4, %v11097_v62  ;;  %v15406_v62 = vld [vmem:[%s19898_s11 + $0x7c] ss:$20 sps:$4 sm:$0xff]  }
 0x972   : > { %v11100_v6 = vpack.c.bf16 %v14227_v4, %v14226_v60  ;;  %v11124_v3 = vpack.c.bf16 %v14217_v1, %v14216_v5 }
 0x973   : > { %v14230_v31 = vpop.permute.xlu0 %14229  ;;  %v14220_v44 = vpop.permute.xlu1 %14219 }
 0x974   : > { %v14232_v36 = vunpack.i.h.bf16 %v14230_v31  ;;  %v14231_v11 = vunpack.i.l.bf16 %v14230_v31  ;;  %v14222_v21 = vunpack.i.h.bf16 %v14220_v44  ;;  %v14221_v19 = vunpack.i.l.bf16 %v14220_v44  ;;  %12117 = vmatprep.subr.msk.bf16.mxu0 %vm16480_vm8, %v11124_v3 }
 0x975   : > { %12118 = vmatpush3.bf16.msk.msra.mxu0 %vm16467_vm4, %v11100_v6 }
 0x976   : > { %v11103_v61 = vpack.c.bf16 %v14232_v36, %v14231_v11  ;;  %v11127_v28 = vpack.c.bf16 %v14222_v21, %v14221_v19 }
 0x977   : > { %v14240_v10 = vpop.permute.xlu0 %14239  ;;  %v14235_v23 = vpop.permute.xlu1 %14234 }
 0x978   : > { %v14242_v9 = vunpack.i.h.bf16 %v14240_v10  ;;  %v14241_v15 = vunpack.i.l.bf16 %v14240_v10  ;;  %v14237_v25 = vunpack.i.h.bf16 %v14235_v23  ;;  %v14236_v13 = vunpack.i.l.bf16 %v14235_v23  ;;  %12119 = vmatprep.subr.msk.bf16.mxu0 %vm16480_vm8, %v11127_v28 }
 0x979   : > { %12120 = vmatpush3.bf16.msk.msra.mxu0 %vm16467_vm4, %v11103_v61 }
 0x97a   : > { %v11142_v26 = vpack.c.bf16 %v14237_v25, %v14236_v13  ;;  %v11145_v32 = vpack.c.bf16 %v14242_v9, %v14241_v15  ;;  %v15408_v15 = vld [vmem:[%s19898_s11 + $0x78] ss:$20 sps:$4 sm:$0xff]  }
 0x97b   : > { %v14250_v35 = vpop.permute.xlu0 %14249  ;;  %v14245_v8 = vpop.permute.xlu1 %14244 }
 0x97c   : > { %v14247_v38 = vunpack.i.h.bf16 %v14245_v8  ;;  %v14246_v39 = vunpack.i.l.bf16 %v14245_v8  ;;  %4561 = vmatmul.mubr.bf16.vlgmr.msra.gmra.mrb[80].mxu0 %v15397_v14  ;;  %12169 = vmatprep.subr.msk.bf16.mxu1 %vm16499_vm12, %v11142_v26  ;;  %v14252_v29 = vunpack.i.h.bf16 %v14250_v35  ;;  %v14251_v48 = vunpack.i.l.bf16 %v14250_v35  ;;  %v15409_v35 = vld [vmem:[%s19898_s11 + $0xa4] ss:$20 sps:$4 sm:$0xff]  }
 0x97d   : > { %12170 = vmatpush3.bf16.msra.mxu1 %v17192_v18  ;;  %4568 = vmatprep.mubr.bf16.mxu0 %v15400_v7 }
 0x97e   : > { %12171 = vmatprep.subr.msk.bf16.mxu1 %vm16499_vm12, %v11145_v32  ;;  %v11148_v33 = vpack.c.bf16 %v14247_v38, %v14246_v39  ;;  %v11151_v42 = vpack.c.bf16 %v14252_v29, %v14251_v48 }
 0x97f   : > { %v14260_v20 = vpop.permute.xlu0 %14259  ;;  %v14255_v40 = vpop.permute.xlu1 %14254 }
 0x980   : > { %v14257_v43 = vunpack.i.h.bf16 %v14255_v40  ;;  %v14256_v54 = vunpack.i.l.bf16 %v14255_v40  ;;  %v14262_v47 = vunpack.i.h.bf16 %v14260_v20  ;;  %v14261_v27 = vunpack.i.l.bf16 %v14260_v20 }
 0x981   : > { %12172 = vmatpush3.bf16.msra.mxu1 %v17194_v49 }
 0x982   : > { %12173 = vmatprep.subr.msk.bf16.mxu1 %vm16499_vm12, %v11148_v33  ;;  %v11154_v56 = vpack.c.bf16 %v14257_v43, %v14256_v54  ;;  %v11130_v2 = vpack.c.bf16 %v14262_v47, %v14261_v27  ;;  %v15419_v43 = vld [vmem:[%s19898_s11 + $0xc8] ss:$20 sps:$4 sm:$0xff]   ;;  %v15420_v54 = vld [vmem:[%s19898_s11 + $0x30] ss:$20 sps:$4 sm:$0xff]   ;;  %v15426_v27 = vld [vmem:[%s19898_s11 + $0x58] ss:$20 sps:$4 sm:$0xff]  }
 0x983   : > { %v14270_v46 = vpop.permute.xlu0 %14269  ;;  %v14265_v45 = vpop.permute.xlu1 %14264  ;;  %v15423_v47 = vld [vmem:[%s19898_s11 + $0x5c] ss:$20 sps:$4 sm:$0xff]  }
 0x984   : > { %4569 = vmatmul.mubr.bf16.gmra.mrb[84].mxu0 %v15402_v34  ;;  %v14267_v51 = vunpack.i.h.bf16 %v14265_v45  ;;  %v14266_v57 = vunpack.i.l.bf16 %v14265_v45  ;;  %v14272_v63 = vunpack.i.h.bf16 %v14270_v46  ;;  %v14271_v52 = vunpack.i.l.bf16 %v14270_v46  ;;  %v15411_v34 = vld [vmem:[%s19898_s11 + $0x8] ss:$20 sps:$4 sm:$0xff]   ;;  %v15415_v46 = vld [vmem:[%s19898_s11 + $0xcc] ss:$20 sps:$4 sm:$0xff]  }
 0x985   : > { %12174 = vmatpush3.bf16.msra.mxu1 %v17199_v24  ;;  %4576 = vmatprep.mubr.bf16.mxu0 %v15403_v12  ;;  %v15414_v12 = vld [vmem:[%s19898_s11 + $0xa0] ss:$20 sps:$4 sm:$0xff]  }
 0x986   : > { %12175 = vmatprep.subr.msk.bf16.mxu1 %vm16499_vm12, %v11151_v42  ;;  %v11157_v6 = vpack.c.bf16 %v14267_v51, %v14266_v57  ;;  %v11133_v3 = vpack.c.bf16 %v14272_v63, %v14271_v52  ;;  %v15417_v45 = vld [vmem:[%s19898_s11 + $0x34] ss:$20 sps:$4 sm:$0xff]   ;;  %v15435_v51 = vld [vmem:[%s19898_s11 + $0x10] ss:$20 sps:$4 sm:$0xff]  }
 0x987   : > { %v14285_v58 = vpop.permute.xlu0 %14284  ;;  %v14275_v59 = vpop.permute.xlu1 %14274  ;;  %v15436_v57 = vld [vmem:[%s19898_s11 + $0xa8] ss:$20 sps:$4 sm:$0xff]   ;;  %v15440_v63 = vld [vmem:[%s19898_s11 + $0x60] ss:$20 sps:$4 sm:$0xff]   ;;  %v15441_v52 = vld [vmem:[%s19898_s11 + $0xd0] ss:$20 sps:$4 sm:$0xff]  }
 0x988   : > { %v14277_v4 = vunpack.i.h.bf16 %v14275_v59  ;;  %v14276_v60 = vunpack.i.l.bf16 %v14275_v59  ;;  %v14287_v31 = vunpack.i.h.bf16 %v14285_v58  ;;  %v14286_v44 = vunpack.i.l.bf16 %v14285_v58  ;;  %v15427_v58 = vld [vmem:[%s19898_s11 + $0x11c] ss:$20 sps:$4 sm:$0xff]   ;;  %v15431_v59 = vld [vmem:[%s19898_s11 + $0x118] ss:$20 sps:$4 sm:$0xff]  }
 0x989   : > { %12176 = vmatpush3.bf16.msra.mxu1 %v17201_v50 }
 0x98a   : > { %12177 = vmatprep.subr.msk.bf16.mxu1 %vm16514_vm14, %v11154_v56  ;;  %v11160_v36 = vpack.c.bf16 %v14277_v4, %v14276_v60  ;;  %v11136_v13 = vpack.c.bf16 %v14287_v31, %v14286_v44  ;;  %v15433_v56 = vld [vmem:[%s19898_s11 + $0xac] ss:$20 sps:$4 sm:$0xff]   ;;  %v15443_v4 = vld [vmem:[%s19898_s11 + $0xfc] ss:$20 sps:$4 sm:$0xff]  }
 0x98b   : > { %v14290_v1 = vpop.permute.xlu0 %14289  ;;  %v14280_v5 = vpop.permute.xlu1 %14279  ;;  %v15445_v60 = vld [vmem:[%s19898_s11 + $0xb0] ss:$20 sps:$4 sm:$0xff]   ;;  %v15451_v31 = vld [vmem:[%s19898_s11 + $0x120] ss:$20 sps:$4 sm:$0xff]   ;;  %v15452_v44 = vld [vmem:[%s19898_s11 + $0x128] ss:$20 sps:$4 sm:$0xff]  }
 0x98c   : > { %4577 = vmatmul.mubr.bf16.gmra.mrb[88].mxu0 %v15405_v0  ;;  %v14282_v11 = vunpack.i.h.bf16 %v14280_v5  ;;  %v14281_v21 = vunpack.i.l.bf16 %v14280_v5  ;;  %v14292_v14 = vunpack.i.h.bf16 %v14290_v1  ;;  %v14291_v7 = vunpack.i.l.bf16 %v14290_v1  ;;  %v15437_v0 = vld [vmem:[%s19898_s11 + $0x38] ss:$20 sps:$4 sm:$0xff]  }
 0x98d   : > { %12178 = vmatpush3.bf16.msk.msra.mxu1 %vm16491_vm10, %v11130_v2  ;;  %4584 = vmatprep.mubr.bf16.mxu0 %v15406_v62  ;;  %v15438_v62 = vld [vmem:[%s19898_s11 + $0xd4] ss:$20 sps:$4 sm:$0xff]   ;;  %v15446_v1 = vld [vmem:[%s19898_s11 + $0xf8] ss:$20 sps:$4 sm:$0xff]  }
 0x98e   : > { %12179 = vmatprep.subr.msk.bf16.mxu1 %vm16514_vm14, %v11157_v6  ;;  %v11163_v8 = vpack.c.bf16 %v14282_v11, %v14281_v21  ;;  %v11139_v40 = vpack.c.bf16 %v14292_v14, %v14291_v7  ;;  %v15442_v2 = vld [vmem:[%s19898_s11 + $0x88] ss:$20 sps:$4 sm:$0xff]   ;;  %v15447_v5 = vld [vmem:[%s19898_s11 + $0xd8] ss:$20 sps:$4 sm:$0xff]  }
 0x98f   : > { %v14300_v19 = vpop.permute.xlu0 %14299  ;;  %v14295_v61 = vpop.permute.xlu1 %14294  ;;  %v15448_v6 = vld [vmem:[%s19898_s11 + $0x124] ss:$20 sps:$4 sm:$0xff]  }
 0x990   : > { %v14302_v28 = vunpack.i.h.bf16 %v14300_v19  ;;  %v14301_v10 = vunpack.i.l.bf16 %v14300_v19  ;;  %v14297_v23 = vunpack.i.h.bf16 %v14295_v61  ;;  %v14296_v9 = vunpack.i.l.bf16 %v14295_v61 }
 0x991   : > { %12180 = vmatpush3.bf16.msk.msra.mxu1 %vm16491_vm10, %v11133_v3  ;;  %v15450_v3 = vld [vmem:[%s19898_s11 + $0x100] ss:$20 sps:$4 sm:$0xff]  }
 0x992   : > { %v11166_v25 = vpack.c.bf16 %v14297_v23, %v14296_v9  ;;  %12181 = vmatprep.subr.msk.bf16.mxu1 %vm16514_vm14, %v11160_v36  ;;  %v11169_v32 = vpack.c.bf16 %v14302_v28, %v14301_v10 }
 0x993   : > { %v14305_v26 = vpop.permute.xlu1 %14304  ;;  %v14310_v20 = vpop.permute.xlu0 %14309 }
 0x994   : > { %v14307_v38 = vunpack.i.h.bf16 %v14305_v26  ;;  %v14306_v39 = vunpack.i.l.bf16 %v14305_v26  ;;  %4585 = vmatmul.mubr.bf16.gmra.mrb[92].mxu0 %v15408_v15  ;;  %13146 = vmatprep.subr.msk.bf16.mxu0 %vm16521_vm1, %v11166_v25  ;;  %v14312_v29 = vunpack.i.h.bf16 %v14310_v20  ;;  %v14311_v48 = vunpack.i.l.bf16 %v14310_v20 }
 0x995   : > { %12182 = vmatpush3.bf16.msk.msra.mxu1 %vm16491_vm10, %v11136_v13  ;;  %13147 = vmatpush3.bf16.msk.msra.mxu0 %vm16521_vm1, %v11166_v25 }
 0x996   : > { %12183 = vmatprep.subr.msk.bf16.mxu1 %vm16514_vm14, %v11163_v8  ;;  %13148 = vmatprep.subr.msk.bf16.mxu0 %vm16521_vm1, %v11169_v32  ;;  %v11172_v33 = vpack.c.bf16 %v14307_v38, %v14306_v39  ;;  %v11175_v42 = vpack.c.bf16 %v14312_v29, %v14311_v48 }
 0x997   : > { %4592 = vmatprep.mubr.bf16.mxu0 %v15409_v35 }
 0x999   : > { %12184 = vmatpush3.bf16.msk.msra.mxu1 %vm16491_vm10, %v11139_v40  ;;  %13149 = vmatpush3.bf16.msk.msra.mxu0 %vm16521_vm1, %v11169_v32 }
 0x99a   : > { %13150 = vmatprep.subr.msk.bf16.mxu0 %vm16521_vm1, %v11172_v33  ;;  %13170 = vmatprep.subr.bf16.mxu1 %v17192_v18 }
 0x99c   : > { %4593 = vmatmul.mubr.bf16.gmra.mrb[96].mxu0 %v15414_v12  ;;  %4658 = vmatmul.mubr.bf16.vlgmr.msra.gmra.mrb[96].mxu1 %v15411_v34 }
 0x99d   : > { %13151 = vmatpush3.bf16.msk.msra.mxu0 %vm16521_vm1, %v11172_v33  ;;  %13171 = vmatpush3.bf16.msra.mxu1 %v17192_v18  ;;  %v15421_v18 = vld [vmem:[%s19898_s11 + $0xf4] ss:$20 sps:$4 sm:$0xff]  }
 0x99e   : > { %13152 = vmatprep.subr.msk.bf16.mxu0 %vm16521_vm1, %v11175_v42  ;;  %13172 = vmatprep.subr.bf16.mxu1 %v17194_v49 }
 0x99f   : > { %4600 = vmatprep.mubr.bf16.mxu0 %v15415_v46  ;;  %4665 = vmatprep.mubr.bf16.mxu1 %v15417_v45 }
 0x9a1   : > { %13153 = vmatpush3.bf16.msk.msra.mxu0 %vm16521_vm1, %v11175_v42  ;;  %13173 = vmatpush3.bf16.msra.mxu1 %v17194_v49  ;;  %v15425_v49 = vld [vmem:[%s19898_s11 + $0xf0] ss:$20 sps:$4 sm:$0xff]  }
 0x9a2   : > { %13174 = vmatprep.subr.bf16.mxu1 %v17199_v24 }
 0x9a4   : > { %4601 = vmatmul.mubr.bf16.gmra.mrb[100].mxu0 %v15419_v43  ;;  %4666 = vmatmul.mubr.bf16.gmra.mrb[100].mxu1 %v15420_v54  ;;  %v4232_v38 = vpop.permute.xlu0 %4231  ;;  %v4227_v20 = vpop.permute.xlu1 %4226 }
 0x9a5   : > { %13175 = vmatpush3.bf16.msra.mxu1 %v17199_v24  ;;  %4608 = vmatprep.mubr.bf16.mxu0 %v15421_v18  ;;  %v15429_v24 = vld [vmem:[%s19898_s11 + $0x84] ss:$20 sps:$4 sm:$0xff]  }
 0x9a6   : > { %13176 = vmatprep.subr.bf16.mxu1 %v17201_v50  ;;  %4673 = vmatprep.mubr.bf16.mxu1 %v15423_v47 }
 0x9a8   : > { %v4242_v12 = vpop.permute.xlu0 %4241  ;;  %v4237_v46 = vpop.permute.xlu1 %4236 }
 0x9a9   : > { %13177 = vmatpush3.bf16.msra.mxu1 %v17201_v50  ;;  %v15432_v50 = vld [vmem:[%s19898_s11 + $0x80] ss:$20 sps:$4 sm:$0xff]  }
 0x9ac   : > { %4609 = vmatmul.mubr.bf16.gmra.mrb[104].mxu0 %v15425_v49  ;;  %4674 = vmatmul.mubr.bf16.gmra.mrb[104].mxu1 %v15426_v27 }
 0x9ad   : > { %4616 = vmatprep.mubr.bf16.mxu0 %v15427_v58  ;;  %4681 = vmatprep.mubr.bf16.mxu1 %v15429_v24 }
 0x9b4   : > { %4617 = vmatmul.mubr.bf16.gmra.mrb[108].mxu0 %v15431_v59  ;;  %4682 = vmatmul.mubr.bf16.gmra.mrb[108].mxu1 %v15432_v50 }
 0x9b5   : > { %4689 = vmatprep.mubr.bf16.mxu1 %v15433_v56  ;;  %13154 = vmatprep.mubr.msk.bf16.mxu0 %vm1567_vm0, %v15435_v51 }
 0x9bc   : > { %4690 = vmatmul.mubr.bf16.gmra.mrb[112].mxu1 %v15436_v57  ;;  %13155 = vmatmul.mubr.msk.bf16.vlgmr.msra.gmra.mrb[112].mxu0 %vm1567_vm0, %v15437_v0 }
 0x9bd   : > { %4697 = vmatprep.mubr.bf16.mxu1 %v15438_v62  ;;  %13158 = vmatprep.mubr.msk.bf16.mxu0 %vm1567_vm0, %v15440_v63  ;;  %v4252_v62 = vpop.permute.xlu0 %4251  ;;  %v4247_v63 = vpop.permute.xlu1 %4246 }
 0x9c4   : > { %4698 = vmatmul.mubr.bf16.gmra.mrb[116].mxu1 %v15441_v52  ;;  %13159 = vmatmul.mubr.msk.bf16.gmra.mrb[116].mxu0 %vm1567_vm0, %v15442_v2 }
 0x9c5   : > { %4705 = vmatprep.mubr.bf16.mxu1 %v15443_v4  ;;  %13162 = vmatprep.mubr.msk.bf16.mxu0 %vm1567_vm0, %v15445_v60 }
 0x9cc   : > { %4706 = vmatmul.mubr.bf16.gmra.mrb[120].mxu1 %v15446_v1  ;;  %13163 = vmatmul.mubr.msk.bf16.gmra.mrb[120].mxu0 %vm1567_vm0, %v15447_v5 }
 0x9cd   : > { %4713 = vmatprep.mubr.bf16.mxu1 %v15448_v6  ;;  %13166 = vmatprep.mubr.msk.bf16.mxu0 %vm1567_vm0, %v15450_v3 }
 0x9d4   : > { %4714 = vmatmul.mubr.bf16.gmra.mrb[124].mxu1 %v15451_v31  ;;  %13167 = vmatmul.mubr.msk.bf16.gmra.mrb[124].mxu0 %vm1567_vm0, %v15452_v44 }
 0xa4f   : > { %v12121_v36 = vpop.f32.mrb[80].mxu0 }
 0xa50   : > { %v12122_v11 = vpop.f32.mrb[81].mxu0 }
 0xa51   : > { %v12123_v21 = vadd.f32 %v12122_v11, %v12121_v36  ;;  %v12124_v19 = vpop.f32.mrb[82].mxu0 }
 0xa52   : > { %v12125_v61 = vpop.f32.mrb[83].mxu0 }
 0xa53   : > { %v12126_v28 = vadd.f32 %v12125_v61, %v12124_v19  ;;  %v4563_v58 = vadd.f32 %v12123_v21, %v4227_v20 }
 0xa55   : > { %v4566_v57 = vadd.f32 %v12126_v28, %v4232_v38 }
 0xa57   : > { %v12127_v10 = vpop.f32.mrb[84].mxu0 }
 0xa58   : > { %v12128_v23 = vpop.f32.mrb[85].mxu0 }
 0xa59   : > { %v12129_v9 = vadd.f32 %v12128_v23, %v12127_v10  ;;  %v12130_v15 = vpop.f32.mrb[86].mxu0  ;;  %v4262_v10 = vpop.permute.xlu0 %4261 }
 0xa5a   : > { %v12131_v25 = vpop.f32.mrb[87].mxu0  ;;  %v4257_v23 = vpop.permute.xlu1 %4256 }
 0xa5b   : > { %v12132_v13 = vadd.f32 %v12131_v25, %v12130_v15  ;;  %v4571_v31 = vadd.f32 %v12129_v9, %v4237_v46 }
 0xa5d   : > { %v4574_v61 = vadd.f32 %v12132_v13, %v4242_v12 }
 0xa5f   : > { %v12133_v14 = vpop.f32.mrb[88].mxu0 }
 0xa60   : > { %v12134_v7 = vpop.f32.mrb[89].mxu0 }
 0xa61   : > { %v12135_v26 = vadd.f32 %v12134_v7, %v12133_v14  ;;  %v12136_v35 = vpop.f32.mrb[90].mxu0 }
 0xa62   : > { %v12137_v8 = vpop.f32.mrb[91].mxu0 }
 0xa63   : > { %v12138_v32 = vadd.f32 %v12137_v8, %v12136_v35  ;;  %v4579_v20 = vadd.f32 %v12135_v26, %v4247_v63 }
 0xa65   : > { %v4582_v13 = vadd.f32 %v12138_v32, %v4252_v62 }
 0xa67   : > { %v12139_v39 = vpop.f32.mrb[92].mxu0 }
 0xa68   : > { %v12140_v40 = vpop.f32.mrb[93].mxu0 }
 0xa69   : > { %v17489_v29 = vadd.f32 %v12140_v40, %v12139_v39  ;;  %v12142_v48 = vpop.f32.mrb[94].mxu0 }
 0xa6a   : > { %v12143_v33 = vpop.f32.mrb[95].mxu0 }
 0xa6b   : > { %v17491_v34 = vadd.f32 %v12143_v33, %v12142_v48 }
 0xa6f   : > { %v12145_v45 = vpop.f32.mrb[96].mxu0  ;;  %v12185_v42 = vpop.f32.mrb[96].mxu1 }
 0xa70   : > { %v12146_v43 = vpop.f32.mrb[97].mxu0  ;;  %v12186_v54 = vpop.f32.mrb[97].mxu1 }
 0xa71   : > { %v17493_v18 = vadd.f32 %v12146_v43, %v12145_v45  ;;  %v12187_v47 = vadd.f32 %v12186_v54, %v12185_v42  ;;  %v12148_v49 = vpop.f32.mrb[98].mxu0  ;;  %v12188_v27 = vpop.f32.mrb[98].mxu1 }
 0xa72   : > { %v12149_v24 = vpop.f32.mrb[99].mxu0  ;;  %v12189_v59 = vpop.f32.mrb[99].mxu1 }
 0xa73   : > { %v17495_v50 = vadd.f32 %v12149_v24, %v12148_v49  ;;  %v12190_v56 = vadd.f32 %v12189_v59, %v12188_v27  ;;  %v17497_v51 = vadd.f32 %v12187_v47, %v4563_v58  ;;  %v4272_v45 = vpop.permute.xlu0 %4271  ;;  %v4267_v42 = vpop.permute.xlu1 %4266  ;;  %v4587_v59 = vadd.f32 %v17489_v29, %v4257_v23 }
 0xa75   : > { %v17499_v0 = vadd.f32 %v12190_v56, %v4566_v57 }
 0xa77   : > { %v12151_v52 = vpop.f32.mrb[100].mxu0  ;;  %v12191_v2 = vpop.f32.mrb[100].mxu1 }
 0xa78   : > { %v12152_v4 = vpop.f32.mrb[101].mxu0  ;;  %v12192_v60 = vpop.f32.mrb[101].mxu1 }
 0xa79   : > { %v17501_v1 = vadd.f32 %v12152_v4, %v12151_v52  ;;  %v12193_v5 = vadd.f32 %v12192_v60, %v12191_v2  ;;  %v12154_v6 = vpop.f32.mrb[102].mxu0  ;;  %v12194_v3 = vpop.f32.mrb[102].mxu1  ;;  %v4590_v52 = vadd.f32 %v17491_v34, %v4262_v10  ;;  %v4598_v34 = vadd.f32 %v17495_v50, %v4272_v45  ;;  %v15454_v50 = vld [vmem:[%s19900_s13 + $0x8] sm:$0xff]  }
 0xa7a   : > { %v12155_v44 = vpop.f32.mrb[103].mxu0  ;;  %v12195_v36 = vpop.f32.mrb[103].mxu1 }
 0xa7b   : > { %v12156_v11 = vadd.f32 %v12155_v44, %v12154_v6  ;;  %v12196_v21 = vadd.f32 %v12195_v36, %v12194_v3  ;;  %v4668_v19 = vadd.f32 %v12193_v5, %v4571_v31  ;;  %v4282_v4 = vpop.permute.xlu0 %4281  ;;  %v4277_v60 = vpop.permute.xlu1 %4276  ;;  %v4595_v36 = vadd.f32 %v17493_v18, %v4267_v42 }
 0xa7d   : > { %v4671_v28 = vadd.f32 %v12196_v21, %v4574_v61 }
 0xa7f   : > { %v12157_v15 = vpop.f32.mrb[104].mxu0  ;;  %v12197_v25 = vpop.f32.mrb[104].mxu1 }
 0xa80   : > { %v12158_v14 = vpop.f32.mrb[105].mxu0  ;;  %v12198_v7 = vpop.f32.mrb[105].mxu1 }
 0xa81   : > { %v12159_v35 = vadd.f32 %v12158_v14, %v12157_v15  ;;  %v12199_v8 = vadd.f32 %v12198_v7, %v12197_v25  ;;  %v12160_v38 = vpop.f32.mrb[106].mxu0  ;;  %v12200_v39 = vpop.f32.mrb[106].mxu1 }
 0xa82   : > { %v12161_v40 = vpop.f32.mrb[107].mxu0  ;;  %v12201_v9 = vpop.f32.mrb[107].mxu1 }
 0xa83   : > { %v17503_v48 = vadd.f32 %v12161_v40, %v12160_v38  ;;  %v12202_v33 = vadd.f32 %v12201_v9, %v12200_v39  ;;  %v17505_v46 = vadd.f32 %v12199_v8, %v4579_v20  ;;  %v4287_v38 = vpop.permute.xlu1 %4286  ;;  %v4606_v39 = vadd.f32 %v12156_v11, %v4282_v4 }
 0xa84   : > { %v4611_v40 = vadd.f32 %v12159_v35, %v4287_v38 }
 0xa85   : > { %v17507_v12 = vadd.f32 %v12202_v33, %v4582_v13 }
 0xa87   : > { %v12163_v43 = vpop.f32.mrb[108].mxu0  ;;  %v12203_v54 = vpop.f32.mrb[108].mxu1 }
 0xa88   : > { %v12164_v47 = vpop.f32.mrb[109].mxu0  ;;  %v12204_v49 = vpop.f32.mrb[109].mxu1 }
 0xa89   : > { %v17509_v27 = vadd.f32 %v12164_v47, %v12163_v43  ;;  %v12205_v58 = vadd.f32 %v12204_v49, %v12203_v54  ;;  %v12166_v26 = vpop.f32.mrb[110].mxu0  ;;  %v12206_v24 = vpop.f32.mrb[110].mxu1 }
 0xa8a   : > { %v12167_v56 = vpop.f32.mrb[111].mxu0  ;;  %v12207_v57 = vpop.f32.mrb[111].mxu1 }
 0xa8b   : > { %v17512_v63 = vadd.f32 %v12167_v56, %v12166_v26  ;;  %v12208_v32 = vadd.f32 %v12207_v57, %v12206_v24  ;;  %v4684_v62 = vadd.f32 %v12205_v58, %v4587_v59 }
 0xa8d   : > { %v4687_v2 = vadd.f32 %v12208_v32, %v4590_v52 }
 0xa8f   : > { %v12209_v5 = vpop.f32.mrb[112].mxu1  ;;  %v13156_v6 = vpop.f32.mrb[112].mxu0 }
 0xa90   : > { %v4765_v3 = vadd.f32 %v13156_v6, %v4668_v19  ;;  %v12210_v31 = vpop.f32.mrb[113].mxu1  ;;  %v4756_v44 = vpop.f32.mrb[113].mxu0  ;;  %v4603_v19 = vadd.f32 %v17501_v1, %v4277_v60 }
 0xa91   : > { %v12211_v21 = vadd.f32 %v12210_v31, %v12209_v5  ;;  %v4757_v29 = vadd.f32 %v4756_v44, %v17497_v51  ;;  %v12212_v61 = vpop.f32.mrb[114].mxu1  ;;  %v13157_v23 = vpop.f32.mrb[114].mxu0 }
 0xa92   : > { %v4768_v15 = vadd.f32 %v13157_v23, %v4671_v28  ;;  %v12213_v25 = vpop.f32.mrb[115].mxu1  ;;  %v4759_v14 = vpop.f32.mrb[115].mxu0  ;;  %v4821_v20 = vmax.f32 %v4765_v3, 0.0  ;;  %v15453_v28 = vld [vmem:[%s19900_s13] sm:$0xff]  }
 0xa93   : > { %v12214_v10 = vadd.f32 %v12213_v25, %v12212_v61  ;;  %v4760_v7 = vadd.f32 %v4759_v14, %v17499_v0  ;;  %v4692_v8 = vadd.f32 %v12211_v21, %v4595_v36  ;;  %v4819_v9 = vmax.f32 %v4757_v29, 0.0  ;;  %v4292_v0 = vpop.permute.xlu0 %4291  ;;  %13178 = vmatprep.mubr.msk.bf16.mxu1 %vm1567_vm0, %v15453_v28 }
 0xa94   : > { %v4822_v18 = vmax.f32 %v4768_v15, 0.0  ;;  %13179 = vmatmul.mubr.msk.bf16.vlgmr.msra.gmra.mrb[128].mxu1 %vm1567_vm0, %v15454_v50  ;;  %v4614_v26 = vadd.f32 %v17503_v48, %v4292_v0  ;;  %v15457_v0 = vld [vmem:[%s19900_s13 + $0x20] sm:$0xff]  }
 0xa95   : > { %v4820_v51 = vmax.f32 %v4760_v7, 0.0  ;;  %v4695_v33 = vadd.f32 %v12214_v10, %v4598_v34  ;;  %v15456_v34 = vld [vmem:[%s19900_s13 + $0x18] sm:$0xff]  }
 0xa96   : > { %v17526_v13 = vpack.i.bf16 %v4822_v18, %v4821_v20  ;;  %v17548_v6 = vpack.c.bf16 %v4822_v18, %v4821_v20 }
 0xa97   : > { %v12215_v45 = vpop.f32.mrb[116].mxu1  ;;  %v13160_v1 = vpop.f32.mrb[116].mxu0  ;;  %v17528_v11 = vpack.i.bf16 %v4820_v51, %v4819_v9 }
 0xa98   : > { %v4781_v35 = vadd.f32 %v13160_v1, %v4684_v62  ;;  %v12216_v42 = vpop.f32.mrb[117].mxu1  ;;  %v4772_v43 = vpop.f32.mrb[117].mxu0  ;;  %14319 = vrot.lane.b32.xlu0 %v17526_v13, %s20032_s7  ;;  %14314 = vrot.lane.b32.xlu1 %v17526_v13, %s20025_s15 }
 0xa99   : > { %v12217_v54 = vadd.f32 %v12216_v42, %v12215_v45  ;;  %v4773_v47 = vadd.f32 %v4772_v43, %v17505_v46  ;;  %v12218_v49 = vpop.f32.mrb[118].mxu1  ;;  %v13161_v58 = vpop.f32.mrb[118].mxu0  ;;  %v17543_v46 = vpack.c.bf16 %v4820_v51, %v4819_v9 }
 0xa9a   : > { %v4784_v24 = vadd.f32 %v13161_v58, %v4687_v2  ;;  %v12219_v59 = vpop.f32.mrb[119].mxu1  ;;  %v4775_v56 = vpop.f32.mrb[119].mxu0  ;;  %v4825_v57 = vmax.f32 %v4781_v35, 0.0  ;;  %v15455_v2 = vld [vmem:[%s19900_s13 + $0x10] sm:$0xff]  }
 0xa9b   : > { %v12220_v32 = vadd.f32 %v12219_v59, %v12218_v49  ;;  %v4776_v62 = vadd.f32 %v4775_v56, %v17507_v12  ;;  %v4700_v52 = vadd.f32 %v12217_v54, %v4603_v19  ;;  %v4823_v60 = vmax.f32 %v4773_v47, 0.0  ;;  %v4297_v12 = vpop.permute.xlu1 %4296  ;;  %13182 = vmatprep.mubr.msk.bf16.mxu1 %vm1567_vm0, %v15455_v2 }
 0xa9c   : > { %v4826_v4 = vmax.f32 %v4784_v24, 0.0  ;;  %14329 = vrot.lane.b32.xlu0 %v17528_v11, %s20032_s7  ;;  %14324 = vrot.lane.b32.xlu1 %v17528_v11, %s20025_s15  ;;  %v4619_v10 = vadd.f32 %v17509_v27, %v4297_v12  ;;  %v15458_v24 = vld [vmem:[%s19900_s13 + $0x28] sm:$0xff]  }
 0xa9d   : > { %v4824_v5 = vmax.f32 %v4776_v62, 0.0  ;;  %v4703_v48 = vadd.f32 %v12220_v32, %v4606_v39  ;;  %13183 = vmatmul.mubr.msk.bf16.gmra.mrb[132].mxu1 %vm1567_vm0, %v15456_v34  ;;  %v15475_v34 = vld [vmem:[%s20037_s20 + $0x4] ss:$36 sps:$4 sm:$0xff]  }
 0xa9e   : > { %v17550_v3 = vpack.i.bf16 %v4826_v4, %v4825_v57  ;;  %13186 = vmatprep.mubr.msk.bf16.mxu1 %vm1567_vm0, %v15457_v0  ;;  %6284 = vmatprep.mubr.bf16.mxu0 %v15475_v34 }
 0xa9f   : > { %v12221_v31 = vpop.f32.mrb[120].mxu1  ;;  %v13164_v44 = vpop.f32.mrb[120].mxu0  ;;  %v17552_v36 = vpack.i.bf16 %v4824_v5, %v4823_v60 }
 0xaa0   : > { %v4797_v21 = vadd.f32 %v13164_v44, %v4700_v52  ;;  %v12222_v29 = vpop.f32.mrb[121].mxu1  ;;  %v4788_v61 = vpop.f32.mrb[121].mxu0  ;;  %14339 = vrot.lane.b32.xlu0 %v17550_v3, %s20032_s7  ;;  %14334 = vrot.lane.b32.xlu1 %v17550_v3, %s20025_s15 }
 0xaa1   : > { %v12223_v23 = vadd.f32 %v12222_v29, %v12221_v31  ;;  %v4789_v15 = vadd.f32 %v4788_v61, %v4692_v8  ;;  %v12224_v25 = vpop.f32.mrb[122].mxu1  ;;  %v13165_v14 = vpop.f32.mrb[122].mxu0  ;;  %v17568_v8 = vpack.c.bf16 %v4824_v5, %v4823_v60  ;;  %v15460_v61 = vld [vmem:[%s19900_s13 + $0x38] sm:$0xff]  }
 0xaa2   : > { %v4800_v7 = vadd.f32 %v13165_v14, %v4703_v48  ;;  %v12225_v38 = vpop.f32.mrb[123].mxu1  ;;  %v4791_v19 = vpop.f32.mrb[123].mxu0  ;;  %v4829_v39 = vmax.f32 %v4797_v21, 0.0  ;;  %v15463_v14 = vld [vmem:[%s20037_s20 + $0xc] ss:$36 sps:$4 sm:$0xff]  }
 0xaa3   : > { %v12226_v20 = vadd.f32 %v12225_v38, %v12224_v25  ;;  %v4792_v18 = vadd.f32 %v4791_v19, %v4695_v33  ;;  %v4708_v9 = vadd.f32 %v12223_v23, %v4611_v40  ;;  %v4827_v28 = vmax.f32 %v4789_v15, 0.0  ;;  %v4302_v40 = vpop.permute.xlu0 %4301 }
 0xaa4   : > { %v4830_v51 = vmax.f32 %v4800_v7, 0.0  ;;  %14349 = vrot.lane.b32.xlu0 %v17552_v36, %s20032_s7  ;;  %14344 = vrot.lane.b32.xlu1 %v17552_v36, %s20025_s15  ;;  %v17573_v33 = vpack.c.bf16 %v4826_v4, %v4825_v57  ;;  %v4622_v32 = vadd.f32 %v17512_v63, %v4302_v40  ;;  %v15459_v63 = vld [vmem:[%s19900_s13 + $0x30] sm:$0xff]  }
 0xaa5   : > { %v4828_v27 = vmax.f32 %v4792_v18, 0.0  ;;  %v4711_v50 = vadd.f32 %v12226_v20, %v4614_v26  ;;  %13187 = vmatmul.mubr.msk.bf16.gmra.mrb[136].mxu1 %vm1567_vm0, %v15458_v24 }
 0xaa6   : > { %v17575_v45 = vpack.i.bf16 %v4830_v51, %v4829_v39  ;;  %v17595_v60 = vpack.c.bf16 %v4830_v51, %v4829_v39  ;;  %13190 = vmatprep.mubr.msk.bf16.mxu1 %vm1567_vm0, %v15459_v63 }
 0xaa7   : > { %v12227_v1 = vpop.f32.mrb[124].mxu1  ;;  %v13168_v35 = vpop.f32.mrb[124].mxu0  ;;  %v17577_v42 = vpack.i.bf16 %v4828_v27, %v4827_v28  ;;  %v17587_v57 = vpack.c.bf16 %v4828_v27, %v4827_v28 }
 0xaa8   : > { %v12228_v43 = vpop.f32.mrb[125].mxu1  ;;  %v4804_v54 = vpop.f32.mrb[125].mxu0  ;;  %14359 = vrot.lane.b32.xlu0 %v17575_v45, %s20032_s7  ;;  %14354 = vrot.lane.b32.xlu1 %v17575_v45, %s20025_s15 }
 0xaa9   : > { %v12229_v47 = vadd.f32 %v12228_v43, %v12227_v1  ;;  %v4805_v49 = vadd.f32 %v4804_v54, %v4708_v9  ;;  %v12230_v58 = vpop.f32.mrb[126].mxu1  ;;  %v13169_v26 = vpop.f32.mrb[126].mxu0 }
 0xaaa   : > { %v12231_v59 = vpop.f32.mrb[127].mxu1  ;;  %v4807_v56 = vpop.f32.mrb[127].mxu0 }
 0xaab   : > { %v4716_v62 = vadd.f32 %v12229_v47, %v4619_v10  ;;  %v12232_v52 = vadd.f32 %v12231_v59, %v12230_v58  ;;  %v4808_v4 = vadd.f32 %v4807_v56, %v4711_v50  ;;  %v4831_v48 = vmax.f32 %v4805_v49, 0.0  ;;  %v5790_v59 = vld [vmem:[%s20039_s6 + $0x10] sm:$0xff] }
 0xaac   : > { %14374 = vrot.lane.b32.xlu0 %v17577_v42, %s20032_s7  ;;  %14364 = vrot.lane.b32.xlu1 %v17577_v42, %s20025_s15 }
 0xaad   : > { %v4813_v5 = vadd.f32 %v13168_v35, %v4716_v62  ;;  %v4719_v2 = vadd.f32 %v12232_v52, %v4622_v32  ;;  %v4832_v12 = vmax.f32 %v4808_v4, 0.0  ;;  %13191 = vmatmul.mubr.msk.bf16.gmra.mrb[140].mxu1 %vm1567_vm0, %v15460_v61  ;;  %v5789_v4 = vld [vmem:[%s20039_s6 + $0x8] sm:$0xff] }
 0xaae   : > { %6381 = vmatprep.mubr.bf16.mxu1 %v15463_v14 }
 0xaaf   : > { %v4833_v31 = vmax.f32 %v4813_v5, 0.0  ;;  %v4816_v44 = vadd.f32 %v13169_v26, %v4719_v2  ;;  %v17600_v21 = vpack.i.bf16 %v4832_v12, %v4831_v48  ;;  %v17608_v23 = vpack.c.bf16 %v4832_v12, %v4831_v48  ;;  %v4851_v48 = vld [vmem:[%s20040_s3] sm:$0xff] }
 0xab0   : > { %14369 = vrot.lane.b32.xlu1 %v17528_v11, %s20033_s26 }
 0xab1   : > { %v4834_v29 = vmax.f32 %v4816_v44, 0.0 }
 0xab3   : > { %v17610_v15 = vpack.i.bf16 %v4834_v29, %v4833_v31  ;;  %v17617_v25 = vpack.c.bf16 %v4834_v29, %v4833_v31 }
 0xab4   : > { %14384 = vrot.lane.b32.xlu1 %v17600_v21, %s20025_s15 }
 0xab5   : > { %14379 = vrot.lane.b32.xlu0 %v17610_v15, %s20025_s15 }
 0xab8   : > { %14389 = vrot.lane.b32.xlu1 %v17528_v11, %s20031_s9 }
 0xab9   : > { %14394 = vrot.lane.b32.xlu0 %v17600_v21, %s20032_s7 }
 0xabc   : > { %14404 = vrot.lane.b32.xlu1 %v17526_v13, %s20033_s26 }
 0xabd   : > { %14399 = vrot.lane.b32.xlu0 %v17610_v15, %s20032_s7 }
 0xac0   : > { %14414 = vrot.lane.b32.xlu1 %v17552_v36, %s20033_s26 }
 0xac1   : > { %14409 = vrot.lane.b32.xlu0 %v17526_v13, %s20031_s9 }
 0xac4   : > { %14424 = vrot.lane.b32.xlu1 %v17550_v3, %s20033_s26 }
 0xac5   : > { %14419 = vrot.lane.b32.xlu0 %v17552_v36, %s20031_s9 }
 0xac8   : > { %14434 = vrot.lane.b32.xlu1 %v17577_v42, %s20033_s26 }
 0xac9   : > { %14429 = vrot.lane.b32.xlu0 %v17550_v3, %s20031_s9 }
 0xacc   : > { %14444 = vrot.lane.b32.xlu1 %v17575_v45, %s20033_s26 }
 0xacd   : > { %14439 = vrot.lane.b32.xlu0 %v17577_v42, %s20031_s9 }
 0xad0   : > { %14454 = vrot.lane.b32.xlu1 %v17600_v21, %s20033_s26 }
 0xad1   : > { %14449 = vrot.lane.b32.xlu0 %v17575_v45, %s20031_s9 }
 0xad4   : > { %14459 = vrot.lane.b32.xlu1 %v17610_v15, %s20033_s26 }
 0xad5   : > { %14464 = vrot.lane.b32.xlu0 %v17600_v21, %s20031_s9 }
 0xad8   : > { %14474 = vrot.lane.b32.xlu1 %v17528_v11, %s20028_s28 }
 0xad9   : > { %14469 = vrot.lane.b32.xlu0 %v17610_v15, %s20031_s9 }
 0xadc   : > { %14484 = vrot.lane.b32.xlu1 %v17526_v13, %s20028_s28 }
 0xadd   : > { %14479 = vrot.lane.b32.xlu0 %v17528_v11, %s20026_s18 }
 0xae0   : > { %14494 = vrot.lane.b32.xlu1 %v17552_v36, %s20028_s28 }
 0xae1   : > { %14489 = vrot.lane.b32.xlu0 %v17526_v13, %s20026_s18 }
 0xae4   : > { %14504 = vrot.lane.b32.xlu1 %v17550_v3, %s20028_s28 }
 0xae5   : > { %14499 = vrot.lane.b32.xlu0 %v17552_v36, %s20026_s18 }
 0xae8   : > { %14514 = vrot.lane.b32.xlu1 %v17577_v42, %s20028_s28 }
 0xae9   : > { %14509 = vrot.lane.b32.xlu0 %v17550_v3, %s20026_s18 }
 0xaec   : > { %14524 = vrot.lane.b32.xlu1 %v17575_v45, %s20028_s28 }
 0xaed   : > { %14519 = vrot.lane.b32.xlu0 %v17577_v42, %s20026_s18 }
 0xaf0   : > { %14534 = vrot.lane.b32.xlu1 %v17600_v21, %s20028_s28 }
 0xaf1   : > { %14529 = vrot.lane.b32.xlu0 %v17575_v45, %s20026_s18 }
 0xaf4   : > { %14539 = vrot.lane.b32.xlu1 %v17528_v11, %s20027_s29 }
 0xaf5   : > { %14544 = vrot.lane.b32.xlu0 %v17600_v21, %s20026_s18 }
 0xaf8   : > { %14554 = vrot.lane.b32.xlu1 %v17610_v15, %s20026_s18 }
 0xaf9   : > { %14549 = vrot.lane.b32.xlu0 %v17610_v15, %s20028_s28 }
 0xafc   : > { %14564 = vrot.lane.b32.xlu1 %v17552_v36, %s20027_s29 }
 0xafd   : > { %14559 = vrot.lane.b32.xlu0 %v17526_v13, %s20027_s29 }
 0xb00   : > { %14574 = vrot.lane.b32.xlu1 %v17577_v42, %s20027_s29 }
 0xb01   : > { %14569 = vrot.lane.b32.xlu0 %v17550_v3, %s20027_s29 }
 0xb04   : > { %14584 = vrot.lane.b32.xlu1 %v17600_v21, %s20027_s29 }
 0xb05   : > { %14579 = vrot.lane.b32.xlu0 %v17575_v45, %s20027_s29 }
 0xb08   : > { %14594 = vrot.lane.b32.xlu1 %v17528_v11, %s20029_s0 }
 0xb09   : > { %14589 = vrot.lane.b32.xlu0 %v17610_v15, %s20027_s29 }
 0xb0a   : > { %v14320_v10 = vpop.permute.xlu0 %14319  ;;  %v14315_v7 = vpop.permute.xlu1 %14314 }
 0xb0b   : > { %v14317_v38 = vunpack.i.h.bf16 %v14315_v7  ;;  %v14316_v19 = vunpack.i.l.bf16 %v14315_v7  ;;  %v14321_v50 = vunpack.i.l.bf16 %v14320_v10  ;;  %v5792_v7 = vld [vmem:[%s20039_s6 + $0x20] sm:$0xff] }
 0xb0c   : > { %14604 = vrot.lane.b32.xlu1 %v17552_v36, %s20029_s0  ;;  %v14322_v36 = vunpack.i.h.bf16 %v14320_v10 }
 0xb0d   : > { %14599 = vrot.lane.b32.xlu0 %v17526_v13, %s20029_s0  ;;  %v11253_v40 = vpack.c.bf16 %v14317_v38, %v14316_v19 }
 0xb0e   : > { %v14330_v39 = vpop.permute.xlu0 %14329  ;;  %v14325_v20 = vpop.permute.xlu1 %14324  ;;  %v11229_v1 = vpack.c.bf16 %v14322_v36, %v14321_v50  ;;  %v5793_v50 = vld [vmem:[%s20039_s6 + $0x28] sm:$0xff] }
 0xb0f   : > { %v14332_v18 = vunpack.i.h.bf16 %v14330_v39  ;;  %v14331_v9 = vunpack.i.l.bf16 %v14330_v39  ;;  %v14327_v51 = vunpack.i.h.bf16 %v14325_v20  ;;  %v14326_v28 = vunpack.i.l.bf16 %v14325_v20  ;;  %v4852_v20 = vld [vmem:[%s20040_s3 + $0x8] sm:$0xff] }
 0xb10   : > { %14614 = vrot.lane.b32.xlu1 %v17577_v42, %s20029_s0 }
 0xb11   : > { %v11226_v11 = vpack.c.bf16 %v14332_v18, %v14331_v9  ;;  %v11250_v27 = vpack.c.bf16 %v14327_v51, %v14326_v28  ;;  %14609 = vrot.lane.b32.xlu0 %v17550_v3, %s20029_s0  ;;  %v5788_v3 = vld [vmem:[%s20038_s4] sm:$0xff]  ;;  %s20041_s4 = sld [smem:[#allocation37_spill]] }
 0xb12   : > { %v14340_v0 = vpop.permute.xlu0 %14339  ;;  %v14335_v13 = vpop.permute.xlu1 %14334 }
 0xb13   : > { %12321 = vmatprep.subr.msk.bf16.mxu1 %vm16480_vm8, %v11250_v27  ;;  %v14337_v35 = vunpack.i.h.bf16 %v14335_v13  ;;  %v14336_v42 = vunpack.i.l.bf16 %v14335_v13  ;;  %v14342_v56 = vunpack.i.h.bf16 %v14340_v0  ;;  %v14341_v32 = vunpack.i.l.bf16 %v14340_v0 }
 0xb14   : > { %14624 = vrot.lane.b32.xlu1 %v17600_v21, %s20029_s0  ;;  %12322 = vmatpush3.bf16.msk.msra.mxu1 %vm16472_vm6, %v11226_v11  ;;  %v5791_v21 = vld [vmem:[%s20039_s6 + $0x18] sm:$0xff]  ;;  %v4853_v11 = vld [vmem:[%s20040_s3 + $0x10] sm:$0xff] }
 0xb15   : > { %14619 = vrot.lane.b32.xlu0 %v17575_v45, %s20029_s0  ;;  %12323 = vmatprep.subr.msk.bf16.mxu1 %vm16480_vm8, %v11253_v40  ;;  %v11259_v5 = vpack.c.bf16 %v14337_v35, %v14336_v42  ;;  %v11235_v2 = vpack.c.bf16 %v14342_v56, %v14341_v32  ;;  %v4854_v42 = vld [vmem:[%s20040_s3 + $0x18] sm:$0xff] }
 0xb16   : > { %v14350_v43 = vpop.permute.xlu0 %14349  ;;  %v14345_v54 = vpop.permute.xlu1 %14344 }
 0xb17   : > { %v14352_v47 = vunpack.i.h.bf16 %v14350_v43  ;;  %v14351_v49 = vunpack.i.l.bf16 %v14350_v43  ;;  %v14347_v58 = vunpack.i.h.bf16 %v14345_v54  ;;  %v14346_v26 = vunpack.i.l.bf16 %v14345_v54  ;;  %s20042_s1 = smov %s20041_s4 }
 0xb18   : > { %5806 = vperm.xlu1 %13512, %v5788_v3   ;;  %12324 = vmatpush3.bf16.msk.msra.mxu1 %vm16472_vm6, %v11229_v1  ;;  %v5794_v1 = vld [vmem:[%s20039_s6 + $0x30] sm:$0xff] }
 0xb19   : > { %v11232_v45 = vpack.c.bf16 %v14352_v47, %v14351_v49  ;;  %v11256_v24 = vpack.c.bf16 %v14347_v58, %v14346_v26  ;;  %14629 = vrot.lane.b32.xlu0 %v17610_v15, %s20029_s0 }
 0xb1a   : > { %v14360_v62 = vpop.permute.xlu0 %14359  ;;  %v14355_v52 = vpop.permute.xlu1 %14354 }
 0xb1b   : > { %12325 = vmatprep.subr.msk.bf16.mxu1 %vm16480_vm8, %v11256_v24  ;;  %v14357_v12 = vunpack.i.h.bf16 %v14355_v52  ;;  %v14356_v63 = vunpack.i.l.bf16 %v14355_v52  ;;  %v14362_v38 = vunpack.i.h.bf16 %v14360_v62  ;;  %v14361_v19 = vunpack.i.l.bf16 %v14360_v62  ;;  %v5795_v62 = vld [vmem:[%s20039_s6 + $0x38] sm:$0xff] }
 0xb1c   : > { %5816 = vperm.xlu1 %13512, %v5790_v59   ;;  %12326 = vmatpush3.bf16.msk.msra.mxu1 %vm16472_vm6, %v11232_v45  ;;  %v4855_v59 = vld [vmem:[%s20040_s3 + $0x20] sm:$0xff] }
 0xb1d   : > { %5811 = vperm.xlu0 %13511, %v5789_v4   ;;  %12327 = vmatprep.subr.msk.bf16.mxu1 %vm16480_vm8, %v11259_v5  ;;  %v11265_v18 = vpack.c.bf16 %v14357_v12, %v14356_v63  ;;  %v11241_v27 = vpack.c.bf16 %v14362_v38, %v14361_v19  ;;  %v4857_v38 = vld [vmem:[%s20040_s3 + $0x30] sm:$0xff] }
 0xb1e   : > { %v14375_v31 = vpop.permute.xlu0 %14374  ;;  %v14365_v44 = vpop.permute.xlu1 %14364 }
 0xb1f   : > { %v14377_v29 = vunpack.i.h.bf16 %v14375_v31  ;;  %v14376_v61 = vunpack.i.l.bf16 %v14375_v31  ;;  %v14367_v15 = vunpack.i.h.bf16 %v14365_v44  ;;  %v14366_v14 = vunpack.i.l.bf16 %v14365_v44  ;;  %v5796_v31 = vld [vmem:[%s20039_s6 + $0x40] sm:$0xff] }
 0xb20   : > { %4869 = vperm.xlu1 %13512, %v4851_v48   ;;  %12328 = vmatpush3.bf16.msk.msra.mxu1 %vm16472_vm6, %v11235_v2 }
 0xb21   : > { %v11238_v34 = vpack.c.bf16 %v14377_v29, %v14376_v61  ;;  %v11262_v10 = vpack.c.bf16 %v14367_v15, %v14366_v14  ;;  %5821 = vperm.xlu0 %13511, %v5791_v21   ;;  %v4856_v29 = vld [vmem:[%s20040_s3 + $0x28] sm:$0xff] }
 0xb22   : > { %v14370_v39 = vpop.permute.xlu1 %14369 }
 0xb23   : > { %v14372_v9 = vunpack.i.h.bf16 %v14370_v39  ;;  %v14371_v51 = vunpack.i.l.bf16 %v14370_v39  ;;  %12329 = vmatprep.subr.msk.bf16.mxu1 %vm16480_vm8, %v11262_v10 }
 0xb24   : > { %5826 = vperm.xlu1 %13512, %v5792_v7   ;;  %12330 = vmatpush3.bf16.msk.msra.mxu1 %vm16472_vm6, %v11238_v34  ;;  %v15461_v34 = vld [vmem:[%s20037_s20 + $0x8] ss:$36 sps:$4 sm:$0xff]  }
 0xb25   : > { %v11202_v28 = vpack.c.bf16 %v14372_v9, %v14371_v51  ;;  %4874 = vperm.xlu0 %13511, %v4852_v20   ;;  %12331 = vmatprep.subr.msk.bf16.mxu1 %vm16480_vm8, %v11265_v18  ;;  %v5797_v20 = vld [vmem:[%s20039_s6 + $0x48] sm:$0xff]  ;;  %v15464_v18 = vld [vmem:[%s20037_s20 + $0x54] ss:$36 sps:$4 sm:$0xff]  }
 0xb26   : > { %v14385_v36 = vpop.permute.xlu1 %14384 }
 0xb27   : > { %v14387_v0 = vunpack.i.h.bf16 %v14385_v36  ;;  %v14386_v13 = vunpack.i.l.bf16 %v14385_v36  ;;  %v14380_v40 = vpop.permute.xlu0 %14379  ;;  %12257 = vmatprep.subr.msk.bf16.mxu0 %vm16467_vm4, %v11202_v28 }
 0xb28   : > { %4879 = vperm.xlu1 %13512, %v4853_v11   ;;  %12332 = vmatpush3.bf16.msk.msra.mxu1 %vm16472_vm6, %v11241_v27  ;;  %v14382_v43 = vunpack.i.h.bf16 %v14380_v40  ;;  %v14381_v54 = vunpack.i.l.bf16 %v14380_v40  ;;  %v4858_v40 = vld [vmem:[%s20040_s3 + $0x38] sm:$0xff] }
 0xb29   : > { %v11268_v3 = vpack.c.bf16 %v14387_v0, %v14386_v13  ;;  %5831 = vperm.xlu0 %13511, %v5793_v50   ;;  %v5798_v50 = vld [vmem:[%s20039_s6 + $0x50] sm:$0xff] }
 0xb2a   : > { %v14390_v35 = vpop.permute.xlu1 %14389  ;;  %v11271_v52 = vpack.c.bf16 %v14382_v43, %v14381_v54  ;;  %v15466_v43 = vld [vmem:[%s20037_s20 + $0x50] ss:$36 sps:$4 sm:$0xff]  }
 0xb2b   : > { %v14392_v47 = vunpack.i.h.bf16 %v14390_v35  ;;  %v14391_v49 = vunpack.i.l.bf16 %v14390_v35  ;;  %v14395_v58 = vpop.permute.xlu0 %14394  ;;  %12333 = vmatprep.subr.msk.bf16.mxu1 %vm16480_vm8, %v11268_v3 }
 0xb2c   : > { %v14397_v26 = vunpack.i.h.bf16 %v14395_v58  ;;  %v14396_v45 = vunpack.i.l.bf16 %v14395_v58  ;;  %5836 = vperm.xlu1 %13512, %v5794_v1  }
 0xb2d   : > { %v11178_v24 = vpack.c.bf16 %v14392_v47, %v14391_v49  ;;  %4884 = vperm.xlu0 %13511, %v4854_v42   ;;  %v4859_v49 = vld [vmem:[%s20040_s3 + $0x40] sm:$0xff] }
 0xb2e   : > { %v11244_v56 = vpack.c.bf16 %v14397_v26, %v14396_v45  ;;  %v14405_v32 = vpop.permute.xlu1 %14404  ;;  %v5799_v45 = vld [vmem:[%s20039_s6 + $0x58] sm:$0xff] }
 0xb2f   : > { %v14407_v4 = vunpack.i.h.bf16 %v14405_v32  ;;  %v14406_v5 = vunpack.i.l.bf16 %v14405_v32  ;;  %v14400_v48 = vpop.permute.xlu0 %14399  ;;  %12258 = vmatpush3.bf16.msk.msra.mxu0 %vm16462_vm2, %v11178_v24  ;;  %v15467_v24 = vld [vmem:[%s20037_s20 + $0x9c] ss:$36 sps:$4 sm:$0xff]  }
 0xb30   : > { %v14402_v2 = vunpack.i.h.bf16 %v14400_v48  ;;  %v14401_v12 = vunpack.i.l.bf16 %v14400_v48  ;;  %4889 = vperm.xlu1 %13512, %v4855_v59   ;;  %12334 = vmatpush3.bf16.msk.msra.mxu1 %vm16472_vm6, %v11244_v56 }
 0xb31   : > { %v11205_v63 = vpack.c.bf16 %v14407_v4, %v14406_v5  ;;  %5841 = vperm.xlu0 %13511, %v5795_v62   ;;  %12335 = vmatprep.subr.msk.bf16.mxu1 %vm16480_vm8, %v11271_v52  ;;  %v5800_v5 = vld [vmem:[%s20039_s6 + $0x60] sm:$0xff] }
 0xb32   : > { %v11247_v44 = vpack.c.bf16 %v14402_v2, %v14401_v12  ;;  %v14415_v21 = vpop.permute.xlu1 %14414  ;;  %v4860_v12 = vld [vmem:[%s20040_s3 + $0x48] sm:$0xff] }
 0xb33   : > { %v14417_v61 = vunpack.i.h.bf16 %v14415_v21  ;;  %v14416_v15 = vunpack.i.l.bf16 %v14415_v21  ;;  %v14410_v14 = vpop.permute.xlu0 %14409  ;;  %12259 = vmatprep.subr.msk.bf16.mxu0 %vm16467_vm4, %v11205_v63 }
 0xb34   : > { %v14412_v10 = vunpack.i.h.bf16 %v14410_v14  ;;  %v14411_v7 = vunpack.i.l.bf16 %v14410_v14  ;;  %5846 = vperm.xlu1 %13512, %v5796_v31   ;;  %12336 = vmatpush3.bf16.msk.msra.mxu1 %vm16472_vm6, %v11247_v44  ;;  %v4861_v14 = vld [vmem:[%s20040_s3 + $0x50] sm:$0xff] }
 0xb35   : > { %4894 = vperm.xlu0 %13511, %v4856_v29   ;;  %v11208_v9 = vpack.c.bf16 %v14417_v61, %v14416_v15  ;;  %v15469_v29 = vld [vmem:[%s20037_s20 + $0x98] ss:$36 sps:$4 sm:$0xff]  }
 0xb36   : > { %v11181_v19 = vpack.c.bf16 %v14412_v10, %v14411_v7  ;;  %v14425_v39 = vpop.permute.xlu1 %14424  ;;  %v5801_v7 = vld [vmem:[%s20039_s6 + $0x68] sm:$0xff] }
 0xb37   : > { %v14427_v51 = vunpack.i.h.bf16 %v14425_v39  ;;  %v14426_v28 = vunpack.i.l.bf16 %v14425_v39  ;;  %v14420_v11 = vpop.permute.xlu0 %14419  ;;  %6382 = vmatmul.mubr.bf16.vlgmr.msra.gmra.mrb[144].mxu1 %v15461_v34 }
 0xb38   : > { %v14422_v27 = vunpack.i.h.bf16 %v14420_v11  ;;  %v14421_v36 = vunpack.i.l.bf16 %v14420_v11  ;;  %4899 = vperm.xlu1 %13512, %v4857_v38   ;;  %12260 = vmatpush3.bf16.msk.msra.mxu0 %vm16462_vm2, %v11181_v19  ;;  %v15470_v38 = vld [vmem:[%s20037_s20 + $0xe4] ss:$36 sps:$4 sm:$0xff]  }
 0xb39   : > { %5851 = vperm.xlu0 %13511, %v5797_v20   ;;  %12261 = vmatprep.subr.msk.bf16.mxu0 %vm16467_vm4, %v11208_v9  ;;  %v11211_v3 = vpack.c.bf16 %v14427_v51, %v14426_v28  ;;  %v5802_v28 = vld [vmem:[%s20039_s6 + $0x70] sm:$0xff] }
 0xb3a   : > { %v11184_v0 = vpack.c.bf16 %v14422_v27, %v14421_v36  ;;  %v14435_v13 = vpop.permute.xlu1 %14434  ;;  %6389 = vmatprep.mubr.bf16.mxu1 %v15464_v18  ;;  %v4862_v36 = vld [vmem:[%s20040_s3 + $0x58] sm:$0xff] }
 0xb3b   : > { %v14437_v1 = vunpack.i.h.bf16 %v14435_v13  ;;  %v14436_v35 = vunpack.i.l.bf16 %v14435_v13  ;;  %v14430_v42 = vpop.permute.xlu0 %14429 }
 0xb3c   : > { %v14432_v54 = vunpack.i.h.bf16 %v14430_v42  ;;  %v14431_v47 = vunpack.i.l.bf16 %v14430_v42  ;;  %5856 = vperm.xlu1 %13512, %v5798_v50   ;;  %12262 = vmatpush3.bf16.msk.msra.mxu0 %vm16462_vm2, %v11184_v0 }
 0xb3d   : > { %4904 = vperm.xlu0 %13511, %v4858_v40   ;;  %12263 = vmatprep.subr.msk.bf16.mxu0 %vm16467_vm4, %v11211_v3  ;;  %v11214_v59 = vpack.c.bf16 %v14437_v1, %v14436_v35  ;;  %v15472_v3 = vld [vmem:[%s20037_s20 + $0xe0] ss:$36 sps:$4 sm:$0xff]  }
 0xb3e   : > { %v11187_v58 = vpack.c.bf16 %v14432_v54, %v14431_v47  ;;  %v14445_v26 = vpop.permute.xlu1 %14444  ;;  %v15476_v54 = vld [vmem:[%s20037_s20 + $0x12c] ss:$36 sps:$4 sm:$0xff]  }
 0xb3f   : > { %v14447_v56 = vunpack.i.h.bf16 %v14445_v26  ;;  %v14446_v32 = vunpack.i.l.bf16 %v14445_v26  ;;  %v14440_v62 = vpop.permute.xlu0 %14439  ;;  %6390 = vmatmul.mubr.bf16.gmra.mrb[148].mxu1 %v15466_v43  ;;  %v4863_v43 = vld [vmem:[%s20040_s3 + $0x60] sm:$0xff] }
 0xb40   : > { %v14442_v52 = vunpack.i.h.bf16 %v14440_v62  ;;  %v14441_v4 = vunpack.i.l.bf16 %v14440_v62  ;;  %4909 = vperm.xlu1 %13512, %v4859_v49   ;;  %12264 = vmatpush3.bf16.msk.msra.mxu0 %vm16462_vm2, %v11187_v58  ;;  %v5803_v58 = vld [vmem:[%s20039_s6 + $0x78] sm:$0xff]  ;;  %v4865_v62 = vld [vmem:[%s20040_s3 + $0x70] sm:$0xff] }
 0xb41   : > { %5861 = vperm.xlu0 %13511, %v5799_v45   ;;  %12265 = vmatprep.subr.msk.bf16.mxu0 %vm16467_vm4, %v11214_v59  ;;  %v11217_v63 = vpack.c.bf16 %v14447_v56, %v14446_v32  ;;  %v15473_v59 = vld [vmem:[%s20037_s20] ss:$36 sps:$4 sm:$0xff]  }
 0xb42   : > { %v11190_v48 = vpack.c.bf16 %v14442_v52, %v14441_v4  ;;  %v14455_v2 = vpop.permute.xlu1 %14454  ;;  %6397 = vmatprep.mubr.bf16.mxu1 %v15467_v24 }
 0xb43   : > { %v14457_v31 = vunpack.i.h.bf16 %v14455_v2  ;;  %v14456_v44 = vunpack.i.l.bf16 %v14455_v2  ;;  %v14450_v21 = vpop.permute.xlu0 %14449 }
 0xb44   : > { %v14452_v61 = vunpack.i.h.bf16 %v14450_v21  ;;  %v14451_v15 = vunpack.i.l.bf16 %v14450_v21  ;;  %5866 = vperm.xlu1 %13512, %v5800_v5   ;;  %12266 = vmatpush3.bf16.msk.msra.mxu0 %vm16462_vm2, %v11190_v48  ;;  %v4864_v5 = vld [vmem:[%s20040_s3 + $0x68] sm:$0xff] }
 0xb45   : > { %4914 = vperm.xlu0 %13511, %v4860_v12   ;;  %12267 = vmatprep.subr.msk.bf16.mxu0 %vm16467_vm4, %v11217_v63  ;;  %v11220_v19 = vpack.c.bf16 %v14457_v31, %v14456_v44  ;;  %v15479_v48 = vld [vmem:[%s20037_s20 + $0x4c] ss:$36 sps:$4 sm:$0xff]  }
 0xb46   : > { %v11193_v34 = vpack.c.bf16 %v14452_v61, %v14451_v15  ;;  %v14460_v10 = vpop.permute.xlu1 %14459  ;;  %v15478_v44 = vld [vmem:[%s20037_s20 + $0x128] ss:$36 sps:$4 sm:$0xff]   ;;  %v15482_v61 = vld [vmem:[%s20037_s20 + $0x174] ss:$36 sps:$4 sm:$0xff]  }
 0xb47   : > { %v14462_v39 = vunpack.i.h.bf16 %v14460_v10  ;;  %v14461_v20 = vunpack.i.l.bf16 %v14460_v10  ;;  %v14465_v18 = vpop.permute.xlu0 %14464  ;;  %6398 = vmatmul.mubr.bf16.gmra.mrb[152].mxu1 %v15469_v29 }
 0xb48   : > { %v14467_v9 = vunpack.i.h.bf16 %v14465_v18  ;;  %v14466_v51 = vunpack.i.l.bf16 %v14465_v18  ;;  %4919 = vperm.xlu1 %13512, %v4861_v14   ;;  %12268 = vmatpush3.bf16.msk.msra.mxu0 %vm16462_vm2, %v11193_v34  ;;  %v4866_v34 = vld [vmem:[%s20040_s3 + $0x78] sm:$0xff] }
 0xb49   : > { %5871 = vperm.xlu0 %13511, %v5801_v7   ;;  %12269 = vmatprep.subr.msk.bf16.mxu0 %vm16467_vm4, %v11220_v19  ;;  %v11223_v50 = vpack.c.bf16 %v14462_v39, %v14461_v20  ;;  %v15481_v39 = vld [vmem:[%s20037_s20 + $0x48] ss:$36 sps:$4 sm:$0xff]  }
 0xb4a   : > { %v11196_v11 = vpack.c.bf16 %v14467_v9, %v14466_v51  ;;  %v14475_v27 = vpop.permute.xlu1 %14474  ;;  %6405 = vmatprep.mubr.bf16.mxu1 %v15470_v38  ;;  %v15485_v9 = vld [vmem:[%s20037_s20 + $0x94] ss:$36 sps:$4 sm:$0xff]  }
 0xb4b   : > { %v14477_v0 = vunpack.i.h.bf16 %v14475_v27  ;;  %v14476_v13 = vunpack.i.l.bf16 %v14475_v27  ;;  %v14470_v40 = vpop.permute.xlu0 %14469 }
 0xb4c   : > { %v14472_v1 = vunpack.i.h.bf16 %v14470_v40  ;;  %v14471_v35 = vunpack.i.l.bf16 %v14470_v40  ;;  %5876 = vperm.xlu1 %13512, %v5802_v28   ;;  %12270 = vmatpush3.bf16.msk.msra.mxu0 %vm16462_vm2, %v11196_v11 }
 0xb4d   : > { %v11322_v42 = vpack.c.bf16 %v14477_v0, %v14476_v13  ;;  %4924 = vperm.xlu0 %13511, %v4862_v36   ;;  %12271 = vmatprep.subr.msk.bf16.mxu0 %vm16467_vm4, %v11223_v50  ;;  %v15484_v0 = vld [vmem:[%s20037_s20 + $0x170] ss:$36 sps:$4 sm:$0xff]  }
 0xb4e   : > { %v11199_v47 = vpack.c.bf16 %v14472_v1, %v14471_v35  ;;  %v14485_v49 = vpop.permute.xlu1 %14484 }
 0xb4f   : > { %v14487_v26 = vunpack.i.h.bf16 %v14485_v49  ;;  %v14486_v45 = vunpack.i.l.bf16 %v14485_v49  ;;  %v14480_v24 = vpop.permute.xlu0 %14479  ;;  %6406 = vmatmul.mubr.bf16.gmra.mrb[156].mxu1 %v15472_v3  ;;  %12449 = vmatprep.subr.msk.bf16.mxu1 %vm16514_vm14, %v11322_v42  ;;  %v15488_v3 = vld [vmem:[%s20037_s20 + $0x1bc] ss:$36 sps:$4 sm:$0xff]   ;;  %v15487_v49 = vld [vmem:[%s20037_s20 + $0x90] ss:$36 sps:$4 sm:$0xff]  }
 0xb50   : > { %v14482_v56 = vunpack.i.h.bf16 %v14480_v24  ;;  %v14481_v32 = vunpack.i.l.bf16 %v14480_v24  ;;  %4929 = vperm.xlu1 %13512, %v4863_v43   ;;  %12272 = vmatpush3.bf16.msk.msra.mxu0 %vm16462_vm2, %v11199_v47 }
 0xb51   : > { %5881 = vperm.xlu0 %13511, %v5803_v58   ;;  %6413 = vmatprep.mubr.bf16.mxu1 %v15476_v54  ;;  %v11325_v2 = vpack.c.bf16 %v14487_v26, %v14486_v45  ;;  %v15491_v45 = vld [vmem:[%s20037_s20 + $0xdc] ss:$36 sps:$4 sm:$0xff]  }
 0xb52   : > { %v11298_v52 = vpack.c.bf16 %v14482_v56, %v14481_v32  ;;  %v14495_v4 = vpop.permute.xlu1 %14494 }
 0xb53   : > { %v14497_v12 = vunpack.i.h.bf16 %v14495_v4  ;;  %v14496_v63 = vunpack.i.l.bf16 %v14495_v4  ;;  %v14490_v31 = vpop.permute.xlu0 %14489  ;;  %6285 = vmatmul.mubr.bf16.vlgmr.msra.gmra.mrb[128].mxu0 %v15473_v59  ;;  %v15490_v4 = vld [vmem:[%s20037_s20 + $0x1b8] ss:$36 sps:$4 sm:$0xff]  }
 0xb54   : > { %v14492_v21 = vunpack.i.h.bf16 %v14490_v31  ;;  %v14491_v29 = vunpack.i.l.bf16 %v14490_v31  ;;  %4939 = vperm.xlu1 %13512, %v4865_v62   ;;  %12450 = vmatpush3.bf16.msk.msra.mxu1 %vm16499_vm12, %v11298_v52 }
 0xb55   : > { %4934 = vperm.xlu0 %13511, %v4864_v5   ;;  %12451 = vmatprep.subr.msk.bf16.mxu1 %vm16514_vm14, %v11325_v2  ;;  %v11328_v10 = vpack.c.bf16 %v14497_v12, %v14496_v63  ;;  %v15494_v2 = vld [vmem:[%s20037_s20 + $0x204] ss:$36 sps:$4 sm:$0xff]  }
 0xb56   : > { %v11301_v15 = vpack.c.bf16 %v14492_v21, %v14491_v29  ;;  %v14505_v14 = vpop.permute.xlu1 %14504  ;;  %6292 = vmatprep.mubr.bf16.mxu0 %v15479_v48 }
 0xb57   : > { %v14507_v7 = vunpack.i.h.bf16 %v14505_v14  ;;  %v14506_v38 = vunpack.i.l.bf16 %v14505_v14  ;;  %v14500_v19 = vpop.permute.xlu0 %14499  ;;  %6414 = vmatmul.mubr.bf16.gmra.mrb[160].mxu1 %v15478_v44 }
 0xb58   : > { %v14502_v20 = vunpack.i.h.bf16 %v14500_v19  ;;  %v14501_v18 = vunpack.i.l.bf16 %v14500_v19  ;;  %12452 = vmatpush3.bf16.msk.msra.mxu1 %vm16499_vm12, %v11301_v15  ;;  %6421 = vmatprep.mubr.bf16.mxu1 %v15482_v61  ;;  %v15493_v61 = vld [vmem:[%s20037_s20 + $0xd8] ss:$36 sps:$4 sm:$0xff]  }
 0xb59   : > { %4944 = vperm.xlu0 %13511, %v4866_v34   ;;  %12453 = vmatprep.subr.msk.bf16.mxu1 %vm16514_vm14, %v11328_v10  ;;  %v11331_v11 = vpack.c.bf16 %v14507_v7, %v14506_v38  ;;  %v15497_v10 = vld [vmem:[%s20037_s20 + $0x124] ss:$36 sps:$4 sm:$0xff]  }
 0xb5a   : > { %v11304_v51 = vpack.c.bf16 %v14502_v20, %v14501_v18  ;;  %v14515_v28 = vpop.permute.xlu1 %14514  ;;  %v15496_v18 = vld [vmem:[%s20037_s20 + $0x200] ss:$36 sps:$4 sm:$0xff]  }
 0xb5b   : > { %v14517_v27 = vunpack.i.h.bf16 %v14515_v28  ;;  %v14516_v36 = vunpack.i.l.bf16 %v14515_v28  ;;  %v14510_v50 = vpop.permute.xlu0 %14509  ;;  %6293 = vmatmul.mubr.bf16.gmra.mrb[132].mxu0 %v15481_v39  ;;  %v15502_v28 = vld [vmem:[%s20037_s20 + $0x1c] ss:$36 sps:$4 sm:$0xff]  }
 0xb5c   : > { %v14512_v13 = vunpack.i.h.bf16 %v14510_v50  ;;  %v14511_v40 = vunpack.i.l.bf16 %v14510_v50  ;;  %12454 = vmatpush3.bf16.msk.msra.mxu1 %vm16499_vm12, %v11304_v51  ;;  %6300 = vmatprep.mubr.bf16.mxu0 %v15485_v9 }
 0xb5d   : > { %12455 = vmatprep.subr.msk.bf16.mxu1 %vm16514_vm14, %v11331_v11  ;;  %v11334_v42 = vpack.c.bf16 %v14517_v27, %v14516_v36 }
 0xb5e   : > { %v11307_v1 = vpack.c.bf16 %v14512_v13, %v14511_v40  ;;  %v14525_v35 = vpop.permute.xlu1 %14524 }
 0xb5f   : > { %v14527_v43 = vunpack.i.h.bf16 %v14525_v35  ;;  %v14526_v54 = vunpack.i.l.bf16 %v14525_v35  ;;  %v14520_v47 = vpop.permute.xlu0 %14519  ;;  %6422 = vmatmul.mubr.bf16.gmra.mrb[164].mxu1 %v15484_v0  ;;  %v15499_v0 = vld [vmem:[%s20037_s20 + $0x120] ss:$36 sps:$4 sm:$0xff]  }
 0xb60   : > { %v14522_v58 = vunpack.i.h.bf16 %v14520_v47  ;;  %v14521_v26 = vunpack.i.l.bf16 %v14520_v47  ;;  %12456 = vmatpush3.bf16.msk.msra.mxu1 %vm16499_vm12, %v11307_v1  ;;  %6429 = vmatprep.mubr.bf16.mxu1 %v15488_v3  ;;  %v15503_v1 = vld [vmem:[%s20037_s20 + $0x16c] ss:$36 sps:$4 sm:$0xff]  }
 0xb61   : > { %12457 = vmatprep.subr.msk.bf16.mxu1 %vm16514_vm14, %v11334_v42  ;;  %v11337_v56 = vpack.c.bf16 %v14527_v43, %v14526_v54  ;;  %v15500_v54 = vld [vmem:[%s20037_s20 + $0x18] ss:$36 sps:$4 sm:$0xff]  }
 0xb62   : > { %v11310_v24 = vpack.c.bf16 %v14522_v58, %v14521_v26  ;;  %v14535_v59 = vpop.permute.xlu1 %14534  ;;  %v15506_v26 = vld [vmem:[%s20037_s20 + $0x64] ss:$36 sps:$4 sm:$0xff]  }
 0xb63   : > { %v14537_v32 = vunpack.i.h.bf16 %v14535_v59  ;;  %v14536_v62 = vunpack.i.l.bf16 %v14535_v59  ;;  %v14530_v52 = vpop.permute.xlu0 %14529  ;;  %6301 = vmatmul.mubr.bf16.gmra.mrb[136].mxu0 %v15487_v49  ;;  %v15505_v59 = vld [vmem:[%s20037_s20 + $0x168] ss:$36 sps:$4 sm:$0xff]  }
 0xb64   : > { %v14532_v5 = vunpack.i.h.bf16 %v14530_v52  ;;  %v14531_v48 = vunpack.i.l.bf16 %v14530_v52  ;;  %12458 = vmatpush3.bf16.msk.msra.mxu1 %vm16499_vm12, %v11310_v24  ;;  %6308 = vmatprep.mubr.bf16.mxu0 %v15491_v45  ;;  %v15509_v52 = vld [vmem:[%s20037_s20 + $0x1b4] ss:$36 sps:$4 sm:$0xff]  }
 0xb65   : > { %12459 = vmatprep.subr.msk.bf16.mxu1 %vm16514_vm14, %v11337_v56  ;;  %v11340_v31 = vpack.c.bf16 %v14537_v32, %v14536_v62 }
 0xb66   : > { %v11313_v12 = vpack.c.bf16 %v14532_v5, %v14531_v48  ;;  %v14540_v63 = vpop.permute.xlu1 %14539 }
 0xb67   : > { %v14542_v44 = vunpack.i.h.bf16 %v14540_v63  ;;  %v14541_v21 = vunpack.i.l.bf16 %v14540_v63  ;;  %v14545_v29 = vpop.permute.xlu0 %14544  ;;  %6430 = vmatmul.mubr.bf16.gmra.mrb[168].mxu1 %v15490_v4  ;;  %v15508_v63 = vld [vmem:[%s20037_s20 + $0x60] ss:$36 sps:$4 sm:$0xff]  }
 0xb68   : > { %v14547_v15 = vunpack.i.h.bf16 %v14545_v29  ;;  %v14546_v14 = vunpack.i.l.bf16 %v14545_v29  ;;  %12460 = vmatpush3.bf16.msk.msra.mxu1 %vm16499_vm12, %v11313_v12  ;;  %6437 = vmatprep.mubr.bf16.mxu1 %v15494_v2 }
 0xb69   : > { %v11274_v34 = vpack.c.bf16 %v14542_v44, %v14541_v21  ;;  %12461 = vmatprep.subr.msk.bf16.mxu1 %vm16514_vm14, %v11340_v31 }
 0xb6a   : > { %v11316_v7 = vpack.c.bf16 %v14547_v15, %v14546_v14  ;;  %v14555_v38 = vpop.permute.xlu1 %14554 }
 0xb6b   : > { %v14557_v19 = vunpack.i.h.bf16 %v14555_v38  ;;  %v14556_v39 = vunpack.i.l.bf16 %v14555_v38  ;;  %v14550_v20 = vpop.permute.xlu0 %14549  ;;  %6309 = vmatmul.mubr.bf16.gmra.mrb[140].mxu0 %v15493_v61  ;;  %12385 = vmatprep.subr.msk.bf16.mxu0 %vm16491_vm10, %v11274_v34  ;;  %v15511_v34 = vld [vmem:[%s20037_s20 + $0x1b0] ss:$36 sps:$4 sm:$0xff]  }
 0xb6c   : > { %v14552_v9 = vunpack.i.h.bf16 %v14550_v20  ;;  %v14551_v51 = vunpack.i.l.bf16 %v14550_v20  ;;  %12386 = vmatpush3.bf16.msra.mxu0 %v17543_v46  ;;  %12462 = vmatpush3.bf16.msk.msra.mxu1 %vm16499_vm12, %v11316_v7 }
 0xb6d   : > { %6316 = vmatprep.mubr.bf16.mxu0 %v15497_v10  ;;  %v11319_v36 = vpack.c.bf16 %v14557_v19, %v14556_v39  ;;  %v15515_v19 = vld [vmem:[%s20037_s20 + $0x1fc] ss:$36 sps:$4 sm:$0xff]  }
 0xb6e   : > { %v11343_v11 = vpack.c.bf16 %v14552_v9, %v14551_v51  ;;  %v14565_v27 = vpop.permute.xlu1 %14564  ;;  %v15514_v51 = vld [vmem:[%s20037_s20 + $0xa8] ss:$36 sps:$4 sm:$0xff]  }
 0xb6f   : > { %v14560_v50 = vpop.permute.xlu0 %14559  ;;  %6438 = vmatmul.mubr.bf16.gmra.mrb[172].mxu1 %v15496_v18  ;;  %v14567_v13 = vunpack.i.h.bf16 %v14565_v27  ;;  %v14566_v40 = vunpack.i.l.bf16 %v14565_v27 }
 0xb70   : > { %v14562_v46 = vunpack.i.h.bf16 %v14560_v50  ;;  %v14561_v3 = vunpack.i.l.bf16 %v14560_v50  ;;  %12463 = vmatprep.subr.msk.bf16.mxu1 %vm16514_vm14, %v11343_v11  ;;  %6575 = vmatprep.mubr.bf16.mxu1 %v15502_v28 }
 0xb71   : > { %12464 = vmatpush3.bf16.msk.msra.mxu1 %vm16499_vm12, %v11319_v36  ;;  %v11280_v47 = vpack.c.bf16 %v14567_v13, %v14566_v40 }
 0xb72   : > { %v11277_v35 = vpack.c.bf16 %v14562_v46, %v14561_v3  ;;  %v14575_v42 = vpop.permute.xlu1 %14574 }
 0xb73   : > { %v14570_v43 = vpop.permute.xlu0 %14569  ;;  %6317 = vmatmul.mubr.bf16.gmra.mrb[144].mxu0 %v15499_v0  ;;  %v14577_v56 = vunpack.i.h.bf16 %v14575_v42  ;;  %v14576_v32 = vunpack.i.l.bf16 %v14575_v42  ;;  %v15517_v0 = vld [vmem:[%s20037_s20 + $0x1f8] ss:$36 sps:$4 sm:$0xff]  }
 0xb74   : > { %v14572_v49 = vunpack.i.h.bf16 %v14570_v43  ;;  %v14571_v58 = vunpack.i.l.bf16 %v14570_v43  ;;  %12387 = vmatprep.subr.msk.bf16.mxu0 %vm16491_vm10, %v11277_v35  ;;  %6324 = vmatprep.mubr.bf16.mxu0 %v15503_v1  ;;  %v15520_v35 = vld [vmem:[%s20037_s20 + $0xf0] ss:$36 sps:$4 sm:$0xff]  }
 0xb75   : > { %12388 = vmatpush3.bf16.msra.mxu0 %v17548_v6  ;;  %v11286_v31 = vpack.c.bf16 %v14577_v56, %v14576_v32 }
 0xb76   : > { %v14585_v45 = vpop.permute.xlu1 %14584  ;;  %12389 = vmatprep.subr.msk.bf16.mxu0 %vm16491_vm10, %v11280_v47  ;;  %v11283_v62 = vpack.c.bf16 %v14572_v49, %v14571_v58  ;;  %v15521_v49 = vld [vmem:[%s20037_s20 + $0x10] ss:$36 sps:$4 sm:$0xff]  }
 0xb77   : > { %v14580_v24 = vpop.permute.xlu0 %14579  ;;  %6576 = vmatmul.mubr.bf16.vlgmr.msra.gmra.mrb[176].mxu1 %v15500_v54  ;;  %v14587_v29 = vunpack.i.h.bf16 %v14585_v45  ;;  %v14586_v61 = vunpack.i.l.bf16 %v14585_v45 }
 0xb78   : > { %6583 = vmatprep.mubr.bf16.mxu1 %v15506_v26  ;;  %v14582_v4 = vunpack.i.h.bf16 %v14580_v24  ;;  %v14581_v5 = vunpack.i.l.bf16 %v14580_v24  ;;  %v15527_v24 = vld [vmem:[%s20037_s20 + $0x5c] ss:$36 sps:$4 sm:$0xff]  }
 0xb79   : > { %12390 = vmatpush3.bf16.msra.mxu0 %v17568_v8  ;;  %v15512_v8 = vld [vmem:[%s20037_s20 + $0xac] ss:$36 sps:$4 sm:$0xff]   ;;  %v11292_v20 = vpack.c.bf16 %v14587_v29, %v14586_v61  ;;  %v15548_v61 = vld [vmem:[%s20037_s20 + $0x20] ss:$36 sps:$4 sm:$0xff]  }
 0xb7a   : > { %v14595_v6 = vpop.permute.xlu1 %14594  ;;  %12391 = vmatprep.subr.msk.bf16.mxu0 %vm16491_vm10, %v11283_v62  ;;  %v11289_v15 = vpack.c.bf16 %v14582_v4, %v14581_v5  ;;  %v15533_v5 = vld [vmem:[%s20037_s20 + $0xa4] ss:$36 sps:$4 sm:$0xff]   ;;  %v15544_v29 = vld [vmem:[%s20037_s20 + $0x210] ss:$36 sps:$4 sm:$0xff]  }
 0xb7b   : > { %v14597_v48 = vunpack.i.h.bf16 %v14595_v6  ;;  %v14596_v2 = vunpack.i.l.bf16 %v14595_v6  ;;  %v14590_v12 = vpop.permute.xlu0 %14589  ;;  %6325 = vmatmul.mubr.bf16.gmra.mrb[148].mxu0 %v15505_v59  ;;  %v15526_v59 = vld [vmem:[%s20037_s20 + $0x138] ss:$36 sps:$4 sm:$0xff]  }
 0xb7c   : > { %6332 = vmatprep.mubr.bf16.mxu0 %v15509_v52  ;;  %v14592_v18 = vunpack.i.h.bf16 %v14590_v12  ;;  %v14591_v28 = vunpack.i.l.bf16 %v14590_v12  ;;  %v15530_v52 = vld [vmem:[%s20037_s20 + $0x184] ss:$36 sps:$4 sm:$0xff]   ;;  %v15529_v6 = vld [vmem:[%s20037_s20 + $0x58] ss:$36 sps:$4 sm:$0xff]  }
 0xb7d   : > { %v11346_v44 = vpack.c.bf16 %v14597_v48, %v14596_v2  ;;  %12392 = vmatpush3.bf16.msra.mxu0 %v17573_v33  ;;  %v15532_v48 = vld [vmem:[%s20037_s20 + $0x180] ss:$36 sps:$4 sm:$0xff]   ;;  %v15536_v2 = vld [vmem:[%s20037_s20 + $0x1cc] ss:$36 sps:$4 sm:$0xff]  }
 0xb7e   : > { %v14605_v21 = vpop.permute.xlu1 %14604  ;;  %12393 = vmatprep.subr.msk.bf16.mxu0 %vm16491_vm10, %v11286_v31  ;;  %v11295_v13 = vpack.c.bf16 %v14592_v18, %v14591_v28  ;;  %v15535_v12 = vld [vmem:[%s20037_s20 + $0xa0] ss:$36 sps:$4 sm:$0xff]   ;;  %v15538_v31 = vld [vmem:[%s20037_s20 + $0x1c8] ss:$36 sps:$4 sm:$0xff]   ;;  %v15564_v28 = vld [vmem:[%s20037_s20 + $0x218] ss:$36 sps:$4 sm:$0xff]  }
 0xb7f   : > { %v14600_v14 = vpop.permute.xlu0 %14599  ;;  %6584 = vmatmul.mubr.bf16.gmra.mrb[180].mxu1 %v15508_v63  ;;  %13194 = vmatprep.subr.msk.bf16.mxu1 %vm16521_vm1, %v11346_v44  ;;  %v14607_v10 = vunpack.i.h.bf16 %v14605_v21  ;;  %v14606_v7 = vunpack.i.l.bf16 %v14605_v21  ;;  %v15539_v63 = vld [vmem:[%s20037_s20 + $0xec] ss:$36 sps:$4 sm:$0xff]   ;;  %v15545_v21 = vld [vmem:[%s20037_s20 + $0x134] ss:$36 sps:$4 sm:$0xff]  }
 0xb80   : > { %v14602_v38 = vunpack.i.h.bf16 %v14600_v14  ;;  %v14601_v33 = vunpack.i.l.bf16 %v14600_v14  ;;  %13195 = vmatpush3.bf16.msk.msra.mxu1 %vm16521_vm1, %v11346_v44  ;;  %6591 = vmatprep.mubr.bf16.mxu1 %v15512_v8  ;;  %v15542_v8 = vld [vmem:[%s20037_s20 + $0x214] ss:$36 sps:$4 sm:$0xff]   ;;  %v15541_v44 = vld [vmem:[%s20037_s20 + $0xe8] ss:$36 sps:$4 sm:$0xff]   ;;  %v15550_v14 = vld [vmem:[%s20037_s20 + $0x17c] ss:$36 sps:$4 sm:$0xff]  }
 0xb81   : > { %12394 = vmatpush3.bf16.msra.mxu0 %v17587_v57  ;;  %v11352_v11 = vpack.c.bf16 %v14607_v10, %v14606_v7  ;;  %v15518_v57 = vld [vmem:[%s20037_s20 + $0xf4] ss:$36 sps:$4 sm:$0xff]   ;;  %v15559_v18 = vld [vmem:[%s20037_s20 + $0x188] ss:$36 sps:$4 sm:$0xff]  }
 0xb82   : > { %v11349_v39 = vpack.c.bf16 %v14602_v38, %v14601_v33  ;;  %12395 = vmatprep.subr.msk.bf16.mxu0 %vm16491_vm10, %v11289_v15  ;;  %v14615_v50 = vpop.permute.xlu1 %14614  ;;  %v15547_v15 = vld [vmem:[%s20037_s20 + $0x130] ss:$36 sps:$4 sm:$0xff]   ;;  %v15552_v7 = vld [vmem:[%s20037_s20 + $0x178] ss:$36 sps:$4 sm:$0xff]   ;;  %v15555_v38 = vld [vmem:[%s20037_s20 + $0x1c4] ss:$36 sps:$4 sm:$0xff]  }
 0xb83   : > { %v14610_v9 = vpop.permute.xlu0 %14609  ;;  %6333 = vmatmul.mubr.bf16.gmra.mrb[152].mxu0 %v15511_v34  ;;  %v14617_v40 = vunpack.i.h.bf16 %v14615_v50  ;;  %v14616_v46 = vunpack.i.l.bf16 %v14615_v50  ;;  %v15549_v34 = vld [vmem:[%s20037_s20 + $0x68] ss:$36 sps:$4 sm:$0xff]   ;;  %v15553_v10 = vld [vmem:[%s20037_s20 + $0xb0] ss:$36 sps:$4 sm:$0xff]   ;;  %v15554_v33 = vld [vmem:[%s20037_s20 + $0xf8] ss:$36 sps:$4 sm:$0xff]  }
 0xb84   : > { %v14612_v27 = vunpack.i.h.bf16 %v14610_v9  ;;  %v14611_v36 = vunpack.i.l.bf16 %v14610_v9  ;;  %13196 = vmatprep.subr.msk.bf16.mxu1 %vm16521_vm1, %v11349_v39  ;;  %6340 = vmatprep.mubr.bf16.mxu0 %v15515_v19  ;;  %v15558_v19 = vld [vmem:[%s20037_s20 + $0x140] ss:$36 sps:$4 sm:$0xff]   ;;  %v15563_v9 = vld [vmem:[%s20037_s20 + $0x1d0] ss:$36 sps:$4 sm:$0xff]  }
 0xb85   : > { %12396 = vmatpush3.bf16.msra.mxu0 %v17595_v60  ;;  %13197 = vmatpush3.bf16.msk.msra.mxu1 %vm16521_vm1, %v11349_v39  ;;  %v15523_v60 = vld [vmem:[%s20037_s20 + $0x14] ss:$36 sps:$4 sm:$0xff]   ;;  %v11358_v42 = vpack.c.bf16 %v14617_v40, %v14616_v46  ;;  %v15557_v39 = vld [vmem:[%s20037_s20 + $0x1c0] ss:$36 sps:$4 sm:$0xff]  }
 0xb86   : > { %12397 = vmatprep.subr.msk.bf16.mxu0 %vm16491_vm10, %v11292_v20  ;;  %13198 = vmatprep.subr.msk.bf16.mxu1 %vm16521_vm1, %v11352_v11  ;;  %v11355_v3 = vpack.c.bf16 %v14612_v27, %v14611_v36  ;;  %v14625_v47 = vpop.permute.xlu1 %14624  ;;  %v15560_v20 = vld [vmem:[%s20037_s20 + $0x20c] ss:$36 sps:$4 sm:$0xff]  }
 0xb87   : > { %6592 = vmatmul.mubr.bf16.gmra.mrb[184].mxu1 %v15514_v51  ;;  %v14620_v1 = vpop.permute.xlu0 %14619  ;;  %v14627_v58 = vunpack.i.h.bf16 %v14625_v47  ;;  %v14626_v26 = vunpack.i.l.bf16 %v14625_v47  ;;  %v15562_v51 = vld [vmem:[%s20037_s20 + $0x208] ss:$36 sps:$4 sm:$0xff]  }
 0xb88   : > { %6599 = vmatprep.mubr.bf16.mxu1 %v15518_v57  ;;  %v14622_v43 = vunpack.i.h.bf16 %v14620_v1  ;;  %v14621_v54 = vunpack.i.l.bf16 %v14620_v1 }
 0xb89   : > { %12398 = vmatpush3.bf16.msra.mxu0 %v17608_v23  ;;  %13199 = vmatpush3.bf16.msk.msra.mxu1 %vm16521_vm1, %v11352_v11  ;;  %v15524_v23 = vld [vmem:[%s20037_s20 + $0x13c] ss:$36 sps:$4 sm:$0xff]   ;;  %v11364_v56 = vpack.c.bf16 %v14627_v58, %v14626_v26 }
 0xb8a   : > { %12399 = vmatprep.subr.msk.bf16.mxu0 %vm16491_vm10, %v11295_v13  ;;  %13200 = vmatprep.subr.msk.bf16.mxu1 %vm16521_vm1, %v11355_v3  ;;  %v11361_v45 = vpack.c.bf16 %v14622_v43, %v14621_v54 }
 0xb8b   : > { %6341 = vmatmul.mubr.bf16.gmra.mrb[156].mxu0 %v15517_v0 }
 0xb8c   : > { %6478 = vmatprep.mubr.bf16.mxu0 %v15523_v60 }
 0xb8d   : > { %12400 = vmatpush3.bf16.msra.mxu0 %v17617_v25  ;;  %13201 = vmatpush3.bf16.msk.msra.mxu1 %vm16521_vm1, %v11355_v3  ;;  %v14630_v25 = vpop.permute.xlu0 %14629 }
 0xb8e   : > { %13202 = vmatprep.subr.msk.bf16.mxu1 %vm16521_vm1, %v11358_v42  ;;  %v14632_v32 = vunpack.i.h.bf16 %v14630_v25  ;;  %v14631_v62 = vunpack.i.l.bf16 %v14630_v25 }
 0xb8f   : > { %6600 = vmatmul.mubr.bf16.gmra.mrb[188].mxu1 %v15520_v35 }
 0xb90   : > { %6607 = vmatprep.mubr.bf16.mxu1 %v15524_v23  ;;  %v11367_v4 = vpack.c.bf16 %v14632_v32, %v14631_v62 }
 0xb91   : > { %13203 = vmatpush3.bf16.msk.msra.mxu1 %vm16521_vm1, %v11358_v42 }
 0xb92   : > { %13204 = vmatprep.subr.msk.bf16.mxu1 %vm16521_vm1, %v11361_v45 }
 0xb93   : > { %6479 = vmatmul.mubr.bf16.vlgmr.msra.gmra.mrb[160].mxu0 %v15521_v49 }
 0xb94   : > { %6486 = vmatprep.mubr.bf16.mxu0 %v15527_v24 }
 0xb95   : > { %13205 = vmatpush3.bf16.msk.msra.mxu1 %vm16521_vm1, %v11361_v45 }
 0xb96   : > { %13206 = vmatprep.subr.msk.bf16.mxu1 %vm16521_vm1, %v11364_v56 }
 0xb97   : > { %6608 = vmatmul.mubr.bf16.gmra.mrb[192].mxu1 %v15526_v59  ;;  %v5807_v40 = vpop.permute.xlu1 %5806 }
 0xb98   : > { %6615 = vmatprep.mubr.bf16.mxu1 %v15530_v52 }
 0xb99   : > { %13207 = vmatpush3.bf16.msk.msra.mxu1 %vm16521_vm1, %v11364_v56 }
 0xb9a   : > { %13208 = vmatprep.subr.msk.bf16.mxu1 %vm16521_vm1, %v11367_v4 }
 0xb9b   : > { %6487 = vmatmul.mubr.bf16.gmra.mrb[164].mxu0 %v15529_v6  ;;  %v5817_v43 = vpop.permute.xlu1 %5816 }
 0xb9c   : > { %6494 = vmatprep.mubr.bf16.mxu0 %v15533_v5  ;;  %v5812_v1 = vpop.permute.xlu0 %5811 }
 0xb9d   : > { %13209 = vmatpush3.bf16.msk.msra.mxu1 %vm16521_vm1, %v11367_v4 }
 0xb9f   : > { %6616 = vmatmul.mubr.bf16.gmra.mrb[196].mxu1 %v15532_v48  ;;  %v18185_v24 = vpop.permute.xlu1 %4869 }
 0xba0   : > { %6623 = vmatprep.mubr.bf16.mxu1 %v15536_v2  ;;  %v5822_v23 = vpop.permute.xlu0 %5821 }
 0xba3   : > { %6495 = vmatmul.mubr.bf16.gmra.mrb[168].mxu0 %v15535_v12  ;;  %v5827_v52 = vpop.permute.xlu1 %5826 }
 0xba4   : > { %6502 = vmatprep.mubr.bf16.mxu0 %v15539_v63  ;;  %v18187_v25 = vpop.permute.xlu0 %4874 }
 0xba7   : > { %6624 = vmatmul.mubr.bf16.gmra.mrb[200].mxu1 %v15538_v31 }
 0xba8   : > { %6631 = vmatprep.mubr.bf16.mxu1 %v15542_v8  ;;  %v5832_v48 = vpop.permute.xlu0 %5831 }
 0xbab   : > { %6503 = vmatmul.mubr.bf16.gmra.mrb[172].mxu0 %v15541_v44 }
 0xbac   : > { %6510 = vmatprep.mubr.bf16.mxu0 %v15545_v21 }
 0xbaf   : > { %6632 = vmatmul.mubr.bf16.gmra.mrb[204].mxu1 %v15544_v29  ;;  %v18193_v29 = vpop.permute.xlu1 %4879 }
 0xbb0   : > { %13210 = vmatprep.mubr.bf16.mxu1 %v15548_v61 }
 0xbb3   : > { %6511 = vmatmul.mubr.bf16.gmra.mrb[176].mxu0 %v15547_v15 }
 0xbb4   : > { %6518 = vmatprep.mubr.bf16.mxu0 %v15550_v14 }
 0xbb7   : > { %13211 = vmatmul.mubr.bf16.vlgmr.msra.gmra.mrb[128].mxu1 %v15549_v34 }
 0xbb8   : > { %13214 = vmatprep.mubr.bf16.mxu1 %v15553_v10 }
 0xbbb   : > { %6519 = vmatmul.mubr.bf16.gmra.mrb[180].mxu0 %v15552_v7  ;;  %v18199_v7 = vpop.permute.xlu0 %4884 }
 0xbbc   : > { %6526 = vmatprep.mubr.bf16.mxu0 %v15555_v38 }
 0xbbf   : > { %13215 = vmatmul.mubr.bf16.gmra.mrb[132].mxu1 %v15554_v33 }
 0xbc0   : > { %13218 = vmatprep.mubr.bf16.mxu1 %v15558_v19 }
 0xbc3   : > { %6527 = vmatmul.mubr.bf16.gmra.mrb[184].mxu0 %v15557_v39 }
 0xbc4   : > { %6534 = vmatprep.mubr.bf16.mxu0 %v15560_v20 }
 0xbc7   : > { %13219 = vmatmul.mubr.bf16.gmra.mrb[136].mxu1 %v15559_v18 }
 0xbc8   : > { %13222 = vmatprep.mubr.bf16.mxu1 %v15563_v9 }
 0xbcb   : > { %6535 = vmatmul.mubr.bf16.gmra.mrb[188].mxu0 %v15562_v51  ;;  %v5837_v51 = vpop.permute.xlu1 %5836 }
 0xbcf   : > { %13223 = vmatmul.mubr.bf16.gmra.mrb[140].mxu1 %v15564_v28 }
 0xc0a   : > { %v12337_v11 = vpop.f32.mrb[144].mxu1 }
 0xc0b   : > { %v12338_v27 = vpop.f32.mrb[145].mxu1 }
 0xc0c   : > { %v12339_v36 = vadd.f32 %v12338_v27, %v12337_v11  ;;  %v12340_v57 = vpop.f32.mrb[146].mxu1 }
 0xc0d   : > { %v12341_v50 = vpop.f32.mrb[147].mxu1 }
 0xc0e   : > { %v12342_v0 = vadd.f32 %v12341_v50, %v12340_v57  ;;  %v5842_v50 = vpop.permute.xlu0 %5841 }
 0xc12   : > { %v12343_v13 = vpop.f32.mrb[148].mxu1 }
 0xc13   : > { %v12344_v46 = vpop.f32.mrb[149].mxu1 }
 0xc14   : > { %v12345_v3 = vadd.f32 %v12344_v46, %v12343_v13  ;;  %v12346_v60 = vpop.f32.mrb[150].mxu1 }
 0xc15   : > { %v12347_v35 = vpop.f32.mrb[151].mxu1 }
 0xc16   : > { %v12348_v42 = vadd.f32 %v12347_v35, %v12346_v60 }
 0xc1a   : > { %v12349_v54 = vpop.f32.mrb[152].mxu1 }
 0xc1b   : > { %v12350_v47 = vpop.f32.mrb[153].mxu1 }
 0xc1c   : > { %v18181_v49 = vadd.f32 %v12350_v47, %v12349_v54  ;;  %v12352_v58 = vpop.f32.mrb[154].mxu1  ;;  %v18213_v47 = vpop.permute.xlu1 %4889 }
 0xc1d   : > { %v12353_v26 = vpop.f32.mrb[155].mxu1 }
 0xc1e   : > { %v18183_v45 = vadd.f32 %v12353_v26, %v12352_v58 }
 0xc22   : > { %v12355_v59 = vpop.f32.mrb[156].mxu1 }
 0xc23   : > { %v12356_v56 = vpop.f32.mrb[157].mxu1 }
 0xc24   : > { %v18189_v32 = vadd.f32 %v12356_v56, %v12355_v59  ;;  %v12358_v62 = vpop.f32.mrb[158].mxu1  ;;  %v18215_v59 = vpop.permute.xlu0 %4894 }
 0xc25   : > { %v12359_v6 = vpop.f32.mrb[159].mxu1 }
 0xc26   : > { %v18191_v4 = vadd.f32 %v12359_v6, %v12358_v62  ;;  %v12273_v5 = vpop.f32.mrb[128].mxu0 }
 0xc27   : > { %v12274_v2 = vpop.f32.mrb[129].mxu0 }
 0xc28   : > { %v12275_v12 = vadd.f32 %v12274_v2, %v12273_v5  ;;  %v12276_v63 = vpop.f32.mrb[130].mxu0 }
 0xc29   : > { %v12277_v31 = vpop.f32.mrb[131].mxu0 }
 0xc2a   : > { %v6287_v8 = vadd.f32 %v12275_v12, %v5807_v40  ;;  %v12278_v44 = vadd.f32 %v12277_v31, %v12276_v63  ;;  %v12361_v21 = vpop.f32.mrb[160].mxu1 }
 0xc2b   : > { %v12362_v61 = vpop.f32.mrb[161].mxu1 }
 0xc2c   : > { %v6290_v15 = vadd.f32 %v12278_v44, %v5812_v1  ;;  %v18195_v14 = vadd.f32 %v12362_v61, %v12361_v21  ;;  %v12364_v34 = vpop.f32.mrb[162].mxu1  ;;  %v18197_v10 = vadd.f32 %v12339_v36, %v6287_v8  ;;  %v5852_v61 = vpop.permute.xlu0 %5851 }
 0xc2d   : > { %v12365_v38 = vpop.f32.mrb[163].mxu1 }
 0xc2e   : > { %v18201_v33 = vadd.f32 %v12365_v38, %v12364_v34  ;;  %v12279_v19 = vpop.f32.mrb[132].mxu0  ;;  %v18203_v39 = vadd.f32 %v12342_v0, %v6290_v15 }
 0xc2f   : > { %v12280_v20 = vpop.f32.mrb[133].mxu0 }
 0xc30   : > { %v12281_v18 = vadd.f32 %v12280_v20, %v12279_v19  ;;  %v12282_v9 = vpop.f32.mrb[134].mxu0 }
 0xc31   : > { %v12283_v28 = vpop.f32.mrb[135].mxu0 }
 0xc32   : > { %v6295_v11 = vadd.f32 %v12281_v18, %v5817_v43  ;;  %v12284_v27 = vadd.f32 %v12283_v28, %v12282_v9  ;;  %v12367_v57 = vpop.f32.mrb[164].mxu1 }
 0xc33   : > { %v12368_v13 = vpop.f32.mrb[165].mxu1 }
 0xc34   : > { %v6298_v36 = vadd.f32 %v12284_v27, %v5822_v23  ;;  %v18205_v40 = vadd.f32 %v12368_v13, %v12367_v57  ;;  %v12370_v46 = vpop.f32.mrb[166].mxu1  ;;  %v18207_v60 = vadd.f32 %v12345_v3, %v6295_v11 }
 0xc35   : > { %v12371_v1 = vpop.f32.mrb[167].mxu1 }
 0xc36   : > { %v18209_v35 = vadd.f32 %v12371_v1, %v12370_v46  ;;  %v12285_v0 = vpop.f32.mrb[136].mxu0  ;;  %v18211_v54 = vadd.f32 %v12348_v42, %v6298_v36  ;;  %v5847_v42 = vpop.permute.xlu1 %5846 }
 0xc37   : > { %v12286_v58 = vpop.f32.mrb[137].mxu0 }
 0xc38   : > { %v12287_v43 = vadd.f32 %v12286_v58, %v12285_v0  ;;  %v12288_v26 = vpop.f32.mrb[138].mxu0 }
 0xc39   : > { %v12289_v56 = vpop.f32.mrb[139].mxu0 }
 0xc3a   : > { %v6303_v23 = vadd.f32 %v12287_v43, %v5827_v52  ;;  %v12290_v62 = vadd.f32 %v12289_v56, %v12288_v26  ;;  %v12373_v6 = vpop.f32.mrb[168].mxu1  ;;  %v18227_v18 = vpop.permute.xlu1 %4899 }
 0xc3b   : > { %v12374_v5 = vpop.f32.mrb[169].mxu1 }
 0xc3c   : > { %v6306_v3 = vadd.f32 %v12290_v62, %v5832_v48  ;;  %v18217_v2 = vadd.f32 %v12374_v5, %v12373_v6  ;;  %v12376_v12 = vpop.f32.mrb[170].mxu1  ;;  %v18220_v63 = vadd.f32 %v18181_v49, %v6303_v23 }
 0xc3d   : > { %v12377_v31 = vpop.f32.mrb[171].mxu1 }
 0xc3e   : > { %v18222_v8 = vadd.f32 %v12377_v31, %v12376_v12  ;;  %v12291_v44 = vpop.f32.mrb[140].mxu0  ;;  %v18225_v21 = vadd.f32 %v18183_v45, %v6306_v3  ;;  %v18234_v45 = vpop.permute.xlu0 %4904 }
 0xc3f   : > { %v12292_v52 = vpop.f32.mrb[141].mxu0  ;;  %v5857_v58 = vpop.permute.xlu1 %5856 }
 0xc40   : > { %v12293_v15 = vadd.f32 %v12292_v52, %v12291_v44  ;;  %v12294_v34 = vpop.f32.mrb[142].mxu0 }
 0xc41   : > { %v12295_v38 = vpop.f32.mrb[143].mxu0 }
 0xc42   : > { %v6311_v48 = vadd.f32 %v12293_v15, %v5837_v51  ;;  %v12296_v19 = vadd.f32 %v12295_v38, %v12294_v34  ;;  %v12379_v20 = vpop.f32.mrb[172].mxu1  ;;  %v5862_v23 = vpop.permute.xlu0 %5861 }
 0xc43   : > { %v12380_v49 = vpop.f32.mrb[173].mxu1  ;;  %v18251_v52 = vpop.permute.xlu1 %4909 }
 0xc44   : > { %v6314_v9 = vadd.f32 %v12296_v19, %v5842_v50  ;;  %v18229_v28 = vadd.f32 %v12380_v49, %v12379_v20  ;;  %v12382_v11 = vpop.f32.mrb[174].mxu1  ;;  %v18232_v27 = vadd.f32 %v18189_v32, %v6311_v48 }
 0xc45   : > { %v12383_v57 = vpop.f32.mrb[175].mxu1 }
 0xc46   : > { %v18236_v13 = vadd.f32 %v12383_v57, %v12382_v11  ;;  %v12297_v36 = vpop.f32.mrb[144].mxu0  ;;  %v18239_v51 = vadd.f32 %v18191_v4, %v6314_v9  ;;  %v18253_v38 = vpop.permute.xlu0 %4914 }
 0xc47   : > { %v12298_v46 = vpop.f32.mrb[145].mxu0 }
 0xc48   : > { %v12299_v1 = vadd.f32 %v12298_v46, %v12297_v36  ;;  %v12300_v0 = vpop.f32.mrb[146].mxu0 }
 0xc49   : > { %v12301_v50 = vpop.f32.mrb[147].mxu0 }
 0xc4a   : > { %v6319_v43 = vadd.f32 %v12299_v1, %v5847_v42  ;;  %v12302_v26 = vadd.f32 %v12301_v50, %v12300_v0  ;;  %v12465_v56 = vpop.f32.mrb[176].mxu1  ;;  %v5872_v50 = vpop.permute.xlu0 %5871 }
 0xc4b   : > { %v12466_v32 = vpop.f32.mrb[177].mxu1 }
 0xc4c   : > { %v6322_v62 = vadd.f32 %v12302_v26, %v5852_v61  ;;  %v18241_v6 = vadd.f32 %v12466_v32, %v12465_v56  ;;  %v12468_v5 = vpop.f32.mrb[178].mxu1  ;;  %v18244_v3 = vadd.f32 %v18195_v14, %v6319_v43 }
 0xc4d   : > { %v12469_v12 = vpop.f32.mrb[179].mxu1 }
 0xc4e   : > { %v18246_v4 = vadd.f32 %v12469_v12, %v12468_v5  ;;  %v12303_v31 = vpop.f32.mrb[148].mxu0  ;;  %v18249_v44 = vadd.f32 %v18201_v33, %v6322_v62  ;;  %v5867_v33 = vpop.permute.xlu1 %5866 }
 0xc4f   : > { %v12304_v42 = vpop.f32.mrb[149].mxu0 }
 0xc50   : > { %v12305_v15 = vadd.f32 %v12304_v42, %v12303_v31  ;;  %v12306_v34 = vpop.f32.mrb[150].mxu0 }
 0xc51   : > { %v12307_v61 = vpop.f32.mrb[151].mxu0 }
 0xc52   : > { %v6327_v48 = vadd.f32 %v12305_v15, %v5857_v58  ;;  %v12308_v19 = vadd.f32 %v12307_v61, %v12306_v34  ;;  %v12471_v20 = vpop.f32.mrb[180].mxu1  ;;  %v18265_v5 = vpop.permute.xlu1 %4919 }
 0xc53   : > { %v12472_v14 = vpop.f32.mrb[181].mxu1 }
 0xc54   : > { %v6330_v49 = vadd.f32 %v12308_v19, %v5862_v23  ;;  %v18255_v9 = vadd.f32 %v12472_v14, %v12471_v20  ;;  %v12474_v11 = vpop.f32.mrb[182].mxu1  ;;  %v18258_v57 = vadd.f32 %v18205_v40, %v6327_v48 }
 0xc55   : > { %v12475_v36 = vpop.f32.mrb[183].mxu1 }
 0xc56   : > { %v18260_v46 = vadd.f32 %v12475_v36, %v12474_v11  ;;  %v12309_v1 = vpop.f32.mrb[152].mxu0  ;;  %v18263_v0 = vadd.f32 %v18209_v35, %v6330_v49  ;;  %v18272_v35 = vpop.permute.xlu0 %4924 }
 0xc57   : > { %v12310_v58 = vpop.f32.mrb[153].mxu0  ;;  %v5877_v11 = vpop.permute.xlu1 %5876 }
 0xc58   : > { %v12311_v43 = vadd.f32 %v12310_v58, %v12309_v1  ;;  %v12312_v26 = vpop.f32.mrb[154].mxu0 }
 0xc59   : > { %v12313_v56 = vpop.f32.mrb[155].mxu0 }
 0xc5a   : > { %v6335_v23 = vadd.f32 %v12311_v43, %v5867_v33  ;;  %v12314_v32 = vadd.f32 %v12313_v56, %v12312_v26  ;;  %v12477_v62 = vpop.f32.mrb[184].mxu1  ;;  %v5882_v58 = vpop.permute.xlu0 %5881 }
 0xc5b   : > { %v12478_v40 = vpop.f32.mrb[185].mxu1 }
 0xc5c   : > { %v6338_v12 = vadd.f32 %v12314_v32, %v5872_v50  ;;  %v18267_v31 = vadd.f32 %v12478_v40, %v12477_v62  ;;  %v12480_v42 = vpop.f32.mrb[186].mxu1  ;;  %v18270_v15 = vadd.f32 %v18217_v2, %v6335_v23 }
 0xc5d   : > { %v12481_v34 = vpop.f32.mrb[187].mxu1 }
 0xc5e   : > { %v18274_v61 = vadd.f32 %v12481_v34, %v12480_v42  ;;  %v12315_v48 = vpop.f32.mrb[156].mxu0  ;;  %v18277_v19 = vadd.f32 %v18222_v8, %v6338_v12 }
 0xc5f   : > { %v12316_v20 = vpop.f32.mrb[157].mxu0 }
 0xc60   : > { %v12317_v14 = vadd.f32 %v12316_v20, %v12315_v48  ;;  %v12318_v49 = vpop.f32.mrb[158].mxu0 }
 0xc61   : > { %v12319_v33 = vpop.f32.mrb[159].mxu0 }
 0xc62   : > { %v6343_v36 = vadd.f32 %v12317_v14, %v5877_v11  ;;  %v12320_v1 = vadd.f32 %v12319_v33, %v12318_v49  ;;  %v12483_v50 = vpop.f32.mrb[188].mxu1 }
 0xc63   : > { %v12484_v2 = vpop.f32.mrb[189].mxu1 }
 0xc64   : > { %v6346_v43 = vadd.f32 %v12320_v1, %v5882_v58  ;;  %v18279_v26 = vadd.f32 %v12484_v2, %v12483_v50  ;;  %v12486_v56 = vpop.f32.mrb[190].mxu1  ;;  %v18282_v23 = vadd.f32 %v18229_v28, %v6343_v36 }
 0xc65   : > { %v12487_v32 = vpop.f32.mrb[191].mxu1 }
 0xc66   : > { %v18284_v8 = vadd.f32 %v12487_v32, %v12486_v56  ;;  %v12401_v62 = vpop.f32.mrb[160].mxu0  ;;  %v18287_v40 = vadd.f32 %v18236_v13, %v6346_v43 }
 0xc67   : > { %v12402_v12 = vpop.f32.mrb[161].mxu0 }
 0xc68   : > { %v12403_v42 = vadd.f32 %v12402_v12, %v12401_v62  ;;  %v12404_v34 = vpop.f32.mrb[162].mxu0 }
 0xc69   : > { %v12405_v48 = vpop.f32.mrb[163].mxu0 }
 0xc6a   : > { %v6481_v20 = vadd.f32 %v12403_v42, %v18197_v10  ;;  %v12406_v14 = vadd.f32 %v12405_v48, %v12404_v34  ;;  %v12489_v49 = vpop.f32.mrb[192].mxu1 }
 0xc6b   : > { %v12490_v11 = vpop.f32.mrb[193].mxu1 }
 0xc6c   : > { %v6484_v33 = vadd.f32 %v12406_v14, %v18203_v39  ;;  %v18291_v28 = vadd.f32 %v12490_v11, %v12489_v49  ;;  %v12492_v36 = vpop.f32.mrb[194].mxu1  ;;  %v6578_v1 = vadd.f32 %v18241_v6, %v6481_v20 }
 0xc6d   : > { %v12493_v50 = vpop.f32.mrb[195].mxu1 }
 0xc6e   : > { %v18294_v58 = vadd.f32 %v12493_v50, %v12492_v36  ;;  %v12407_v13 = vpop.f32.mrb[164].mxu0  ;;  %v18297_v2 = vadd.f32 %v18246_v4, %v6484_v33 }
 0xc6f   : > { %v12408_v43 = vpop.f32.mrb[165].mxu0 }
 0xc70   : > { %v12409_v56 = vadd.f32 %v12408_v43, %v12407_v13  ;;  %v12410_v10 = vpop.f32.mrb[166].mxu0 }
 0xc71   : > { %v12411_v32 = vpop.f32.mrb[167].mxu0 }
 0xc72   : > { %v6489_v62 = vadd.f32 %v12409_v56, %v18207_v60  ;;  %v12412_v12 = vadd.f32 %v12411_v32, %v12410_v10  ;;  %v12495_v39 = vpop.f32.mrb[196].mxu1 }
 0xc73   : > { %v12496_v42 = vpop.f32.mrb[197].mxu1 }
 0xc74   : > { %v6492_v34 = vadd.f32 %v12412_v12, %v18211_v54  ;;  %v18301_v48 = vadd.f32 %v12496_v42, %v12495_v39  ;;  %v12498_v6 = vpop.f32.mrb[198].mxu1  ;;  %v6586_v20 = vadd.f32 %v18255_v9, %v6489_v62 }
 0xc75   : > { %v12499_v14 = vpop.f32.mrb[199].mxu1 }
 0xc76   : > { %v18304_v49 = vadd.f32 %v12499_v14, %v12498_v6  ;;  %v12413_v4 = vpop.f32.mrb[168].mxu0  ;;  %v6589_v11 = vadd.f32 %v18260_v46, %v6492_v34 }
 0xc77   : > { %v12414_v33 = vpop.f32.mrb[169].mxu0 }
 0xc78   : > { %v12415_v36 = vadd.f32 %v12414_v33, %v12413_v4  ;;  %v12416_v50 = vpop.f32.mrb[170].mxu0 }
 0xc79   : > { %v12417_v60 = vpop.f32.mrb[171].mxu0 }
 0xc7a   : > { %v6497_v13 = vadd.f32 %v12415_v36, %v18220_v63  ;;  %v12418_v43 = vadd.f32 %v12417_v60, %v12416_v50  ;;  %v12501_v56 = vpop.f32.mrb[200].mxu1 }
 0xc7b   : > { %v12502_v54 = vpop.f32.mrb[201].mxu1 }
 0xc7c   : > { %v6500_v10 = vadd.f32 %v12418_v43, %v18225_v21  ;;  %v18309_v32 = vadd.f32 %v12502_v54, %v12501_v56  ;;  %v12504_v9 = vpop.f32.mrb[202].mxu1  ;;  %v6594_v62 = vadd.f32 %v18267_v31, %v6497_v13 }
 0xc7d   : > { %v12505_v12 = vpop.f32.mrb[203].mxu1 }
 0xc7e   : > { %v18312_v39 = vadd.f32 %v12505_v12, %v12504_v9  ;;  %v12419_v46 = vpop.f32.mrb[172].mxu0  ;;  %v6597_v42 = vadd.f32 %v18274_v61, %v6500_v10 }
 0xc7f   : > { %v12420_v34 = vpop.f32.mrb[173].mxu0 }
 0xc80   : > { %v12421_v6 = vadd.f32 %v12420_v34, %v12419_v46  ;;  %v12422_v14 = vpop.f32.mrb[174].mxu0  ;;  %v13310_v46 = vadd.f32 %v6586_v20, %v18193_v29 }
 0xc81   : > { %v12423_v63 = vpop.f32.mrb[175].mxu0 }
 0xc82   : > { %v6505_v4 = vadd.f32 %v12421_v6, %v18232_v27  ;;  %v12424_v33 = vadd.f32 %v12423_v63, %v12422_v14  ;;  %v12507_v36 = vpop.f32.mrb[204].mxu1  ;;  %v13312_v14 = vadd.f32 %v6578_v1, %v18185_v24 }
 0xc83   : > { %v12508_v21 = vpop.f32.mrb[205].mxu1 }
 0xc84   : > { %v6508_v50 = vadd.f32 %v12424_v33, %v18239_v51  ;;  %v18317_v60 = vadd.f32 %v12508_v21, %v12507_v36  ;;  %v12510_v31 = vpop.f32.mrb[206].mxu1  ;;  %v6602_v13 = vadd.f32 %v18279_v26, %v6505_v4  ;;  %v13314_v4 = vadd.f32 %v6589_v11, %v18199_v7 }
 0xc85   : > { %v12511_v43 = vpop.f32.mrb[207].mxu1  ;;  %v13316_v21 = vadd.f32 %v18297_v2, %v18187_v25 }
 0xc86   : > { %v18320_v56 = vadd.f32 %v12511_v43, %v12510_v31  ;;  %v12425_v61 = vpop.f32.mrb[176].mxu0  ;;  %v6605_v54 = vadd.f32 %v18284_v8, %v6508_v50  ;;  %v13318_v25 = vadd.f32 %v6602_v13, %v18227_v18 }
 0xc87   : > { %v12426_v10 = vpop.f32.mrb[177].mxu0 }
 0xc88   : > { %v12427_v9 = vadd.f32 %v12426_v10, %v12425_v61  ;;  %v12428_v12 = vpop.f32.mrb[178].mxu0 }
 0xc89   : > { %v12429_v27 = vpop.f32.mrb[179].mxu0 }
 0xc8a   : > { %v6513_v34 = vadd.f32 %v12427_v9, %v18244_v3  ;;  %v12430_v51 = vadd.f32 %v12429_v27, %v12428_v12  ;;  %v13212_v6 = vpop.f32.mrb[128].mxu1 }
 0xc8b   : > { %v13311_v63 = vadd.f32 %v13310_v46, %v13212_v6  ;;  %v6674_v26 = vpop.f32.mrb[129].mxu1 }
 0xc8c   : > { %v6516_v33 = vadd.f32 %v12430_v51, %v18249_v44  ;;  %v13313_v36 = vadd.f32 %v13312_v14, %v6674_v26  ;;  %v13213_v8 = vpop.f32.mrb[130].mxu1  ;;  %v6610_v50 = vadd.f32 %v18291_v28, %v6513_v34  ;;  %v13320_v28 = vadd.f32 %v6594_v62, %v18213_v47 }
 0xc8d   : > { %v13315_v29 = vadd.f32 %v13314_v4, %v13213_v8  ;;  %v6677_v20 = vpop.f32.mrb[131].mxu1  ;;  %v13322_v34 = vadd.f32 %v6605_v54, %v18234_v45  ;;  %v13324_v51 = vadd.f32 %v6597_v42, %v18215_v59  ;;  %v18347_v6 = vmax.f32 %v13311_v63, 0.0 }
 0xc8e   : > { %v13317_v3 = vadd.f32 %v13316_v21, %v6677_v20  ;;  %v12431_v31 = vpop.f32.mrb[180].mxu0  ;;  %v6613_v43 = vadd.f32 %v18294_v58, %v6516_v33  ;;  %v18332_v1 = vmax.f32 %v13313_v36, 0.0 }
 0xc8f   : > { %v12432_v24 = vpop.f32.mrb[181].mxu0  ;;  %v18336_v11 = vmax.f32 %v13315_v29, 0.0 }
 0xc90   : > { %v18334_v61 = vmax.f32 %v13317_v3, 0.0  ;;  %v12433_v7 = vadd.f32 %v12432_v24, %v12431_v31  ;;  %v12434_v44 = vpop.f32.mrb[182].mxu0 }
 0xc91   : > { %v12435_v10 = vpop.f32.mrb[183].mxu0  ;;  %v18357_v59 = vpack.i.bf16 %v18336_v11, %v18347_v6 }
 0xc92   : > { %v6521_v2 = vadd.f32 %v12433_v7, %v18258_v57  ;;  %v12436_v9 = vadd.f32 %v12435_v10, %v12434_v44  ;;  %v13216_v12 = vpop.f32.mrb[132].mxu1  ;;  %v18343_v58 = vpack.i.bf16 %v18334_v61, %v18332_v1  ;;  %v13332_v44 = vadd.f32 %v6613_v43, %v18253_v38  ;;  %v4930_v43 = vpop.permute.xlu1 %4929 }
 0xc93   : > { %v13319_v27 = vadd.f32 %v13318_v25, %v13216_v12  ;;  %v6690_v46 = vpop.f32.mrb[133].mxu1 }
 0xc94   : > { %v6524_v18 = vadd.f32 %v12436_v9, %v18263_v0  ;;  %v13321_v13 = vadd.f32 %v13320_v28, %v6690_v46  ;;  %v13217_v47 = vpop.f32.mrb[134].mxu1  ;;  %14644 = vrot.lane.b32.xlu0 %v18343_v58, %s20031_s9  ;;  %14634 = vrot.lane.b32.xlu1 %v18343_v58, %s20033_s26  ;;  %v6618_v57 = vadd.f32 %v18301_v48, %v6521_v2 }
 0xc95   : > { %v13323_v62 = vadd.f32 %v13322_v34, %v13217_v47  ;;  %v6693_v14 = vpop.f32.mrb[135].mxu1  ;;  %v18379_v10 = vmax.f32 %v13319_v27, 0.0 }
 0xc96   : > { %v13325_v26 = vadd.f32 %v13324_v51, %v6693_v14  ;;  %v12437_v45 = vpop.f32.mrb[184].mxu0  ;;  %v6621_v0 = vadd.f32 %v18304_v49, %v6524_v18  ;;  %v18360_v54 = vmax.f32 %v13321_v13, 0.0  ;;  %v13326_v8 = vadd.f32 %v6618_v57, %v18265_v5 }
 0xc97   : > { %v12438_v42 = vpop.f32.mrb[185].mxu0  ;;  %v18368_v48 = vmax.f32 %v13323_v62, 0.0  ;;  %v13328_v49 = vadd.f32 %v6610_v50, %v18251_v52 }
 0xc98   : > { %v18362_v63 = vmax.f32 %v13325_v26, 0.0  ;;  %v12439_v4 = vadd.f32 %v12438_v42, %v12437_v45  ;;  %v12440_v33 = vpop.f32.mrb[186].mxu0  ;;  %14649 = vrot.lane.b32.xlu0 %v18357_v59, %s20031_s9  ;;  %14639 = vrot.lane.b32.xlu1 %v18357_v59, %s20033_s26  ;;  %v13330_v7 = vadd.f32 %v6621_v0, %v18272_v35 }
 0xc99   : > { %v12441_v36 = vpop.f32.mrb[187].mxu0  ;;  %v18389_v38 = vpack.i.bf16 %v18368_v48, %v18379_v10 }
 0xc9a   : > { %v6529_v21 = vadd.f32 %v12439_v4, %v18270_v15  ;;  %v12442_v29 = vadd.f32 %v12441_v36, %v12440_v33  ;;  %v13220_v20 = vpop.f32.mrb[136].mxu1  ;;  %v18375_v3 = vpack.i.bf16 %v18362_v63, %v18360_v54 }
 0xc9b   : > { %v13327_v31 = vadd.f32 %v13326_v8, %v13220_v20  ;;  %v6706_v24 = vpop.f32.mrb[137].mxu1 }
 0xc9c   : > { %v6532_v5 = vadd.f32 %v12442_v29, %v18277_v19  ;;  %v13329_v25 = vadd.f32 %v13328_v49, %v6706_v24  ;;  %v13221_v52 = vpop.f32.mrb[138].mxu1  ;;  %14664 = vrot.lane.b32.xlu0 %v18375_v3, %s20031_s9  ;;  %14654 = vrot.lane.b32.xlu1 %v18375_v3, %s20033_s26  ;;  %v6626_v15 = vadd.f32 %v18309_v32, %v6529_v21  ;;  %v4935_v32 = vpop.permute.xlu0 %4934 }
 0xc9d   : > { %v13331_v50 = vadd.f32 %v13330_v7, %v13221_v52  ;;  %v6709_v28 = vpop.f32.mrb[139].mxu1  ;;  %v18407_v14 = vmax.f32 %v13327_v31, 0.0 }
 0xc9e   : > { %v13333_v2 = vadd.f32 %v13332_v44, %v6709_v28  ;;  %v12443_v35 = vpop.f32.mrb[188].mxu0  ;;  %v6629_v19 = vadd.f32 %v18312_v39, %v6532_v5  ;;  %v18392_v12 = vmax.f32 %v13329_v25, 0.0  ;;  %v13336_v13 = vadd.f32 %v6626_v15, %v4930_v43  ;;  %v15579_v15 = vld [vmem:[%s20042_s1 + $0xc] ss:$36 sps:$4 sm:$0xff]  }
 0xc9f   : > { %v12444_v9 = vpop.f32.mrb[189].mxu0  ;;  %v18400_v51 = vmax.f32 %v13331_v50, 0.0  ;;  %8042 = vmatprep.mubr.bf16.mxu1 %v15579_v15 }
 0xca0   : > { %v18394_v27 = vmax.f32 %v13333_v2, 0.0  ;;  %v12445_v46 = vadd.f32 %v12444_v9, %v12443_v35  ;;  %v12446_v34 = vpop.f32.mrb[190].mxu0  ;;  %14669 = vrot.lane.b32.xlu0 %v18389_v38, %s20031_s9  ;;  %14659 = vrot.lane.b32.xlu1 %v18389_v38, %s20033_s26  ;;  %v13340_v45 = vadd.f32 %v6629_v19, %v4935_v32  ;;  %v4945_v29 = vpop.permute.xlu0 %4944 }
 0xca1   : > { %v12447_v18 = vpop.f32.mrb[191].mxu0  ;;  %v18417_v8 = vpack.i.bf16 %v18400_v51, %v18407_v14 }
 0xca2   : > { %v6537_v39 = vadd.f32 %v12445_v46, %v18282_v23  ;;  %v12448_v47 = vadd.f32 %v12447_v18, %v12446_v34  ;;  %v13224_v57 = vpop.f32.mrb[140].mxu1  ;;  %v18405_v62 = vpack.i.bf16 %v18394_v27, %v18392_v12  ;;  %v4940_v23 = vpop.permute.xlu1 %4939 }
 0xca3   : > { %v6722_v26 = vpop.f32.mrb[141].mxu1 }
 0xca4   : > { %v6540_v0 = vadd.f32 %v12448_v47, %v18287_v40  ;;  %v6634_v42 = vadd.f32 %v18317_v60, %v6537_v39  ;;  %v13337_v4 = vadd.f32 %v13336_v13, %v6722_v26  ;;  %v13225_v33 = vpop.f32.mrb[142].mxu1  ;;  %14684 = vrot.lane.b32.xlu0 %v18405_v62, %s20031_s9  ;;  %14674 = vrot.lane.b32.xlu1 %v18405_v62, %s20033_s26 }
 0xca5   : > { %v6725_v36 = vpop.f32.mrb[143].mxu1 }
 0xca6   : > { %v13334_v49 = vadd.f32 %v6634_v42, %v4940_v23  ;;  %v6637_v21 = vadd.f32 %v18320_v56, %v6540_v0  ;;  %v13341_v40 = vadd.f32 %v13340_v45, %v6725_v36  ;;  %v18420_v20 = vmax.f32 %v13337_v4, 0.0  ;;  %v15567_v56 = vld [vmem:[%s20041_s4 + $0x4] ss:$36 sps:$4 sm:$0xff]  }
 0xca7   : > { %7945 = vmatprep.mubr.bf16.mxu0 %v15567_v56  ;;  %v7450_v4 = vld [vmem:[%s20043_s2 + $0x8] sm:$0xff] }
 0xca8   : > { %v13335_v60 = vadd.f32 %v13334_v49, %v13224_v57  ;;  %v13338_v31 = vadd.f32 %v6637_v21, %v4945_v29  ;;  %v18422_v24 = vmax.f32 %v13341_v40, 0.0  ;;  %14689 = vrot.lane.b32.xlu0 %v18417_v8, %s20031_s9  ;;  %14679 = vrot.lane.b32.xlu1 %v18417_v8, %s20033_s26 }
 0xcaa   : > { %v13339_v7 = vadd.f32 %v13338_v31, %v13225_v33  ;;  %v18430_v44 = vpack.i.bf16 %v18422_v24, %v18420_v20  ;;  %v18435_v5 = vmax.f32 %v13335_v60, 0.0  ;;  %v7449_v33 = vld [vmem:[%s20043_s2] sm:$0xff]  ;;  %v7452_v31 = vld [vmem:[%s20043_s2 + $0x18] sm:$0xff] }
 0xcac   : > { %v18437_v25 = vmax.f32 %v13339_v7, 0.0  ;;  %14704 = vrot.lane.b32.xlu0 %v18430_v44, %s20031_s9  ;;  %14694 = vrot.lane.b32.xlu1 %v18430_v44, %s20033_s26  ;;  %v7451_v7 = vld [vmem:[%s20043_s2 + $0x10] sm:$0xff] }
 0xcae   : > { %v18445_v52 = vpack.i.bf16 %v18437_v25, %v18435_v5 }
 0xcb0   : > { %14709 = vrot.lane.b32.xlu0 %v18445_v52, %s20031_s9  ;;  %14699 = vrot.lane.b32.xlu1 %v18445_v52, %s20033_s26 }
 0xcb4   : > { %14719 = vrot.lane.b32.xlu0 %v18343_v58, %s20032_s7  ;;  %14714 = vrot.lane.b32.xlu1 %v18343_v58, %s20025_s15 }
 0xcb8   : > { %14729 = vrot.lane.b32.xlu0 %v18357_v59, %s20032_s7  ;;  %14724 = vrot.lane.b32.xlu1 %v18357_v59, %s20025_s15 }
 0xcbc   : > { %14739 = vrot.lane.b32.xlu0 %v18375_v3, %s20032_s7  ;;  %14734 = vrot.lane.b32.xlu1 %v18375_v3, %s20025_s15 }
 0xcc0   : > { %14749 = vrot.lane.b32.xlu0 %v18389_v38, %s20032_s7  ;;  %14744 = vrot.lane.b32.xlu1 %v18389_v38, %s20025_s15 }
 0xcc4   : > { %14759 = vrot.lane.b32.xlu0 %v18405_v62, %s20032_s7  ;;  %14754 = vrot.lane.b32.xlu1 %v18405_v62, %s20025_s15 }
 0xcc8   : > { %14769 = vrot.lane.b32.xlu0 %v18417_v8, %s20032_s7  ;;  %14764 = vrot.lane.b32.xlu1 %v18417_v8, %s20025_s15 }
 0xccc   : > { %14784 = vrot.lane.b32.xlu0 %v18430_v44, %s20032_s7  ;;  %14774 = vrot.lane.b32.xlu1 %v18430_v44, %s20025_s15 }
 0xcd0   : > { %14789 = vrot.lane.b32.xlu0 %v18445_v52, %s20032_s7  ;;  %14779 = vrot.lane.b32.xlu1 %v18445_v52, %s20025_s15 }
 0xcd4   : > { %14799 = vrot.lane.b32.xlu0 %v18357_v59, %s20027_s29  ;;  %14794 = vrot.lane.b32.xlu1 %v18343_v58, %s20027_s29 }
 0xcd8   : > { %14809 = vrot.lane.b32.xlu0 %v18389_v38, %s20027_s29  ;;  %14804 = vrot.lane.b32.xlu1 %v18375_v3, %s20027_s29 }
 0xcdc   : > { %14819 = vrot.lane.b32.xlu0 %v18417_v8, %s20027_s29  ;;  %14814 = vrot.lane.b32.xlu1 %v18405_v62, %s20027_s29 }
 0xce0   : > { %14829 = vrot.lane.b32.xlu0 %v18445_v52, %s20027_s29  ;;  %14824 = vrot.lane.b32.xlu1 %v18430_v44, %s20027_s29 }
 0xce4   : > { %14839 = vrot.lane.b32.xlu0 %v18343_v58, %s20026_s18  ;;  %14834 = vrot.lane.b32.xlu1 %v18343_v58, %s20028_s28 }
 0xce8   : > { %14849 = vrot.lane.b32.xlu0 %v18357_v59, %s20026_s18  ;;  %14844 = vrot.lane.b32.xlu1 %v18357_v59, %s20028_s28 }
 0xcec   : > { %14859 = vrot.lane.b32.xlu0 %v18375_v3, %s20026_s18  ;;  %14854 = vrot.lane.b32.xlu1 %v18375_v3, %s20028_s28 }
 0xcf0   : > { %14869 = vrot.lane.b32.xlu0 %v18389_v38, %s20026_s18  ;;  %14864 = vrot.lane.b32.xlu1 %v18389_v38, %s20028_s28 }
 0xcf4   : > { %14879 = vrot.lane.b32.xlu0 %v18405_v62, %s20026_s18  ;;  %14874 = vrot.lane.b32.xlu1 %v18405_v62, %s20028_s28 }
 0xcf8   : > { %14889 = vrot.lane.b32.xlu0 %v18417_v8, %s20026_s18  ;;  %14884 = vrot.lane.b32.xlu1 %v18417_v8, %s20028_s28 }
 0xcfc   : > { %14904 = vrot.lane.b32.xlu0 %v18430_v44, %s20026_s18  ;;  %14894 = vrot.lane.b32.xlu1 %v18430_v44, %s20028_s28 }
 0xd00   : > { %14909 = vrot.lane.b32.xlu0 %v18445_v52, %s20026_s18  ;;  %14899 = vrot.lane.b32.xlu1 %v18445_v52, %s20028_s28 }
 0xd04   : > { %14919 = vrot.lane.b32.xlu0 %v18357_v59, %s20029_s0  ;;  %14914 = vrot.lane.b32.xlu1 %v18343_v58, %s20029_s0 }
 0xd06   : > { %v14645_v50 = vpop.permute.xlu0 %14644  ;;  %v14635_v28 = vpop.permute.xlu1 %14634 }
 0xd07   : > { %v14647_v2 = vunpack.i.h.bf16 %v14645_v50  ;;  %v14646_v35 = vunpack.i.l.bf16 %v14645_v50  ;;  %v14637_v19 = vunpack.i.h.bf16 %v14635_v28  ;;  %v14636_v43 = vunpack.i.l.bf16 %v14635_v28 }
 0xd08   : > { %14929 = vrot.lane.b32.xlu0 %v18389_v38, %s20029_s0  ;;  %14924 = vrot.lane.b32.xlu1 %v18375_v3, %s20029_s0 }
 0xd09   : > { %v11370_v9 = vpack.c.bf16 %v14647_v2, %v14646_v35  ;;  %v11394_v46 = vpack.c.bf16 %v14637_v19, %v14636_v43  ;;  %v7454_v19 = vld [vmem:[%s20043_s2 + $0x28] sm:$0xff]  ;;  %v7453_v43 = vld [vmem:[%s20043_s2 + $0x20] sm:$0xff] }
 0xd0a   : > { %v14650_v34 = vpop.permute.xlu0 %14649  ;;  %v14640_v32 = vpop.permute.xlu1 %14639 }
 0xd0b   : > { %v14652_v59 = vunpack.i.h.bf16 %v14650_v34  ;;  %v14651_v18 = vunpack.i.l.bf16 %v14650_v34  ;;  %v14642_v13 = vunpack.i.h.bf16 %v14640_v32  ;;  %v14641_v58 = vunpack.i.l.bf16 %v14640_v32  ;;  %12529 = vmatprep.subr.msk.bf16.mxu0 %vm16467_vm4, %v11394_v46 }
 0xd0c   : > { %14939 = vrot.lane.b32.xlu0 %v18417_v8, %s20029_s0  ;;  %14934 = vrot.lane.b32.xlu1 %v18405_v62, %s20029_s0 }
 0xd0d   : > { %v11373_v38 = vpack.c.bf16 %v14652_v59, %v14651_v18  ;;  %v11397_v39 = vpack.c.bf16 %v14642_v13, %v14641_v58  ;;  %12530 = vmatpush3.bf16.msk.msra.mxu0 %vm16462_vm2, %v11370_v9 }
 0xd0e   : > { %v14665_v3 = vpop.permute.xlu0 %14664  ;;  %v14655_v47 = vpop.permute.xlu1 %14654 }
 0xd0f   : > { %v14667_v57 = vunpack.i.h.bf16 %v14665_v3  ;;  %v14666_v26 = vunpack.i.l.bf16 %v14665_v3  ;;  %v14657_v45 = vunpack.i.h.bf16 %v14655_v47  ;;  %v14656_v0 = vunpack.i.l.bf16 %v14655_v47  ;;  %12531 = vmatprep.subr.msk.bf16.mxu0 %vm16467_vm4, %v11397_v39  ;;  %v7455_v39 = vld [vmem:[%s20043_s2 + $0x30] sm:$0xff] }
 0xd10   : > { %14949 = vrot.lane.b32.xlu0 %v18445_v52, %s20029_s0  ;;  %14944 = vrot.lane.b32.xlu1 %v18430_v44, %s20029_s0 }
 0xd11   : > { %v11376_v62 = vpack.c.bf16 %v14667_v57, %v14666_v26  ;;  %v11400_v42 = vpack.c.bf16 %v14657_v45, %v14656_v0  ;;  %12532 = vmatpush3.bf16.msk.msra.mxu0 %vm16462_vm2, %v11373_v38  ;;  %v7456_v38 = vld [vmem:[%s20043_s2 + $0x38] sm:$0xff] }
 0xd12   : > { %v14670_v23 = vpop.permute.xlu0 %14669  ;;  %v14660_v36 = vpop.permute.xlu1 %14659 }
 0xd13   : > { %v14672_v8 = vunpack.i.h.bf16 %v14670_v23  ;;  %v14671_v49 = vunpack.i.l.bf16 %v14670_v23  ;;  %v14662_v21 = vunpack.i.h.bf16 %v14660_v36  ;;  %v14661_v40 = vunpack.i.l.bf16 %v14660_v36  ;;  %12533 = vmatprep.subr.msk.bf16.mxu0 %vm16467_vm4, %v11400_v42 }
 0xd14   : > { %7472 = vperm.xlu0 %13511, %v7450_v4   ;;  %7467 = vperm.xlu1 %13512, %v7449_v33   ;;  %v7458_v4 = vld [vmem:[%s20043_s2 + $0x48] sm:$0xff]  ;;  %v7457_v33 = vld [vmem:[%s20043_s2 + $0x40] sm:$0xff] }
 0xd15   : > { %v11379_v29 = vpack.c.bf16 %v14672_v8, %v14671_v49  ;;  %v11403_v60 = vpack.c.bf16 %v14662_v21, %v14661_v40  ;;  %12534 = vmatpush3.bf16.msk.msra.mxu0 %vm16462_vm2, %v11376_v62 }
 0xd16   : > { %v14685_v44 = vpop.permute.xlu0 %14684  ;;  %v14675_v56 = vpop.permute.xlu1 %14674 }
 0xd17   : > { %v14687_v52 = vunpack.i.h.bf16 %v14685_v44  ;;  %v14686_v15 = vunpack.i.l.bf16 %v14685_v44  ;;  %v14677_v50 = vunpack.i.h.bf16 %v14675_v56  ;;  %v14676_v28 = vunpack.i.l.bf16 %v14675_v56  ;;  %12535 = vmatprep.subr.msk.bf16.mxu0 %vm16467_vm4, %v11403_v60 }
 0xd18   : > { %7482 = vperm.xlu0 %13511, %v7452_v31   ;;  %7477 = vperm.xlu1 %13512, %v7451_v7   ;;  %v7460_v31 = vld [vmem:[%s20043_s2 + $0x58] sm:$0xff]  ;;  %v7459_v7 = vld [vmem:[%s20043_s2 + $0x50] sm:$0xff] }
 0xd19   : > { %v11382_v2 = vpack.c.bf16 %v14687_v52, %v14686_v15  ;;  %v11406_v35 = vpack.c.bf16 %v14677_v50, %v14676_v28  ;;  %12536 = vmatpush3.bf16.msk.msra.mxu0 %vm16462_vm2, %v11379_v29 }
 0xd1a   : > { %v14690_v9 = vpop.permute.xlu0 %14689  ;;  %v14680_v46 = vpop.permute.xlu1 %14679 }
 0xd1b   : > { %v14692_v34 = vunpack.i.h.bf16 %v14690_v9  ;;  %v14691_v32 = vunpack.i.l.bf16 %v14690_v9  ;;  %v14682_v59 = vunpack.i.h.bf16 %v14680_v46  ;;  %v14681_v18 = vunpack.i.l.bf16 %v14680_v46  ;;  %12537 = vmatprep.subr.msk.bf16.mxu0 %vm16467_vm4, %v11406_v35 }
 0xd1c   : > { %7492 = vperm.xlu0 %13511, %v7454_v19   ;;  %7487 = vperm.xlu1 %13512, %v7453_v43   ;;  %v7462_v43 = vld [vmem:[%s20043_s2 + $0x68] sm:$0xff] }
 0xd1d   : > { %v11385_v13 = vpack.c.bf16 %v14692_v34, %v14691_v32  ;;  %v11409_v58 = vpack.c.bf16 %v14682_v59, %v14681_v18  ;;  %12538 = vmatpush3.bf16.msk.msra.mxu0 %vm16462_vm2, %v11382_v2  ;;  %v15565_v2 = vld [vmem:[%s20042_s1] ss:$36 sps:$4 sm:$0xff]   ;;  %v15568_v32 = vld [vmem:[%s20042_s1 + $0x4c] ss:$36 sps:$4 sm:$0xff]  }
 0xd1e   : > { %v14705_v3 = vpop.permute.xlu0 %14704  ;;  %v14695_v47 = vpop.permute.xlu1 %14694  ;;  %v7461_v34 = vld [vmem:[%s20043_s2 + $0x60] sm:$0xff] }
 0xd1f   : > { %v14707_v57 = vunpack.i.h.bf16 %v14705_v3  ;;  %v14706_v26 = vunpack.i.l.bf16 %v14705_v3  ;;  %v14697_v45 = vunpack.i.h.bf16 %v14695_v47  ;;  %v14696_v0 = vunpack.i.l.bf16 %v14695_v47  ;;  %12539 = vmatprep.subr.msk.bf16.mxu0 %vm16467_vm4, %v11409_v58  ;;  %v7464_v3 = vld [vmem:[%s20043_s2 + $0x78] sm:$0xff] }
 0xd20   : > { %7502 = vperm.xlu0 %13511, %v7456_v38   ;;  %7497 = vperm.xlu1 %13512, %v7455_v39  }
 0xd21   : > { %v11388_v62 = vpack.c.bf16 %v14707_v57, %v14706_v26  ;;  %v11412_v42 = vpack.c.bf16 %v14697_v45, %v14696_v0  ;;  %12540 = vmatpush3.bf16.msk.msra.mxu0 %vm16462_vm2, %v11385_v13  ;;  %v7463_v26 = vld [vmem:[%s20043_s2 + $0x70] sm:$0xff]  ;;  %s16045_s2 = smov [#allocation14]  }
 0xd22   : > { %v14710_v23 = vpop.permute.xlu0 %14709  ;;  %v14700_v36 = vpop.permute.xlu1 %14699  ;;  %s15947_s19 = sshll.u32 %s16045_s2, 4  ;;  %s15948_s19 = int_to_ptr.vmem [resolvable:$false] %s15947_s19 }
 0xd23   : > { %v14712_v8 = vunpack.i.h.bf16 %v14710_v23  ;;  %v14711_v49 = vunpack.i.l.bf16 %v14710_v23  ;;  %v14702_v21 = vunpack.i.h.bf16 %v14700_v36  ;;  %v14701_v40 = vunpack.i.l.bf16 %v14700_v36  ;;  %12541 = vmatprep.subr.msk.bf16.mxu0 %vm16467_vm4, %v11412_v42  ;;  %v15571_v36 = vld [vmem:[%s20042_s1 + $0x94] ss:$36 sps:$4 sm:$0xff]   ;;  %s15949_s4 = scalar_lea.vmem %s15948_s19, 256 }
 0xd24   : > { %7512 = vperm.xlu0 %13511, %v7458_v4   ;;  %7507 = vperm.xlu1 %13512, %v7457_v33   ;;  %v15570_v4 = vld [vmem:[%s20042_s1 + $0x48] ss:$36 sps:$4 sm:$0xff]  }
 0xd25   : > { %v11391_v29 = vpack.c.bf16 %v14712_v8, %v14711_v49  ;;  %v11415_v60 = vpack.c.bf16 %v14702_v21, %v14701_v40  ;;  %12542 = vmatpush3.bf16.msk.msra.mxu0 %vm16462_vm2, %v11388_v62 }
 0xd26   : > { %v14720_v44 = vpop.permute.xlu0 %14719  ;;  %v14715_v56 = vpop.permute.xlu1 %14714 }
 0xd27   : > { %v14722_v52 = vunpack.i.h.bf16 %v14720_v44  ;;  %v14721_v15 = vunpack.i.l.bf16 %v14720_v44  ;;  %v14717_v50 = vunpack.i.h.bf16 %v14715_v56  ;;  %v14716_v28 = vunpack.i.l.bf16 %v14715_v56  ;;  %12543 = vmatprep.subr.msk.bf16.mxu0 %vm16467_vm4, %v11415_v60 }
 0xd28   : > { %7522 = vperm.xlu0 %13511, %v7460_v31   ;;  %7517 = vperm.xlu1 %13512, %v7459_v7  }
 0xd29   : > { %v11418_v35 = vpack.c.bf16 %v14722_v52, %v14721_v15  ;;  %v11442_v19 = vpack.c.bf16 %v14717_v50, %v14716_v28  ;;  %12544 = vmatpush3.bf16.msk.msra.mxu0 %vm16462_vm2, %v11391_v29 }
 0xd2a   : > { %v14730_v9 = vpop.permute.xlu0 %14729  ;;  %v14725_v46 = vpop.permute.xlu1 %14724 }
 0xd2b   : > { %v14732_v59 = vunpack.i.h.bf16 %v14730_v9  ;;  %v14731_v18 = vunpack.i.l.bf16 %v14730_v9  ;;  %v14727_v13 = vunpack.i.h.bf16 %v14725_v46  ;;  %v14726_v58 = vunpack.i.l.bf16 %v14725_v46  ;;  %12593 = vmatprep.subr.msk.bf16.mxu1 %vm16480_vm8, %v11442_v19 }
 0xd2c   : > { %7946 = vmatmul.mubr.bf16.vlgmr.msra.gmra.mrb[192].mxu0 %v15565_v2  ;;  %7532 = vperm.xlu0 %13511, %v7462_v43   ;;  %v15573_v2 = vld [vmem:[%s20042_s1 + $0x90] ss:$36 sps:$4 sm:$0xff]   ;;  %v15574_v43 = vld [vmem:[%s20042_s1 + $0xdc] ss:$36 sps:$4 sm:$0xff]  }
 0xd2d   : > { %v11421_v38 = vpack.c.bf16 %v14732_v59, %v14731_v18  ;;  %v11445_v39 = vpack.c.bf16 %v14727_v13, %v14726_v58  ;;  %7527 = vperm.xlu1 %13512, %v7461_v34   ;;  %12594 = vmatpush3.bf16.msk.msra.mxu1 %vm16472_vm6, %v11418_v35 }
 0xd2e   : > { %v14740_v47 = vpop.permute.xlu0 %14739  ;;  %v14735_v57 = vpop.permute.xlu1 %14734  ;;  %7953 = vmatprep.mubr.bf16.mxu0 %v15568_v32 }
 0xd2f   : > { %v14742_v45 = vunpack.i.h.bf16 %v14740_v47  ;;  %v14741_v0 = vunpack.i.l.bf16 %v14740_v47  ;;  %v14737_v62 = vunpack.i.h.bf16 %v14735_v57  ;;  %v14736_v42 = vunpack.i.l.bf16 %v14735_v57  ;;  %12595 = vmatprep.subr.msk.bf16.mxu1 %vm16480_vm8, %v11445_v39 }
 0xd30   : > { %7542 = vperm.xlu0 %13511, %v7464_v3  }
 0xd31   : > { %v11424_v33 = vpack.c.bf16 %v14742_v45, %v14741_v0  ;;  %v11448_v23 = vpack.c.bf16 %v14737_v62, %v14736_v42  ;;  %7537 = vperm.xlu1 %13512, %v7463_v26   ;;  %12596 = vmatpush3.bf16.msk.msra.mxu1 %vm16472_vm6, %v11421_v38  ;;  %v15576_v45 = vld [vmem:[%s20042_s1 + $0xd8] ss:$36 sps:$4 sm:$0xff]   ;;  %v15580_v42 = vld [vmem:[%s20042_s1 + $0x124] ss:$36 sps:$4 sm:$0xff]  }
 0xd32   : > { %v14750_v8 = vpop.permute.xlu0 %14749  ;;  %v14745_v49 = vpop.permute.xlu1 %14744 }
 0xd33   : > { %v14752_v21 = vunpack.i.h.bf16 %v14750_v8  ;;  %v14751_v40 = vunpack.i.l.bf16 %v14750_v8  ;;  %v14747_v29 = vunpack.i.h.bf16 %v14745_v49  ;;  %v14746_v60 = vunpack.i.l.bf16 %v14745_v49  ;;  %12597 = vmatprep.subr.msk.bf16.mxu1 %vm16480_vm8, %v11448_v23 }
 0xd34   : > { %7954 = vmatmul.mubr.bf16.gmra.mrb[196].mxu0 %v15570_v4 }
 0xd35   : > { %v11427_v31 = vpack.c.bf16 %v14752_v21, %v14751_v40  ;;  %v11451_v7 = vpack.c.bf16 %v14747_v29, %v14746_v60  ;;  %12598 = vmatpush3.bf16.msk.msra.mxu1 %vm16472_vm6, %v11424_v33  ;;  %7961 = vmatprep.mubr.bf16.mxu0 %v15571_v36 }
 0xd36   : > { %v14760_v44 = vpop.permute.xlu0 %14759  ;;  %v14755_v56 = vpop.permute.xlu1 %14754 }
 0xd37   : > { %v14762_v52 = vunpack.i.h.bf16 %v14760_v44  ;;  %v14761_v15 = vunpack.i.l.bf16 %v14760_v44  ;;  %v14757_v50 = vunpack.i.h.bf16 %v14755_v56  ;;  %v14756_v28 = vunpack.i.l.bf16 %v14755_v56  ;;  %12599 = vmatprep.subr.msk.bf16.mxu1 %vm16480_vm8, %v11451_v7 }
 0xd39   : > { %v11430_v35 = vpack.c.bf16 %v14762_v52, %v14761_v15  ;;  %v11454_v19 = vpack.c.bf16 %v14757_v50, %v14756_v28  ;;  %12600 = vmatpush3.bf16.msk.msra.mxu1 %vm16472_vm6, %v11427_v31  ;;  %v15577_v52 = vld [vmem:[%s20042_s1 + $0x8] ss:$36 sps:$4 sm:$0xff]   ;;  %v15582_v15 = vld [vmem:[%s20042_s1 + $0x120] ss:$36 sps:$4 sm:$0xff]  }
 0xd3a   : > { %v14770_v9 = vpop.permute.xlu0 %14769  ;;  %v14765_v46 = vpop.permute.xlu1 %14764  ;;  %v15583_v28 = vld [vmem:[%s20042_s1 + $0x16c] ss:$36 sps:$4 sm:$0xff]  }
 0xd3b   : > { %v14772_v34 = vunpack.i.h.bf16 %v14770_v9  ;;  %v14771_v32 = vunpack.i.l.bf16 %v14770_v9  ;;  %v14767_v59 = vunpack.i.h.bf16 %v14765_v46  ;;  %v14766_v18 = vunpack.i.l.bf16 %v14765_v46  ;;  %12601 = vmatprep.subr.msk.bf16.mxu1 %vm16480_vm8, %v11454_v19  ;;  %v15585_v19 = vld [vmem:[%s20042_s1 + $0x54] ss:$36 sps:$4 sm:$0xff]  }
 0xd3c   : > { %7962 = vmatmul.mubr.bf16.gmra.mrb[200].mxu0 %v15573_v2 }
 0xd3d   : > { %v11433_v13 = vpack.c.bf16 %v14772_v34, %v14771_v32  ;;  %v11457_v58 = vpack.c.bf16 %v14767_v59, %v14766_v18  ;;  %12602 = vmatpush3.bf16.msk.msra.mxu1 %vm16472_vm6, %v11430_v35  ;;  %7969 = vmatprep.mubr.bf16.mxu0 %v15574_v43  ;;  %v7025_v43 = vpack.c.bf16 %v18334_v61, %v18332_v1 }
 0xd3e   : > { %v14785_v38 = vpop.permute.xlu0 %14784  ;;  %v14775_v39 = vpop.permute.xlu1 %14774  ;;  %v7026_v18 = vpack.c.bf16 %v18336_v11, %v18347_v6 }
 0xd3f   : > { %v14787_v3 = vunpack.i.h.bf16 %v14785_v38  ;;  %v14786_v47 = vunpack.i.l.bf16 %v14785_v38  ;;  %v14777_v57 = vunpack.i.h.bf16 %v14775_v39  ;;  %v14776_v26 = vunpack.i.l.bf16 %v14775_v39  ;;  %12603 = vmatprep.subr.msk.bf16.mxu1 %vm16480_vm8, %v11457_v58  ;;  %v15587_v39 = vld [vmem:[%s20042_s1 + $0x168] ss:$36 sps:$4 sm:$0xff]  }
 0xd41   : > { %v11436_v0 = vpack.c.bf16 %v14787_v3, %v14786_v47  ;;  %v11460_v62 = vpack.c.bf16 %v14777_v57, %v14776_v26  ;;  %12604 = vmatpush3.bf16.msk.msra.mxu1 %vm16472_vm6, %v11433_v13  ;;  %v15588_v3 = vld [vmem:[%s20042_s1 + $0x50] ss:$36 sps:$4 sm:$0xff]  }
 0xd42   : > { %v14790_v4 = vpop.permute.xlu0 %14789  ;;  %v14780_v33 = vpop.permute.xlu1 %14779  ;;  %v15589_v47 = vld [vmem:[%s20042_s1 + $0x1b4] ss:$36 sps:$4 sm:$0xff]  }
 0xd43   : > { %v14792_v23 = vunpack.i.h.bf16 %v14790_v4  ;;  %v14791_v36 = vunpack.i.l.bf16 %v14790_v4  ;;  %v14782_v8 = vunpack.i.h.bf16 %v14780_v33  ;;  %v14781_v49 = vunpack.i.l.bf16 %v14780_v33  ;;  %12605 = vmatprep.subr.msk.bf16.mxu1 %vm16480_vm8, %v11460_v62 }
 0xd44   : > { %7970 = vmatmul.mubr.bf16.gmra.mrb[204].mxu0 %v15576_v45  ;;  %v15591_v45 = vld [vmem:[%s20042_s1 + $0x9c] ss:$36 sps:$4 sm:$0xff]  }
 0xd45   : > { %v11439_v21 = vpack.c.bf16 %v14792_v23, %v14791_v36  ;;  %v11463_v40 = vpack.c.bf16 %v14782_v8, %v14781_v49  ;;  %12606 = vmatpush3.bf16.msk.msra.mxu1 %vm16472_vm6, %v11436_v0  ;;  %7977 = vmatprep.mubr.bf16.mxu0 %v15580_v42  ;;  %v7027_v0 = vpack.c.bf16 %v18362_v63, %v18360_v54 }
 0xd46   : > { %v14800_v29 = vpop.permute.xlu0 %14799  ;;  %v14795_v60 = vpop.permute.xlu1 %14794  ;;  %v7028_v36 = vpack.c.bf16 %v18368_v48, %v18379_v10 }
 0xd47   : > { %v14797_v31 = vunpack.i.h.bf16 %v14795_v60  ;;  %v14796_v7 = vunpack.i.l.bf16 %v14795_v60  ;;  %12607 = vmatprep.subr.msk.bf16.mxu1 %vm16480_vm8, %v11463_v40  ;;  %v14802_v44 = vunpack.i.h.bf16 %v14800_v29  ;;  %v14801_v56 = vunpack.i.l.bf16 %v14800_v29 }
 0xd49   : > { %v11466_v50 = vpack.c.bf16 %v14797_v31, %v14796_v7  ;;  %12608 = vmatpush3.bf16.msk.msra.mxu1 %vm16472_vm6, %v11439_v21  ;;  %v11469_v9 = vpack.c.bf16 %v14802_v44, %v14801_v56  ;;  %v15593_v7 = vld [vmem:[%s20042_s1 + $0x1b0] ss:$36 sps:$4 sm:$0xff]   ;;  %v15594_v44 = vld [vmem:[%s20042_s1 + $0x98] ss:$36 sps:$4 sm:$0xff]  }
 0xd4a   : > { %v14810_v2 = vpop.permute.xlu0 %14809  ;;  %v14805_v35 = vpop.permute.xlu1 %14804 }
 0xd4b   : > { %12657 = vmatprep.subr.msk.bf16.mxu0 %vm16491_vm10, %v11466_v50  ;;  %v14807_v46 = vunpack.i.h.bf16 %v14805_v35  ;;  %v14806_v34 = vunpack.i.l.bf16 %v14805_v35  ;;  %v14812_v13 = vunpack.i.h.bf16 %v14810_v2  ;;  %v14811_v58 = vunpack.i.l.bf16 %v14810_v2  ;;  %v15595_v2 = vld [vmem:[%s20042_s1 + $0x1fc] ss:$36 sps:$4 sm:$0xff]  }
 0xd4c   : > { %7978 = vmatmul.mubr.bf16.gmra.mrb[208].mxu0 %v15582_v15  ;;  %8043 = vmatmul.mubr.bf16.vlgmr.msra.gmra.mrb[208].mxu1 %v15577_v52 }
 0xd4d   : > { %12658 = vmatpush3.bf16.msra.mxu0 %v7025_v43  ;;  %7985 = vmatprep.mubr.bf16.mxu0 %v15583_v28  ;;  %v11472_v38 = vpack.c.bf16 %v14807_v46, %v14806_v34  ;;  %v11475_v62 = vpack.c.bf16 %v14812_v13, %v14811_v58  ;;  %v7029_v28 = vpack.c.bf16 %v18394_v27, %v18392_v12  ;;  %v15597_v46 = vld [vmem:[%s20042_s1 + $0xe4] ss:$36 sps:$4 sm:$0xff]  }
 0xd4e   : > { %12659 = vmatprep.subr.msk.bf16.mxu0 %vm16491_vm10, %v11469_v9  ;;  %v14820_v32 = vpop.permute.xlu0 %14819  ;;  %v14815_v59 = vpop.permute.xlu1 %14814  ;;  %8050 = vmatprep.mubr.bf16.mxu1 %v15585_v19 }
 0xd4f   : > { %v14817_v42 = vunpack.i.h.bf16 %v14815_v59  ;;  %v14816_v4 = vunpack.i.l.bf16 %v14815_v59  ;;  %v14822_v29 = vunpack.i.h.bf16 %v14820_v32  ;;  %v14821_v60 = vunpack.i.l.bf16 %v14820_v32 }
 0xd51   : > { %12660 = vmatpush3.bf16.msra.mxu0 %v7026_v18  ;;  %v11478_v31 = vpack.c.bf16 %v14817_v42, %v14816_v4  ;;  %v11481_v34 = vpack.c.bf16 %v14822_v29, %v14821_v60  ;;  %v15599_v4 = vld [vmem:[%s20042_s1 + $0x1f8] ss:$36 sps:$4 sm:$0xff]  }
 0xd52   : > { %12661 = vmatprep.subr.msk.bf16.mxu0 %vm16491_vm10, %v11472_v38  ;;  %v18717_v57 = vpop.permute.xlu0 %14829  ;;  %v14825_v26 = vpop.permute.xlu1 %14824 }
 0xd53   : > { %v14827_v32 = vunpack.i.h.bf16 %v14825_v26  ;;  %v14826_v59 = vunpack.i.l.bf16 %v14825_v26 }
 0xd54   : > { %7986 = vmatmul.mubr.bf16.gmra.mrb[212].mxu0 %v15587_v39  ;;  %8051 = vmatmul.mubr.bf16.gmra.mrb[212].mxu1 %v15588_v3  ;;  %v7030_v39 = vpack.c.bf16 %v18400_v51, %v18407_v14 }
 0xd55   : > { %12662 = vmatpush3.bf16.msra.mxu0 %v7027_v0  ;;  %7993 = vmatprep.mubr.bf16.mxu0 %v15589_v47  ;;  %v14832_v0 = vunpack.i.h.bf16 %v18717_v57  ;;  %v11484_v42 = vpack.c.bf16 %v14827_v32, %v14826_v59  ;;  %v15607_v59 = vld [vmem:[%s20042_s1 + $0x174] ss:$36 sps:$4 sm:$0xff]  }
 0xd56   : > { %12663 = vmatprep.subr.msk.bf16.mxu0 %vm16491_vm10, %v11475_v62  ;;  %v14840_v33 = vpop.permute.xlu0 %14839  ;;  %v14835_v23 = vpop.permute.xlu1 %14834  ;;  %8058 = vmatprep.mubr.bf16.mxu1 %v15591_v45  ;;  %v14831_v62 = vunpack.i.l.bf16 %v18717_v57 }
 0xd57   : > { %v14842_v8 = vunpack.i.h.bf16 %v14840_v33  ;;  %v14841_v49 = vunpack.i.l.bf16 %v14840_v33  ;;  %v14837_v21 = vunpack.i.h.bf16 %v14835_v23  ;;  %v14836_v40 = vunpack.i.l.bf16 %v14835_v23  ;;  %v15600_v33 = vld [vmem:[%s20042_s1 + $0xe0] ss:$36 sps:$4 sm:$0xff]  }
 0xd59   : > { %v11490_v56 = vpack.c.bf16 %v14842_v8, %v14841_v49  ;;  %v11514_v52 = vpack.c.bf16 %v14837_v21, %v14836_v40  ;;  %12664 = vmatpush3.bf16.msra.mxu0 %v7028_v36  ;;  %v7031_v49 = vpack.c.bf16 %v18422_v24, %v18420_v20  ;;  %v15601_v21 = vld [vmem:[%s20042_s1 + $0x12c] ss:$36 sps:$4 sm:$0xff]  }
 0xd5a   : > { %12665 = vmatprep.subr.msk.bf16.mxu0 %vm16491_vm10, %v11478_v31  ;;  %v14850_v15 = vpop.permute.xlu0 %14849  ;;  %v14845_v50 = vpop.permute.xlu1 %14844 }
 0xd5b   : > { %v14852_v35 = vunpack.i.h.bf16 %v14850_v15  ;;  %v14851_v19 = vunpack.i.l.bf16 %v14850_v15  ;;  %v14847_v43 = vunpack.i.h.bf16 %v14845_v50  ;;  %v14846_v9 = vunpack.i.l.bf16 %v14845_v50  ;;  %12721 = vmatprep.subr.msk.bf16.mxu1 %vm16514_vm14, %v11514_v52 }
 0xd5c   : > { %7994 = vmatmul.mubr.bf16.gmra.mrb[216].mxu0 %v15593_v7  ;;  %8059 = vmatmul.mubr.bf16.gmra.mrb[216].mxu1 %v15594_v44  ;;  %v15605_v7 = vld [vmem:[%s20042_s1 + $0x14] ss:$36 sps:$4 sm:$0xff]   ;;  %v11487_v44 = vpack.c.bf16 %v14832_v0, %v14831_v62 }
 0xd5d   : > { %v11493_v18 = vpack.c.bf16 %v14852_v35, %v14851_v19  ;;  %v11517_v13 = vpack.c.bf16 %v14847_v43, %v14846_v9  ;;  %12666 = vmatpush3.bf16.msra.mxu0 %v7029_v28  ;;  %12722 = vmatpush3.bf16.msk.msra.mxu1 %vm16499_vm12, %v11490_v56  ;;  %v7032_v28 = vpack.c.bf16 %v18437_v25, %v18435_v5  ;;  %v15603_v9 = vld [vmem:[%s20042_s1 + $0x10] ss:$36 sps:$4 sm:$0xff]  }
 0xd5e   : > { %12667 = vmatprep.subr.msk.bf16.mxu0 %vm16491_vm10, %v11481_v34  ;;  %v14860_v58 = vpop.permute.xlu0 %14859  ;;  %v14855_v38 = vpop.permute.xlu1 %14854  ;;  %8001 = vmatprep.mubr.bf16.mxu0 %v15595_v2 }
 0xd5f   : > { %v14862_v3 = vunpack.i.h.bf16 %v14860_v58  ;;  %v14861_v47 = vunpack.i.l.bf16 %v14860_v58  ;;  %v14857_v26 = vunpack.i.h.bf16 %v14855_v38  ;;  %v14856_v45 = vunpack.i.l.bf16 %v14855_v38  ;;  %12723 = vmatprep.subr.msk.bf16.mxu1 %vm16514_vm14, %v11517_v13  ;;  %8066 = vmatprep.mubr.bf16.mxu1 %v15597_v46  ;;  %v15606_v46 = vld [vmem:[%s20042_s1 + $0x128] ss:$36 sps:$4 sm:$0xff]   ;;  %v15609_v58 = vld [vmem:[%s20042_s1 + $0x5c] ss:$36 sps:$4 sm:$0xff]  }
 0xd61   : > { %v11496_v23 = vpack.c.bf16 %v14862_v3, %v14861_v47  ;;  %v11520_v36 = vpack.c.bf16 %v14857_v26, %v14856_v45  ;;  %12668 = vmatpush3.bf16.msra.mxu0 %v7030_v39  ;;  %12724 = vmatpush3.bf16.msk.msra.mxu1 %vm16499_vm12, %v11493_v18 }
 0xd62   : > { %12669 = vmatprep.subr.msk.bf16.mxu0 %vm16491_vm10, %v11484_v42  ;;  %v14870_v8 = vpop.permute.xlu0 %14869  ;;  %v14865_v57 = vpop.permute.xlu1 %14864 }
 0xd63   : > { %v14872_v40 = vunpack.i.h.bf16 %v14870_v8  ;;  %v14871_v29 = vunpack.i.l.bf16 %v14870_v8  ;;  %v14867_v60 = vunpack.i.h.bf16 %v14865_v57  ;;  %v14866_v31 = vunpack.i.l.bf16 %v14865_v57  ;;  %12725 = vmatprep.subr.msk.bf16.mxu1 %vm16514_vm14, %v11520_v36  ;;  %v15611_v36 = vld [vmem:[%s20042_s1 + $0x170] ss:$36 sps:$4 sm:$0xff]   ;;  %v15612_v8 = vld [vmem:[%s20042_s1 + $0x58] ss:$36 sps:$4 sm:$0xff]  }
 0xd64   : > { %8002 = vmatmul.mubr.bf16.gmra.mrb[220].mxu0 %v15599_v4  ;;  %8067 = vmatmul.mubr.bf16.gmra.mrb[220].mxu1 %v15600_v33 }
 0xd65   : > { %v11499_v56 = vpack.c.bf16 %v14872_v40, %v14871_v29  ;;  %v11523_v52 = vpack.c.bf16 %v14867_v60, %v14866_v31  ;;  %12670 = vmatpush3.bf16.msra.mxu0 %v7031_v49  ;;  %12726 = vmatpush3.bf16.msk.msra.mxu1 %vm16499_vm12, %v11496_v23  ;;  %v15615_v60 = vld [vmem:[%s20042_s1 + $0xa4] ss:$36 sps:$4 sm:$0xff]  }
 0xd66   : > { %12671 = vmatprep.subr.msk.bf16.mxu0 %vm16491_vm10, %v11487_v44  ;;  %v14880_v15 = vpop.permute.xlu0 %14879  ;;  %v14875_v50 = vpop.permute.xlu1 %14874  ;;  %8074 = vmatprep.mubr.bf16.mxu1 %v15601_v21  ;;  %v15613_v21 = vld [vmem:[%s20042_s1 + $0x1bc] ss:$36 sps:$4 sm:$0xff]  }
 0xd67   : > { %v14882_v2 = vunpack.i.h.bf16 %v14880_v15  ;;  %v14881_v35 = vunpack.i.l.bf16 %v14880_v15  ;;  %v14877_v19 = vunpack.i.h.bf16 %v14875_v50  ;;  %v14876_v43 = vunpack.i.l.bf16 %v14875_v50  ;;  %12727 = vmatprep.subr.msk.bf16.mxu1 %vm16514_vm14, %v11523_v52  ;;  %8139 = vmatprep.mubr.bf16.mxu0 %v15605_v7 }
 0xd69   : > { %v11502_v34 = vpack.c.bf16 %v14882_v2, %v14881_v35  ;;  %v11526_v32 = vpack.c.bf16 %v14877_v19, %v14876_v43  ;;  %12672 = vmatpush3.bf16.msra.mxu0 %v7032_v28  ;;  %12728 = vmatpush3.bf16.msk.msra.mxu1 %vm16499_vm12, %v11499_v56 }
 0xd6a   : > { %v14890_v18 = vpop.permute.xlu0 %14889  ;;  %v14885_v13 = vpop.permute.xlu1 %14884 }
 0xd6b   : > { %v14892_v38 = vunpack.i.h.bf16 %v14890_v18  ;;  %v14891_v39 = vunpack.i.l.bf16 %v14890_v18  ;;  %v14887_v3 = vunpack.i.h.bf16 %v14885_v13  ;;  %v14886_v47 = vunpack.i.l.bf16 %v14885_v13  ;;  %12729 = vmatprep.subr.msk.bf16.mxu1 %vm16514_vm14, %v11526_v32  ;;  %v15619_v32 = vld [vmem:[%s20042_s1 + $0x204] ss:$36 sps:$4 sm:$0xff]   ;;  %v15621_v18 = vld [vmem:[%s20042_s1 + $0xec] ss:$36 sps:$4 sm:$0xff]  }
 0xd6c   : > { %8075 = vmatmul.mubr.bf16.gmra.mrb[224].mxu1 %v15606_v46  ;;  %8140 = vmatmul.mubr.bf16.vlgmr.msra.gmra.mrb[224].mxu0 %v15603_v9  ;;  %v15617_v9 = vld [vmem:[%s20042_s1 + $0x1b8] ss:$36 sps:$4 sm:$0xff]   ;;  %v15618_v46 = vld [vmem:[%s20042_s1 + $0xa0] ss:$36 sps:$4 sm:$0xff]  }
 0xd6d   : > { %v11505_v26 = vpack.c.bf16 %v14892_v38, %v14891_v39  ;;  %v11529_v45 = vpack.c.bf16 %v14887_v3, %v14886_v47  ;;  %12730 = vmatpush3.bf16.msk.msra.mxu1 %vm16499_vm12, %v11502_v34  ;;  %8082 = vmatprep.mubr.bf16.mxu1 %v15607_v59 }
 0xd6e   : > { %v14905_v0 = vpop.permute.xlu0 %14904  ;;  %v14895_v62 = vpop.permute.xlu1 %14894  ;;  %8147 = vmatprep.mubr.bf16.mxu0 %v15609_v58 }
 0xd6f   : > { %v14907_v42 = vunpack.i.h.bf16 %v14905_v0  ;;  %v14906_v4 = vunpack.i.l.bf16 %v14905_v0  ;;  %v14897_v33 = vunpack.i.h.bf16 %v14895_v62  ;;  %v14896_v23 = vunpack.i.l.bf16 %v14895_v62  ;;  %12731 = vmatprep.subr.msk.bf16.mxu1 %vm16514_vm14, %v11529_v45  ;;  %v15623_v45 = vld [vmem:[%s20042_s1 + $0x200] ss:$36 sps:$4 sm:$0xff]   ;;  %v15624_v0 = vld [vmem:[%s20042_s1 + $0xe8] ss:$36 sps:$4 sm:$0xff]  }
 0xd71   : > { %v11508_v57 = vpack.c.bf16 %v14907_v42, %v14906_v4  ;;  %v11532_v49 = vpack.c.bf16 %v14897_v33, %v14896_v23  ;;  %12732 = vmatpush3.bf16.msk.msra.mxu1 %vm16499_vm12, %v11505_v26  ;;  %v15625_v42 = vld [vmem:[%s20042_s1 + $0x134] ss:$36 sps:$4 sm:$0xff]   ;;  %v15629_v4 = vld [vmem:[%s20042_s1 + $0x1c] ss:$36 sps:$4 sm:$0xff]  }
 0xd72   : > { %v14910_v40 = vpop.permute.xlu0 %14909  ;;  %v14900_v29 = vpop.permute.xlu1 %14899 }
 0xd73   : > { %v14912_v31 = vunpack.i.h.bf16 %v14910_v40  ;;  %v14911_v7 = vunpack.i.l.bf16 %v14910_v40  ;;  %v14902_v44 = vunpack.i.h.bf16 %v14900_v29  ;;  %v14901_v56 = vunpack.i.l.bf16 %v14900_v29  ;;  %12733 = vmatprep.subr.msk.bf16.mxu1 %vm16514_vm14, %v11532_v49  ;;  %v15627_v40 = vld [vmem:[%s20042_s1 + $0x18] ss:$36 sps:$4 sm:$0xff]   ;;  %v15630_v29 = vld [vmem:[%s20042_s1 + $0x130] ss:$36 sps:$4 sm:$0xff]  }
 0xd74   : > { %8083 = vmatmul.mubr.bf16.gmra.mrb[228].mxu1 %v15611_v36  ;;  %8148 = vmatmul.mubr.bf16.gmra.mrb[228].mxu0 %v15612_v8 }
 0xd75   : > { %v11511_v52 = vpack.c.bf16 %v14912_v31, %v14911_v7  ;;  %v11535_v15 = vpack.c.bf16 %v14902_v44, %v14901_v56  ;;  %12734 = vmatpush3.bf16.msk.msra.mxu1 %vm16499_vm12, %v11508_v57  ;;  %8090 = vmatprep.mubr.bf16.mxu1 %v15613_v21  ;;  %v15631_v31 = vld [vmem:[%s20042_s1 + $0x17c] ss:$36 sps:$4 sm:$0xff]   ;;  %v15633_v7 = vld [vmem:[%s20042_s1 + $0x64] ss:$36 sps:$4 sm:$0xff]  }
 0xd76   : > { %v14920_v50 = vpop.permute.xlu0 %14919  ;;  %v14915_v28 = vpop.permute.xlu1 %14914  ;;  %8155 = vmatprep.mubr.bf16.mxu0 %v15615_v60 }
 0xd77   : > { %v14917_v2 = vunpack.i.h.bf16 %v14915_v28  ;;  %v14916_v35 = vunpack.i.l.bf16 %v14915_v28  ;;  %12735 = vmatprep.subr.msk.bf16.mxu1 %vm16514_vm14, %v11535_v15  ;;  %v14922_v19 = vunpack.i.h.bf16 %v14920_v50  ;;  %v14921_v43 = vunpack.i.l.bf16 %v14920_v50 }
 0xd79   : > { %v11538_v34 = vpack.c.bf16 %v14917_v2, %v14916_v35  ;;  %12736 = vmatpush3.bf16.msk.msra.mxu1 %vm16499_vm12, %v11511_v52  ;;  %v11541_v13 = vpack.c.bf16 %v14922_v19, %v14921_v43  ;;  %v15635_v35 = vld [vmem:[%s20042_s1 + $0x178] ss:$36 sps:$4 sm:$0xff]   ;;  %v15636_v19 = vld [vmem:[%s20042_s1 + $0x60] ss:$36 sps:$4 sm:$0xff]  }
 0xd7a   : > { %v14925_v59 = vpop.permute.xlu1 %14924  ;;  %v14930_v39 = vpop.permute.xlu0 %14929  ;;  %v15637_v43 = vld [vmem:[%s20042_s1 + $0x1c4] ss:$36 sps:$4 sm:$0xff]  }
 0xd7b   : > { %13226 = vmatprep.subr.msk.bf16.mxu0 %vm16521_vm1, %v11538_v34  ;;  %v14927_v58 = vunpack.i.h.bf16 %v14925_v59  ;;  %v14926_v38 = vunpack.i.l.bf16 %v14925_v59  ;;  %v14932_v3 = vunpack.i.h.bf16 %v14930_v39  ;;  %v14931_v47 = vunpack.i.l.bf16 %v14930_v39  ;;  %v15643_v59 = vld [vmem:[%s20042_s1 + $0x20c] ss:$36 sps:$4 sm:$0xff]   ;;  %v15652_v39 = vld [vmem:[%s20042_s1 + $0x20] ss:$36 sps:$4 sm:$0xff]  }
 0xd7c   : > { %8091 = vmatmul.mubr.bf16.gmra.mrb[232].mxu1 %v15617_v9  ;;  %8156 = vmatmul.mubr.bf16.gmra.mrb[232].mxu0 %v15618_v46  ;;  %v15639_v9 = vld [vmem:[%s20042_s1 + $0xac] ss:$36 sps:$4 sm:$0xff]  }
 0xd7d   : > { %13227 = vmatpush3.bf16.msk.msra.mxu0 %vm16521_vm1, %v11538_v34  ;;  %8098 = vmatprep.mubr.bf16.mxu1 %v15619_v32  ;;  %v11544_v26 = vpack.c.bf16 %v14927_v58, %v14926_v38  ;;  %v11547_v33 = vpack.c.bf16 %v14932_v3, %v14931_v47  ;;  %v15641_v34 = vld [vmem:[%s20042_s1 + $0x1c0] ss:$36 sps:$4 sm:$0xff]   ;;  %v15642_v32 = vld [vmem:[%s20042_s1 + $0xa8] ss:$36 sps:$4 sm:$0xff]   ;;  %v15648_v58 = vld [vmem:[%s20042_s1 + $0xf0] ss:$36 sps:$4 sm:$0xff]  }
 0xd7e   : > { %13228 = vmatprep.subr.msk.bf16.mxu0 %vm16521_vm1, %v11541_v13  ;;  %8163 = vmatprep.mubr.bf16.mxu0 %v15621_v18  ;;  %v14935_v62 = vpop.permute.xlu1 %14934  ;;  %v14940_v8 = vpop.permute.xlu0 %14939  ;;  %v15645_v18 = vld [vmem:[%s20042_s1 + $0xf4] ss:$36 sps:$4 sm:$0xff]   ;;  %v15651_v38 = vld [vmem:[%s20042_s1 + $0x13c] ss:$36 sps:$4 sm:$0xff]   ;;  %v15653_v47 = vld [vmem:[%s20042_s1 + $0x68] ss:$36 sps:$4 sm:$0xff]  }
 0xd7f   : > { %v14937_v23 = vunpack.i.h.bf16 %v14935_v62  ;;  %v14936_v36 = vunpack.i.l.bf16 %v14935_v62  ;;  %v14942_v57 = vunpack.i.h.bf16 %v14940_v8  ;;  %v14941_v49 = vunpack.i.l.bf16 %v14940_v8  ;;  %v15649_v3 = vld [vmem:[%s20042_s1 + $0x138] ss:$36 sps:$4 sm:$0xff]   ;;  %v15667_v8 = vld [vmem:[%s20042_s1 + $0x1d0] ss:$36 sps:$4 sm:$0xff]  }
 0xd80   : > { %v15658_v62 = vld [vmem:[%s20042_s1 + $0xf8] ss:$36 sps:$4 sm:$0xff]  }
 0xd81   : > { %13229 = vmatpush3.bf16.msk.msra.mxu0 %vm16521_vm1, %v11541_v13  ;;  %v11550_v21 = vpack.c.bf16 %v14937_v23, %v14936_v36  ;;  %v11553_v44 = vpack.c.bf16 %v14942_v57, %v14941_v49  ;;  %v15647_v13 = vld [vmem:[%s20042_s1 + $0x208] ss:$36 sps:$4 sm:$0xff]   ;;  %v15666_v36 = vld [vmem:[%s20042_s1 + $0x214] ss:$36 sps:$4 sm:$0xff]  }
 0xd82   : > { %13230 = vmatprep.subr.msk.bf16.mxu0 %vm16521_vm1, %v11544_v26  ;;  %v14945_v60 = vpop.permute.xlu1 %14944  ;;  %v14950_v15 = vpop.permute.xlu0 %14949  ;;  %v15663_v23 = vld [vmem:[%s20042_s1 + $0x188] ss:$36 sps:$4 sm:$0xff]   ;;  %v15664_v57 = vld [vmem:[%s20042_s1 + $0x210] ss:$36 sps:$4 sm:$0xff]   ;;  %v15668_v49 = vld [vmem:[%s20042_s1 + $0x218] ss:$36 sps:$4 sm:$0xff]  }
 0xd83   : > { %v14947_v56 = vunpack.i.h.bf16 %v14945_v60  ;;  %v14946_v52 = vunpack.i.l.bf16 %v14945_v60  ;;  %v14952_v50 = vunpack.i.h.bf16 %v14950_v15  ;;  %v14951_v28 = vunpack.i.l.bf16 %v14950_v15 }
 0xd84   : > { %8099 = vmatmul.mubr.bf16.gmra.mrb[236].mxu1 %v15623_v45  ;;  %8164 = vmatmul.mubr.bf16.gmra.mrb[236].mxu0 %v15624_v0  ;;  %v15657_v45 = vld [vmem:[%s20042_s1 + $0xb0] ss:$36 sps:$4 sm:$0xff]   ;;  %v15654_v0 = vld [vmem:[%s20042_s1 + $0x180] ss:$36 sps:$4 sm:$0xff]  }
 0xd85   : > { %13231 = vmatpush3.bf16.msk.msra.mxu0 %vm16521_vm1, %v11544_v26  ;;  %8171 = vmatprep.mubr.bf16.mxu0 %v15625_v42  ;;  %v11556_v2 = vpack.c.bf16 %v14947_v56, %v14946_v52  ;;  %v11559_v46 = vpack.c.bf16 %v14952_v50, %v14951_v28  ;;  %v15656_v26 = vld [vmem:[%s20042_s1 + $0x184] ss:$36 sps:$4 sm:$0xff]   ;;  %v15661_v42 = vld [vmem:[%s20042_s1 + $0x1cc] ss:$36 sps:$4 sm:$0xff]  }
 0xd86   : > { %13232 = vmatprep.subr.msk.bf16.mxu0 %vm16521_vm1, %v11547_v33  ;;  %8236 = vmatprep.mubr.bf16.mxu1 %v15629_v4  ;;  %v15662_v4 = vld [vmem:[%s20042_s1 + $0x140] ss:$36 sps:$4 sm:$0xff]  }
 0xd89   : > { %13233 = vmatpush3.bf16.msk.msra.mxu0 %vm16521_vm1, %v11547_v33  ;;  %v15659_v33 = vld [vmem:[%s20042_s1 + $0x1c8] ss:$36 sps:$4 sm:$0xff]  }
 0xd8a   : > { %13234 = vmatprep.subr.msk.bf16.mxu0 %vm16521_vm1, %v11550_v21 }
 0xd8c   : > { %8172 = vmatmul.mubr.bf16.gmra.mrb[240].mxu0 %v15630_v29  ;;  %8237 = vmatmul.mubr.bf16.vlgmr.msra.gmra.mrb[240].mxu1 %v15627_v40 }
 0xd8d   : > { %13235 = vmatpush3.bf16.msk.msra.mxu0 %vm16521_vm1, %v11550_v21  ;;  %8179 = vmatprep.mubr.bf16.mxu0 %v15631_v31 }
 0xd8e   : > { %13236 = vmatprep.subr.msk.bf16.mxu0 %vm16521_vm1, %v11553_v44  ;;  %8244 = vmatprep.mubr.bf16.mxu1 %v15633_v7 }
 0xd91   : > { %13237 = vmatpush3.bf16.msk.msra.mxu0 %vm16521_vm1, %v11553_v44 }
 0xd92   : > { %13238 = vmatprep.subr.msk.bf16.mxu0 %vm16521_vm1, %v11556_v2 }
 0xd94   : > { %8180 = vmatmul.mubr.bf16.gmra.mrb[244].mxu0 %v15635_v35  ;;  %8245 = vmatmul.mubr.bf16.gmra.mrb[244].mxu1 %v15636_v19 }
 0xd95   : > { %13239 = vmatpush3.bf16.msk.msra.mxu0 %vm16521_vm1, %v11556_v2  ;;  %8187 = vmatprep.mubr.bf16.mxu0 %v15637_v43 }
 0xd96   : > { %13240 = vmatprep.subr.msk.bf16.mxu0 %vm16521_vm1, %v11559_v46  ;;  %8252 = vmatprep.mubr.bf16.mxu1 %v15639_v9 }
 0xd99   : > { %13241 = vmatpush3.bf16.msk.msra.mxu0 %vm16521_vm1, %v11559_v46 }
 0xd9c   : > { %8188 = vmatmul.mubr.bf16.gmra.mrb[248].mxu0 %v15641_v34  ;;  %8253 = vmatmul.mubr.bf16.gmra.mrb[248].mxu1 %v15642_v32 }
 0xd9d   : > { %8195 = vmatprep.mubr.bf16.mxu0 %v15643_v59  ;;  %8260 = vmatprep.mubr.bf16.mxu1 %v15645_v18 }
 0xda4   : > { %8196 = vmatmul.mubr.bf16.gmra.mrb[252].mxu0 %v15647_v13  ;;  %8261 = vmatmul.mubr.bf16.gmra.mrb[252].mxu1 %v15648_v58 }
 0xda5   : > { %8268 = vmatprep.mubr.bf16.mxu1 %v15651_v38  ;;  %13242 = vmatprep.mubr.bf16.mxu0 %v15652_v39  ;;  %v7473_v38 = vpop.permute.xlu0 %7472  ;;  %v7468_v39 = vpop.permute.xlu1 %7467 }
 0xdac   : > { %8269 = vmatmul.mubr.bf16.gmra.mrb[0].mxu1 %v15649_v3  ;;  %13243 = vmatmul.mubr.bf16.vlgmr.msra.gmra.mrb[0].mxu0 %v15653_v47 }
 0xdad   : > { %8276 = vmatprep.mubr.bf16.mxu1 %v15656_v26  ;;  %13246 = vmatprep.mubr.bf16.mxu0 %v15657_v45 }
 0xdb4   : > { %8277 = vmatmul.mubr.bf16.gmra.mrb[4].mxu1 %v15654_v0  ;;  %13247 = vmatmul.mubr.bf16.gmra.mrb[4].mxu0 %v15658_v62 }
 0xdb5   : > { %8284 = vmatprep.mubr.bf16.mxu1 %v15661_v42  ;;  %13250 = vmatprep.mubr.bf16.mxu0 %v15662_v4 }
 0xdbc   : > { %8285 = vmatmul.mubr.bf16.gmra.mrb[8].mxu1 %v15659_v33  ;;  %13251 = vmatmul.mubr.bf16.gmra.mrb[8].mxu0 %v15663_v23 }
 0xdbd   : > { %8292 = vmatprep.mubr.bf16.mxu1 %v15666_v36  ;;  %13254 = vmatprep.mubr.bf16.mxu0 %v15667_v8 }
 0xdc4   : > { %8293 = vmatmul.mubr.bf16.gmra.mrb[12].mxu1 %v15664_v57  ;;  %13255 = vmatmul.mubr.bf16.gmra.mrb[12].mxu0 %v15668_v49 }
 0xdff   : > { %v12545_v21 = vpop.f32.mrb[192].mxu0 }
 0xe00   : > { %v12546_v40 = vpop.f32.mrb[193].mxu0 }
 0xe01   : > { %v12547_v29 = vadd.f32 %v12546_v40, %v12545_v21  ;;  %v12548_v60 = vpop.f32.mrb[194].mxu0 }
 0xe02   : > { %v12549_v31 = vpop.f32.mrb[195].mxu0 }
 0xe03   : > { %v12550_v7 = vadd.f32 %v12549_v31, %v12548_v60  ;;  %v7948_v0 = vadd.f32 %v12547_v29, %v7468_v39  ;;  %v7483_v60 = vpop.permute.xlu0 %7482  ;;  %v7478_v31 = vpop.permute.xlu1 %7477 }
 0xe05   : > { %v7951_v8 = vadd.f32 %v12550_v7, %v7473_v38 }
 0xe07   : > { %v12551_v44 = vpop.f32.mrb[196].mxu0 }
 0xe08   : > { %v12552_v56 = vpop.f32.mrb[197].mxu0 }
 0xe09   : > { %v12553_v52 = vadd.f32 %v12552_v56, %v12551_v44  ;;  %v12554_v15 = vpop.f32.mrb[198].mxu0 }
 0xe0a   : > { %v12555_v50 = vpop.f32.mrb[199].mxu0 }
 0xe0b   : > { %v12556_v28 = vadd.f32 %v12555_v50, %v12554_v15  ;;  %v7956_v50 = vadd.f32 %v12553_v52, %v7478_v31 }
 0xe0f   : > { %v12557_v2 = vpop.f32.mrb[200].mxu0 }
 0xe10   : > { %v12558_v35 = vpop.f32.mrb[201].mxu0 }
 0xe11   : > { %v12559_v19 = vadd.f32 %v12558_v35, %v12557_v2  ;;  %v12560_v43 = vpop.f32.mrb[202].mxu0 }
 0xe12   : > { %v12561_v9 = vpop.f32.mrb[203].mxu0 }
 0xe13   : > { %v12562_v46 = vadd.f32 %v12561_v9, %v12560_v43 }
 0xe17   : > { %v12563_v34 = vpop.f32.mrb[204].mxu0 }
 0xe18   : > { %v12564_v32 = vpop.f32.mrb[205].mxu0 }
 0xe19   : > { %v18972_v59 = vadd.f32 %v12564_v32, %v12563_v34  ;;  %v12566_v18 = vpop.f32.mrb[206].mxu0  ;;  %v7959_v32 = vadd.f32 %v12556_v28, %v7483_v60 }
 0xe1a   : > { %v12567_v13 = vpop.f32.mrb[207].mxu0 }
 0xe1b   : > { %v18974_v58 = vadd.f32 %v12567_v13, %v12566_v18 }
 0xe1f   : > { %v12569_v3 = vpop.f32.mrb[208].mxu0  ;;  %v12609_v47 = vpop.f32.mrb[208].mxu1 }
 0xe20   : > { %v12570_v26 = vpop.f32.mrb[209].mxu0  ;;  %v12610_v45 = vpop.f32.mrb[209].mxu1 }
 0xe21   : > { %v18976_v62 = vadd.f32 %v12570_v26, %v12569_v3  ;;  %v12611_v42 = vadd.f32 %v12610_v45, %v12609_v47  ;;  %v12572_v4 = vpop.f32.mrb[210].mxu0  ;;  %v12612_v33 = vpop.f32.mrb[210].mxu1 }
 0xe22   : > { %v12573_v23 = vpop.f32.mrb[211].mxu0  ;;  %v12613_v36 = vpop.f32.mrb[211].mxu1 }
 0xe23   : > { %v18978_v57 = vadd.f32 %v12611_v42, %v7948_v0  ;;  %v18980_v49 = vadd.f32 %v12573_v23, %v12572_v4  ;;  %v12614_v21 = vadd.f32 %v12613_v36, %v12612_v33  ;;  %v7493_v3 = vpop.permute.xlu0 %7492  ;;  %v7488_v47 = vpop.permute.xlu1 %7487 }
 0xe24   : > { %v7964_v42 = vadd.f32 %v12559_v19, %v7488_v47 }
 0xe25   : > { %v18982_v40 = vadd.f32 %v12614_v21, %v7951_v8  ;;  %v7967_v21 = vadd.f32 %v12562_v46, %v7493_v3 }
 0xe27   : > { %v12575_v44 = vpop.f32.mrb[212].mxu0  ;;  %v12615_v56 = vpop.f32.mrb[212].mxu1 }
 0xe28   : > { %v12576_v29 = vpop.f32.mrb[213].mxu0  ;;  %v12616_v15 = vpop.f32.mrb[213].mxu1 }
 0xe29   : > { %v18984_v2 = vadd.f32 %v12576_v29, %v12575_v44  ;;  %v12617_v35 = vadd.f32 %v12616_v15, %v12615_v56  ;;  %v12578_v43 = vpop.f32.mrb[214].mxu0  ;;  %v12618_v9 = vpop.f32.mrb[214].mxu1 }
 0xe2a   : > { %v12579_v7 = vpop.f32.mrb[215].mxu0  ;;  %v12619_v34 = vpop.f32.mrb[215].mxu1 }
 0xe2b   : > { %v18986_v18 = vadd.f32 %v12617_v35, %v7956_v50  ;;  %v18988_v13 = vadd.f32 %v12579_v7, %v12578_v43  ;;  %v12620_v38 = vadd.f32 %v12619_v34, %v12618_v9  ;;  %v7503_v29 = vpop.permute.xlu0 %7502  ;;  %v7498_v15 = vpop.permute.xlu1 %7497 }
 0xe2c   : > { %v7972_v9 = vadd.f32 %v18972_v59, %v7498_v15  ;;  %v7975_v47 = vadd.f32 %v18974_v58, %v7503_v29 }
 0xe2d   : > { %v18990_v39 = vadd.f32 %v12620_v38, %v7959_v32 }
 0xe2f   : > { %v12581_v26 = vpop.f32.mrb[216].mxu0  ;;  %v12621_v45 = vpop.f32.mrb[216].mxu1 }
 0xe30   : > { %v12582_v52 = vpop.f32.mrb[217].mxu0  ;;  %v12622_v0 = vpop.f32.mrb[217].mxu1 }
 0xe31   : > { %v18992_v4 = vadd.f32 %v12582_v52, %v12581_v26  ;;  %v12623_v33 = vadd.f32 %v12622_v0, %v12621_v45  ;;  %v12584_v23 = vpop.f32.mrb[218].mxu0  ;;  %v12624_v36 = vpop.f32.mrb[218].mxu1 }
 0xe32   : > { %v12585_v28 = vpop.f32.mrb[219].mxu0  ;;  %v12625_v8 = vpop.f32.mrb[219].mxu1 }
 0xe33   : > { %v18994_v60 = vadd.f32 %v12623_v33, %v7964_v42  ;;  %v18996_v31 = vadd.f32 %v12585_v28, %v12584_v23  ;;  %v12626_v44 = vadd.f32 %v12625_v8, %v12624_v36  ;;  %v7513_v42 = vpop.permute.xlu0 %7512  ;;  %v7508_v33 = vpop.permute.xlu1 %7507 }
 0xe34   : > { %v7980_v8 = vadd.f32 %v18976_v62, %v7508_v33  ;;  %v7983_v58 = vadd.f32 %v18980_v49, %v7513_v42 }
 0xe35   : > { %v18998_v56 = vadd.f32 %v12626_v44, %v7967_v21 }
 0xe37   : > { %v12587_v50 = vpop.f32.mrb[220].mxu0  ;;  %v12627_v35 = vpop.f32.mrb[220].mxu1 }
 0xe38   : > { %v12588_v19 = vpop.f32.mrb[221].mxu0  ;;  %v12628_v43 = vpop.f32.mrb[221].mxu1 }
 0xe39   : > { %v19001_v7 = vadd.f32 %v12588_v19, %v12587_v50  ;;  %v12629_v34 = vadd.f32 %v12628_v43, %v12627_v35  ;;  %v12590_v32 = vpop.f32.mrb[222].mxu0  ;;  %v12630_v46 = vpop.f32.mrb[222].mxu1 }
 0xe3a   : > { %v12591_v38 = vpop.f32.mrb[223].mxu0  ;;  %v12631_v3 = vpop.f32.mrb[223].mxu1 }
 0xe3b   : > { %v19004_v26 = vadd.f32 %v12629_v34, %v7972_v9  ;;  %v19006_v45 = vadd.f32 %v12591_v38, %v12590_v32  ;;  %v12632_v52 = vadd.f32 %v12631_v3, %v12630_v46  ;;  %v7523_v62 = vpop.permute.xlu0 %7522  ;;  %v7518_v38 = vpop.permute.xlu1 %7517 }
 0xe3c   : > { %v7988_v42 = vadd.f32 %v18984_v2, %v7518_v38 }
 0xe3d   : > { %v19008_v0 = vadd.f32 %v12632_v52, %v7975_v47 }
 0xe3f   : > { %v12633_v23 = vpop.f32.mrb[224].mxu1  ;;  %v12673_v59 = vpop.f32.mrb[224].mxu0 }
 0xe40   : > { %v12634_v36 = vpop.f32.mrb[225].mxu1  ;;  %v12674_v28 = vpop.f32.mrb[225].mxu0 }
 0xe41   : > { %v12635_v21 = vadd.f32 %v12634_v36, %v12633_v23  ;;  %v12675_v44 = vadd.f32 %v12674_v28, %v12673_v59  ;;  %v12636_v15 = vpop.f32.mrb[226].mxu1  ;;  %v12676_v50 = vpop.f32.mrb[226].mxu0  ;;  %v7991_v36 = vadd.f32 %v18988_v13, %v7523_v62 }
 0xe42   : > { %v12637_v29 = vpop.f32.mrb[227].mxu1  ;;  %v12677_v35 = vpop.f32.mrb[227].mxu0 }
 0xe43   : > { %v19012_v19 = vadd.f32 %v12635_v21, %v7980_v8  ;;  %v19015_v43 = vadd.f32 %v12675_v44, %v18978_v57  ;;  %v12638_v9 = vadd.f32 %v12637_v29, %v12636_v15  ;;  %v12678_v34 = vadd.f32 %v12677_v35, %v12676_v50  ;;  %v7533_v2 = vpop.permute.xlu0 %7532  ;;  %v7528_v29 = vpop.permute.xlu1 %7527 }
 0xe44   : > { %v7996_v62 = vadd.f32 %v18992_v4, %v7528_v29 }
 0xe45   : > { %v19017_v32 = vadd.f32 %v12638_v9, %v7983_v58  ;;  %v19020_v46 = vadd.f32 %v12678_v34, %v18982_v40 }
 0xe47   : > { %v12639_v3 = vpop.f32.mrb[228].mxu1  ;;  %v12679_v47 = vpop.f32.mrb[228].mxu0 }
 0xe48   : > { %v12640_v52 = vpop.f32.mrb[229].mxu1  ;;  %v12680_v49 = vpop.f32.mrb[229].mxu0 }
 0xe49   : > { %v12641_v33 = vadd.f32 %v12640_v52, %v12639_v3  ;;  %v12681_v23 = vadd.f32 %v12680_v49, %v12679_v47  ;;  %v12642_v59 = vpop.f32.mrb[230].mxu1  ;;  %v12682_v57 = vpop.f32.mrb[230].mxu0  ;;  %v7999_v52 = vadd.f32 %v18996_v31, %v7533_v2 }
 0xe4a   : > { %v12643_v28 = vpop.f32.mrb[231].mxu1  ;;  %v12683_v8 = vpop.f32.mrb[231].mxu0 }
 0xe4b   : > { %v19024_v21 = vadd.f32 %v12641_v33, %v7988_v42  ;;  %v19027_v40 = vadd.f32 %v12681_v23, %v18986_v18  ;;  %v12644_v44 = vadd.f32 %v12643_v28, %v12642_v59  ;;  %v12684_v15 = vadd.f32 %v12683_v8, %v12682_v57  ;;  %v7543_v4 = vpop.permute.xlu0 %7542  ;;  %v7538_v28 = vpop.permute.xlu1 %7537 }
 0xe4c   : > { %v8004_v2 = vadd.f32 %v19001_v7, %v7538_v28 }
 0xe4d   : > { %v19029_v50 = vadd.f32 %v12644_v44, %v7991_v36  ;;  %v19032_v58 = vadd.f32 %v12684_v15, %v18990_v39 }
 0xe4f   : > { %v12645_v35 = vpop.f32.mrb[232].mxu1  ;;  %v12685_v9 = vpop.f32.mrb[232].mxu0 }
 0xe50   : > { %v12646_v34 = vpop.f32.mrb[233].mxu1  ;;  %v12686_v13 = vpop.f32.mrb[233].mxu0 }
 0xe51   : > { %v12647_v38 = vadd.f32 %v12646_v34, %v12645_v35  ;;  %v12687_v3 = vadd.f32 %v12686_v13, %v12685_v9  ;;  %v12648_v47 = vpop.f32.mrb[234].mxu1  ;;  %v12688_v18 = vpop.f32.mrb[234].mxu0  ;;  %v8007_v34 = vadd.f32 %v19006_v45, %v7543_v4 }
 0xe52   : > { %v12649_v49 = vpop.f32.mrb[235].mxu1  ;;  %v12689_v42 = vpop.f32.mrb[235].mxu0 }
 0xe53   : > { %v19036_v33 = vadd.f32 %v12647_v38, %v7996_v62  ;;  %v19039_v39 = vadd.f32 %v12687_v3, %v18994_v60  ;;  %v12650_v23 = vadd.f32 %v12649_v49, %v12648_v47  ;;  %v12690_v59 = vadd.f32 %v12689_v42, %v12688_v18 }
 0xe55   : > { %v19041_v57 = vadd.f32 %v12650_v23, %v7999_v52  ;;  %v19044_v36 = vadd.f32 %v12690_v59, %v18998_v56 }
 0xe57   : > { %v12651_v8 = vpop.f32.mrb[236].mxu1  ;;  %v12691_v44 = vpop.f32.mrb[236].mxu0 }
 0xe58   : > { %v12652_v15 = vpop.f32.mrb[237].mxu1  ;;  %v12692_v31 = vpop.f32.mrb[237].mxu0 }
 0xe59   : > { %v12653_v29 = vadd.f32 %v12652_v15, %v12651_v8  ;;  %v12693_v35 = vadd.f32 %v12692_v31, %v12691_v44  ;;  %v12654_v9 = vpop.f32.mrb[238].mxu1  ;;  %v12694_v60 = vpop.f32.mrb[238].mxu0 }
 0xe5a   : > { %v12655_v13 = vpop.f32.mrb[239].mxu1  ;;  %v12695_v62 = vpop.f32.mrb[239].mxu0 }
 0xe5b   : > { %v19048_v38 = vadd.f32 %v12653_v29, %v8004_v2  ;;  %v19051_v56 = vadd.f32 %v12693_v35, %v19004_v26  ;;  %v12656_v3 = vadd.f32 %v12655_v13, %v12654_v9  ;;  %v12696_v47 = vadd.f32 %v12695_v62, %v12694_v60 }
 0xe5d   : > { %v19053_v18 = vadd.f32 %v12656_v3, %v8007_v34  ;;  %v19056_v52 = vadd.f32 %v12696_v47, %v19008_v0 }
 0xe5f   : > { %v12697_v7 = vpop.f32.mrb[240].mxu0  ;;  %v12737_v49 = vpop.f32.mrb[240].mxu1 }
 0xe60   : > { %v12698_v42 = vpop.f32.mrb[241].mxu0  ;;  %v12738_v23 = vpop.f32.mrb[241].mxu1 }
 0xe61   : > { %v12699_v59 = vadd.f32 %v12698_v42, %v12697_v7  ;;  %v12739_v45 = vadd.f32 %v12738_v23, %v12737_v49  ;;  %v12700_v4 = vpop.f32.mrb[242].mxu0  ;;  %v12740_v28 = vpop.f32.mrb[242].mxu1 }
 0xe62   : > { %v12701_v8 = vpop.f32.mrb[243].mxu0  ;;  %v12741_v44 = vpop.f32.mrb[243].mxu1 }
 0xe63   : > { %v19059_v26 = vadd.f32 %v12699_v59, %v19012_v19  ;;  %v12702_v15 = vadd.f32 %v12701_v8, %v12700_v4  ;;  %v12742_v31 = vadd.f32 %v12741_v44, %v12740_v28  ;;  %v8239_v2 = vadd.f32 %v12739_v45, %v19015_v43 }
 0xe65   : > { %v19063_v0 = vadd.f32 %v12702_v15, %v19017_v32  ;;  %v8242_v29 = vadd.f32 %v12742_v31, %v19020_v46 }
 0xe67   : > { %v12703_v35 = vpop.f32.mrb[244].mxu0  ;;  %v12743_v9 = vpop.f32.mrb[244].mxu1 }
 0xe68   : > { %v12704_v60 = vpop.f32.mrb[245].mxu0  ;;  %v12744_v34 = vpop.f32.mrb[245].mxu1 }
 0xe69   : > { %v12705_v13 = vadd.f32 %v12704_v60, %v12703_v35  ;;  %v12745_v62 = vadd.f32 %v12744_v34, %v12743_v9  ;;  %v12706_v3 = vpop.f32.mrb[246].mxu0  ;;  %v12746_v47 = vpop.f32.mrb[246].mxu1 }
 0xe6a   : > { %v12707_v7 = vpop.f32.mrb[247].mxu0  ;;  %v12747_v19 = vpop.f32.mrb[247].mxu1 }
 0xe6b   : > { %v19067_v49 = vadd.f32 %v12705_v13, %v19024_v21  ;;  %v12708_v42 = vadd.f32 %v12707_v7, %v12706_v3  ;;  %v12748_v43 = vadd.f32 %v12747_v19, %v12746_v47  ;;  %v8247_v32 = vadd.f32 %v12745_v62, %v19027_v40 }
 0xe6d   : > { %v19071_v23 = vadd.f32 %v12708_v42, %v19029_v50  ;;  %v8250_v46 = vadd.f32 %v12748_v43, %v19032_v58 }
 0xe6f   : > { %v12709_v59 = vpop.f32.mrb[248].mxu0  ;;  %v12749_v45 = vpop.f32.mrb[248].mxu1 }
 0xe70   : > { %v12710_v4 = vpop.f32.mrb[249].mxu0  ;;  %v12750_v28 = vpop.f32.mrb[249].mxu1 }
 0xe71   : > { %v12711_v8 = vadd.f32 %v12710_v4, %v12709_v59  ;;  %v12751_v44 = vadd.f32 %v12750_v28, %v12749_v45  ;;  %v12712_v15 = vpop.f32.mrb[250].mxu0  ;;  %v12752_v31 = vpop.f32.mrb[250].mxu1 }
 0xe72   : > { %v12713_v35 = vpop.f32.mrb[251].mxu0  ;;  %v12753_v21 = vpop.f32.mrb[251].mxu1 }
 0xe73   : > { %v19075_v9 = vadd.f32 %v12711_v8, %v19036_v33  ;;  %v12714_v60 = vadd.f32 %v12713_v35, %v12712_v15  ;;  %v12754_v40 = vadd.f32 %v12753_v21, %v12752_v31  ;;  %v8255_v50 = vadd.f32 %v12751_v44, %v19039_v39 }
 0xe75   : > { %v19079_v34 = vadd.f32 %v12714_v60, %v19041_v57  ;;  %v8258_v58 = vadd.f32 %v12754_v40, %v19044_v36 }
 0xe77   : > { %v12715_v13 = vpop.f32.mrb[252].mxu0  ;;  %v12755_v62 = vpop.f32.mrb[252].mxu1 }
 0xe78   : > { %v12716_v3 = vpop.f32.mrb[253].mxu0  ;;  %v12756_v47 = vpop.f32.mrb[253].mxu1 }
 0xe79   : > { %v12717_v7 = vadd.f32 %v12716_v3, %v12715_v13  ;;  %v12757_v19 = vadd.f32 %v12756_v47, %v12755_v62  ;;  %v12718_v42 = vpop.f32.mrb[254].mxu0  ;;  %v12758_v43 = vpop.f32.mrb[254].mxu1 }
 0xe7a   : > { %v12719_v59 = vpop.f32.mrb[255].mxu0  ;;  %v12759_v33 = vpop.f32.mrb[255].mxu1 }
 0xe7b   : > { %v19083_v45 = vadd.f32 %v12717_v7, %v19048_v38  ;;  %v12720_v4 = vadd.f32 %v12719_v59, %v12718_v42  ;;  %v12760_v39 = vadd.f32 %v12759_v33, %v12758_v43  ;;  %v8263_v57 = vadd.f32 %v12757_v19, %v19051_v56 }
 0xe7d   : > { %v19087_v28 = vadd.f32 %v12720_v4, %v19053_v18  ;;  %v8266_v36 = vadd.f32 %v12760_v39, %v19056_v52 }
 0xe7f   : > { %v12761_v8 = vpop.f32.mrb[0].mxu1  ;;  %v13244_v44 = vpop.f32.mrb[0].mxu0 }
 0xe80   : > { %v8344_v15 = vadd.f32 %v13244_v44, %v8247_v32  ;;  %v12762_v31 = vpop.f32.mrb[1].mxu1  ;;  %v8335_v35 = vpop.f32.mrb[1].mxu0 }
 0xe81   : > { %v12763_v21 = vadd.f32 %v12762_v31, %v12761_v8  ;;  %v8336_v60 = vadd.f32 %v8335_v35, %v8239_v2  ;;  %v12764_v40 = vpop.f32.mrb[2].mxu1  ;;  %v13245_v13 = vpop.f32.mrb[2].mxu0 }
 0xe82   : > { %v8347_v38 = vadd.f32 %v13245_v13, %v8250_v46  ;;  %v12765_v62 = vpop.f32.mrb[3].mxu1  ;;  %v8338_v3 = vpop.f32.mrb[3].mxu0  ;;  %v8400_v18 = vmax.f32 %v8344_v15, 0.0 }
 0xe83   : > { %v12766_v47 = vadd.f32 %v12765_v62, %v12764_v40  ;;  %v8339_v7 = vadd.f32 %v8338_v3, %v8242_v29  ;;  %v8271_v56 = vadd.f32 %v12763_v21, %v19059_v26  ;;  %v8398_v42 = vmax.f32 %v8336_v60, 0.0 }
 0xe84   : > { %v8401_v19 = vmax.f32 %v8347_v38, 0.0 }
 0xe85   : > { %v8399_v52 = vmax.f32 %v8339_v7, 0.0  ;;  %v8274_v43 = vadd.f32 %v12766_v47, %v19063_v0 }
 0xe86   : > { %v19092_v32 = vpack.i.bf16 %v8401_v19, %v8400_v18  ;;  %v19108_v62 = vpack.c.bf16 %v8401_v19, %v8400_v18 }
 0xe87   : > { %v12767_v59 = vpop.f32.mrb[4].mxu1  ;;  %v13248_v33 = vpop.f32.mrb[4].mxu0  ;;  %v19094_v2 = vpack.i.bf16 %v8399_v52, %v8398_v42  ;;  %v19101_v13 = vpack.c.bf16 %v8399_v52, %v8398_v42 }
 0xe88   : > { %v8360_v4 = vadd.f32 %v13248_v33, %v8263_v57  ;;  %v12768_v46 = vpop.f32.mrb[5].mxu1  ;;  %v8351_v39 = vpop.f32.mrb[5].mxu0 }
 0xe89   : > { %v12769_v8 = vadd.f32 %v12768_v46, %v12767_v59  ;;  %v8352_v44 = vadd.f32 %v8351_v39, %v8255_v50  ;;  %v12770_v29 = vpop.f32.mrb[6].mxu1  ;;  %v13249_v31 = vpop.f32.mrb[6].mxu0  ;;  %14964 = vrot.lane.b32.xlu0 %v19094_v2, %s20031_s9  ;;  %14954 = vrot.lane.b32.xlu1 %v19094_v2, %s20033_s26 }
 0xe8a   : > { %v8363_v26 = vadd.f32 %v13249_v31, %v8266_v36  ;;  %v12771_v0 = vpop.f32.mrb[7].mxu1  ;;  %v8354_v15 = vpop.f32.mrb[7].mxu0  ;;  %v8404_v35 = vmax.f32 %v8360_v4, 0.0 }
 0xe8b   : > { %v12772_v21 = vadd.f32 %v12771_v0, %v12770_v29  ;;  %v8355_v60 = vadd.f32 %v8354_v15, %v8258_v58  ;;  %v8279_v57 = vadd.f32 %v12769_v8, %v19067_v49  ;;  %v8402_v50 = vmax.f32 %v8352_v44, 0.0 }
 0xe8c   : > { %v8405_v40 = vmax.f32 %v8363_v26, 0.0 }
 0xe8d   : > { %v8403_v38 = vmax.f32 %v8355_v60, 0.0  ;;  %14969 = vrot.lane.b32.xlu0 %v19092_v32, %s20031_s9  ;;  %14959 = vrot.lane.b32.xlu1 %v19092_v32, %s20033_s26  ;;  %v8282_v36 = vadd.f32 %v12772_v21, %v19071_v23 }
 0xe8e   : > { %v19110_v3 = vpack.i.bf16 %v8405_v40, %v8404_v35  ;;  %v19126_v21 = vpack.c.bf16 %v8405_v40, %v8404_v35 }
 0xe8f   : > { %v12773_v58 = vpop.f32.mrb[8].mxu1  ;;  %v13252_v47 = vpop.f32.mrb[8].mxu0  ;;  %v19112_v49 = vpack.i.bf16 %v8403_v38, %v8402_v50  ;;  %v19119_v26 = vpack.c.bf16 %v8403_v38, %v8402_v50 }
 0xe90   : > { %v8376_v7 = vadd.f32 %v13252_v47, %v8279_v57  ;;  %v12774_v42 = vpop.f32.mrb[9].mxu1  ;;  %v8367_v52 = vpop.f32.mrb[9].mxu0 }
 0xe91   : > { %v12775_v59 = vadd.f32 %v12774_v42, %v12773_v58  ;;  %v8368_v33 = vadd.f32 %v8367_v52, %v8271_v56  ;;  %v12776_v4 = vpop.f32.mrb[10].mxu1  ;;  %v13253_v46 = vpop.f32.mrb[10].mxu0  ;;  %14984 = vrot.lane.b32.xlu0 %v19112_v49, %s20031_s9  ;;  %14974 = vrot.lane.b32.xlu1 %v19112_v49, %s20033_s26 }
 0xe92   : > { %v8379_v23 = vadd.f32 %v13253_v46, %v8282_v36  ;;  %v12777_v18 = vpop.f32.mrb[11].mxu1  ;;  %v8370_v19 = vpop.f32.mrb[11].mxu0  ;;  %v8408_v39 = vmax.f32 %v8376_v7, 0.0 }
 0xe93   : > { %v12778_v8 = vadd.f32 %v12777_v18, %v12776_v4  ;;  %v8371_v44 = vadd.f32 %v8370_v19, %v8274_v43  ;;  %v8287_v29 = vadd.f32 %v12775_v59, %v19075_v9  ;;  %v8406_v56 = vmax.f32 %v8368_v33, 0.0 }
 0xe94   : > { %v8409_v31 = vmax.f32 %v8379_v23, 0.0 }
 0xe95   : > { %v8407_v0 = vmax.f32 %v8371_v44, 0.0  ;;  %14989 = vrot.lane.b32.xlu0 %v19110_v3, %s20031_s9  ;;  %14979 = vrot.lane.b32.xlu1 %v19110_v3, %s20033_s26  ;;  %v8290_v15 = vadd.f32 %v12778_v8, %v19079_v34 }
 0xe96   : > { %v19128_v60 = vpack.i.bf16 %v8409_v31, %v8408_v39  ;;  %v19139_v33 = vpack.c.bf16 %v8409_v31, %v8408_v39 }
 0xe97   : > { %v12779_v43 = vpop.f32.mrb[12].mxu1  ;;  %v13256_v57 = vpop.f32.mrb[12].mxu0  ;;  %v19130_v9 = vpack.i.bf16 %v8407_v0, %v8406_v56  ;;  %v19136_v40 = vpack.c.bf16 %v8407_v0, %v8406_v56  ;;  %v15683_v56 = vld [vmem:[%s20044_s8 + $0xc] ss:$36 sps:$4 sm:$0xff]  }
 0xe98   : > { %v12780_v50 = vpop.f32.mrb[13].mxu1  ;;  %v8383_v38 = vpop.f32.mrb[13].mxu0  ;;  %9687 = vmatprep.mubr.bf16.mxu1 %v15683_v56 }
 0xe99   : > { %v12781_v36 = vadd.f32 %v12780_v50, %v12779_v43  ;;  %v8384_v58 = vadd.f32 %v8383_v38, %v8287_v29  ;;  %v12782_v47 = vpop.f32.mrb[14].mxu1  ;;  %v13257_v7 = vpop.f32.mrb[14].mxu0  ;;  %15004 = vrot.lane.b32.xlu0 %v19130_v9, %s20031_s9  ;;  %14994 = vrot.lane.b32.xlu1 %v19130_v9, %s20033_s26 }
 0xe9a   : > { %v12783_v34 = vpop.f32.mrb[15].mxu1  ;;  %v8386_v35 = vpop.f32.mrb[15].mxu0 }
 0xe9b   : > { %v8295_v42 = vadd.f32 %v12781_v36, %v19083_v45  ;;  %v12784_v52 = vadd.f32 %v12783_v34, %v12782_v47  ;;  %v8387_v59 = vadd.f32 %v8386_v35, %v8290_v15  ;;  %v8410_v46 = vmax.f32 %v8384_v58, 0.0  ;;  %v15671_v45 = vld [vmem:[%s20044_s8 + $0x4] ss:$36 sps:$4 sm:$0xff]  }
 0xe9c   : > { %9590 = vmatprep.mubr.bf16.mxu0 %v15671_v45 }
 0xe9d   : > { %v8392_v4 = vadd.f32 %v13256_v57, %v8295_v42  ;;  %v8298_v23 = vadd.f32 %v12784_v52, %v19087_v28  ;;  %v8411_v18 = vmax.f32 %v8387_v59, 0.0  ;;  %15009 = vrot.lane.b32.xlu0 %v19128_v60, %s20031_s9  ;;  %14999 = vrot.lane.b32.xlu1 %v19128_v60, %s20033_s26 }
 0xe9f   : > { %v8412_v19 = vmax.f32 %v8392_v4, 0.0  ;;  %v8395_v8 = vadd.f32 %v13257_v7, %v8298_v23  ;;  %v19146_v44 = vpack.i.bf16 %v8411_v18, %v8410_v46  ;;  %v19155_v28 = vpack.c.bf16 %v8411_v18, %v8410_v46 }
 0xea1   : > { %v8413_v39 = vmax.f32 %v8395_v8, 0.0  ;;  %15024 = vrot.lane.b32.xlu0 %v19146_v44, %s20031_s9  ;;  %15014 = vrot.lane.b32.xlu1 %v19146_v44, %s20033_s26 }
 0xea3   : > { %v19157_v29 = vpack.i.bf16 %v8413_v39, %v8412_v19  ;;  %v19163_v31 = vpack.c.bf16 %v8413_v39, %v8412_v19 }
 0xea5   : > { %15029 = vrot.lane.b32.xlu0 %v19157_v29, %s20031_s9  ;;  %15019 = vrot.lane.b32.xlu1 %v19157_v29, %s20033_s26 }
 0xea9   : > { %15039 = vrot.lane.b32.xlu0 %v19094_v2, %s20032_s7  ;;  %15034 = vrot.lane.b32.xlu1 %v19094_v2, %s20025_s15 }
 0xead   : > { %15049 = vrot.lane.b32.xlu0 %v19092_v32, %s20032_s7  ;;  %15044 = vrot.lane.b32.xlu1 %v19092_v32, %s20025_s15 }
 0xeb1   : > { %15059 = vrot.lane.b32.xlu0 %v19112_v49, %s20032_s7  ;;  %15054 = vrot.lane.b32.xlu1 %v19112_v49, %s20025_s15 }
 0xeb5   : > { %15069 = vrot.lane.b32.xlu0 %v19110_v3, %s20032_s7  ;;  %15064 = vrot.lane.b32.xlu1 %v19110_v3, %s20025_s15 }
 0xeb9   : > { %15079 = vrot.lane.b32.xlu0 %v19130_v9, %s20032_s7  ;;  %15074 = vrot.lane.b32.xlu1 %v19130_v9, %s20025_s15 }
 0xebd   : > { %15089 = vrot.lane.b32.xlu0 %v19128_v60, %s20032_s7  ;;  %15084 = vrot.lane.b32.xlu1 %v19128_v60, %s20025_s15 }
 0xec1   : > { %15104 = vrot.lane.b32.xlu0 %v19146_v44, %s20032_s7  ;;  %15094 = vrot.lane.b32.xlu1 %v19146_v44, %s20025_s15 }
 0xec5   : > { %15109 = vrot.lane.b32.xlu0 %v19157_v29, %s20032_s7  ;;  %15099 = vrot.lane.b32.xlu1 %v19157_v29, %s20025_s15  ;;  %s10670_s7 = sshll.u32 %s16187_s5, 7  ;;  %s10132_s5 = scalar_lea.sflag [#allocation5], %s16395_s14 }
 0xec9   : > { %15119 = vrot.lane.b32.xlu0 %v19092_v32, %s20027_s29  ;;  %15114 = vrot.lane.b32.xlu1 %v19094_v2, %s20027_s29 }
 0xecd   : > { %15129 = vrot.lane.b32.xlu0 %v19110_v3, %s20027_s29  ;;  %15124 = vrot.lane.b32.xlu1 %v19112_v49, %s20027_s29 }
 0xed1   : > { %15139 = vrot.lane.b32.xlu0 %v19128_v60, %s20027_s29  ;;  %15134 = vrot.lane.b32.xlu1 %v19130_v9, %s20027_s29 }
 0xed5   : > { %15149 = vrot.lane.b32.xlu0 %v19157_v29, %s20027_s29  ;;  %15144 = vrot.lane.b32.xlu1 %v19146_v44, %s20027_s29  ;;  %s20045_s29 = sld [smem:[#allocation40_spill]] }
 0xed9   : > { %15159 = vrot.lane.b32.xlu0 %v19094_v2, %s20026_s18  ;;  %15154 = vrot.lane.b32.xlu1 %v19094_v2, %s20028_s28 }
 0xedb   : > { %v9095_v18 = vld [vmem:[%s20045_s29 + $0x8] sm:$0xff]  ;;  %v9094_v19 = vld [vmem:[%s20045_s29] sm:$0xff] }
 0xedc   : > { %v9106_v17 = vld [vmem:[%s20045_s29 + $0x60] sm:$0xff] }
 0xedd   : > { %15169 = vrot.lane.b32.xlu0 %v19092_v32, %s20026_s18  ;;  %15164 = vrot.lane.b32.xlu1 %v19092_v32, %s20028_s28 }
 0xee1   : > { %15179 = vrot.lane.b32.xlu0 %v19112_v49, %s20026_s18  ;;  %15174 = vrot.lane.b32.xlu1 %v19112_v49, %s20028_s28 }
 0xee5   : > { %15189 = vrot.lane.b32.xlu0 %v19110_v3, %s20026_s18  ;;  %15184 = vrot.lane.b32.xlu1 %v19110_v3, %s20028_s28 }
 0xee9   : > { %15199 = vrot.lane.b32.xlu0 %v19130_v9, %s20026_s18  ;;  %15194 = vrot.lane.b32.xlu1 %v19130_v9, %s20028_s28 }
 0xeed   : > { %15209 = vrot.lane.b32.xlu0 %v19128_v60, %s20026_s18  ;;  %15204 = vrot.lane.b32.xlu1 %v19128_v60, %s20028_s28 }
 0xef1   : > { %15224 = vrot.lane.b32.xlu0 %v19146_v44, %s20026_s18  ;;  %15214 = vrot.lane.b32.xlu1 %v19146_v44, %s20028_s28 }
 0xef5   : > { %15229 = vrot.lane.b32.xlu0 %v19157_v29, %s20026_s18  ;;  %15219 = vrot.lane.b32.xlu1 %v19157_v29, %s20028_s28  ;;  %s20047_s18 = sld [smem:[#allocation41_spill]]  ;;  %s10280_s28 = sshll.u32 %s16395_s14, 3 }
 0xef9   : > { %15239 = vrot.lane.b32.xlu0 %v19092_v32, %s20029_s0  ;;  %15234 = vrot.lane.b32.xlu1 %v19094_v2, %s20029_s0 }
 0xefb   : > { %v14965_v0 = vpop.permute.xlu0 %14964  ;;  %v14955_v15 = vpop.permute.xlu1 %14954 }
 0xefc   : > { %v14967_v43 = vunpack.i.h.bf16 %v14965_v0  ;;  %v14966_v57 = vunpack.i.l.bf16 %v14965_v0  ;;  %v14957_v50 = vunpack.i.h.bf16 %v14955_v15  ;;  %v14956_v38 = vunpack.i.l.bf16 %v14955_v15 }
 0xefd   : > { %15249 = vrot.lane.b32.xlu0 %v19110_v3, %s20029_s0  ;;  %15244 = vrot.lane.b32.xlu1 %v19112_v49, %s20029_s0 }
 0xefe   : > { %v11562_v36 = vpack.c.bf16 %v14967_v43, %v14966_v57  ;;  %v11586_v58 = vpack.c.bf16 %v14957_v50, %v14956_v38  ;;  %v9097_v43 = vld [vmem:[%s20045_s29 + $0x18] sm:$0xff]  ;;  %v9096_v57 = vld [vmem:[%s20045_s29 + $0x10] sm:$0xff] }
 0xeff   : > { %v14970_v47 = vpop.permute.xlu0 %14969  ;;  %v14960_v7 = vpop.permute.xlu1 %14959 }
 0xf00   : > { %v14972_v32 = vunpack.i.h.bf16 %v14970_v47  ;;  %v14971_v34 = vunpack.i.l.bf16 %v14970_v47  ;;  %v14962_v35 = vunpack.i.h.bf16 %v14960_v7  ;;  %v14961_v2 = vunpack.i.l.bf16 %v14960_v7  ;;  %12801 = vmatprep.subr.msk.bf16.mxu0 %vm16467_vm4, %v11586_v58 }
 0xf01   : > { %15259 = vrot.lane.b32.xlu0 %v19128_v60, %s20029_s0  ;;  %15254 = vrot.lane.b32.xlu1 %v19130_v9, %s20029_s0 }
 0xf02   : > { %v11565_v3 = vpack.c.bf16 %v14972_v32, %v14971_v34  ;;  %v11589_v42 = vpack.c.bf16 %v14962_v35, %v14961_v2  ;;  %12802 = vmatpush3.bf16.msk.msra.mxu0 %vm16462_vm2, %v11562_v36  ;;  %v9099_v35 = vld [vmem:[%s20045_s29 + $0x28] sm:$0xff]  ;;  %v9098_v2 = vld [vmem:[%s20045_s29 + $0x20] sm:$0xff] }
 0xf03   : > { %v14985_v49 = vpop.permute.xlu0 %14984  ;;  %v14975_v52 = vpop.permute.xlu1 %14974 }
 0xf04   : > { %v14987_v59 = vunpack.i.h.bf16 %v14985_v49  ;;  %v14986_v4 = vunpack.i.l.bf16 %v14985_v49  ;;  %v14977_v46 = vunpack.i.h.bf16 %v14975_v52  ;;  %v14976_v23 = vunpack.i.l.bf16 %v14975_v52  ;;  %12803 = vmatprep.subr.msk.bf16.mxu0 %vm16467_vm4, %v11589_v42 }
 0xf05   : > { %15269 = vrot.lane.b32.xlu0 %v19157_v29, %s20029_s0  ;;  %15264 = vrot.lane.b32.xlu1 %v19146_v44, %s20029_s0  ;;  %s800_s0 = scalar_lea.vmem [#allocation14], %s10280_s28 }
 0xf06   : > { %v11568_v60 = vpack.c.bf16 %v14987_v59, %v14986_v4  ;;  %v11592_v9 = vpack.c.bf16 %v14977_v46, %v14976_v23  ;;  %12804 = vmatpush3.bf16.msk.msra.mxu0 %vm16462_vm2, %v11565_v3  ;;  %s10145_s3 = sshll.u32 %s800_s0, 4  ;;  %s19845_s3 = int_to_ptr.vmem [resolvable:$true] %s10145_s3 }
 0xf07   : > { %v14990_v8 = vpop.permute.xlu0 %14989  ;;  %v14980_v45 = vpop.permute.xlu1 %14979  ;;  %s15943_s10 = scalar_lea.vmem %s19845_s3, 128  ;;  %p15950_p9 = scmp.lt.s32.totalorder %s19845_s3, %s15948_s19 }
 0xf08   : > { %v14992_v39 = vunpack.i.h.bf16 %v14990_v8  ;;  %v14991_v29 = vunpack.i.l.bf16 %v14990_v8  ;;  %v14982_v56 = vunpack.i.h.bf16 %v14980_v45  ;;  %v14981_v0 = vunpack.i.l.bf16 %v14980_v45  ;;  %12805 = vmatprep.subr.msk.bf16.mxu0 %vm16467_vm4, %v11592_v9  ;;  %v9100_v9 = vld [vmem:[%s20045_s29 + $0x30] sm:$0xff]  ;;  %p15944_p12 = scmp.ne.s32.totalorder %s19845_s3, %s15943_s10  ;;  %p15951_p13 = scmp.lt.s32.totalorder %s15949_s4, %s15943_s10 }
 0xf09   : > { %9117 = vperm.xlu0 %13511, %v9095_v18   ;;  %9112 = vperm.xlu1 %13512, %v9094_v19  }
 0xf0a   : > { %v11571_v44 = vpack.c.bf16 %v14992_v39, %v14991_v29  ;;  %v11595_v15 = vpack.c.bf16 %v14982_v56, %v14981_v0  ;;  %12806 = vmatpush3.bf16.msk.msra.mxu0 %vm16462_vm2, %v11568_v60  ;;  %v9101_v60 = vld [vmem:[%s20045_s29 + $0x38] sm:$0xff]  ;;  %p15945_p3 = pnand %p15944_p12, %p16345_p10  ;;  %p15952_p0 = por %p15951_p13, %p15950_p9 }
 0xf0b   : > { %v15005_v50 = vpop.permute.xlu0 %15004  ;;  %v14995_v38 = vpop.permute.xlu1 %14994 }
 0xf0c   : > { %v15007_v36 = vunpack.i.h.bf16 %v15005_v50  ;;  %v15006_v58 = vunpack.i.l.bf16 %v15005_v50  ;;  %v14997_v47 = vunpack.i.h.bf16 %v14995_v38  ;;  %v14996_v7 = vunpack.i.l.bf16 %v14995_v38  ;;  %12807 = vmatprep.subr.msk.bf16.mxu0 %vm16467_vm4, %v11595_v15  ;;  %v9102_v15 = vld [vmem:[%s20045_s29 + $0x40] sm:$0xff]  ;;  %p15946_p7 = pneg %p15945_p3 }
 0xf0d   : > { %9127 = vperm.xlu0 %13511, %v9097_v43   ;;  %9122 = vperm.xlu1 %13512, %v9096_v57  }
 0xf0e   : > { %v11574_v32 = vpack.c.bf16 %v15007_v36, %v15006_v58  ;;  %v11598_v34 = vpack.c.bf16 %v14997_v47, %v14996_v7  ;;  %12808 = vmatpush3.bf16.msk.msra.mxu0 %vm16462_vm2, %v11571_v44  ;;  %v9103_v44 = vld [vmem:[%s20045_s29 + $0x48] sm:$0xff]  ;;  %p15953_p5 = pnand %p15952_p0, %p15946_p7 }
 0xf0f   : > { %v15010_v3 = vpop.permute.xlu0 %15009  ;;  %v15000_v42 = vpop.permute.xlu1 %14999 }
 0xf10   : > { %v15012_v49 = vunpack.i.h.bf16 %v15010_v3  ;;  %v15011_v52 = vunpack.i.l.bf16 %v15010_v3  ;;  %v15002_v59 = vunpack.i.h.bf16 %v15000_v42  ;;  %v15001_v4 = vunpack.i.l.bf16 %v15000_v42  ;;  %12809 = vmatprep.subr.msk.bf16.mxu0 %vm16467_vm4, %v11598_v34  ;;  %v9104_v34 = vld [vmem:[%s20045_s29 + $0x50] sm:$0xff] }
 0xf11   : > { %9137 = vperm.xlu0 %13511, %v9099_v35   ;;  %9132 = vperm.xlu1 %13512, %v9098_v2  }
 0xf12   : > { %v11577_v46 = vpack.c.bf16 %v15012_v49, %v15011_v52  ;;  %v11601_v23 = vpack.c.bf16 %v15002_v59, %v15001_v4  ;;  %12810 = vmatpush3.bf16.msk.msra.mxu0 %vm16462_vm2, %v11574_v32  ;;  %v9105_v32 = vld [vmem:[%s20045_s29 + $0x58] sm:$0xff]  ;;  %v15669_v59 = vld [vmem:[%s20044_s8] ss:$36 sps:$4 sm:$0xff]  }
 0xf13   : > { %v15025_v18 = vpop.permute.xlu0 %15024  ;;  %v15015_v19 = vpop.permute.xlu1 %15014 }
 0xf14   : > { %v15027_v8 = vunpack.i.h.bf16 %v15025_v18  ;;  %v15026_v45 = vunpack.i.l.bf16 %v15025_v18  ;;  %v15017_v39 = vunpack.i.h.bf16 %v15015_v19  ;;  %v15016_v29 = vunpack.i.l.bf16 %v15015_v19  ;;  %12811 = vmatprep.subr.msk.bf16.mxu0 %vm16467_vm4, %v11601_v23  ;;  %v9107_v23 = vld [vmem:[%s20045_s29 + $0x68] sm:$0xff] }
 0xf15   : > { %9147 = vperm.xlu0 %13511, %v9101_v60   ;;  %9142 = vperm.xlu1 %13512, %v9100_v9   ;;  %v15674_v18 = vld [vmem:[%s20044_s8 + $0x4c] ss:$36 sps:$4 sm:$0xff]  }
 0xf16   : > { %v11580_v56 = vpack.c.bf16 %v15027_v8, %v15026_v45  ;;  %v11604_v0 = vpack.c.bf16 %v15017_v39, %v15016_v29  ;;  %12812 = vmatpush3.bf16.msk.msra.mxu0 %vm16462_vm2, %v11577_v46 }
 0xf17   : > { %v15030_v43 = vpop.permute.xlu0 %15029  ;;  %v15020_v57 = vpop.permute.xlu1 %15019 }
 0xf18   : > { %v15032_v50 = vunpack.i.h.bf16 %v15030_v43  ;;  %v15031_v38 = vunpack.i.l.bf16 %v15030_v43  ;;  %v15022_v36 = vunpack.i.h.bf16 %v15020_v57  ;;  %v15021_v58 = vunpack.i.l.bf16 %v15020_v57  ;;  %12813 = vmatprep.subr.msk.bf16.mxu0 %vm16467_vm4, %v11604_v0 }
 0xf19   : > { %9157 = vperm.xlu0 %13511, %v9103_v44   ;;  %9152 = vperm.xlu1 %13512, %v9102_v15   ;;  %v9108_v15 = vld [vmem:[%s20045_s29 + $0x70] sm:$0xff] }
 0xf1a   : > { %v11583_v47 = vpack.c.bf16 %v15032_v50, %v15031_v38  ;;  %v11607_v7 = vpack.c.bf16 %v15022_v36, %v15021_v58  ;;  %12814 = vmatpush3.bf16.msk.msra.mxu0 %vm16462_vm2, %v11580_v56  ;;  %v9109_v56 = vld [vmem:[%s20045_s29 + $0x78] sm:$0xff]  ;;  %v15672_v36 = vld [vmem:[%s20044_s8 + $0x48] ss:$36 sps:$4 sm:$0xff]  }
 0xf1b   : > { %v15040_v35 = vpop.permute.xlu0 %15039  ;;  %v15035_v2 = vpop.permute.xlu1 %15034 }
 0xf1c   : > { %v15042_v3 = vunpack.i.h.bf16 %v15040_v35  ;;  %v15041_v42 = vunpack.i.l.bf16 %v15040_v35  ;;  %v15037_v49 = vunpack.i.h.bf16 %v15035_v2  ;;  %v15036_v52 = vunpack.i.l.bf16 %v15035_v2  ;;  %12815 = vmatprep.subr.msk.bf16.mxu0 %vm16467_vm4, %v11607_v7  ;;  %v15677_v35 = vld [vmem:[%s20044_s8 + $0x94] ss:$36 sps:$4 sm:$0xff]  }
 0xf1d   : > { %9167 = vperm.xlu0 %13511, %v9105_v32   ;;  %9162 = vperm.xlu1 %13512, %v9104_v34   ;;  %v10084_v34 = vld [vmem:[%s20046_s21] sm:$0xff]  ;;  %s20048_s21 = sld [smem:[#allocation43_spill]] }
 0xf1e   : > { %v11610_v4 = vpack.c.bf16 %v15042_v3, %v15041_v42  ;;  %v11634_v46 = vpack.c.bf16 %v15037_v49, %v15036_v52  ;;  %12816 = vmatpush3.bf16.msk.msra.mxu0 %vm16462_vm2, %v11583_v47  ;;  %vm16044_vm2 = vmmov 0  }
 0xf1f   : > { %v15050_v60 = vpop.permute.xlu0 %15049  ;;  %v15045_v9 = vpop.permute.xlu1 %15044 }
 0xf20   : > { %v15052_v19 = vunpack.i.h.bf16 %v15050_v60  ;;  %v15051_v8 = vunpack.i.l.bf16 %v15050_v60  ;;  %v15047_v45 = vunpack.i.h.bf16 %v15045_v9  ;;  %v15046_v39 = vunpack.i.l.bf16 %v15045_v9  ;;  %12865 = vmatprep.subr.msk.bf16.mxu1 %vm16480_vm8, %v11634_v46 }
 0xf21   : > { %9591 = vmatmul.mubr.bf16.vlgmr.msra.gmra.mrb[16].mxu0 %v15669_v59  ;;  %9177 = vperm.xlu0 %13511, %v9107_v23  }
 0xf22   : > { %v11613_v16 = vpack.c.bf16 %v15052_v19, %v15051_v8  ;;  %v11637_v29 = vpack.c.bf16 %v15047_v45, %v15046_v39  ;;  %9172 = vperm.xlu1 %13512, %v9106_v17   ;;  %12866 = vmatpush3.bf16.msk.msra.mxu1 %vm16472_vm6, %v11610_v4  ;;  %v15680_v45 = vld [vmem:[%s20044_s8 + $0xdc] ss:$36 sps:$4 sm:$0xff]  }
 0xf23   : > { %v15060_v0 = vpop.permute.xlu0 %15059  ;;  %v15055_v44 = vpop.permute.xlu1 %15054  ;;  %9598 = vmatprep.mubr.bf16.mxu0 %v15674_v18  ;;  %v15675_v18 = vld [vmem:[%s20044_s8 + $0x90] ss:$36 sps:$4 sm:$0xff]   ;;  %s19843_s16 = scalar_lea.hbm %s20048_s21, %s10670_s7 }
 0xf24   : > { %v15062_v43 = vunpack.i.h.bf16 %v15060_v0  ;;  %v15061_v57 = vunpack.i.l.bf16 %v15060_v0  ;;  %v15057_v50 = vunpack.i.h.bf16 %v15055_v44  ;;  %v15056_v38 = vunpack.i.l.bf16 %v15055_v44  ;;  %12867 = vmatprep.subr.msk.bf16.mxu1 %vm16480_vm8, %v11637_v29 }
 0xf25   : > { %9187 = vperm.xlu0 %13511, %v9109_v56  }
 0xf26   : > { %v11616_v58 = vpack.c.bf16 %v15062_v43, %v15061_v57  ;;  %v11640_v47 = vpack.c.bf16 %v15057_v50, %v15056_v38  ;;  %9182 = vperm.xlu1 %13512, %v9108_v15   ;;  %12868 = vmatpush3.bf16.msk.msra.mxu1 %vm16472_vm6, %v11613_v16 }
 0xf27   : > { %v15070_v7 = vpop.permute.xlu0 %15069  ;;  %v15065_v32 = vpop.permute.xlu1 %15064 }
 0xf28   : > { %v15072_v2 = vunpack.i.h.bf16 %v15070_v7  ;;  %v15071_v3 = vunpack.i.l.bf16 %v15070_v7  ;;  %v15067_v42 = vunpack.i.h.bf16 %v15065_v32  ;;  %v15066_v49 = vunpack.i.l.bf16 %v15065_v32  ;;  %12869 = vmatprep.subr.msk.bf16.mxu1 %vm16480_vm8, %v11640_v47  ;;  %v15678_v7 = vld [vmem:[%s20044_s8 + $0xd8] ss:$36 sps:$4 sm:$0xff]  }
 0xf29   : > { %9599 = vmatmul.mubr.bf16.gmra.mrb[20].mxu0 %v15672_v36 }
 0xf2a   : > { %v11619_v52 = vpack.c.bf16 %v15072_v2, %v15071_v3  ;;  %v11643_v59 = vpack.c.bf16 %v15067_v42, %v15066_v49  ;;  %10087 = vperm.xlu1 %13512, %v10084_v34   ;;  %12870 = vmatpush3.bf16.msk.msra.mxu1 %vm16472_vm6, %v11616_v58 }
 0xf2b   : > { %v15080_v4 = vpop.permute.xlu0 %15079  ;;  %v15075_v46 = vpop.permute.xlu1 %15074  ;;  %9606 = vmatprep.mubr.bf16.mxu0 %v15677_v35  ;;  %v15686_v35 = vld [vmem:[%s20044_s8 + $0x124] ss:$36 sps:$4 sm:$0xff]  }
 0xf2c   : > { %v15082_v23 = vunpack.i.h.bf16 %v15080_v4  ;;  %v15081_v60 = vunpack.i.l.bf16 %v15080_v4  ;;  %v15077_v9 = vunpack.i.h.bf16 %v15075_v46  ;;  %v15076_v17 = vunpack.i.l.bf16 %v15075_v46  ;;  %12871 = vmatprep.subr.msk.bf16.mxu1 %vm16480_vm8, %v11643_v59 }
 0xf2e   : > { %v11622_v19 = vpack.c.bf16 %v15082_v23, %v15081_v60  ;;  %v11646_v8 = vpack.c.bf16 %v15077_v9, %v15076_v17  ;;  %12872 = vmatpush3.bf16.msk.msra.mxu1 %vm16472_vm6, %v11619_v52 }
 0xf2f   : > { %v15090_v39 = vpop.permute.xlu0 %15089  ;;  %v15085_v16 = vpop.permute.xlu1 %15084 }
 0xf30   : > { %v15092_v29 = vunpack.i.h.bf16 %v15090_v39  ;;  %v15091_v56 = vunpack.i.l.bf16 %v15090_v39  ;;  %v15087_v0 = vunpack.i.h.bf16 %v15085_v16  ;;  %v15086_v44 = vunpack.i.l.bf16 %v15085_v16  ;;  %12873 = vmatprep.subr.msk.bf16.mxu1 %vm16480_vm8, %v11646_v8  ;;  %v15681_v8 = vld [vmem:[%s20044_s8 + $0x8] ss:$36 sps:$4 sm:$0xff]  }
 0xf31   : > { %9607 = vmatmul.mubr.bf16.gmra.mrb[24].mxu0 %v15675_v18  ;;  %v15689_v16 = vld [vmem:[%s20044_s8 + $0x16c] ss:$36 sps:$4 sm:$0xff]  }
 0xf32   : > { %v11625_v15 = vpack.c.bf16 %v15092_v29, %v15091_v56  ;;  %v11649_v43 = vpack.c.bf16 %v15087_v0, %v15086_v44  ;;  %12874 = vmatpush3.bf16.msk.msra.mxu1 %vm16472_vm6, %v11622_v19  ;;  %9614 = vmatprep.mubr.bf16.mxu0 %v15680_v45  ;;  %v15684_v45 = vld [vmem:[%s20044_s8 + $0x120] ss:$36 sps:$4 sm:$0xff]   ;;  %v15692_v56 = vld [vmem:[%s20044_s8 + $0x54] ss:$36 sps:$4 sm:$0xff]  }
 0xf33   : > { %v15105_v57 = vpop.permute.xlu0 %15104  ;;  %v15095_v50 = vpop.permute.xlu1 %15094 }
 0xf34   : > { %v15107_v38 = vunpack.i.h.bf16 %v15105_v57  ;;  %v15106_v36 = vunpack.i.l.bf16 %v15105_v57  ;;  %v15097_v58 = vunpack.i.h.bf16 %v15095_v50  ;;  %v15096_v47 = vunpack.i.l.bf16 %v15095_v50  ;;  %12875 = vmatprep.subr.msk.bf16.mxu1 %vm16480_vm8, %v11649_v43 }
 0xf36   : > { %v11628_v32 = vpack.c.bf16 %v15107_v38, %v15106_v36  ;;  %v11652_v34 = vpack.c.bf16 %v15097_v58, %v15096_v47  ;;  %12876 = vmatpush3.bf16.msk.msra.mxu1 %vm16472_vm6, %v11625_v15  ;;  %v15687_v36 = vld [vmem:[%s20044_s8 + $0x168] ss:$36 sps:$4 sm:$0xff]   ;;  %v15690_v58 = vld [vmem:[%s20044_s8 + $0x50] ss:$36 sps:$4 sm:$0xff]  }
 0xf37   : > { %v15110_v2 = vpop.permute.xlu0 %15109  ;;  %v15100_v3 = vpop.permute.xlu1 %15099 }
 0xf38   : > { %v15112_v42 = vunpack.i.h.bf16 %v15110_v2  ;;  %v15111_v49 = vunpack.i.l.bf16 %v15110_v2  ;;  %v15102_v52 = vunpack.i.h.bf16 %v15100_v3  ;;  %v15101_v59 = vunpack.i.l.bf16 %v15100_v3  ;;  %12877 = vmatprep.subr.msk.bf16.mxu1 %vm16480_vm8, %v11652_v34 }
 0xf39   : > { %9615 = vmatmul.mubr.bf16.gmra.mrb[28].mxu0 %v15678_v7 }
 0xf3a   : > { %v11631_v4 = vpack.c.bf16 %v15112_v42, %v15111_v49  ;;  %v11655_v46 = vpack.c.bf16 %v15102_v52, %v15101_v59  ;;  %12878 = vmatpush3.bf16.msk.msra.mxu1 %vm16472_vm6, %v11628_v32  ;;  %9622 = vmatprep.mubr.bf16.mxu0 %v15686_v35  ;;  %v15698_v32 = vld [vmem:[%s20044_s8 + $0x9c] ss:$36 sps:$4 sm:$0xff]  }
 0xf3b   : > { %v15120_v23 = vpop.permute.xlu0 %15119  ;;  %v15115_v60 = vpop.permute.xlu1 %15114 }
 0xf3c   : > { %v15117_v9 = vunpack.i.h.bf16 %v15115_v60  ;;  %v15116_v17 = vunpack.i.l.bf16 %v15115_v60  ;;  %12879 = vmatprep.subr.msk.bf16.mxu1 %vm16480_vm8, %v11655_v46  ;;  %v15122_v18 = vunpack.i.h.bf16 %v15120_v23  ;;  %v15121_v19 = vunpack.i.l.bf16 %v15120_v23  ;;  %v15693_v60 = vld [vmem:[%s20044_s8 + $0x1b0] ss:$36 sps:$4 sm:$0xff]  }
 0xf3e   : > { %v11658_v39 = vpack.c.bf16 %v15117_v9, %v15116_v17  ;;  %12880 = vmatpush3.bf16.msk.msra.mxu1 %vm16472_vm6, %v11631_v4  ;;  %v11661_v0 = vpack.c.bf16 %v15122_v18, %v15121_v19 }
 0xf3f   : > { %v15130_v30 = vpop.permute.xlu0 %15129  ;;  %v15125_v29 = vpop.permute.xlu1 %15124 }
 0xf40   : > { %12929 = vmatprep.subr.msk.bf16.mxu0 %vm16491_vm10, %v11658_v39  ;;  %v15127_v44 = vunpack.i.h.bf16 %v15125_v29  ;;  %v15126_v15 = vunpack.i.l.bf16 %v15125_v29  ;;  %v15132_v57 = vunpack.i.h.bf16 %v15130_v30  ;;  %v15131_v50 = vunpack.i.l.bf16 %v15130_v30 }
 0xf41   : > { %9623 = vmatmul.mubr.bf16.gmra.mrb[32].mxu0 %v15684_v45  ;;  %9688 = vmatmul.mubr.bf16.vlgmr.msra.gmra.mrb[16].mxu1 %v15681_v8  ;;  %v15701_v8 = vld [vmem:[%s20044_s8 + $0x1fc] ss:$36 sps:$4 sm:$0xff]  }
 0xf42   : > { %12930 = vmatpush3.bf16.msra.mxu0 %v19101_v13  ;;  %9630 = vmatprep.mubr.bf16.mxu0 %v15689_v16  ;;  %v11664_v38 = vpack.c.bf16 %v15127_v44, %v15126_v15  ;;  %v15695_v13 = vld [vmem:[%s20044_s8 + $0x1b4] ss:$36 sps:$4 sm:$0xff]   ;;  %v11667_v34 = vpack.c.bf16 %v15132_v57, %v15131_v50 }
 0xf43   : > { %12931 = vmatprep.subr.msk.bf16.mxu0 %vm16491_vm10, %v11661_v0  ;;  %v15140_v22 = vpop.permute.xlu0 %15139  ;;  %v15135_v43 = vpop.permute.xlu1 %15134  ;;  %9695 = vmatprep.mubr.bf16.mxu1 %v15692_v56 }
 0xf44   : > { %v15137_v35 = vunpack.i.h.bf16 %v15135_v43  ;;  %v15136_v2 = vunpack.i.l.bf16 %v15135_v43  ;;  %v15142_v4 = vunpack.i.h.bf16 %v15140_v22  ;;  %v15141_v46 = vunpack.i.l.bf16 %v15140_v22 }
 0xf46   : > { %12932 = vmatpush3.bf16.msra.mxu0 %v19108_v62  ;;  %v11670_v23 = vpack.c.bf16 %v15137_v35, %v15136_v2  ;;  %v11673_v29 = vpack.c.bf16 %v15142_v4, %v15141_v46 }
 0xf47   : > { %12933 = vmatprep.subr.msk.bf16.mxu0 %vm16491_vm10, %v11664_v38  ;;  %v19432_v47 = vpop.permute.xlu0 %15149  ;;  %v15145_v7 = vpop.permute.xlu1 %15144 }
 0xf48   : > { %v15147_v56 = vunpack.i.h.bf16 %v15145_v7  ;;  %v15146_v0 = vunpack.i.l.bf16 %v15145_v7  ;;  %v15699_v7 = vld [vmem:[%s20044_s8 + $0x1f8] ss:$36 sps:$4 sm:$0xff]  }
 0xf49   : > { %9631 = vmatmul.mubr.bf16.gmra.mrb[36].mxu0 %v15687_v36  ;;  %9696 = vmatmul.mubr.bf16.gmra.mrb[20].mxu1 %v15690_v58  ;;  %v15152_v58 = vunpack.i.h.bf16 %v19432_v47 }
 0xf4a   : > { %12934 = vmatpush3.bf16.msra.mxu0 %v19119_v26  ;;  %9638 = vmatprep.mubr.bf16.mxu0 %v15695_v13  ;;  %v15696_v26 = vld [vmem:[%s20044_s8 + $0x98] ss:$36 sps:$4 sm:$0xff]   ;;  %v11676_v13 = vpack.c.bf16 %v15147_v56, %v15146_v0 }
 0xf4b   : > { %12935 = vmatprep.subr.msk.bf16.mxu0 %vm16491_vm10, %v11667_v34  ;;  %v15160_v62 = vpop.permute.xlu0 %15159  ;;  %v15155_v3 = vpop.permute.xlu1 %15154  ;;  %9703 = vmatprep.mubr.bf16.mxu1 %v15698_v32  ;;  %v15702_v32 = vld [vmem:[%s20044_s8 + $0xe0] ss:$36 sps:$4 sm:$0xff]  }
 0xf4c   : > { %v15162_v42 = vunpack.i.h.bf16 %v15160_v62  ;;  %v15161_v49 = vunpack.i.l.bf16 %v15160_v62  ;;  %v15157_v52 = vunpack.i.h.bf16 %v15155_v3  ;;  %v15156_v59 = vunpack.i.l.bf16 %v15155_v3  ;;  %v15707_v62 = vld [vmem:[%s20044_s8 + $0x12c] ss:$36 sps:$4 sm:$0xff]  }
 0xf4e   : > { %v11682_v9 = vpack.c.bf16 %v15162_v42, %v15161_v49  ;;  %v11706_v17 = vpack.c.bf16 %v15157_v52, %v15156_v59  ;;  %12936 = vmatpush3.bf16.msra.mxu0 %v19126_v21  ;;  %v15704_v21 = vld [vmem:[%s20044_s8 + $0xe4] ss:$36 sps:$4 sm:$0xff]  }
 0xf4f   : > { %12937 = vmatprep.subr.msk.bf16.mxu0 %vm16491_vm10, %v11670_v23  ;;  %v15170_v18 = vpop.permute.xlu0 %15169  ;;  %v15165_v19 = vpop.permute.xlu1 %15164 }
 0xf50   : > { %v15172_v45 = vunpack.i.h.bf16 %v15170_v18  ;;  %v15171_v39 = vunpack.i.l.bf16 %v15170_v18  ;;  %v15167_v16 = vunpack.i.h.bf16 %v15165_v19  ;;  %v15166_v30 = vunpack.i.l.bf16 %v15165_v19  ;;  %12993 = vmatprep.subr.msk.bf16.mxu1 %vm16514_vm14, %v11706_v17 }
 0xf51   : > { %9639 = vmatmul.mubr.bf16.gmra.mrb[40].mxu0 %v15693_v60  ;;  %9704 = vmatmul.mubr.bf16.gmra.mrb[24].mxu1 %v15696_v26 }
 0xf52   : > { %v11685_v44 = vpack.c.bf16 %v15172_v45, %v15171_v39  ;;  %v11709_v15 = vpack.c.bf16 %v15167_v16, %v15166_v30  ;;  %12938 = vmatpush3.bf16.msra.mxu0 %v19136_v40  ;;  %12994 = vmatpush3.bf16.msk.msra.mxu1 %vm16499_vm12, %v11682_v9  ;;  %v15151_v40 = vunpack.i.l.bf16 %v19432_v47  ;;  %v15713_v45 = vld [vmem:[%s20044_s8 + $0x174] ss:$36 sps:$4 sm:$0xff]   ;;  %v15716_v30 = vld [vmem:[%s20044_s8 + $0x5c] ss:$36 sps:$4 sm:$0xff]  }
 0xf53   : > { %12939 = vmatprep.subr.msk.bf16.mxu0 %vm16491_vm10, %v11673_v29  ;;  %v15180_v22 = vpop.permute.xlu0 %15179  ;;  %v15175_v43 = vpop.permute.xlu1 %15174  ;;  %9646 = vmatprep.mubr.bf16.mxu0 %v15701_v8 }
 0xf54   : > { %v15182_v57 = vunpack.i.h.bf16 %v15180_v22  ;;  %v15181_v50 = vunpack.i.l.bf16 %v15180_v22  ;;  %v15177_v38 = vunpack.i.h.bf16 %v15175_v43  ;;  %v15176_v36 = vunpack.i.l.bf16 %v15175_v43  ;;  %12995 = vmatprep.subr.msk.bf16.mxu1 %vm16514_vm14, %v11709_v15  ;;  %9711 = vmatprep.mubr.bf16.mxu1 %v15704_v21 }
 0xf55   : > { %v11679_v59 = vpack.c.bf16 %v15152_v58, %v15151_v40  ;;  %v15714_v58 = vld [vmem:[%s20044_s8 + $0x58] ss:$36 sps:$4 sm:$0xff]  }
 0xf56   : > { %v11688_v34 = vpack.c.bf16 %v15182_v57, %v15181_v50  ;;  %v11712_v35 = vpack.c.bf16 %v15177_v38, %v15176_v36  ;;  %12940 = vmatpush3.bf16.msra.mxu0 %v19139_v33  ;;  %12996 = vmatpush3.bf16.msk.msra.mxu1 %vm16499_vm12, %v11685_v44  ;;  %v15710_v33 = vld [vmem:[%s20044_s8 + $0x14] ss:$36 sps:$4 sm:$0xff]  }
 0xf57   : > { %12941 = vmatprep.subr.msk.bf16.mxu0 %vm16491_vm10, %v11676_v13  ;;  %v15190_v47 = vpop.permute.xlu0 %15189  ;;  %v15185_v2 = vpop.permute.xlu1 %15184  ;;  %v15711_v36 = vld [vmem:[%s20044_s8 + $0x170] ss:$36 sps:$4 sm:$0xff]  }
 0xf58   : > { %v15192_v3 = vunpack.i.h.bf16 %v15190_v47  ;;  %v15191_v42 = vunpack.i.l.bf16 %v15190_v47  ;;  %v15187_v49 = vunpack.i.h.bf16 %v15185_v2  ;;  %v15186_v52 = vunpack.i.l.bf16 %v15185_v2  ;;  %12997 = vmatprep.subr.msk.bf16.mxu1 %vm16514_vm14, %v11712_v35  ;;  %v15722_v35 = vld [vmem:[%s20044_s8 + $0xa4] ss:$36 sps:$4 sm:$0xff]  }
 0xf59   : > { %9647 = vmatmul.mubr.bf16.gmra.mrb[44].mxu0 %v15699_v7  ;;  %9712 = vmatmul.mubr.bf16.gmra.mrb[28].mxu1 %v15702_v32  ;;  %v15719_v7 = vld [vmem:[%s20044_s8 + $0x1bc] ss:$36 sps:$4 sm:$0xff]  }
 0xf5a   : > { %v11691_v4 = vpack.c.bf16 %v15192_v3, %v15191_v42  ;;  %v11715_v46 = vpack.c.bf16 %v15187_v49, %v15186_v52  ;;  %12942 = vmatpush3.bf16.msra.mxu0 %v19155_v28  ;;  %12998 = vmatpush3.bf16.msk.msra.mxu1 %vm16499_vm12, %v11688_v34  ;;  %v15705_v28 = vld [vmem:[%s20044_s8 + $0x128] ss:$36 sps:$4 sm:$0xff]  }
 0xf5b   : > { %12943 = vmatprep.subr.msk.bf16.mxu0 %vm16491_vm10, %v11679_v59  ;;  %v15200_v23 = vpop.permute.xlu0 %15199  ;;  %v15195_v60 = vpop.permute.xlu1 %15194  ;;  %9719 = vmatprep.mubr.bf16.mxu1 %v15707_v62 }
 0xf5c   : > { %v15202_v26 = vunpack.i.h.bf16 %v15200_v23  ;;  %v15201_v9 = vunpack.i.l.bf16 %v15200_v23  ;;  %v15197_v17 = vunpack.i.h.bf16 %v15195_v60  ;;  %v15196_v18 = vunpack.i.l.bf16 %v15195_v60  ;;  %12999 = vmatprep.subr.msk.bf16.mxu1 %vm16514_vm14, %v11715_v46  ;;  %9784 = vmatprep.mubr.bf16.mxu0 %v15710_v33  ;;  %v15717_v60 = vld [vmem:[%s20044_s8 + $0x1b8] ss:$36 sps:$4 sm:$0xff]  }
 0xf5e   : > { %v11694_v19 = vpack.c.bf16 %v15202_v26, %v15201_v9  ;;  %v11718_v8 = vpack.c.bf16 %v15197_v17, %v15196_v18  ;;  %12944 = vmatpush3.bf16.msra.mxu0 %v19163_v31  ;;  %13000 = vmatpush3.bf16.msk.msra.mxu1 %vm16499_vm12, %v11691_v4  ;;  %v15720_v26 = vld [vmem:[%s20044_s8 + $0xa0] ss:$36 sps:$4 sm:$0xff]   ;;  %v15728_v18 = vld [vmem:[%s20044_s8 + $0xec] ss:$36 sps:$4 sm:$0xff]  }
 0xf5f   : > { %v15210_v39 = vpop.permute.xlu0 %15209  ;;  %v15205_v16 = vpop.permute.xlu1 %15204  ;;  %v15725_v17 = vld [vmem:[%s20044_s8 + $0x204] ss:$36 sps:$4 sm:$0xff]  }
 0xf60   : > { %v15212_v21 = vunpack.i.h.bf16 %v15210_v39  ;;  %v15211_v29 = vunpack.i.l.bf16 %v15210_v39  ;;  %v15207_v56 = vunpack.i.h.bf16 %v15205_v16  ;;  %v15206_v0 = vunpack.i.l.bf16 %v15205_v16  ;;  %13001 = vmatprep.subr.msk.bf16.mxu1 %vm16514_vm14, %v11718_v8  ;;  %v15723_v16 = vld [vmem:[%s20044_s8 + $0x200] ss:$36 sps:$4 sm:$0xff]  }
 0xf61   : > { %9720 = vmatmul.mubr.bf16.gmra.mrb[32].mxu1 %v15705_v28  ;;  %9785 = vmatmul.mubr.bf16.vlgmr.msra.gmra.mrb[48].mxu0 %v15708_v37 }
 0xf62   : > { %v11697_v31 = vpack.c.bf16 %v15212_v21, %v15211_v29  ;;  %v11721_v44 = vpack.c.bf16 %v15207_v56, %v15206_v0  ;;  %13002 = vmatpush3.bf16.msk.msra.mxu1 %vm16499_vm12, %v11694_v19  ;;  %9727 = vmatprep.mubr.bf16.mxu1 %v15713_v45  ;;  %v15731_v29 = vld [vmem:[%s20044_s8 + $0x134] ss:$36 sps:$4 sm:$0xff]   ;;  %v15734_v56 = vld [vmem:[%s20044_s8 + $0x1c] ss:$36 sps:$4 sm:$0xff]  }
 0xf63   : > { %v15225_v15 = vpop.permute.xlu0 %15224  ;;  %v15215_v22 = vpop.permute.xlu1 %15214  ;;  %9792 = vmatprep.mubr.bf16.mxu0 %v15716_v30  ;;  %v15726_v30 = vld [vmem:[%s20044_s8 + $0xe8] ss:$36 sps:$4 sm:$0xff]  }
 0xf64   : > { %v15227_v43 = vunpack.i.h.bf16 %v15225_v15  ;;  %v15226_v57 = vunpack.i.l.bf16 %v15225_v15  ;;  %v15217_v50 = vunpack.i.h.bf16 %v15215_v22  ;;  %v15216_v38 = vunpack.i.l.bf16 %v15215_v22  ;;  %13003 = vmatprep.subr.msk.bf16.mxu1 %vm16514_vm14, %v11721_v44 }
 0xf66   : > { %v11700_v40 = vpack.c.bf16 %v15227_v43, %v15226_v57  ;;  %v11724_v13 = vpack.c.bf16 %v15217_v50, %v15216_v38  ;;  %13004 = vmatpush3.bf16.msk.msra.mxu1 %vm16499_vm12, %v11697_v31  ;;  %v15729_v50 = vld [vmem:[%s20044_s8 + $0x130] ss:$36 sps:$4 sm:$0xff]   ;;  %v15732_v38 = vld [vmem:[%s20044_s8 + $0x18] ss:$36 sps:$4 sm:$0xff]  }
 0xf67   : > { %v15230_v32 = vpop.permute.xlu0 %15229  ;;  %v15220_v34 = vpop.permute.xlu1 %15219 }
 0xf68   : > { %v15232_v47 = vunpack.i.h.bf16 %v15230_v32  ;;  %v15231_v2 = vunpack.i.l.bf16 %v15230_v32  ;;  %v15222_v62 = vunpack.i.h.bf16 %v15220_v34  ;;  %v15221_v3 = vunpack.i.l.bf16 %v15220_v34  ;;  %13005 = vmatprep.subr.msk.bf16.mxu1 %vm16514_vm14, %v11724_v13 }
 0xf69   : > { %9728 = vmatmul.mubr.bf16.gmra.mrb[36].mxu1 %v15711_v36  ;;  %9793 = vmatmul.mubr.bf16.gmra.mrb[52].mxu0 %v15714_v58  ;;  %v15737_v58 = vld [vmem:[%s20044_s8 + $0x17c] ss:$36 sps:$4 sm:$0xff]  }
 0xf6a   : > { %v11703_v42 = vpack.c.bf16 %v15232_v47, %v15231_v2  ;;  %v11727_v49 = vpack.c.bf16 %v15222_v62, %v15221_v3  ;;  %13006 = vmatpush3.bf16.msk.msra.mxu1 %vm16499_vm12, %v11700_v40  ;;  %9735 = vmatprep.mubr.bf16.mxu1 %v15719_v7  ;;  %v15740_v40 = vld [vmem:[%s20044_s8 + $0x64] ss:$36 sps:$4 sm:$0xff]   ;;  %v15735_v62 = vld [vmem:[%s20044_s8 + $0x178] ss:$36 sps:$4 sm:$0xff]  }
 0xf6b   : > { %v15240_v52 = vpop.permute.xlu0 %15239  ;;  %v15235_v33 = vpop.permute.xlu1 %15234  ;;  %9800 = vmatprep.mubr.bf16.mxu0 %v15722_v35  ;;  %v15738_v3 = vld [vmem:[%s20044_s8 + $0x60] ss:$36 sps:$4 sm:$0xff]  }
 0xf6c   : > { %v15237_v59 = vunpack.i.h.bf16 %v15235_v33  ;;  %v15236_v4 = vunpack.i.l.bf16 %v15235_v33  ;;  %13007 = vmatprep.subr.msk.bf16.mxu1 %vm16514_vm14, %v11727_v49  ;;  %v15242_v46 = vunpack.i.h.bf16 %v15240_v52  ;;  %v15241_v23 = vunpack.i.l.bf16 %v15240_v52  ;;  %v15746_v49 = vld [vmem:[%s20044_s8 + $0xac] ss:$36 sps:$4 sm:$0xff]   ;;  %v15741_v33 = vld [vmem:[%s20044_s8 + $0x1c0] ss:$36 sps:$4 sm:$0xff]  }
 0xf6e   : > { %v11730_v9 = vpack.c.bf16 %v15237_v59, %v15236_v4  ;;  %13008 = vmatpush3.bf16.msk.msra.mxu1 %vm16499_vm12, %v11703_v42  ;;  %v11733_v28 = vpack.c.bf16 %v15242_v46, %v15241_v23  ;;  %v15743_v42 = vld [vmem:[%s20044_s8 + $0x1c4] ss:$36 sps:$4 sm:$0xff]   ;;  %v15749_v4 = vld [vmem:[%s20044_s8 + $0x20c] ss:$36 sps:$4 sm:$0xff]   ;;  %v15752_v46 = vld [vmem:[%s20044_s8 + $0xf4] ss:$36 sps:$4 sm:$0xff]  }
 0xf6f   : > { %v15245_v53 = vpop.permute.xlu1 %15244  ;;  %v15250_v8 = vpop.permute.xlu0 %15249  ;;  %v15744_v59 = vld [vmem:[%s20044_s8 + $0xa8] ss:$36 sps:$4 sm:$0xff]  }
 0xf70   : > { %13258 = vmatprep.subr.msk.bf16.mxu0 %vm16521_vm1, %v11730_v9  ;;  %v15247_v37 = vunpack.i.h.bf16 %v15245_v53  ;;  %v15246_v19 = vunpack.i.l.bf16 %v15245_v53  ;;  %v15252_v41 = vunpack.i.h.bf16 %v15250_v8  ;;  %v15251_v45 = vunpack.i.l.bf16 %v15250_v8  ;;  %v15747_v23 = vld [vmem:[%s20044_s8 + $0x208] ss:$36 sps:$4 sm:$0xff]   ;;  %v15766_v8 = vld [vmem:[%s20044_s8 + $0x140] ss:$36 sps:$4 sm:$0xff]  }
 0xf71   : > { %9736 = vmatmul.mubr.bf16.gmra.mrb[40].mxu1 %v15717_v60  ;;  %9801 = vmatmul.mubr.bf16.gmra.mrb[56].mxu0 %v15720_v26  ;;  %v15755_v60 = vld [vmem:[%s20044_s8 + $0x13c] ss:$36 sps:$4 sm:$0xff]   ;;  %v15760_v53 = vld [vmem:[%s20044_s8 + $0x184] ss:$36 sps:$4 sm:$0xff]  }
 0xf72   : > { %13259 = vmatpush3.bf16.msk.msra.mxu0 %vm16521_vm1, %v11730_v9  ;;  %9743 = vmatprep.mubr.bf16.mxu1 %v15725_v17  ;;  %v11736_v39 = vpack.c.bf16 %v15247_v37, %v15246_v19  ;;  %v11739_v0 = vpack.c.bf16 %v15252_v41, %v15251_v45  ;;  %v15756_v26 = vld [vmem:[%s20044_s8 + $0x20] ss:$36 sps:$4 sm:$0xff]   ;;  %v15753_v9 = vld [vmem:[%s20044_s8 + $0x138] ss:$36 sps:$4 sm:$0xff]   ;;  %v15757_v17 = vld [vmem:[%s20044_s8 + $0x68] ss:$36 sps:$4 sm:$0xff]  }
 0xf73   : > { %13260 = vmatprep.subr.msk.bf16.mxu0 %vm16521_vm1, %v11733_v28  ;;  %9808 = vmatprep.mubr.bf16.mxu0 %v15728_v18  ;;  %v15255_v21 = vpop.permute.xlu1 %15254  ;;  %v15260_v15 = vpop.permute.xlu0 %15259  ;;  %v15761_v18 = vld [vmem:[%s20044_s8 + $0xb0] ss:$36 sps:$4 sm:$0xff]   ;;  %v15762_v37 = vld [vmem:[%s20044_s8 + $0xf8] ss:$36 sps:$4 sm:$0xff]   ;;  %v15763_v41 = vld [vmem:[%s20044_s8 + $0x1c8] ss:$36 sps:$4 sm:$0xff]  }
 0xf74   : > { %v15257_v31 = vunpack.i.h.bf16 %v15255_v21  ;;  %v15256_v44 = vunpack.i.l.bf16 %v15255_v21  ;;  %v15262_v22 = vunpack.i.h.bf16 %v15260_v15  ;;  %v15261_v43 = vunpack.i.l.bf16 %v15260_v15  ;;  %v15765_v19 = vld [vmem:[%s20044_s8 + $0x1cc] ss:$36 sps:$4 sm:$0xff]   ;;  %v15772_v21 = vld [vmem:[%s20044_s8 + $0x218] ss:$36 sps:$4 sm:$0xff]  }
 0xf75   : > { %v15767_v45 = vld [vmem:[%s20044_s8 + $0x188] ss:$36 sps:$4 sm:$0xff]  }
 0xf76   : > { %13261 = vmatpush3.bf16.msk.msra.mxu0 %vm16521_vm1, %v11733_v28  ;;  %v11742_v57 = vpack.c.bf16 %v15257_v31, %v15256_v44  ;;  %v11745_v13 = vpack.c.bf16 %v15262_v22, %v15261_v43  ;;  %v15758_v28 = vld [vmem:[%s20044_s8 + $0x180] ss:$36 sps:$4 sm:$0xff]  }
 0xf77   : > { %13262 = vmatprep.subr.msk.bf16.mxu0 %vm16521_vm1, %v11736_v39  ;;  %v15265_v36 = vpop.permute.xlu1 %15264  ;;  %v15270_v34 = vpop.permute.xlu0 %15269 }
 0xf78   : > { %v15267_v7 = vunpack.i.h.bf16 %v15265_v36  ;;  %v15266_v32 = vunpack.i.l.bf16 %v15265_v36  ;;  %v15272_v35 = vunpack.i.h.bf16 %v15270_v34  ;;  %v15271_v47 = vunpack.i.l.bf16 %v15270_v34 }
 0xf79   : > { %9744 = vmatmul.mubr.bf16.gmra.mrb[44].mxu1 %v15723_v16  ;;  %9809 = vmatmul.mubr.bf16.gmra.mrb[60].mxu0 %v15726_v30  ;;  %v15771_v16 = vld [vmem:[%s20044_s8 + $0x1d0] ss:$36 sps:$4 sm:$0xff]   ;;  %v16043_v34 = vmov 0.0  }
 0xf7a   : > { %13263 = vmatpush3.bf16.msk.msra.mxu0 %vm16521_vm1, %v11736_v39  ;;  %9816 = vmatprep.mubr.bf16.mxu0 %v15731_v29  ;;  %v11748_v2 = vpack.c.bf16 %v15267_v7, %v15266_v32  ;;  %v11751_v52 = vpack.c.bf16 %v15272_v35, %v15271_v47  ;;  %v15770_v39 = vld [vmem:[%s20044_s8 + $0x214] ss:$36 sps:$4 sm:$0xff]  }
 0xf7b   : > { %13264 = vmatprep.subr.msk.bf16.mxu0 %vm16521_vm1, %v11739_v0  ;;  %9881 = vmatprep.mubr.bf16.mxu1 %v15734_v56  ;;  %v15768_v30 = vld [vmem:[%s20044_s8 + $0x210] ss:$36 sps:$4 sm:$0xff]  }
 0xf7c   : > { %13290 = vmatprep.subr.bf16.mxu1 %v16043_v34 }
 0xf7e   : > { %13265 = vmatpush3.bf16.msk.msra.mxu0 %vm16521_vm1, %v11739_v0 }
 0xf7f   : > { %13266 = vmatprep.subr.msk.bf16.mxu0 %vm16521_vm1, %v11742_v57 }
 0xf81   : > { %9817 = vmatmul.mubr.bf16.gmra.mrb[64].mxu0 %v15729_v50  ;;  %9882 = vmatmul.mubr.bf16.vlgmr.msra.gmra.mrb[48].mxu1 %v15732_v38 }
 0xf82   : > { %13267 = vmatpush3.bf16.msk.msra.mxu0 %vm16521_vm1, %v11742_v57  ;;  %9824 = vmatprep.mubr.bf16.mxu0 %v15737_v58 }
 0xf83   : > { %13268 = vmatprep.subr.msk.bf16.mxu0 %vm16521_vm1, %v11745_v13  ;;  %9889 = vmatprep.mubr.bf16.mxu1 %v15740_v40 }
 0xf86   : > { %13269 = vmatpush3.bf16.msk.msra.mxu0 %vm16521_vm1, %v11745_v13 }
 0xf87   : > { %13270 = vmatprep.subr.msk.bf16.mxu0 %vm16521_vm1, %v11748_v2 }
 0xf89   : > { %9825 = vmatmul.mubr.bf16.gmra.mrb[68].mxu0 %v15735_v62  ;;  %9890 = vmatmul.mubr.bf16.gmra.mrb[52].mxu1 %v15738_v3 }
 0xf8a   : > { %13271 = vmatpush3.bf16.msk.msra.mxu0 %vm16521_vm1, %v11748_v2  ;;  %9832 = vmatprep.mubr.bf16.mxu0 %v15743_v42 }
 0xf8b   : > { %13272 = vmatprep.subr.msk.bf16.mxu0 %vm16521_vm1, %v11751_v52  ;;  %9897 = vmatprep.mubr.bf16.mxu1 %v15746_v49 }
 0xf8e   : > { %13273 = vmatpush3.bf16.msk.msra.mxu0 %vm16521_vm1, %v11751_v52  ;;  %v9118_v52 = vpop.permute.xlu0 %9117 }
 0xf91   : > { %9833 = vmatmul.mubr.bf16.gmra.mrb[72].mxu0 %v15741_v33  ;;  %9898 = vmatmul.mubr.bf16.gmra.mrb[56].mxu1 %v15744_v59  ;;  %v9113_v33 = vpop.permute.xlu1 %9112 }
 0xf92   : > { %9840 = vmatprep.mubr.bf16.mxu0 %v15749_v4  ;;  %9905 = vmatprep.mubr.bf16.mxu1 %v15752_v46 }
 0xf99   : > { %9841 = vmatmul.mubr.bf16.gmra.mrb[76].mxu0 %v15747_v23  ;;  %9906 = vmatmul.mubr.bf16.gmra.mrb[60].mxu1 %v15750_v55 }
 0xf9a   : > { %9913 = vmatprep.mubr.bf16.mxu1 %v15755_v60  ;;  %13274 = vmatprep.mubr.bf16.mxu0 %v15756_v26 }
 0xfa1   : > { %9914 = vmatmul.mubr.bf16.gmra.mrb[64].mxu1 %v15753_v9  ;;  %13275 = vmatmul.mubr.bf16.vlgmr.msra.gmra.mrb[80].mxu0 %v15757_v17 }
 0xfa2   : > { %9921 = vmatprep.mubr.bf16.mxu1 %v15760_v53  ;;  %13278 = vmatprep.mubr.bf16.mxu0 %v15761_v18 }
 0xfa9   : > { %9922 = vmatmul.mubr.bf16.gmra.mrb[68].mxu1 %v15758_v28  ;;  %13279 = vmatmul.mubr.bf16.gmra.mrb[84].mxu0 %v15762_v37 }
 0xfaa   : > { %9929 = vmatprep.mubr.bf16.mxu1 %v15765_v19  ;;  %13282 = vmatprep.mubr.bf16.mxu0 %v15766_v8 }
 0xfb1   : > { %9930 = vmatmul.mubr.bf16.gmra.mrb[72].mxu1 %v15763_v41  ;;  %13283 = vmatmul.mubr.bf16.gmra.mrb[88].mxu0 %v15767_v45  ;;  %v9128_v45 = vpop.permute.xlu0 %9127 }
 0xfb2   : > { %9937 = vmatprep.mubr.bf16.mxu1 %v15770_v39  ;;  %13286 = vmatprep.mubr.bf16.mxu0 %v15771_v16  ;;  %v9123_v39 = vpop.permute.xlu1 %9122 }
 0xfb9   : > { %9938 = vmatmul.mubr.bf16.gmra.mrb[76].mxu1 %v15768_v30  ;;  %13287 = vmatmul.mubr.bf16.gmra.mrb[92].mxu0 %v15772_v21 }
 0xfba   : > { %13306 = vmatprep.mubr.msk.bf16.mxu1 %vm16044_vm2, %v16043_v34 }
 0xff4   : > { %v12817_v29 = vpop.f32.mrb[16].mxu0 }
 0xff5   : > { %v12818_v56 = vpop.f32.mrb[17].mxu0 }
 0xff6   : > { %v12819_v0 = vadd.f32 %v12818_v56, %v12817_v29  ;;  %v12820_v31 = vpop.f32.mrb[18].mxu0 }
 0xff7   : > { %v12821_v44 = vpop.f32.mrb[19].mxu0 }
 0xff8   : > { %v12822_v15 = vadd.f32 %v12821_v44, %v12820_v31  ;;  %v9593_v55 = vadd.f32 %v12819_v0, %v9113_v33 }
 0xffa   : > { %v9596_v28 = vadd.f32 %v12822_v15, %v9118_v52 }
 0xffc   : > { %v12823_v22 = vpop.f32.mrb[20].mxu0 }
 0xffd   : > { %v12824_v43 = vpop.f32.mrb[21].mxu0 }
 0xffe   : > { %v12825_v57 = vadd.f32 %v12824_v43, %v12823_v22  ;;  %v12826_v50 = vpop.f32.mrb[22].mxu0 }
 0xfff   : > { %v12827_v38 = vpop.f32.mrb[23].mxu0 }
0x1000   : > { %v12828_v36 = vadd.f32 %v12827_v38, %v12826_v50  ;;  %v9601_v56 = vadd.f32 %v12825_v57, %v9123_v39 }
0x1002   : > { %v9604_v50 = vadd.f32 %v12828_v36, %v9128_v45 }
0x1004   : > { %v12829_v58 = vpop.f32.mrb[24].mxu0 }
0x1005   : > { %v12830_v40 = vpop.f32.mrb[25].mxu0 }
0x1006   : > { %v12831_v13 = vadd.f32 %v12830_v40, %v12829_v58  ;;  %v12832_v7 = vpop.f32.mrb[26].mxu0 }
0x1007   : > { %v12833_v32 = vpop.f32.mrb[27].mxu0 }
0x1008   : > { %v12834_v35 = vadd.f32 %v12833_v32, %v12832_v7  ;;  %v9138_v32 = vpop.permute.xlu0 %9137 }
0x100c   : > { %v12835_v47 = vpop.f32.mrb[28].mxu0 }
0x100d   : > { %v12836_v2 = vpop.f32.mrb[29].mxu0 }
0x100e   : > { %v19682_v62 = vadd.f32 %v12836_v2, %v12835_v47  ;;  %v12838_v3 = vpop.f32.mrb[30].mxu0  ;;  %v9133_v47 = vpop.permute.xlu1 %9132 }
0x100f   : > { %v12839_v42 = vpop.f32.mrb[31].mxu0  ;;  %v9609_v52 = vadd.f32 %v12831_v13, %v9133_v47 }
0x1010   : > { %v19684_v49 = vadd.f32 %v12839_v42, %v12838_v3 }
0x1014   : > { %v12841_v59 = vpop.f32.mrb[32].mxu0  ;;  %v12881_v4 = vpop.f32.mrb[16].mxu1 }
0x1015   : > { %v12842_v46 = vpop.f32.mrb[33].mxu0  ;;  %v12882_v23 = vpop.f32.mrb[17].mxu1 }
0x1016   : > { %v19686_v60 = vadd.f32 %v12842_v46, %v12841_v59  ;;  %v12883_v26 = vadd.f32 %v12882_v23, %v12881_v4  ;;  %v12844_v9 = vpop.f32.mrb[34].mxu0  ;;  %v12884_v17 = vpop.f32.mrb[18].mxu1 }
0x1017   : > { %v12845_v53 = vpop.f32.mrb[35].mxu0  ;;  %v12885_v18 = vpop.f32.mrb[19].mxu1 }
0x1018   : > { %v19688_v37 = vadd.f32 %v12883_v26, %v9593_v55  ;;  %v19690_v19 = vadd.f32 %v12845_v53, %v12844_v9  ;;  %v12886_v8 = vadd.f32 %v12885_v18, %v12884_v17  ;;  %v9612_v55 = vadd.f32 %v12834_v35, %v9138_v32  ;;  %v9148_v18 = vpop.permute.xlu0 %9147 }
0x101a   : > { %v19692_v41 = vadd.f32 %v12886_v8, %v9596_v28  ;;  %v9143_v28 = vpop.permute.xlu1 %9142 }
0x101c   : > { %v12847_v16 = vpop.f32.mrb[36].mxu0  ;;  %v12887_v30 = vpop.f32.mrb[20].mxu1 }
0x101d   : > { %v12848_v21 = vpop.f32.mrb[37].mxu0  ;;  %v12888_v29 = vpop.f32.mrb[21].mxu1 }
0x101e   : > { %v19695_v0 = vadd.f32 %v12848_v21, %v12847_v16  ;;  %v12889_v31 = vadd.f32 %v12888_v29, %v12887_v30  ;;  %v12850_v44 = vpop.f32.mrb[38].mxu0  ;;  %v12890_v15 = vpop.f32.mrb[22].mxu1  ;;  %v9617_v16 = vadd.f32 %v19682_v62, %v9143_v28 }
0x101f   : > { %v12851_v22 = vpop.f32.mrb[39].mxu0  ;;  %v12891_v43 = vpop.f32.mrb[23].mxu1 }
0x1020   : > { %v19697_v38 = vadd.f32 %v12889_v31, %v9601_v56  ;;  %v19699_v58 = vadd.f32 %v12851_v22, %v12850_v44  ;;  %v12892_v40 = vadd.f32 %v12891_v43, %v12890_v15  ;;  %v9620_v44 = vadd.f32 %v19684_v49, %v9148_v18  ;;  %v9153_v32 = vpop.permute.xlu1 %9152 }
0x1022   : > { %v19701_v7 = vadd.f32 %v12892_v40, %v9604_v50  ;;  %v9158_v40 = vpop.permute.xlu0 %9157 }
0x1023   : > { %v9628_v49 = vadd.f32 %v19690_v19, %v9158_v40 }
0x1024   : > { %v12853_v2 = vpop.f32.mrb[40].mxu0  ;;  %v12893_v3 = vpop.f32.mrb[24].mxu1 }
0x1025   : > { %v12854_v57 = vpop.f32.mrb[41].mxu0  ;;  %v12894_v42 = vpop.f32.mrb[25].mxu1 }
0x1026   : > { %v19703_v33 = vadd.f32 %v12854_v57, %v12853_v2  ;;  %v12895_v59 = vadd.f32 %v12894_v42, %v12893_v3  ;;  %v12856_v4 = vpop.f32.mrb[42].mxu0  ;;  %v12896_v46 = vpop.f32.mrb[26].mxu1  ;;  %v9625_v57 = vadd.f32 %v19686_v60, %v9153_v32 }
0x1027   : > { %v12857_v36 = vpop.f32.mrb[43].mxu0  ;;  %v12897_v23 = vpop.f32.mrb[27].mxu1 }
0x1028   : > { %v19705_v26 = vadd.f32 %v12895_v59, %v9609_v52  ;;  %v19707_v9 = vadd.f32 %v12857_v36, %v12856_v4  ;;  %v12898_v17 = vadd.f32 %v12897_v23, %v12896_v46  ;;  %v9168_v60 = vpop.permute.xlu0 %9167 }
0x102a   : > { %v19709_v53 = vadd.f32 %v12898_v17, %v9612_v55 }
0x102c   : > { %v12859_v8 = vpop.f32.mrb[44].mxu0  ;;  %v12899_v45 = vpop.f32.mrb[28].mxu1 }
0x102d   : > { %v12860_v13 = vpop.f32.mrb[45].mxu0  ;;  %v12900_v39 = vpop.f32.mrb[29].mxu1 }
0x102e   : > { %v19712_v30 = vadd.f32 %v12860_v13, %v12859_v8  ;;  %v12901_v21 = vadd.f32 %v12900_v39, %v12899_v45  ;;  %v12862_v29 = vpop.f32.mrb[46].mxu0  ;;  %v12902_v35 = vpop.f32.mrb[30].mxu1 }
0x102f   : > { %v12863_v56 = vpop.f32.mrb[47].mxu0  ;;  %v12903_v31 = vpop.f32.mrb[31].mxu1 }
0x1030   : > { %v19715_v15 = vadd.f32 %v12901_v21, %v9617_v16  ;;  %v19717_v22 = vadd.f32 %v12863_v56, %v12862_v29  ;;  %v12904_v43 = vadd.f32 %v12903_v31, %v12902_v35  ;;  %v9163_v45 = vpop.permute.xlu1 %9162  ;;  %v9636_v31 = vadd.f32 %v19699_v58, %v9168_v60 }
0x1031   : > { %v9633_v21 = vadd.f32 %v19695_v0, %v9163_v45  ;;  %v9178_v0 = vpop.permute.xlu0 %9177 }
0x1032   : > { %v19719_v50 = vadd.f32 %v12904_v43, %v9620_v44 }
0x1034   : > { %v12905_v47 = vpop.f32.mrb[32].mxu1  ;;  %v12945_v62 = vpop.f32.mrb[48].mxu0 }
0x1035   : > { %v12906_v2 = vpop.f32.mrb[33].mxu1  ;;  %v12946_v3 = vpop.f32.mrb[49].mxu0 }
0x1036   : > { %v12907_v42 = vadd.f32 %v12906_v2, %v12905_v47  ;;  %v12947_v52 = vadd.f32 %v12946_v3, %v12945_v62  ;;  %v12908_v59 = vpop.f32.mrb[34].mxu1  ;;  %v12948_v4 = vpop.f32.mrb[50].mxu0 }
0x1037   : > { %v12909_v46 = vpop.f32.mrb[35].mxu1  ;;  %v12949_v36 = vpop.f32.mrb[51].mxu0 }
0x1038   : > { %v19723_v23 = vadd.f32 %v12907_v42, %v9625_v57  ;;  %v19726_v55 = vadd.f32 %v12947_v52, %v19688_v37  ;;  %v12910_v17 = vadd.f32 %v12909_v46, %v12908_v59  ;;  %v12950_v18 = vadd.f32 %v12949_v36, %v12948_v4  ;;  %v9173_v3 = vpop.permute.xlu1 %9172 }
0x1039   : > { %v9641_v59 = vadd.f32 %v19703_v33, %v9173_v3  ;;  %v9644_v36 = vadd.f32 %v19707_v9, %v9178_v0  ;;  %v9188_v33 = vpop.permute.xlu0 %9187 }
0x103a   : > { %v19728_v28 = vadd.f32 %v12910_v17, %v9628_v49  ;;  %v19731_v8 = vadd.f32 %v12950_v18, %v19692_v41 }
0x103c   : > { %v12911_v13 = vpop.f32.mrb[36].mxu1  ;;  %v12951_v39 = vpop.f32.mrb[52].mxu0 }
0x103d   : > { %v12912_v16 = vpop.f32.mrb[37].mxu1  ;;  %v12952_v19 = vpop.f32.mrb[53].mxu0 }
0x103e   : > { %v12913_v29 = vadd.f32 %v12912_v16, %v12911_v13  ;;  %v12953_v35 = vadd.f32 %v12952_v19, %v12951_v39  ;;  %v12914_v56 = vpop.f32.mrb[38].mxu1  ;;  %v12954_v37 = vpop.f32.mrb[54].mxu0 }
0x103f   : > { %v12915_v44 = vpop.f32.mrb[39].mxu1  ;;  %v12955_v43 = vpop.f32.mrb[55].mxu0 }
0x1040   : > { %v19735_v40 = vadd.f32 %v12913_v29, %v9633_v21  ;;  %v19738_v41 = vadd.f32 %v12953_v35, %v19697_v38  ;;  %v12916_v32 = vadd.f32 %v12915_v44, %v12914_v56  ;;  %v12956_v47 = vadd.f32 %v12955_v43, %v12954_v37  ;;  %v9183_v19 = vpop.permute.xlu1 %9182 }
0x1041   : > { %v9649_v56 = vadd.f32 %v19712_v30, %v9183_v19  ;;  %v9652_v43 = vadd.f32 %v19717_v22, %v9188_v33 }
0x1042   : > { %v19740_v62 = vadd.f32 %v12916_v32, %v9636_v31  ;;  %v19743_v2 = vadd.f32 %v12956_v47, %v19701_v7 }
0x1044   : > { %v12917_v57 = vpop.f32.mrb[40].mxu1  ;;  %v12957_v42 = vpop.f32.mrb[56].mxu0 }
0x1045   : > { %v12918_v52 = vpop.f32.mrb[41].mxu1  ;;  %v12958_v58 = vpop.f32.mrb[57].mxu0 }
0x1046   : > { %v12919_v4 = vadd.f32 %v12918_v52, %v12917_v57  ;;  %v12959_v49 = vadd.f32 %v12958_v58, %v12957_v42  ;;  %v12920_v46 = vpop.f32.mrb[42].mxu1  ;;  %v12960_v38 = vpop.f32.mrb[58].mxu0 }
0x1047   : > { %v12921_v17 = vpop.f32.mrb[43].mxu1  ;;  %v12961_v18 = vpop.f32.mrb[59].mxu0 }
0x1048   : > { %v19747_v60 = vadd.f32 %v12919_v4, %v9641_v59  ;;  %v19750_v7 = vadd.f32 %v12959_v49, %v19705_v26  ;;  %v12922_v45 = vadd.f32 %v12921_v17, %v12920_v46  ;;  %v12962_v13 = vadd.f32 %v12961_v18, %v12960_v38 }
0x104a   : > { %v19752_v39 = vadd.f32 %v12922_v45, %v9644_v36  ;;  %v19755_v16 = vadd.f32 %v12962_v13, %v19709_v53 }
0x104c   : > { %v12923_v21 = vpop.f32.mrb[44].mxu1  ;;  %v12963_v29 = vpop.f32.mrb[60].mxu0 }
0x104d   : > { %v12924_v35 = vpop.f32.mrb[45].mxu1  ;;  %v12964_v9 = vpop.f32.mrb[61].mxu0 }
0x104e   : > { %v12925_v37 = vadd.f32 %v12924_v35, %v12923_v21  ;;  %v12965_v31 = vadd.f32 %v12964_v9, %v12963_v29  ;;  %v12926_v44 = vpop.f32.mrb[46].mxu1  ;;  %v12966_v26 = vpop.f32.mrb[62].mxu0 }
0x104f   : > { %v12927_v32 = vpop.f32.mrb[47].mxu1  ;;  %v12967_v47 = vpop.f32.mrb[63].mxu0 }
0x1050   : > { %v19759_v0 = vadd.f32 %v12925_v37, %v9649_v56  ;;  %v19762_v53 = vadd.f32 %v12965_v31, %v19715_v15  ;;  %v12928_v3 = vadd.f32 %v12927_v32, %v12926_v44  ;;  %v12968_v57 = vadd.f32 %v12967_v47, %v12966_v26 }
0x1052   : > { %v19764_v42 = vadd.f32 %v12928_v3, %v9652_v43  ;;  %v19767_v52 = vadd.f32 %v12968_v57, %v19719_v50 }
0x1054   : > { %v12969_v30 = vpop.f32.mrb[64].mxu0  ;;  %v13009_v58 = vpop.f32.mrb[48].mxu1 }
0x1055   : > { %v12970_v59 = vpop.f32.mrb[65].mxu0  ;;  %v13010_v4 = vpop.f32.mrb[49].mxu1 }
0x1056   : > { %v12971_v49 = vadd.f32 %v12970_v59, %v12969_v30  ;;  %v13011_v22 = vadd.f32 %v13010_v4, %v13009_v58  ;;  %v12972_v46 = vpop.f32.mrb[66].mxu0  ;;  %v13012_v38 = vpop.f32.mrb[50].mxu1 }
0x1057   : > { %v12973_v36 = vpop.f32.mrb[67].mxu0  ;;  %v13013_v17 = vpop.f32.mrb[51].mxu1 }
0x1058   : > { %v19770_v15 = vadd.f32 %v12971_v49, %v19723_v23  ;;  %v12974_v18 = vadd.f32 %v12973_v36, %v12972_v46  ;;  %v13014_v45 = vadd.f32 %v13013_v17, %v13012_v38  ;;  %v9884_v13 = vadd.f32 %v13011_v22, %v19726_v55 }
0x105a   : > { %v19774_v50 = vadd.f32 %v12974_v18, %v19728_v28  ;;  %v19777_v33 = vadd.f32 %v13014_v45, %v19731_v8 }
0x105c   : > { %v12975_v19 = vpop.f32.mrb[68].mxu0  ;;  %v13015_v21 = vpop.f32.mrb[52].mxu1 }
0x105d   : > { %v12976_v29 = vpop.f32.mrb[69].mxu0  ;;  %v13016_v35 = vpop.f32.mrb[53].mxu1 }
0x105e   : > { %v12977_v9 = vadd.f32 %v12976_v29, %v12975_v19  ;;  %v13017_v56 = vadd.f32 %v13016_v35, %v13015_v21  ;;  %v12978_v37 = vpop.f32.mrb[70].mxu0  ;;  %v13018_v31 = vpop.f32.mrb[54].mxu1 }
0x105f   : > { %v12979_v23 = vpop.f32.mrb[71].mxu0  ;;  %v13019_v44 = vpop.f32.mrb[55].mxu1 }
0x1060   : > { %v19780_v26 = vadd.f32 %v12977_v9, %v19735_v40  ;;  %v12980_v55 = vadd.f32 %v12979_v23, %v12978_v37  ;;  %v13020_v43 = vadd.f32 %v13019_v44, %v13018_v31  ;;  %v9892_v28 = vadd.f32 %v13017_v56, %v19738_v41 }
0x1062   : > { %v19784_v8 = vadd.f32 %v12980_v55, %v19740_v62  ;;  %v9895_v32 = vadd.f32 %v13020_v43, %v19743_v2 }
0x1064   : > { %v12981_v47 = vpop.f32.mrb[72].mxu0  ;;  %v13021_v3 = vpop.f32.mrb[56].mxu1 }
0x1065   : > { %v12982_v57 = vpop.f32.mrb[73].mxu0  ;;  %v13022_v30 = vpop.f32.mrb[57].mxu1 }
0x1066   : > { %v12983_v58 = vadd.f32 %v12982_v57, %v12981_v47  ;;  %v13023_v59 = vadd.f32 %v13022_v30, %v13021_v3  ;;  %v12984_v4 = vpop.f32.mrb[74].mxu0  ;;  %v13024_v49 = vpop.f32.mrb[58].mxu1 }
0x1067   : > { %v12985_v22 = vpop.f32.mrb[75].mxu0  ;;  %v13025_v40 = vpop.f32.mrb[59].mxu1 }
0x1068   : > { %v19788_v46 = vadd.f32 %v12983_v58, %v19747_v60  ;;  %v12986_v38 = vadd.f32 %v12985_v22, %v12984_v4  ;;  %v13026_v41 = vadd.f32 %v13025_v40, %v13024_v49  ;;  %v9900_v62 = vadd.f32 %v13023_v59, %v19750_v7 }
0x106a   : > { %v19792_v36 = vadd.f32 %v12986_v38, %v19752_v39  ;;  %v9903_v2 = vadd.f32 %v13026_v41, %v19755_v16 }
0x106c   : > { %v12987_v17 = vpop.f32.mrb[76].mxu0  ;;  %v13027_v18 = vpop.f32.mrb[60].mxu1 }
0x106d   : > { %v12988_v45 = vpop.f32.mrb[77].mxu0  ;;  %v13028_v19 = vpop.f32.mrb[61].mxu1 }
0x106e   : > { %v12989_v21 = vadd.f32 %v12988_v45, %v12987_v17  ;;  %v13029_v29 = vadd.f32 %v13028_v19, %v13027_v18  ;;  %v12990_v35 = vpop.f32.mrb[78].mxu0  ;;  %v13030_v9 = vpop.f32.mrb[62].mxu1 }
0x106f   : > { %v12991_v56 = vpop.f32.mrb[79].mxu0  ;;  %v13031_v60 = vpop.f32.mrb[63].mxu1 }
0x1070   : > { %v19796_v37 = vadd.f32 %v12989_v21, %v19759_v0  ;;  %v12992_v31 = vadd.f32 %v12991_v56, %v12990_v35  ;;  %v13032_v7 = vadd.f32 %v13031_v60, %v13030_v9  ;;  %v9908_v39 = vadd.f32 %v13029_v29, %v19762_v53 }
0x1072   : > { %v19800_v23 = vadd.f32 %v12992_v31, %v19764_v42  ;;  %v9911_v16 = vadd.f32 %v13032_v7, %v19767_v52 }
0x1074   : > { %v13033_v44 = vpop.f32.mrb[64].mxu1  ;;  %v13276_v55 = vpop.f32.mrb[80].mxu0 }
0x1075   : > { %v9989_v43 = vadd.f32 %v13276_v55, %v9892_v28  ;;  %v13034_v47 = vpop.f32.mrb[65].mxu1  ;;  %v9980_v3 = vpop.f32.mrb[81].mxu0 }
0x1076   : > { %v13035_v57 = vadd.f32 %v13034_v47, %v13033_v44  ;;  %v9981_v30 = vadd.f32 %v9980_v3, %v9884_v13  ;;  %v13036_v58 = vpop.f32.mrb[66].mxu1  ;;  %v13277_v59 = vpop.f32.mrb[82].mxu0 }
0x1077   : > { %v10045_v0 = vadd.f32 %v9989_v43, %v18347_v6  ;;  %v9992_v4 = vadd.f32 %v13277_v59, %v9895_v32  ;;  %v13037_v49 = vpop.f32.mrb[67].mxu1  ;;  %v9983_v22 = vpop.f32.mrb[83].mxu0 }
0x1078   : > { %v10043_v53 = vadd.f32 %v9981_v30, %v18332_v1  ;;  %v13038_v42 = vadd.f32 %v13037_v49, %v13036_v58  ;;  %v9984_v40 = vadd.f32 %v9983_v22, %v19777_v33  ;;  %v9916_v52 = vadd.f32 %v13035_v57, %v19770_v15 }
0x1079   : > { %v10046_v28 = vadd.f32 %v9992_v4, %v18336_v11  ;;  %v10061_v41 = vmax.f32 %v10045_v0, 0.0 }
0x107a   : > { %v10044_v38 = vadd.f32 %v9984_v40, %v18334_v61  ;;  %v9919_v13 = vadd.f32 %v13038_v42, %v19774_v50  ;;  %v10059_v18 = vmax.f32 %v10043_v53, 0.0 }
0x107b   : > { %v10062_v17 = vmax.f32 %v10046_v28, 0.0 }
0x107c   : > { %v10060_v6 = vmax.f32 %v10044_v38, 0.0  ;;  %v13039_v32 = vpop.f32.mrb[68].mxu1  ;;  %v13280_v45 = vpop.f32.mrb[84].mxu0 }
0x107d   : > { %v10076_v19 = vpack.c.bf16 %v10062_v17, %v10061_v41  ;;  %v10005_v21 = vadd.f32 %v13280_v45, %v9908_v39  ;;  %v13040_v1 = vpop.f32.mrb[69].mxu1  ;;  %v9996_v29 = vpop.f32.mrb[85].mxu0 }
0x107e   : > { %v10075_v35 = vpack.c.bf16 %v10060_v6, %v10059_v18  ;;  %v13041_v33 = vadd.f32 %v13040_v1, %v13039_v32  ;;  %v9997_v9 = vadd.f32 %v9996_v29, %v9900_v62  ;;  %v13042_v15 = vpop.f32.mrb[70].mxu1  ;;  %v13281_v56 = vpop.f32.mrb[86].mxu0 }
0x107f   : > { %v10049_v11 = vadd.f32 %v10005_v21, %v18379_v10  ;;  %v10008_v61 = vadd.f32 %v13281_v56, %v9911_v16  ;;  %v13043_v60 = vpop.f32.mrb[71].mxu1  ;;  %v9999_v50 = vpop.f32.mrb[87].mxu0 }
0x1080   : > { %v10047_v31 = vadd.f32 %v9997_v9, %v18360_v54  ;;  %v13044_v7 = vadd.f32 %v13043_v60, %v13042_v15  ;;  %v10000_v44 = vadd.f32 %v9999_v50, %v9903_v2  ;;  %13291 = vmatpush3.bf16.msra.mxu1 %v10075_v35  ;;  %v9924_v55 = vadd.f32 %v13041_v33, %v19780_v26 }
0x1081   : > { %v10050_v39 = vadd.f32 %v10008_v61, %v18368_v48  ;;  %13292 = vmatprep.subr.bf16.mxu1 %v16043_v34  ;;  %v10065_v47 = vmax.f32 %v10049_v11, 0.0 }
0x1082   : > { %v10048_v62 = vadd.f32 %v10000_v44, %v18362_v63  ;;  %v9927_v43 = vadd.f32 %v13044_v7, %v19784_v8  ;;  %v10063_v16 = vmax.f32 %v10047_v31, 0.0 }
0x1083   : > { %v10066_v10 = vmax.f32 %v10050_v39, 0.0 }
0x1084   : > { %v10064_v3 = vmax.f32 %v10048_v62, 0.0  ;;  %v13045_v57 = vpop.f32.mrb[72].mxu1  ;;  %v13284_v30 = vpop.f32.mrb[88].mxu0  ;;  %13293 = vmatpush3.bf16.msra.mxu1 %v10076_v19 }
0x1085   : > { %v10078_v54 = vpack.c.bf16 %v10066_v10, %v10065_v47  ;;  %v10021_v2 = vadd.f32 %v13284_v30, %v9924_v55  ;;  %v13046_v58 = vpop.f32.mrb[73].mxu1  ;;  %v10012_v59 = vpop.f32.mrb[89].mxu0  ;;  %13294 = vmatprep.subr.bf16.mxu1 %v16043_v34 }
0x1086   : > { %v10077_v48 = vpack.c.bf16 %v10064_v3, %v10063_v16  ;;  %v13047_v26 = vadd.f32 %v13046_v58, %v13045_v57  ;;  %v10013_v0 = vadd.f32 %v10012_v59, %v9916_v52  ;;  %v13048_v4 = vpop.f32.mrb[74].mxu1  ;;  %v13285_v63 = vpop.f32.mrb[90].mxu0 }
0x1087   : > { %v10053_v8 = vadd.f32 %v10021_v2, %v18407_v14  ;;  %v10024_v49 = vadd.f32 %v13285_v63, %v9927_v43  ;;  %v13049_v22 = vpop.f32.mrb[75].mxu1  ;;  %v10015_v53 = vpop.f32.mrb[91].mxu0 }
0x1088   : > { %v10051_v42 = vadd.f32 %v10013_v0, %v18392_v12  ;;  %v13050_v40 = vadd.f32 %v13049_v22, %v13048_v4  ;;  %v10016_v28 = vadd.f32 %v10015_v53, %v9919_v13  ;;  %13295 = vmatpush3.bf16.msra.mxu1 %v10077_v48  ;;  %v9932_v38 = vadd.f32 %v13047_v26, %v19788_v46 }
0x1089   : > { %v10054_v41 = vadd.f32 %v10024_v49, %v18400_v51  ;;  %13296 = vmatprep.subr.bf16.mxu1 %v16043_v34  ;;  %v10069_v18 = vmax.f32 %v10053_v8, 0.0 }
0x108a   : > { %v10052_v52 = vadd.f32 %v10016_v28, %v18394_v27  ;;  %v9935_v17 = vadd.f32 %v13050_v40, %v19792_v36  ;;  %v10067_v6 = vmax.f32 %v10051_v42, 0.0 }
0x108b   : > { %v10070_v14 = vmax.f32 %v10054_v41, 0.0 }
0x108c   : > { %v10068_v32 = vmax.f32 %v10052_v52, 0.0  ;;  %v13051_v45 = vpop.f32.mrb[76].mxu1  ;;  %v13288_v19 = vpop.f32.mrb[92].mxu0  ;;  %13297 = vmatpush3.bf16.msra.mxu1 %v10078_v54 }
0x108d   : > { %v10080_v12 = vpack.c.bf16 %v10070_v14, %v10069_v18  ;;  %v13052_v13 = vpop.f32.mrb[77].mxu1  ;;  %v10028_v21 = vpop.f32.mrb[93].mxu0  ;;  %13298 = vmatprep.subr.bf16.mxu1 %v16043_v34 }
0x108e   : > { %v10079_v46 = vpack.c.bf16 %v10068_v32, %v10067_v6  ;;  %v13053_v51 = vadd.f32 %v13052_v13, %v13051_v45  ;;  %v10029_v1 = vadd.f32 %v10028_v21, %v9932_v38  ;;  %v13054_v29 = vpop.f32.mrb[78].mxu1  ;;  %v13289_v35 = vpop.f32.mrb[94].mxu0 }
0x108f   : > { %v13055_v27 = vpop.f32.mrb[79].mxu1  ;;  %v10031_v33 = vpop.f32.mrb[95].mxu0 }
0x1090   : > { %v9940_v36 = vadd.f32 %v13053_v51, %v19796_v37  ;;  %v10055_v9 = vadd.f32 %v10029_v1, %v18420_v20  ;;  %v13056_v15 = vadd.f32 %v13055_v27, %v13054_v29  ;;  %v10032_v56 = vadd.f32 %v10031_v33, %v9935_v17  ;;  %13299 = vmatpush3.bf16.msra.mxu1 %v10079_v46 }
0x1091   : > { %13300 = vmatprep.subr.bf16.mxu1 %v16043_v34 }
0x1092   : > { %v10037_v11 = vadd.f32 %v13288_v19, %v9940_v36  ;;  %v9943_v61 = vadd.f32 %v13056_v15, %v19800_v23  ;;  %v10056_v60 = vadd.f32 %v10032_v56, %v18422_v24  ;;  %v10071_v31 = vmax.f32 %v10055_v9, 0.0  ;;  %v10083_v24 = vld [vmem:[%s20047_s18] sm:$0xf] }
0x1094   : > { %v10057_v50 = vadd.f32 %v10037_v11, %v18435_v5  ;;  %v10040_v7 = vadd.f32 %v13289_v35, %v9943_v61  ;;  %v10072_v44 = vmax.f32 %v10056_v60, 0.0  ;;  %13301 = vmatpush3.bf16.msra.mxu1 %v10080_v12  ;;  %v10088_v5 = vpop.permute.xlu1 %10087 }
0x1095   : > { %13302 = vmatprep.subr.bf16.mxu1 %v16043_v34 }
0x1096   : > { %v10058_v20 = vadd.f32 %v10040_v7, %v18437_v25  ;;  %v10081_v37 = vpack.c.bf16 %v10072_v44, %v10071_v31  ;;  %v10073_v55 = vmax.f32 %v10057_v50, 0.0 }
0x1098   : > { %v10074_v39 = vmax.f32 %v10058_v20, 0.0  ;;  %13303 = vmatpush3.bf16.msra.mxu1 %v10081_v37 }
0x1099   : > { %13304 = vmatprep.subr.bf16.mxu1 %v16043_v34 }
0x109a   : > { %v10082_v23 = vpack.c.bf16 %v10074_v39, %v10073_v55 }
0x109c   : > { %13305 = vmatpush3.bf16.msra.mxu1 %v10082_v23 }
0x109f   : > { %13307 = vmatmul.mubr.bf16.vlgmr.msra.gmra.mrb[80].mxu1 %v10083_v24 }
0x1172   : > { %v10124_v25 = vpop.f32.mrb[80].mxu1 }
0x1173   : > { %v10125_v62 = vadd.f32 %v10124_v25, %v10088_v5  ;;  %v13308_v43 = vpop.f32.mrb[81].mxu1 }
0x1174   : > { %v10127_v34 = vpop.f32.mrb[82].mxu1 }
0x1175   : > { %10130 = vst [vmem:[%s800_s0] sm:$0xff] %v10125_v62  ;;  %v13309_v47 = vpop.f32.mrb[83].mxu1 }
0x1176   : > { %15956 = shalt.err (!%p15953_p5)
}
0x1177   : > { %s15957_s14 = scalar_lea.hbm %s19843_s16, 128  ;;  %s15961_s15 = scalar_lea.hbm %s20048_s21, 256 }
0x1178   : > { %p15958_p1 = scmp.ne.s32.totalorder %s19843_s16, %s15957_s14  ;;  %p15962_p4 = scmp.lt.u32.totalorder %s19843_s16, %s20048_s21 }
0x1179   : > { %p15963_p6 = scmp.lt.u32.totalorder %s15961_s15, %s15957_s14  ;;  %p15965_p12 = scmp.lt.u32.totalorder %s15957_s14, %s19843_s16 }
0x117a   : > { %p15959_p11 = pnand %p15958_p1, %p16345_p10 }
0x117b   : > { %p15964_p8 = por %p15963_p6, %p15962_p4 }
0x117c   : > { %p15960_p2 = pneg %p15959_p11 }
0x117d   : > { %p15966_p3 = por %p15965_p12, %p15964_p8 }
0x117f   : > { %p15967_p7 = pnand %p15966_p3, %p15960_p2 }
0x1181   : > { %15970 = shalt.err (!%p15967_p7)
}
0x1182   : > { %13380 = dma.vmem_to_hbm [thread:$0]  (%p16345_p10), %s19845_s3, 128, %s19843_s16, %s10132_s5  }
0x1183 PF: > { %s20049_s7 = sld [smem:[#allocation20_spill]]  ;;  %s20050_s0 = sld [smem:[#allocation21_spill]] }
0x1184   : > { %p20052_p13 = scmp.ge.s32.totalorder %s16021_s25, 2 }
0x1189   : > { %s10157_s6 = sand.u32 1, %s20049_s7   ;;  %p20051_p9 = scmp.ne.s32.totalorder %s20050_s0, 0 }
0x118a   : > { %s10158_s22 = scalar_lea.sflag [#allocation5], %s10157_s6 }
0x118b   : > { %p13403_p0 = pnand %p20052_p13, %p20051_p9 }
0x118d   : > { %16004 = dma.done.wait (!%p13403_p0), %s10158_s22, 128  }
0x118e   : > { %16006 = vsyncadd (!%p13403_p0), %s10158_s22, 4294967168  ;;  %s20053_s10 = sld [smem:[#allocation22_spill]]  ;;  %p39_p5 = scmp.ge.s32.totalorder %s16331_s27, 4  }
0x118f   : > { %s20054_s4 = smov %s16013_s30  ;;  %s20055_s30 = smov %s16017_s24 }
0x1190   : > { %s20057_s25 = smov %s16331_s27  ;;  %41 = sbr.rel (!%p39_p5) target bundleno = 30 (0x1e), region = 177 }
0x1194   : > { %s20056_s24 = smov %s20053_s10 }
0x1197   :  { %10163 = vsyncpa [#allocation4], 1 }
0x1198   :  { %10165 = vsyncpa [#allocation4 + $0x1], 1 }
0x1199   :  { %10166 = vsyncpa [#allocation7], 1 }
0x119a   :  { %10167 = vsyncpa [#allocation10], 1 }
0x119b   :  { %10168 = vsyncpa [#allocation13], 1 }
0x119c   :  { %10169 = vsyncpa [#allocation5], 1 }
0x119d   :  { %10171 = vsyncpa [#allocation5 + $0x1], 1 }

</bundles_post_ra>
